<compile_context>
chip_gen: v7x
topology: tpu7x:2x2x1
jax: 0.10.0
libtpu: 0.0.40
codegen_flags: <defaults>
</compile_context>

<pallas_src>
import jax
import jax.numpy as jnp
from jax.experimental import pallas as pl
from jax.experimental.pallas import tpu as pltpu


def _vmem_spec():
    return pl.BlockSpec(memory_space=pltpu.MemorySpace.VMEM)


def _same_conv_im2col(inp, w_mat, k):
    """Stride-1 'same' KxK conv as ONE im2col GEMM.

    inp:   (N, H, W, Cin) value (already in vregs/VMEM)
    w_mat: (K*K*Cin, Cout) value, rows ordered (kh, kw, cin)  (HWIO reshaped)
    returns (N*H*W, Cout) float32
    """
    n, h, w, c = inp.shape
    p = k // 2
    # zero-pad H and W via concatenation (kept in-kernel; no HBM traffic)
    zw = jnp.zeros((n, h, p, c), jnp.float32)
    xw = jnp.concatenate([zw, inp, zw], axis=2)
    zh = jnp.zeros((n, p, w + 2 * p, c), jnp.float32)
    xp = jnp.concatenate([zh, xw, zh], axis=1)                 # (N, H+2p, W+2p, C)
    taps = [xp[:, kh:kh + h, kw:kw + w, :]
            for kh in range(k) for kw in range(k)]
    patches = jnp.concatenate(taps, axis=-1)                   # (N, H, W, K*K*C)
    patches = patches.reshape(n * h * w, k * k * c)
    return jnp.dot(patches, w_mat, preferred_element_type=jnp.float32)


def fused_inception_kernel(ee_ref, eo_ref, oe_ref, oo_ref,
                           w1x1_ref, w2b_ref, w3b_ref, w4_ref,
                           g_ref, b_ref, o_ref):
    f32 = jnp.float32
    ee = ee_ref[...]                 # x[:, 0::2, 0::2, :]  (N, Ho, Wo, Cin)
    eo = eo_ref[...]                 # x[:, 0::2, 1::2, :]
    oe = oe_ref[...]                 # x[:, 1::2, 0::2, :]
    oo = oo_ref[...]                 # x[:, 1::2, 1::2, :]
    n, ho, wo, cin = ee.shape
    cout = w2b_ref.shape[-1]
    m = n * ho * wo

    # ---- branch-4 front end: MaxPool2d(3, 2, 1) on the original input.
    # pool1[o, q] = max of x over rows {2o-1, 2o, 2o+1} x cols {2q-1, 2q, 2q+1};
    # expressed with the even/odd phases this is the 4 phases plus one-step
    # shifted copies of eo / oe / oo (shift fill = -inf == MaxPool padding).
    def shift_h(a):                  # result[:, o] = a[:, o-1]; -inf at o == 0
        pad = jnp.full((n, 1, wo, cin), -jnp.inf, f32)
        return jnp.concatenate([pad, a[:, :ho - 1]], axis=1)

    def shift_w(a):                  # result[:, :, q] = a[:, :, q-1]; -inf at q == 0
        pad = jnp.full((n, ho, 1, cin), -jnp.inf, f32)
        return jnp.concatenate([pad, a[:, :, :wo - 1]], axis=2)

    eo_l = shift_w(eo)
    oe_u = shift_h(oe)
    oo_u = shift_h(oo)
    oo_l = shift_w(oo)
    oo_ul = shift_h(oo_l)
    pool1 = ee
    for tap in (eo, eo_l, oe, oe_u, oo, oo_u, oo_l, oo_ul):
        pool1 = jnp.maximum(pool1, tap)                        # (N, Ho, Wo, Cin)

    # ---- branches 1 / 2-front / 3-front: the three 1x1 stride-2 convs as
    # ONE merged GEMM on the stride-2 subsample (== the even/even phase).
    mm = jnp.dot(ee.reshape(m, cin), w1x1_ref[...],
                 preferred_element_type=f32)                   # (M, 3*Cout)
    out1 = mm[:, :cout]
    t2 = mm[:, cout:2 * cout].reshape(n, ho, wo, cout)
    t3 = mm[:, 2 * cout:3 * cout].reshape(n, ho, wo, cout)

    # ---- KxK "same" convs, one im2col GEMM each.
    out2 = _same_conv_im2col(t2, w2b_ref[...], 3)              # (M, Cout)
    out3 = _same_conv_im2col(t3, w3b_ref[...], 5)
    out4 = _same_conv_im2col(pool1, w4_ref[...], 5)

    # ---- channel concat (lane-dense 128 channels) + train-mode BN + ReLU.
    cat = jnp.concatenate([out1, out2, out3, out4], axis=-1)   # (M, 4*Cout)
    c4 = 4 * cout
    mean = jnp.sum(cat, axis=0, keepdims=True) / m
    var = jnp.sum((cat - mean) ** 2, axis=0, keepdims=True) / m
    y = (cat - mean) * jax.lax.rsqrt(var + 1e-5) * g_ref[...] + b_ref[...]
    y = jnp.maximum(y, 0.0).reshape(n, ho, wo, c4)             # (N, Ho, Wo, 4*Cout)

    # ---- final MaxPool2d(3, 2, 1), fused; zero padding is exact post-ReLU.
    hf, wf = o_ref.shape[1], o_ref.shape[2]
    zw = jnp.zeros((n, ho, 1, c4), f32)
    yw = jnp.concatenate([zw, y, zw], axis=2)
    zh = jnp.zeros((n, 1, wo + 2, c4), f32)
    yp = jnp.concatenate([zh, yw, zh], axis=1)                 # (N, Ho+2, Wo+2, 4*Cout)
    rows = []
    for oh in range(hf):
        r = jnp.maximum(jnp.maximum(yp[:, 2 * oh], yp[:, 2 * oh + 1]),
                        yp[:, 2 * oh + 2])                     # (N, Wo+2, 4*Cout)
        cols = []
        for ow in range(wf):
            cols.append(jnp.maximum(
                jnp.maximum(r[:, 2 * ow:2 * ow + 1, :],
                            r[:, 2 * ow + 1:2 * ow + 2, :]),
                r[:, 2 * ow + 2:2 * ow + 3, :]))               # (N, 1, 4*Cout)
        rows.append(jnp.concatenate(cols, axis=1).reshape(n, 1, wf, c4))
    o_ref[...] = jnp.concatenate(rows, axis=1)                 # (N, Hf, Wf, 4*Cout)


# ------------------------------- wrapper ------------------------------------

@jax.jit
def inception_block_v2(x_nchw, params):
    x = jnp.transpose(x_nchw, (0, 2, 3, 1)).astype(jnp.float32)   # NCHW -> NHWC
    n, h, w, cin = x.shape
    assert h % 2 == 0 and w % 2 == 0
    cout = params["w1"].shape[-1]

    # Even/odd phase split of x (pure layout glue, same total bytes as x).
    # x_ee is exactly the stride-2 subsample the 1x1/stride-2 convs need; the
    # 4 phases together let the kernel compute MaxPool2d(3,2,1) of x without
    # any strided in-kernel reads or a 9x-materialized taps tensor.
    x_ee = x[:, 0::2, 0::2, :]
    x_eo = x[:, 0::2, 1::2, :]
    x_oe = x[:, 1::2, 0::2, :]
    x_oo = x[:, 1::2, 1::2, :]

    # Merge the three 1x1 stride-2 conv weights into one (Cin, 3*Cout) GEMM
    # operand; reshape the KxK conv weights to im2col (K*K*Cin, Cout) form.
    w1x1 = jnp.concatenate([params["w1"][0, 0], params["w2a"][0, 0],
                            params["w3a"][0, 0]], axis=-1)
    w2b_m = params["w2b"].reshape(-1, cout)
    w3b_m = params["w3b"].reshape(-1, cout)
    w4_m = params["w4"].reshape(-1, cout)
    gamma = params["gamma"].reshape(1, 4 * cout)
    beta = params["beta"].reshape(1, 4 * cout)

    ho, wo = h // 2, w // 2
    hf, wf = (ho - 1) // 2 + 1, (wo - 1) // 2 + 1

    out_nhwc = pl.pallas_call(
        fused_inception_kernel,
        out_shape=jax.ShapeDtypeStruct((n, hf, wf, 4 * cout), jnp.float32),
        in_specs=[_vmem_spec()] * 10,
        out_specs=_vmem_spec(),
    )(x_ee, x_eo, x_oe, x_oo, w1x1, w2b_m, w3b_m, w4_m, gamma, beta)

    return jnp.transpose(out_nhwc, (0, 3, 1, 2))                  # NHWC -> NCHW


# ------------------------ params + pure-JAX reference -----------------------

def init_params(key, in_channel=16, out_channel=32):
    ks = jax.random.split(key, 8)

    def wmk(k, kh, kw, ci, co):        # conv weights stored HWIO
        scale = 1.0 / jnp.sqrt(float(ci * kh * kw))
        return scale * jax.random.normal(k, (kh, kw, ci, co), jnp.float32)

    return {
        "w1":  wmk(ks[0], 1, 1, in_channel, out_channel),
        "w2a": wmk(ks[1], 1, 1, in_channel, out_channel),
        "w2b": wmk(ks[2], 3, 3, out_channel, out_channel),
        "w3a": wmk(ks[3], 1, 1, in_channel, out_channel),
        "w3b": wmk(ks[4], 5, 5, out_channel, out_channel),
        "w4":  wmk(ks[5], 5, 5, in_channel, out_channel),
        "gamma": jax.random.uniform(ks[6], (4 * out_channel,), jnp.float32, 0.5, 1.5),
        "beta":  0.1 * jax.random.normal(ks[7], (4 * out_channel,), jnp.float32),
    }


def reference_forward(x_nchw, params):
    x = x_nchw.astype(jnp.float32)
    dn = ("NCHW", "HWIO", "NCHW")

    def conv(inp, w, stride, pad):
        return jax.lax.conv_general_dilated(
            inp, w, (stride, stride), [(pad, pad), (pad, pad)],
            dimension_numbers=dn)

    def mp(inp):
        return jax.lax.reduce_window(
            inp, -jnp.inf, jax.lax.max,
            (1, 1, 3, 3), (1, 1, 2, 2), [(0, 0), (0, 0), (1, 1), (1, 1)])

    o1 = conv(x, params["w1"], 2, 0)
    o2 = conv(conv(x, params["w2a"], 2, 0), params["w2b"], 1, 1)
    o3 = conv(conv(x, params["w3a"], 2, 0), params["w3b"], 1, 2)
    o4 = conv(mp(x), params["w4"], 1, 2)
    cat = jnp.concatenate([o1, o2, o3, o4], axis=1)
    mean = jnp.mean(cat, axis=(0, 2, 3), keepdims=True)
    var = jnp.mean((cat - mean) ** 2, axis=(0, 2, 3), keepdims=True)
    g = params["gamma"].reshape(1, -1, 1, 1)
    b = params["beta"].reshape(1, -1, 1, 1)
    y = jnp.maximum((cat - mean) * jax.lax.rsqrt(var + 1e-5) * g + b, 0.0)
    return mp(y)


if __name__ == "__main__":
    key = jax.random.PRNGKey(0)
    kx, kp = jax.random.split(key)

    # NCHW input matching the module defaults: in_channel=16, spatial 16x16.
    x = jax.random.normal(kx, (2, 16, 16, 16), jnp.float32)
    params = init_params(kp, in_channel=16, out_channel=32)

    out = inception_block_v2(x, params)
    jax.block_until_ready(out)

    assert out.shape == (2, 128, 4, 4), out.shape
    ref = reference_forward(x, params)
    if not jnp.allclose(out, ref, atol=1e-3, rtol=1e-3):
        raise AssertionError(
            f"mismatch vs reference, max abs err={jnp.max(jnp.abs(out - ref))}")
    print("KERNEL_OK")
</pallas_src>

<mosaic_0001>
module attributes {stable_mosaic.version = 11 : i64} {
  func.func @fused_inception_kernel(%arg0: memref<2x8x8x16xf32, #tpu.memory_space<vmem>>, %arg1: memref<2x8x8x16xf32, #tpu.memory_space<vmem>>, %arg2: memref<2x8x8x16xf32, #tpu.memory_space<vmem>>, %arg3: memref<2x8x8x16xf32, #tpu.memory_space<vmem>>, %arg4: memref<16x96xf32, #tpu.memory_space<vmem>>, %arg5: memref<288x32xf32, #tpu.memory_space<vmem>>, %arg6: memref<800x32xf32, #tpu.memory_space<vmem>>, %arg7: memref<400x32xf32, #tpu.memory_space<vmem>>, %arg8: memref<1x128xf32, #tpu.memory_space<vmem>>, %arg9: memref<1x128xf32, #tpu.memory_space<vmem>>, %arg10: memref<2x4x4x128xf32, #tpu.memory_space<vmem>>) attributes {dimension_semantics = [], scalar_prefetch = 0 : i64, scratch_operands = 0 : i64, tpu.core_type = #tpu.core_type<tc>} {
    %c0 = arith.constant 0 : index
    %c0_0 = arith.constant 0 : index
    %c0_1 = arith.constant 0 : index
    %c0_2 = arith.constant 0 : index
    %0 = vector.load %arg0[%c0, %c0_0, %c0_1, %c0_2] : memref<2x8x8x16xf32, #tpu.memory_space<vmem>>, vector<2x8x8x16xf32>
    %c0_3 = arith.constant 0 : index
    %c0_4 = arith.constant 0 : index
    %c0_5 = arith.constant 0 : index
    %c0_6 = arith.constant 0 : index
    %1 = vector.load %arg1[%c0_3, %c0_4, %c0_5, %c0_6] : memref<2x8x8x16xf32, #tpu.memory_space<vmem>>, vector<2x8x8x16xf32>
    %c0_7 = arith.constant 0 : index
    %c0_8 = arith.constant 0 : index
    %c0_9 = arith.constant 0 : index
    %c0_10 = arith.constant 0 : index
    %2 = vector.load %arg2[%c0_7, %c0_8, %c0_9, %c0_10] : memref<2x8x8x16xf32, #tpu.memory_space<vmem>>, vector<2x8x8x16xf32>
    %c0_11 = arith.constant 0 : index
    %c0_12 = arith.constant 0 : index
    %c0_13 = arith.constant 0 : index
    %c0_14 = arith.constant 0 : index
    %3 = vector.load %arg3[%c0_11, %c0_12, %c0_13, %c0_14] : memref<2x8x8x16xf32, #tpu.memory_space<vmem>>, vector<2x8x8x16xf32>
    %cst = arith.constant 0xFF800000 : f32
    %4 = vector.broadcast %cst : f32 to vector<2x8x1x16xf32>
    %5 = vector.extract_strided_slice %1 {offsets = [0, 0, 0, 0], sizes = [2, 8, 7, 16], strides = [1, 1, 1, 1]} : vector<2x8x8x16xf32> to vector<2x8x7x16xf32>
    %6 = tpu.concatenate %4, %5 in 2 : vector<2x8x1x16xf32>, vector<2x8x7x16xf32> -> vector<2x8x8x16xf32>
    %cst_15 = arith.constant 0xFF800000 : f32
    %7 = vector.broadcast %cst_15 : f32 to vector<2x1x8x16xf32>
    %8 = vector.extract_strided_slice %2 {offsets = [0, 0, 0, 0], sizes = [2, 7, 8, 16], strides = [1, 1, 1, 1]} : vector<2x8x8x16xf32> to vector<2x7x8x16xf32>
    %9 = tpu.concatenate %7, %8 in 1 : vector<2x1x8x16xf32>, vector<2x7x8x16xf32> -> vector<2x8x8x16xf32>
    %cst_16 = arith.constant 0xFF800000 : f32
    %10 = vector.broadcast %cst_16 : f32 to vector<2x1x8x16xf32>
    %11 = vector.extract_strided_slice %3 {offsets = [0, 0, 0, 0], sizes = [2, 7, 8, 16], strides = [1, 1, 1, 1]} : vector<2x8x8x16xf32> to vector<2x7x8x16xf32>
    %12 = tpu.concatenate %10, %11 in 1 : vector<2x1x8x16xf32>, vector<2x7x8x16xf32> -> vector<2x8x8x16xf32>
    %cst_17 = arith.constant 0xFF800000 : f32
    %13 = vector.broadcast %cst_17 : f32 to vector<2x8x1x16xf32>
    %14 = vector.extract_strided_slice %3 {offsets = [0, 0, 0, 0], sizes = [2, 8, 7, 16], strides = [1, 1, 1, 1]} : vector<2x8x8x16xf32> to vector<2x8x7x16xf32>
    %15 = tpu.concatenate %13, %14 in 2 : vector<2x8x1x16xf32>, vector<2x8x7x16xf32> -> vector<2x8x8x16xf32>
    %cst_18 = arith.constant 0xFF800000 : f32
    %16 = vector.broadcast %cst_18 : f32 to vector<2x1x8x16xf32>
    %17 = vector.extract_strided_slice %15 {offsets = [0, 0, 0, 0], sizes = [2, 7, 8, 16], strides = [1, 1, 1, 1]} : vector<2x8x8x16xf32> to vector<2x7x8x16xf32>
    %18 = tpu.concatenate %16, %17 in 1 : vector<2x1x8x16xf32>, vector<2x7x8x16xf32> -> vector<2x8x8x16xf32>
    %19 = arith.maximumf %0, %1 : vector<2x8x8x16xf32>
    %20 = arith.maximumf %19, %6 : vector<2x8x8x16xf32>
    %21 = arith.maximumf %20, %2 : vector<2x8x8x16xf32>
    %22 = arith.maximumf %21, %9 : vector<2x8x8x16xf32>
    %23 = arith.maximumf %22, %3 : vector<2x8x8x16xf32>
    %24 = arith.maximumf %23, %12 : vector<2x8x8x16xf32>
    %25 = arith.maximumf %24, %15 : vector<2x8x8x16xf32>
    %26 = arith.maximumf %25, %18 : vector<2x8x8x16xf32>
    %27 = vector.shape_cast %0 : vector<2x8x8x16xf32> to vector<128x16xf32>
    %c0_19 = arith.constant 0 : index
    %c0_20 = arith.constant 0 : index
    %28 = vector.load %arg4[%c0_19, %c0_20] : memref<16x96xf32, #tpu.memory_space<vmem>>, vector<16x96xf32>
    %cst_21 = arith.constant dense<0.000000e+00> : vector<128x96xf32>
    %29 = tpu.matmul %27, %28, %cst_21 {dimension_numbers = #tpu.dot_dimension_numbers<[1], [0], [0], [1], [0, 0, 1, 1], [], []>} : vector<128x16xf32>, vector<16x96xf32>, vector<128x96xf32> -> vector<128x96xf32>
    %30 = vector.extract_strided_slice %29 {offsets = [0, 0], sizes = [128, 32], strides = [1, 1]} : vector<128x96xf32> to vector<128x32xf32>
    %31 = vector.extract_strided_slice %29 {offsets = [0, 32], sizes = [128, 32], strides = [1, 1]} : vector<128x96xf32> to vector<128x32xf32>
    %32 = vector.shape_cast %31 : vector<128x32xf32> to vector<2x8x8x32xf32>
    %33 = vector.extract_strided_slice %29 {offsets = [0, 64], sizes = [128, 32], strides = [1, 1]} : vector<128x96xf32> to vector<128x32xf32>
    %34 = vector.shape_cast %33 : vector<128x32xf32> to vector<2x8x8x32xf32>
    %c0_22 = arith.constant 0 : index
    %c0_23 = arith.constant 0 : index
    %35 = vector.load %arg5[%c0_22, %c0_23] : memref<288x32xf32, #tpu.memory_space<vmem>>, vector<288x32xf32>
    %cst_24 = arith.constant 0.000000e+00 : f32
    %36 = vector.broadcast %cst_24 : f32 to vector<2x8x1x32xf32>
    %37 = tpu.concatenate %36, %32, %36 in 2 : vector<2x8x1x32xf32>, vector<2x8x8x32xf32>, vector<2x8x1x32xf32> -> vector<2x8x10x32xf32>
    %cst_25 = arith.constant 0.000000e+00 : f32
    %38 = vector.broadcast %cst_25 : f32 to vector<2x1x10x32xf32>
    %39 = tpu.concatenate %38, %37, %38 in 1 : vector<2x1x10x32xf32>, vector<2x8x10x32xf32>, vector<2x1x10x32xf32> -> vector<2x10x10x32xf32>
    %40 = vector.extract_strided_slice %39 {offsets = [0, 0, 0, 0], sizes = [2, 8, 8, 32], strides = [1, 1, 1, 1]} : vector<2x10x10x32xf32> to vector<2x8x8x32xf32>
    %41 = vector.extract_strided_slice %39 {offsets = [0, 0, 1, 0], sizes = [2, 8, 8, 32], strides = [1, 1, 1, 1]} : vector<2x10x10x32xf32> to vector<2x8x8x32xf32>
    %42 = vector.extract_strided_slice %39 {offsets = [0, 0, 2, 0], sizes = [2, 8, 8, 32], strides = [1, 1, 1, 1]} : vector<2x10x10x32xf32> to vector<2x8x8x32xf32>
    %43 = vector.extract_strided_slice %39 {offsets = [0, 1, 0, 0], sizes = [2, 8, 8, 32], strides = [1, 1, 1, 1]} : vector<2x10x10x32xf32> to vector<2x8x8x32xf32>
    %44 = vector.extract_strided_slice %39 {offsets = [0, 1, 1, 0], sizes = [2, 8, 8, 32], strides = [1, 1, 1, 1]} : vector<2x10x10x32xf32> to vector<2x8x8x32xf32>
    %45 = vector.extract_strided_slice %39 {offsets = [0, 1, 2, 0], sizes = [2, 8, 8, 32], strides = [1, 1, 1, 1]} : vector<2x10x10x32xf32> to vector<2x8x8x32xf32>
    %46 = vector.extract_strided_slice %39 {offsets = [0, 2, 0, 0], sizes = [2, 8, 8, 32], strides = [1, 1, 1, 1]} : vector<2x10x10x32xf32> to vector<2x8x8x32xf32>
    %47 = vector.extract_strided_slice %39 {offsets = [0, 2, 1, 0], sizes = [2, 8, 8, 32], strides = [1, 1, 1, 1]} : vector<2x10x10x32xf32> to vector<2x8x8x32xf32>
    %48 = vector.extract_strided_slice %39 {offsets = [0, 2, 2, 0], sizes = [2, 8, 8, 32], strides = [1, 1, 1, 1]} : vector<2x10x10x32xf32> to vector<2x8x8x32xf32>
    %49 = tpu.concatenate %40, %41, %42, %43, %44, %45, %46, %47, %48 in 3 : vector<2x8x8x32xf32>, vector<2x8x8x32xf32>, vector<2x8x8x32xf32>, vector<2x8x8x32xf32>, vector<2x8x8x32xf32>, vector<2x8x8x32xf32>, vector<2x8x8x32xf32>, vector<2x8x8x32xf32>, vector<2x8x8x32xf32> -> vector<2x8x8x288xf32>
    %50 = vector.shape_cast %49 : vector<2x8x8x288xf32> to vector<128x288xf32>
    %cst_26 = arith.constant dense<0.000000e+00> : vector<128x32xf32>
    %51 = tpu.matmul %50, %35, %cst_26 {dimension_numbers = #tpu.dot_dimension_numbers<[1], [0], [0], [1], [0, 0, 1, 1], [], []>} : vector<128x288xf32>, vector<288x32xf32>, vector<128x32xf32> -> vector<128x32xf32>
    %c0_27 = arith.constant 0 : index
    %c0_28 = arith.constant 0 : index
    %52 = vector.load %arg6[%c0_27, %c0_28] : memref<800x32xf32, #tpu.memory_space<vmem>>, vector<800x32xf32>
    %cst_29 = arith.constant 0.000000e+00 : f32
    %53 = vector.broadcast %cst_29 : f32 to vector<2x8x2x32xf32>
    %54 = tpu.concatenate %53, %34, %53 in 2 : vector<2x8x2x32xf32>, vector<2x8x8x32xf32>, vector<2x8x2x32xf32> -> vector<2x8x12x32xf32>
    %cst_30 = arith.constant 0.000000e+00 : f32
    %55 = vector.broadcast %cst_30 : f32 to vector<2x2x12x32xf32>
    %56 = tpu.concatenate %55, %54, %55 in 1 : vector<2x2x12x32xf32>, vector<2x8x12x32xf32>, vector<2x2x12x32xf32> -> vector<2x12x12x32xf32>
    %57 = vector.extract_strided_slice %56 {offsets = [0, 0, 0, 0], sizes = [2, 8, 8, 32], strides = [1, 1, 1, 1]} : vector<2x12x12x32xf32> to vector<2x8x8x32xf32>
    %58 = vector.extract_strided_slice %56 {offsets = [0, 0, 1, 0], sizes = [2, 8, 8, 32], strides = [1, 1, 1, 1]} : vector<2x12x12x32xf32> to vector<2x8x8x32xf32>
    %59 = vector.extract_strided_slice %56 {offsets = [0, 0, 2, 0], sizes = [2, 8, 8, 32], strides = [1, 1, 1, 1]} : vector<2x12x12x32xf32> to vector<2x8x8x32xf32>
    %60 = vector.extract_strided_slice %56 {offsets = [0, 0, 3, 0], sizes = [2, 8, 8, 32], strides = [1, 1, 1, 1]} : vector<2x12x12x32xf32> to vector<2x8x8x32xf32>
    %61 = vector.extract_strided_slice %56 {offsets = [0, 0, 4, 0], sizes = [2, 8, 8, 32], strides = [1, 1, 1, 1]} : vector<2x12x12x32xf32> to vector<2x8x8x32xf32>
    %62 = vector.extract_strided_slice %56 {offsets = [0, 1, 0, 0], sizes = [2, 8, 8, 32], strides = [1, 1, 1, 1]} : vector<2x12x12x32xf32> to vector<2x8x8x32xf32>
    %63 = vector.extract_strided_slice %56 {offsets = [0, 1, 1, 0], sizes = [2, 8, 8, 32], strides = [1, 1, 1, 1]} : vector<2x12x12x32xf32> to vector<2x8x8x32xf32>
    %64 = vector.extract_strided_slice %56 {offsets = [0, 1, 2, 0], sizes = [2, 8, 8, 32], strides = [1, 1, 1, 1]} : vector<2x12x12x32xf32> to vector<2x8x8x32xf32>
    %65 = vector.extract_strided_slice %56 {offsets = [0, 1, 3, 0], sizes = [2, 8, 8, 32], strides = [1, 1, 1, 1]} : vector<2x12x12x32xf32> to vector<2x8x8x32xf32>
    %66 = vector.extract_strided_slice %56 {offsets = [0, 1, 4, 0], sizes = [2, 8, 8, 32], strides = [1, 1, 1, 1]} : vector<2x12x12x32xf32> to vector<2x8x8x32xf32>
    %67 = vector.extract_strided_slice %56 {offsets = [0, 2, 0, 0], sizes = [2, 8, 8, 32], strides = [1, 1, 1, 1]} : vector<2x12x12x32xf32> to vector<2x8x8x32xf32>
    %68 = vector.extract_strided_slice %56 {offsets = [0, 2, 1, 0], sizes = [2, 8, 8, 32], strides = [1, 1, 1, 1]} : vector<2x12x12x32xf32> to vector<2x8x8x32xf32>
    %69 = vector.extract_strided_slice %56 {offsets = [0, 2, 2, 0], sizes = [2, 8, 8, 32], strides = [1, 1, 1, 1]} : vector<2x12x12x32xf32> to vector<2x8x8x32xf32>
    %70 = vector.extract_strided_slice %56 {offsets = [0, 2, 3, 0], sizes = [2, 8, 8, 32], strides = [1, 1, 1, 1]} : vector<2x12x12x32xf32> to vector<2x8x8x32xf32>
    %71 = vector.extract_strided_slice %56 {offsets = [0, 2, 4, 0], sizes = [2, 8, 8, 32], strides = [1, 1, 1, 1]} : vector<2x12x12x32xf32> to vector<2x8x8x32xf32>
    %72 = vector.extract_strided_slice %56 {offsets = [0, 3, 0, 0], sizes = [2, 8, 8, 32], strides = [1, 1, 1, 1]} : vector<2x12x12x32xf32> to vector<2x8x8x32xf32>
    %73 = vector.extract_strided_slice %56 {offsets = [0, 3, 1, 0], sizes = [2, 8, 8, 32], strides = [1, 1, 1, 1]} : vector<2x12x12x32xf32> to vector<2x8x8x32xf32>
    %74 = vector.extract_strided_slice %56 {offsets = [0, 3, 2, 0], sizes = [2, 8, 8, 32], strides = [1, 1, 1, 1]} : vector<2x12x12x32xf32> to vector<2x8x8x32xf32>
    %75 = vector.extract_strided_slice %56 {offsets = [0, 3, 3, 0], sizes = [2, 8, 8, 32], strides = [1, 1, 1, 1]} : vector<2x12x12x32xf32> to vector<2x8x8x32xf32>
    %76 = vector.extract_strided_slice %56 {offsets = [0, 3, 4, 0], sizes = [2, 8, 8, 32], strides = [1, 1, 1, 1]} : vector<2x12x12x32xf32> to vector<2x8x8x32xf32>
    %77 = vector.extract_strided_slice %56 {offsets = [0, 4, 0, 0], sizes = [2, 8, 8, 32], strides = [1, 1, 1, 1]} : vector<2x12x12x32xf32> to vector<2x8x8x32xf32>
    %78 = vector.extract_strided_slice %56 {offsets = [0, 4, 1, 0], sizes = [2, 8, 8, 32], strides = [1, 1, 1, 1]} : vector<2x12x12x32xf32> to vector<2x8x8x32xf32>
    %79 = vector.extract_strided_slice %56 {offsets = [0, 4, 2, 0], sizes = [2, 8, 8, 32], strides = [1, 1, 1, 1]} : vector<2x12x12x32xf32> to vector<2x8x8x32xf32>
    %80 = vector.extract_strided_slice %56 {offsets = [0, 4, 3, 0], sizes = [2, 8, 8, 32], strides = [1, 1, 1, 1]} : vector<2x12x12x32xf32> to vector<2x8x8x32xf32>
    %81 = vector.extract_strided_slice %56 {offsets = [0, 4, 4, 0], sizes = [2, 8, 8, 32], strides = [1, 1, 1, 1]} : vector<2x12x12x32xf32> to vector<2x8x8x32xf32>
    %82 = tpu.concatenate %57, %58, %59, %60, %61, %62, %63, %64, %65, %66, %67, %68, %69, %70, %71, %72 in 3 : vector<2x8x8x32xf32>, vector<2x8x8x32xf32>, vector<2x8x8x32xf32>, vector<2x8x8x32xf32>, vector<2x8x8x32xf32>, vector<2x8x8x32xf32>, vector<2x8x8x32xf32>, vector<2x8x8x32xf32>, vector<2x8x8x32xf32>, vector<2x8x8x32xf32>, vector<2x8x8x32xf32>, vector<2x8x8x32xf32>, vector<2x8x8x32xf32>, vector<2x8x8x32xf32>, vector<2x8x8x32xf32>, vector<2x8x8x32xf32> -> vector<2x8x8x512xf32>
    %83 = tpu.concatenate %73, %74, %75, %76, %77, %78, %79, %80, %81 in 3 : vector<2x8x8x32xf32>, vector<2x8x8x32xf32>, vector<2x8x8x32xf32>, vector<2x8x8x32xf32>, vector<2x8x8x32xf32>, vector<2x8x8x32xf32>, vector<2x8x8x32xf32>, vector<2x8x8x32xf32>, vector<2x8x8x32xf32> -> vector<2x8x8x288xf32>
    %84 = tpu.concatenate %82, %83 in 3 : vector<2x8x8x512xf32>, vector<2x8x8x288xf32> -> vector<2x8x8x800xf32>
    %85 = vector.shape_cast %84 : vector<2x8x8x800xf32> to vector<128x800xf32>
    %cst_31 = arith.constant dense<0.000000e+00> : vector<128x32xf32>
    %86 = tpu.matmul %85, %52, %cst_31 {dimension_numbers = #tpu.dot_dimension_numbers<[1], [0], [0], [1], [0, 0, 1, 1], [], []>} : vector<128x800xf32>, vector<800x32xf32>, vector<128x32xf32> -> vector<128x32xf32>
    %c0_32 = arith.constant 0 : index
    %c0_33 = arith.constant 0 : index
    %87 = vector.load %arg7[%c0_32, %c0_33] : memref<400x32xf32, #tpu.memory_space<vmem>>, vector<400x32xf32>
    %cst_34 = arith.constant 0.000000e+00 : f32
    %88 = vector.broadcast %cst_34 : f32 to vector<2x8x2x16xf32>
    %89 = tpu.concatenate %88, %26, %88 in 2 : vector<2x8x2x16xf32>, vector<2x8x8x16xf32>, vector<2x8x2x16xf32> -> vector<2x8x12x16xf32>
    %cst_35 = arith.constant 0.000000e+00 : f32
    %90 = vector.broadcast %cst_35 : f32 to vector<2x2x12x16xf32>
    %91 = tpu.concatenate %90, %89, %90 in 1 : vector<2x2x12x16xf32>, vector<2x8x12x16xf32>, vector<2x2x12x16xf32> -> vector<2x12x12x16xf32>
    %92 = vector.extract_strided_slice %91 {offsets = [0, 0, 0, 0], sizes = [2, 8, 8, 16], strides = [1, 1, 1, 1]} : vector<2x12x12x16xf32> to vector<2x8x8x16xf32>
    %93 = vector.extract_strided_slice %91 {offsets = [0, 0, 1, 0], sizes = [2, 8, 8, 16], strides = [1, 1, 1, 1]} : vector<2x12x12x16xf32> to vector<2x8x8x16xf32>
    %94 = vector.extract_strided_slice %91 {offsets = [0, 0, 2, 0], sizes = [2, 8, 8, 16], strides = [1, 1, 1, 1]} : vector<2x12x12x16xf32> to vector<2x8x8x16xf32>
    %95 = vector.extract_strided_slice %91 {offsets = [0, 0, 3, 0], sizes = [2, 8, 8, 16], strides = [1, 1, 1, 1]} : vector<2x12x12x16xf32> to vector<2x8x8x16xf32>
    %96 = vector.extract_strided_slice %91 {offsets = [0, 0, 4, 0], sizes = [2, 8, 8, 16], strides = [1, 1, 1, 1]} : vector<2x12x12x16xf32> to vector<2x8x8x16xf32>
    %97 = vector.extract_strided_slice %91 {offsets = [0, 1, 0, 0], sizes = [2, 8, 8, 16], strides = [1, 1, 1, 1]} : vector<2x12x12x16xf32> to vector<2x8x8x16xf32>
    %98 = vector.extract_strided_slice %91 {offsets = [0, 1, 1, 0], sizes = [2, 8, 8, 16], strides = [1, 1, 1, 1]} : vector<2x12x12x16xf32> to vector<2x8x8x16xf32>
    %99 = vector.extract_strided_slice %91 {offsets = [0, 1, 2, 0], sizes = [2, 8, 8, 16], strides = [1, 1, 1, 1]} : vector<2x12x12x16xf32> to vector<2x8x8x16xf32>
    %100 = vector.extract_strided_slice %91 {offsets = [0, 1, 3, 0], sizes = [2, 8, 8, 16], strides = [1, 1, 1, 1]} : vector<2x12x12x16xf32> to vector<2x8x8x16xf32>
    %101 = vector.extract_strided_slice %91 {offsets = [0, 1, 4, 0], sizes = [2, 8, 8, 16], strides = [1, 1, 1, 1]} : vector<2x12x12x16xf32> to vector<2x8x8x16xf32>
    %102 = vector.extract_strided_slice %91 {offsets = [0, 2, 0, 0], sizes = [2, 8, 8, 16], strides = [1, 1, 1, 1]} : vector<2x12x12x16xf32> to vector<2x8x8x16xf32>
    %103 = vector.extract_strided_slice %91 {offsets = [0, 2, 1, 0], sizes = [2, 8, 8, 16], strides = [1, 1, 1, 1]} : vector<2x12x12x16xf32> to vector<2x8x8x16xf32>
    %104 = vector.extract_strided_slice %91 {offsets = [0, 2, 2, 0], sizes = [2, 8, 8, 16], strides = [1, 1, 1, 1]} : vector<2x12x12x16xf32> to vector<2x8x8x16xf32>
    %105 = vector.extract_strided_slice %91 {offsets = [0, 2, 3, 0], sizes = [2, 8, 8, 16], strides = [1, 1, 1, 1]} : vector<2x12x12x16xf32> to vector<2x8x8x16xf32>
    %106 = vector.extract_strided_slice %91 {offsets = [0, 2, 4, 0], sizes = [2, 8, 8, 16], strides = [1, 1, 1, 1]} : vector<2x12x12x16xf32> to vector<2x8x8x16xf32>
    %107 = vector.extract_strided_slice %91 {offsets = [0, 3, 0, 0], sizes = [2, 8, 8, 16], strides = [1, 1, 1, 1]} : vector<2x12x12x16xf32> to vector<2x8x8x16xf32>
    %108 = vector.extract_strided_slice %91 {offsets = [0, 3, 1, 0], sizes = [2, 8, 8, 16], strides = [1, 1, 1, 1]} : vector<2x12x12x16xf32> to vector<2x8x8x16xf32>
    %109 = vector.extract_strided_slice %91 {offsets = [0, 3, 2, 0], sizes = [2, 8, 8, 16], strides = [1, 1, 1, 1]} : vector<2x12x12x16xf32> to vector<2x8x8x16xf32>
    %110 = vector.extract_strided_slice %91 {offsets = [0, 3, 3, 0], sizes = [2, 8, 8, 16], strides = [1, 1, 1, 1]} : vector<2x12x12x16xf32> to vector<2x8x8x16xf32>
    %111 = vector.extract_strided_slice %91 {offsets = [0, 3, 4, 0], sizes = [2, 8, 8, 16], strides = [1, 1, 1, 1]} : vector<2x12x12x16xf32> to vector<2x8x8x16xf32>
    %112 = vector.extract_strided_slice %91 {offsets = [0, 4, 0, 0], sizes = [2, 8, 8, 16], strides = [1, 1, 1, 1]} : vector<2x12x12x16xf32> to vector<2x8x8x16xf32>
    %113 = vector.extract_strided_slice %91 {offsets = [0, 4, 1, 0], sizes = [2, 8, 8, 16], strides = [1, 1, 1, 1]} : vector<2x12x12x16xf32> to vector<2x8x8x16xf32>
    %114 = vector.extract_strided_slice %91 {offsets = [0, 4, 2, 0], sizes = [2, 8, 8, 16], strides = [1, 1, 1, 1]} : vector<2x12x12x16xf32> to vector<2x8x8x16xf32>
    %115 = vector.extract_strided_slice %91 {offsets = [0, 4, 3, 0], sizes = [2, 8, 8, 16], strides = [1, 1, 1, 1]} : vector<2x12x12x16xf32> to vector<2x8x8x16xf32>
    %116 = vector.extract_strided_slice %91 {offsets = [0, 4, 4, 0], sizes = [2, 8, 8, 16], strides = [1, 1, 1, 1]} : vector<2x12x12x16xf32> to vector<2x8x8x16xf32>
    %117 = tpu.concatenate %92, %93, %94, %95, %96, %97, %98, %99, %100, %101, %102, %103, %104, %105, %106, %107 in 3 : vector<2x8x8x16xf32>, vector<2x8x8x16xf32>, vector<2x8x8x16xf32>, vector<2x8x8x16xf32>, vector<2x8x8x16xf32>, vector<2x8x8x16xf32>, vector<2x8x8x16xf32>, vector<2x8x8x16xf32>, vector<2x8x8x16xf32>, vector<2x8x8x16xf32>, vector<2x8x8x16xf32>, vector<2x8x8x16xf32>, vector<2x8x8x16xf32>, vector<2x8x8x16xf32>, vector<2x8x8x16xf32>, vector<2x8x8x16xf32> -> vector<2x8x8x256xf32>
    %118 = tpu.concatenate %108, %109, %110, %111, %112, %113, %114, %115, %116 in 3 : vector<2x8x8x16xf32>, vector<2x8x8x16xf32>, vector<2x8x8x16xf32>, vector<2x8x8x16xf32>, vector<2x8x8x16xf32>, vector<2x8x8x16xf32>, vector<2x8x8x16xf32>, vector<2x8x8x16xf32>, vector<2x8x8x16xf32> -> vector<2x8x8x144xf32>
    %119 = tpu.concatenate %117, %118 in 3 : vector<2x8x8x256xf32>, vector<2x8x8x144xf32> -> vector<2x8x8x400xf32>
    %120 = vector.shape_cast %119 : vector<2x8x8x400xf32> to vector<128x400xf32>
    %cst_36 = arith.constant dense<0.000000e+00> : vector<128x32xf32>
    %121 = tpu.matmul %120, %87, %cst_36 {dimension_numbers = #tpu.dot_dimension_numbers<[1], [0], [0], [1], [0, 0, 1, 1], [], []>} : vector<128x400xf32>, vector<400x32xf32>, vector<128x32xf32> -> vector<128x32xf32>
    %122 = tpu.concatenate %30, %51, %86, %121 in 1 : vector<128x32xf32>, vector<128x32xf32>, vector<128x32xf32>, vector<128x32xf32> -> vector<128x128xf32>
    %cst_37 = arith.constant dense<0.000000e+00> : vector<128xf32>
    %123 = vector.multi_reduction <add>, %122, %cst_37 [0] : vector<128x128xf32> to vector<128xf32>
    %124 = vector.shape_cast %123 : vector<128xf32> to vector<1x128xf32>
    %cst_38 = arith.constant 1.280000e+02 : f32
    %125 = vector.broadcast %cst_38 : f32 to vector<1x128xf32>
    %126 = arith.divf %124, %125 : vector<1x128xf32>
    %127 = vector.broadcast %126 : vector<1x128xf32> to vector<128x128xf32>
    %128 = arith.subf %122, %127 : vector<128x128xf32>
    %129 = arith.mulf %128, %128 : vector<128x128xf32>
    %cst_39 = arith.constant dense<0.000000e+00> : vector<128xf32>
    %130 = vector.multi_reduction <add>, %129, %cst_39 [0] : vector<128x128xf32> to vector<128xf32>
    %131 = vector.shape_cast %130 : vector<128xf32> to vector<1x128xf32>
    %cst_40 = arith.constant 1.280000e+02 : f32
    %132 = vector.broadcast %cst_40 : f32 to vector<1x128xf32>
    %133 = arith.divf %131, %132 : vector<1x128xf32>
    %134 = vector.broadcast %126 : vector<1x128xf32> to vector<128x128xf32>
    %135 = arith.subf %122, %134 : vector<128x128xf32>
    %cst_41 = arith.constant 9.99999974E-6 : f32
    %136 = vector.broadcast %cst_41 : f32 to vector<1x128xf32>
    %137 = arith.addf %133, %136 : vector<1x128xf32>
    %138 = math.rsqrt %137 : vector<1x128xf32>
    %139 = vector.broadcast %138 : vector<1x128xf32> to vector<128x128xf32>
    %140 = arith.mulf %135, %139 : vector<128x128xf32>
    %c0_42 = arith.constant 0 : index
    %c0_43 = arith.constant 0 : index
    %141 = vector.load %arg8[%c0_42, %c0_43] : memref<1x128xf32, #tpu.memory_space<vmem>>, vector<1x128xf32>
    %142 = vector.broadcast %141 : vector<1x128xf32> to vector<128x128xf32>
    %143 = arith.mulf %140, %142 : vector<128x128xf32>
    %c0_44 = arith.constant 0 : index
    %c0_45 = arith.constant 0 : index
    %144 = vector.load %arg9[%c0_44, %c0_45] : memref<1x128xf32, #tpu.memory_space<vmem>>, vector<1x128xf32>
    %145 = vector.broadcast %144 : vector<1x128xf32> to vector<128x128xf32>
    %146 = arith.addf %143, %145 : vector<128x128xf32>
    %cst_46 = arith.constant 0.000000e+00 : f32
    %147 = vector.broadcast %cst_46 : f32 to vector<128x128xf32>
    %148 = arith.maximumf %146, %147 : vector<128x128xf32>
    %149 = vector.shape_cast %148 : vector<128x128xf32> to vector<2x8x8x128xf32>
    %cst_47 = arith.constant 0.000000e+00 : f32
    %150 = vector.broadcast %cst_47 : f32 to vector<2x8x1x128xf32>
    %151 = tpu.concatenate %150, %149, %150 in 2 : vector<2x8x1x128xf32>, vector<2x8x8x128xf32>, vector<2x8x1x128xf32> -> vector<2x8x10x128xf32>
    %cst_48 = arith.constant 0.000000e+00 : f32
    %152 = vector.broadcast %cst_48 : f32 to vector<2x1x10x128xf32>
    %153 = tpu.concatenate %152, %151, %152 in 1 : vector<2x1x10x128xf32>, vector<2x8x10x128xf32>, vector<2x1x10x128xf32> -> vector<2x10x10x128xf32>
    %154 = vector.extract_strided_slice %153 {offsets = [0, 0, 0, 0], sizes = [2, 1, 10, 128], strides = [1, 1, 1, 1]} : vector<2x10x10x128xf32> to vector<2x1x10x128xf32>
    %155 = vector.shape_cast %154 : vector<2x1x10x128xf32> to vector<2x10x128xf32>
    %156 = vector.extract_strided_slice %153 {offsets = [0, 1, 0, 0], sizes = [2, 1, 10, 128], strides = [1, 1, 1, 1]} : vector<2x10x10x128xf32> to vector<2x1x10x128xf32>
    %157 = vector.shape_cast %156 : vector<2x1x10x128xf32> to vector<2x10x128xf32>
    %158 = arith.maximumf %155, %157 : vector<2x10x128xf32>
    %159 = vector.extract_strided_slice %153 {offsets = [0, 2, 0, 0], sizes = [2, 1, 10, 128], strides = [1, 1, 1, 1]} : vector<2x10x10x128xf32> to vector<2x1x10x128xf32>
    %160 = vector.shape_cast %159 : vector<2x1x10x128xf32> to vector<2x10x128xf32>
    %161 = arith.maximumf %158, %160 : vector<2x10x128xf32>
    %162 = vector.extract_strided_slice %161 {offsets = [0, 0, 0], sizes = [2, 1, 128], strides = [1, 1, 1]} : vector<2x10x128xf32> to vector<2x1x128xf32>
    %163 = vector.extract_strided_slice %161 {offsets = [0, 1, 0], sizes = [2, 1, 128], strides = [1, 1, 1]} : vector<2x10x128xf32> to vector<2x1x128xf32>
    %164 = arith.maximumf %162, %163 : vector<2x1x128xf32>
    %165 = vector.extract_strided_slice %161 {offsets = [0, 2, 0], sizes = [2, 1, 128], strides = [1, 1, 1]} : vector<2x10x128xf32> to vector<2x1x128xf32>
    %166 = arith.maximumf %164, %165 : vector<2x1x128xf32>
    %167 = vector.extract_strided_slice %161 {offsets = [0, 2, 0], sizes = [2, 1, 128], strides = [1, 1, 1]} : vector<2x10x128xf32> to vector<2x1x128xf32>
    %168 = vector.extract_strided_slice %161 {offsets = [0, 3, 0], sizes = [2, 1, 128], strides = [1, 1, 1]} : vector<2x10x128xf32> to vector<2x1x128xf32>
    %169 = arith.maximumf %167, %168 : vector<2x1x128xf32>
    %170 = vector.extract_strided_slice %161 {offsets = [0, 4, 0], sizes = [2, 1, 128], strides = [1, 1, 1]} : vector<2x10x128xf32> to vector<2x1x128xf32>
    %171 = arith.maximumf %169, %170 : vector<2x1x128xf32>
    %172 = vector.extract_strided_slice %161 {offsets = [0, 4, 0], sizes = [2, 1, 128], strides = [1, 1, 1]} : vector<2x10x128xf32> to vector<2x1x128xf32>
    %173 = vector.extract_strided_slice %161 {offsets = [0, 5, 0], sizes = [2, 1, 128], strides = [1, 1, 1]} : vector<2x10x128xf32> to vector<2x1x128xf32>
    %174 = arith.maximumf %172, %173 : vector<2x1x128xf32>
    %175 = vector.extract_strided_slice %161 {offsets = [0, 6, 0], sizes = [2, 1, 128], strides = [1, 1, 1]} : vector<2x10x128xf32> to vector<2x1x128xf32>
    %176 = arith.maximumf %174, %175 : vector<2x1x128xf32>
    %177 = vector.extract_strided_slice %161 {offsets = [0, 6, 0], sizes = [2, 1, 128], strides = [1, 1, 1]} : vector<2x10x128xf32> to vector<2x1x128xf32>
    %178 = vector.extract_strided_slice %161 {offsets = [0, 7, 0], sizes = [2, 1, 128], strides = [1, 1, 1]} : vector<2x10x128xf32> to vector<2x1x128xf32>
    %179 = arith.maximumf %177, %178 : vector<2x1x128xf32>
    %180 = vector.extract_strided_slice %161 {offsets = [0, 8, 0], sizes = [2, 1, 128], strides = [1, 1, 1]} : vector<2x10x128xf32> to vector<2x1x128xf32>
    %181 = arith.maximumf %179, %180 : vector<2x1x128xf32>
    %182 = tpu.concatenate %166, %171, %176, %181 in 1 : vector<2x1x128xf32>, vector<2x1x128xf32>, vector<2x1x128xf32>, vector<2x1x128xf32> -> vector<2x4x128xf32>
    %183 = vector.shape_cast %182 : vector<2x4x128xf32> to vector<2x1x4x128xf32>
    %184 = vector.extract_strided_slice %153 {offsets = [0, 2, 0, 0], sizes = [2, 1, 10, 128], strides = [1, 1, 1, 1]} : vector<2x10x10x128xf32> to vector<2x1x10x128xf32>
    %185 = vector.shape_cast %184 : vector<2x1x10x128xf32> to vector<2x10x128xf32>
    %186 = vector.extract_strided_slice %153 {offsets = [0, 3, 0, 0], sizes = [2, 1, 10, 128], strides = [1, 1, 1, 1]} : vector<2x10x10x128xf32> to vector<2x1x10x128xf32>
    %187 = vector.shape_cast %186 : vector<2x1x10x128xf32> to vector<2x10x128xf32>
    %188 = arith.maximumf %185, %187 : vector<2x10x128xf32>
    %189 = vector.extract_strided_slice %153 {offsets = [0, 4, 0, 0], sizes = [2, 1, 10, 128], strides = [1, 1, 1, 1]} : vector<2x10x10x128xf32> to vector<2x1x10x128xf32>
    %190 = vector.shape_cast %189 : vector<2x1x10x128xf32> to vector<2x10x128xf32>
    %191 = arith.maximumf %188, %190 : vector<2x10x128xf32>
    %192 = vector.extract_strided_slice %191 {offsets = [0, 0, 0], sizes = [2, 1, 128], strides = [1, 1, 1]} : vector<2x10x128xf32> to vector<2x1x128xf32>
    %193 = vector.extract_strided_slice %191 {offsets = [0, 1, 0], sizes = [2, 1, 128], strides = [1, 1, 1]} : vector<2x10x128xf32> to vector<2x1x128xf32>
    %194 = arith.maximumf %192, %193 : vector<2x1x128xf32>
    %195 = vector.extract_strided_slice %191 {offsets = [0, 2, 0], sizes = [2, 1, 128], strides = [1, 1, 1]} : vector<2x10x128xf32> to vector<2x1x128xf32>
    %196 = arith.maximumf %194, %195 : vector<2x1x128xf32>
    %197 = vector.extract_strided_slice %191 {offsets = [0, 2, 0], sizes = [2, 1, 128], strides = [1, 1, 1]} : vector<2x10x128xf32> to vector<2x1x128xf32>
    %198 = vector.extract_strided_slice %191 {offsets = [0, 3, 0], sizes = [2, 1, 128], strides = [1, 1, 1]} : vector<2x10x128xf32> to vector<2x1x128xf32>
    %199 = arith.maximumf %197, %198 : vector<2x1x128xf32>
    %200 = vector.extract_strided_slice %191 {offsets = [0, 4, 0], sizes = [2, 1, 128], strides = [1, 1, 1]} : vector<2x10x128xf32> to vector<2x1x128xf32>
    %201 = arith.maximumf %199, %200 : vector<2x1x128xf32>
    %202 = vector.extract_strided_slice %191 {offsets = [0, 4, 0], sizes = [2, 1, 128], strides = [1, 1, 1]} : vector<2x10x128xf32> to vector<2x1x128xf32>
    %203 = vector.extract_strided_slice %191 {offsets = [0, 5, 0], sizes = [2, 1, 128], strides = [1, 1, 1]} : vector<2x10x128xf32> to vector<2x1x128xf32>
    %204 = arith.maximumf %202, %203 : vector<2x1x128xf32>
    %205 = vector.extract_strided_slice %191 {offsets = [0, 6, 0], sizes = [2, 1, 128], strides = [1, 1, 1]} : vector<2x10x128xf32> to vector<2x1x128xf32>
    %206 = arith.maximumf %204, %205 : vector<2x1x128xf32>
    %207 = vector.extract_strided_slice %191 {offsets = [0, 6, 0], sizes = [2, 1, 128], strides = [1, 1, 1]} : vector<2x10x128xf32> to vector<2x1x128xf32>
    %208 = vector.extract_strided_slice %191 {offsets = [0, 7, 0], sizes = [2, 1, 128], strides = [1, 1, 1]} : vector<2x10x128xf32> to vector<2x1x128xf32>
    %209 = arith.maximumf %207, %208 : vector<2x1x128xf32>
    %210 = vector.extract_strided_slice %191 {offsets = [0, 8, 0], sizes = [2, 1, 128], strides = [1, 1, 1]} : vector<2x10x128xf32> to vector<2x1x128xf32>
    %211 = arith.maximumf %209, %210 : vector<2x1x128xf32>
    %212 = tpu.concatenate %196, %201, %206, %211 in 1 : vector<2x1x128xf32>, vector<2x1x128xf32>, vector<2x1x128xf32>, vector<2x1x128xf32> -> vector<2x4x128xf32>
    %213 = vector.shape_cast %212 : vector<2x4x128xf32> to vector<2x1x4x128xf32>
    %214 = vector.extract_strided_slice %153 {offsets = [0, 4, 0, 0], sizes = [2, 1, 10, 128], strides = [1, 1, 1, 1]} : vector<2x10x10x128xf32> to vector<2x1x10x128xf32>
    %215 = vector.shape_cast %214 : vector<2x1x10x128xf32> to vector<2x10x128xf32>
    %216 = vector.extract_strided_slice %153 {offsets = [0, 5, 0, 0], sizes = [2, 1, 10, 128], strides = [1, 1, 1, 1]} : vector<2x10x10x128xf32> to vector<2x1x10x128xf32>
    %217 = vector.shape_cast %216 : vector<2x1x10x128xf32> to vector<2x10x128xf32>
    %218 = arith.maximumf %215, %217 : vector<2x10x128xf32>
    %219 = vector.extract_strided_slice %153 {offsets = [0, 6, 0, 0], sizes = [2, 1, 10, 128], strides = [1, 1, 1, 1]} : vector<2x10x10x128xf32> to vector<2x1x10x128xf32>
    %220 = vector.shape_cast %219 : vector<2x1x10x128xf32> to vector<2x10x128xf32>
    %221 = arith.maximumf %218, %220 : vector<2x10x128xf32>
    %222 = vector.extract_strided_slice %221 {offsets = [0, 0, 0], sizes = [2, 1, 128], strides = [1, 1, 1]} : vector<2x10x128xf32> to vector<2x1x128xf32>
    %223 = vector.extract_strided_slice %221 {offsets = [0, 1, 0], sizes = [2, 1, 128], strides = [1, 1, 1]} : vector<2x10x128xf32> to vector<2x1x128xf32>
    %224 = arith.maximumf %222, %223 : vector<2x1x128xf32>
    %225 = vector.extract_strided_slice %221 {offsets = [0, 2, 0], sizes = [2, 1, 128], strides = [1, 1, 1]} : vector<2x10x128xf32> to vector<2x1x128xf32>
    %226 = arith.maximumf %224, %225 : vector<2x1x128xf32>
    %227 = vector.extract_strided_slice %221 {offsets = [0, 2, 0], sizes = [2, 1, 128], strides = [1, 1, 1]} : vector<2x10x128xf32> to vector<2x1x128xf32>
    %228 = vector.extract_strided_slice %221 {offsets = [0, 3, 0], sizes = [2, 1, 128], strides = [1, 1, 1]} : vector<2x10x128xf32> to vector<2x1x128xf32>
    %229 = arith.maximumf %227, %228 : vector<2x1x128xf32>
    %230 = vector.extract_strided_slice %221 {offsets = [0, 4, 0], sizes = [2, 1, 128], strides = [1, 1, 1]} : vector<2x10x128xf32> to vector<2x1x128xf32>
    %231 = arith.maximumf %229, %230 : vector<2x1x128xf32>
    %232 = vector.extract_strided_slice %221 {offsets = [0, 4, 0], sizes = [2, 1, 128], strides = [1, 1, 1]} : vector<2x10x128xf32> to vector<2x1x128xf32>
    %233 = vector.extract_strided_slice %221 {offsets = [0, 5, 0], sizes = [2, 1, 128], strides = [1, 1, 1]} : vector<2x10x128xf32> to vector<2x1x128xf32>
    %234 = arith.maximumf %232, %233 : vector<2x1x128xf32>
    %235 = vector.extract_strided_slice %221 {offsets = [0, 6, 0], sizes = [2, 1, 128], strides = [1, 1, 1]} : vector<2x10x128xf32> to vector<2x1x128xf32>
    %236 = arith.maximumf %234, %235 : vector<2x1x128xf32>
    %237 = vector.extract_strided_slice %221 {offsets = [0, 6, 0], sizes = [2, 1, 128], strides = [1, 1, 1]} : vector<2x10x128xf32> to vector<2x1x128xf32>
    %238 = vector.extract_strided_slice %221 {offsets = [0, 7, 0], sizes = [2, 1, 128], strides = [1, 1, 1]} : vector<2x10x128xf32> to vector<2x1x128xf32>
    %239 = arith.maximumf %237, %238 : vector<2x1x128xf32>
    %240 = vector.extract_strided_slice %221 {offsets = [0, 8, 0], sizes = [2, 1, 128], strides = [1, 1, 1]} : vector<2x10x128xf32> to vector<2x1x128xf32>
    %241 = arith.maximumf %239, %240 : vector<2x1x128xf32>
    %242 = tpu.concatenate %226, %231, %236, %241 in 1 : vector<2x1x128xf32>, vector<2x1x128xf32>, vector<2x1x128xf32>, vector<2x1x128xf32> -> vector<2x4x128xf32>
    %243 = vector.shape_cast %242 : vector<2x4x128xf32> to vector<2x1x4x128xf32>
    %244 = vector.extract_strided_slice %153 {offsets = [0, 6, 0, 0], sizes = [2, 1, 10, 128], strides = [1, 1, 1, 1]} : vector<2x10x10x128xf32> to vector<2x1x10x128xf32>
    %245 = vector.shape_cast %244 : vector<2x1x10x128xf32> to vector<2x10x128xf32>
    %246 = vector.extract_strided_slice %153 {offsets = [0, 7, 0, 0], sizes = [2, 1, 10, 128], strides = [1, 1, 1, 1]} : vector<2x10x10x128xf32> to vector<2x1x10x128xf32>
    %247 = vector.shape_cast %246 : vector<2x1x10x128xf32> to vector<2x10x128xf32>
    %248 = arith.maximumf %245, %247 : vector<2x10x128xf32>
    %249 = vector.extract_strided_slice %153 {offsets = [0, 8, 0, 0], sizes = [2, 1, 10, 128], strides = [1, 1, 1, 1]} : vector<2x10x10x128xf32> to vector<2x1x10x128xf32>
    %250 = vector.shape_cast %249 : vector<2x1x10x128xf32> to vector<2x10x128xf32>
    %251 = arith.maximumf %248, %250 : vector<2x10x128xf32>
    %252 = vector.extract_strided_slice %251 {offsets = [0, 0, 0], sizes = [2, 1, 128], strides = [1, 1, 1]} : vector<2x10x128xf32> to vector<2x1x128xf32>
    %253 = vector.extract_strided_slice %251 {offsets = [0, 1, 0], sizes = [2, 1, 128], strides = [1, 1, 1]} : vector<2x10x128xf32> to vector<2x1x128xf32>
    %254 = arith.maximumf %252, %253 : vector<2x1x128xf32>
    %255 = vector.extract_strided_slice %251 {offsets = [0, 2, 0], sizes = [2, 1, 128], strides = [1, 1, 1]} : vector<2x10x128xf32> to vector<2x1x128xf32>
    %256 = arith.maximumf %254, %255 : vector<2x1x128xf32>
    %257 = vector.extract_strided_slice %251 {offsets = [0, 2, 0], sizes = [2, 1, 128], strides = [1, 1, 1]} : vector<2x10x128xf32> to vector<2x1x128xf32>
    %258 = vector.extract_strided_slice %251 {offsets = [0, 3, 0], sizes = [2, 1, 128], strides = [1, 1, 1]} : vector<2x10x128xf32> to vector<2x1x128xf32>
    %259 = arith.maximumf %257, %258 : vector<2x1x128xf32>
    %260 = vector.extract_strided_slice %251 {offsets = [0, 4, 0], sizes = [2, 1, 128], strides = [1, 1, 1]} : vector<2x10x128xf32> to vector<2x1x128xf32>
    %261 = arith.maximumf %259, %260 : vector<2x1x128xf32>
    %262 = vector.extract_strided_slice %251 {offsets = [0, 4, 0], sizes = [2, 1, 128], strides = [1, 1, 1]} : vector<2x10x128xf32> to vector<2x1x128xf32>
    %263 = vector.extract_strided_slice %251 {offsets = [0, 5, 0], sizes = [2, 1, 128], strides = [1, 1, 1]} : vector<2x10x128xf32> to vector<2x1x128xf32>
    %264 = arith.maximumf %262, %263 : vector<2x1x128xf32>
    %265 = vector.extract_strided_slice %251 {offsets = [0, 6, 0], sizes = [2, 1, 128], strides = [1, 1, 1]} : vector<2x10x128xf32> to vector<2x1x128xf32>
    %266 = arith.maximumf %264, %265 : vector<2x1x128xf32>
    %267 = vector.extract_strided_slice %251 {offsets = [0, 6, 0], sizes = [2, 1, 128], strides = [1, 1, 1]} : vector<2x10x128xf32> to vector<2x1x128xf32>
    %268 = vector.extract_strided_slice %251 {offsets = [0, 7, 0], sizes = [2, 1, 128], strides = [1, 1, 1]} : vector<2x10x128xf32> to vector<2x1x128xf32>
    %269 = arith.maximumf %267, %268 : vector<2x1x128xf32>
    %270 = vector.extract_strided_slice %251 {offsets = [0, 8, 0], sizes = [2, 1, 128], strides = [1, 1, 1]} : vector<2x10x128xf32> to vector<2x1x128xf32>
    %271 = arith.maximumf %269, %270 : vector<2x1x128xf32>
    %272 = tpu.concatenate %256, %261, %266, %271 in 1 : vector<2x1x128xf32>, vector<2x1x128xf32>, vector<2x1x128xf32>, vector<2x1x128xf32> -> vector<2x4x128xf32>
    %273 = vector.shape_cast %272 : vector<2x4x128xf32> to vector<2x1x4x128xf32>
    %274 = tpu.concatenate %183, %213, %243, %273 in 1 : vector<2x1x4x128xf32>, vector<2x1x4x128xf32>, vector<2x1x4x128xf32>, vector<2x1x4x128xf32> -> vector<2x4x4x128xf32>
    %c0_49 = arith.constant 0 : index
    %c0_50 = arith.constant 0 : index
    %c0_51 = arith.constant 0 : index
    %c0_52 = arith.constant 0 : index
    %275 = vector.load %arg10[%c0_49, %c0_50, %c0_51, %c0_52] : memref<2x4x4x128xf32, #tpu.memory_space<vmem>>, vector<2x4x4x128xf32>
    tpu.vector_store %arg10[%c0_49, %c0_50, %c0_51, %c0_52], %274 {strides = array<i32>} : memref<2x4x4x128xf32, #tpu.memory_space<vmem>>, vector<2x4x4x128xf32>,
    return
  }
}

</mosaic_0001>

<bundles_post_ra>
// kernel: inception_block_v2.1
= control target key start
LH: loop header
LB: loop body
LE: loop exit
PB: predicated region body
PF: predicated region fallthrough
CT: control target
= control target key end

     0   :  { %vm353_vm0 = vcmask 130048   ;;  %vm148_vm1 = vcmask 1040384   ;;  %s18323_s0 = inlined_call_operand.vmem [shape: f32[2,8,8,16], index: 0, kind: input, shape index: {}]   ;;  %s18324_s1 = inlined_call_operand.vmem [shape: f32[2,8,8,16], index: 1, kind: input, shape index: {}]   ;;  %s18325_s2 = inlined_call_operand.vmem [shape: f32[2,8,8,16], index: 2, kind: input, shape index: {}]   ;;  %s18326_s3 = inlined_call_operand.vmem [shape: f32[2,8,8,16], index: 3, kind: input, shape index: {}]   ;;  %s18327_s4 = inlined_call_operand.vmem [shape: f32[16,96], index: 4, kind: input, shape index: {}]   ;;  %s18328_s5 = inlined_call_operand.vmem [shape: f32[288,32], index: 5, kind: input, shape index: {}]   ;;  %s18329_s6 = inlined_call_operand.vmem [shape: f32[800,32], index: 6, kind: input, shape index: {}]   ;;  %s18330_s7 = inlined_call_operand.vmem [shape: f32[400,32], index: 7, kind: input, shape index: {}]   ;;  %s18331_s8 = inlined_call_operand.vmem [shape: f32[1,128], index: 8, kind: input, shape index: {}]   ;;  %s18332_s9 = inlined_call_operand.vmem [shape: f32[1,128], index: 9, kind: input, shape index: {}]   ;;  %s18333_s10 = inlined_call_operand.hbm [shape: f32[2,4,4,128], index: 10, kind: output, shape index: {}]  }
   0x1   :  { %v351_v0 = vld [vmem:[%s18327_s4] sm:$0xff]  ;;  %v352_v1 = vld [vmem:[%s18327_s4 + $0x8] sm:$0xff]  ;;  %v38_v5 = vld [vmem:[%s18323_s0 + $0x10] sm:$0xff] }
   0x2   :  { %v36_v2 = vld [vmem:[%s18323_s0] sm:$0xff]  ;;  %v7487_v3 = vpack.c.bf16 %v352_v1, %v351_v0  ;;  %v37_v4 = vld [vmem:[%s18323_s0 + $0x8] sm:$0xff]  ;;  %v39_v6 = vld [vmem:[%s18323_s0 + $0x18] sm:$0xff] }
   0x3   :  { %7399 = vmatprep.mubr.msk.f32.mxu0 %vm353_vm0, %v36_v2  ;;  %v40_v7 = vld [vmem:[%s18323_s0 + $0x20] sm:$0xff]  ;;  %v41_v8 = vld [vmem:[%s18323_s0 + $0x28] sm:$0xff]  ;;  %v42_v9 = vld [vmem:[%s18323_s0 + $0x30] sm:$0xff] }
   0x4   :  { %7488 = vmatprep.subr.bf16.mxu0 %v7487_v3  ;;  %v43_v10 = vld [vmem:[%s18323_s0 + $0x38] sm:$0xff]  ;;  %v44_v12 = vld [vmem:[%s18323_s0 + $0x40] sm:$0xff]  ;;  %v45_v14 = vld [vmem:[%s18323_s0 + $0x48] sm:$0xff] }
   0x5   :  { %7490 = vmatpush3.bf16.msra.mxu0 %v7487_v3  ;;  %v59_v11 = vld [vmem:[%s18324_s1 + $0x38] sm:$0xff]  ;;  %v46_v15 = vld [vmem:[%s18323_s0 + $0x50] sm:$0xff] }
   0x6   :  { %v123_v13 = vrot.slane %v59_v11, 7 }
   0x8   :  { %7400 = vmatmul.mubr.msk.f32.vlgmr.msra.gmra.mrb[0].mxu0 %vm353_vm0, %v37_v4 }
   0x9   :  { %7402 = vmatprep.mubr.msk.f32.mxu0 %vm353_vm0, %v38_v5 }
   0xc   :  { %7403 = vmatmul.mubr.msk.f32.gmra.mrb[2].mxu0 %vm353_vm0, %v39_v6 }
   0xd   :  { %7405 = vmatprep.mubr.msk.f32.mxu0 %vm353_vm0, %v40_v7 }
  0x10   :  { %7406 = vmatmul.mubr.msk.f32.gmra.mrb[4].mxu0 %vm353_vm0, %v41_v8 }
  0x11   :  { %7408 = vmatprep.mubr.msk.f32.mxu0 %vm353_vm0, %v42_v9 }
  0x14   :  { %7409 = vmatmul.mubr.msk.f32.gmra.mrb[6].mxu0 %vm353_vm0, %v43_v10 }
  0x15   :  { %7411 = vmatprep.mubr.msk.f32.mxu0 %vm353_vm0, %v44_v12 }
  0x16   :  { %15 = vsyncpa [#allocation3], 0  ;;  %v156_v16 = vsel %vm148_vm1, -inf, %v123_v13  ;;  %v236_v17 = vmax.f32 %v43_v10, %v59_v11  ;;  %v47_v18 = vld [vmem:[%s18323_s0 + $0x58] sm:$0xff]  ;;  %v48_v20 = vld [vmem:[%s18323_s0 + $0x60] sm:$0xff]  ;;  %s9469_s14 = smov 96  }
  0x17   :  { %v75_v19 = vld [vmem:[%s18325_s2 + $0x38] sm:$0xff]  ;;  %v49_v24 = vld [vmem:[%s18323_s0 + $0x68] sm:$0xff]  ;;  %v74_v25 = vld [vmem:[%s18325_s2 + $0x30] sm:$0xff]  ;;  %s9470_s15 = smov 64   ;;  %vm814_vm2 = vcmask 1045504   ;;  %vm1122_vm3 = vcmask 261120  }
  0x18   :  { %7412 = vmatmul.mubr.msk.f32.gmra.mrb[8].mxu0 %vm353_vm0, %v45_v14  ;;  %v91_v21 = vld [vmem:[%s18326_s3 + $0x38] sm:$0xff]  ;;  %v252_v22 = vmax.f32 %v236_v17, %v156_v16  ;;  %v50_v27 = vld [vmem:[%s18323_s0 + $0x70] sm:$0xff]  ;;  %v579_v57 = vld [vmem:[%s18328_s5 + $0x100] sm:$0xff]  ;;  %vm1703_vm4 = vcmask 1041408   ;;  %s9472_s16 = smov 32   ;;  %vm724_vm5 = vcmask 1046528  }
  0x19   :  { %7414 = vmatprep.mubr.msk.f32.mxu0 %vm353_vm0, %v46_v15  ;;  %v188_v26 = vrot.slane %v91_v21, 7  ;;  %v90_v28 = vld [vmem:[%s18326_s3 + $0x30] sm:$0xff]  ;;  %v51_v31 = vld [vmem:[%s18323_s0 + $0x78] sm:$0xff]  ;;  %v580_v58 = vld [vmem:[%s18328_s5 + $0x108] sm:$0xff]  ;;  %vm1904_vm6 = vcmask 1044480   ;;  %vm1982_vm7 = vcmask 1043456  }
  0x1a   :  { %v268_v23 = vmax.f32 %v252_v22, %v75_v19  ;;  %v187_v32 = vrot.slane %v90_v28, 7  ;;  %v67_v38 = vld [vmem:[%s18324_s1 + $0x78] sm:$0xff]  ;;  %v82_v46 = vld [vmem:[%s18325_s2 + $0x70] sm:$0xff]  ;;  %v7523_v59 = vpack.c.bf16 %v580_v58, %v579_v57  ;;  %vm1138_vm8 = vcmask 523264   ;;  %s9473_s17 = smov 16   ;;  %s9474_s18 = smov 48  }
  0x1b   :  { %v220_v33 = vsel %vm148_vm1, -inf, %v188_v26  ;;  %v131_v39 = vrot.slane %v67_v38, 7  ;;  %v244_v41 = vmax.f32 %v51_v31, %v67_v38  ;;  %v83_v42 = vld [vmem:[%s18325_s2 + $0x78] sm:$0xff]  ;;  %v98_v48 = vld [vmem:[%s18326_s3 + $0x70] sm:$0xff]  ;;  %vm1154_vm9 = vcmask 785408   ;;  %s9475_s29 = smov 80  }
  0x1c   :  { %7415 = vmatmul.mubr.msk.f32.gmra.mrb[10].mxu0 %vm353_vm0, %v47_v18  ;;  %v283_v29 = vmax.f32 %v268_v23, %v74_v25  ;;  %v9623_v36 = vsel %vm148_vm1, -inf, %v187_v32  ;;  %v99_v43 = vld [vmem:[%s18326_s3 + $0x78] sm:$0xff]  ;;  %v195_v51 = vrot.slane %v98_v48, 7  ;;  %7524 = vmatprep.subr.bf16.mxu0 %v7523_v59  ;;  %v581_v60 = vld [vmem:[%s18328_s5 + $0x110] sm:$0xff]  ;;  %vm5003_vm10 = vcmask 392192  }
  0x1d   :  { %7417 = vmatprep.mubr.msk.f32.mxu0 %vm353_vm0, %v48_v20  ;;  %19274 = vst [vmem:[#allocation5_spill] sm:$0xff] %v9623_v36  ;;  %v164_v40 = vsel %vm148_vm1, -inf, %v131_v39  ;;  %v196_v47 = vrot.slane %v99_v43, 7  ;;  %7526 = vmatpush3.bf16.msra.mxu0 %v7523_v59  ;;  %v582_v61 = vld [vmem:[%s18328_s5 + $0x118] sm:$0xff]  ;;  %vm5030_vm11 = vcmask 654336   ;;  %vm5061_vm12 = vcmask 916480  }
  0x1e   :  { %v298_v30 = vmax.f32 %v283_v29, %v91_v21  ;;  %v260_v44 = vmax.f32 %v244_v41, %v164_v40  ;;  %v9646_v55 = vsel %vm148_vm1, -inf, %v195_v51  ;;  %v7527_v62 = vpack.c.bf16 %v582_v61, %v581_v60 }
  0x1f   :  { %v228_v52 = vsel %vm148_vm1, -inf, %v196_v47  ;;  %19276 = vst [vmem:[#allocation7_spill] sm:$0xff] %v9646_v55  ;;  %vm6688_vm13 = vcmask 1042432  }
  0x20   :  { %7418 = vmatmul.mubr.msk.f32.gmra.mrb[12].mxu0 %vm353_vm0, %v49_v24  ;;  %v313_v34 = vmax.f32 %v298_v30, %v90_v28  ;;  %v276_v45 = vmax.f32 %v260_v44, %v83_v42  ;;  %7528 = vmatprep.subr.bf16.mxu0 %v7527_v62 }
  0x21   :  { %7420 = vmatprep.mubr.msk.f32.mxu0 %vm353_vm0, %v50_v27  ;;  %7530 = vmatpush3.bf16.msra.mxu0 %v7527_v62 }
  0x22   :  { %v328_v35 = vmax.f32 %v313_v34, %v220_v33  ;;  %v290_v49 = vmax.f32 %v276_v45, %v82_v46 }
  0x24   :  { %7421 = vmatmul.mubr.msk.f32.gmra.mrb[14].mxu0 %vm353_vm0, %v51_v31  ;;  %v9626_v37 = vmax.f32 %v328_v35, %v9623_v36  ;;  %v306_v50 = vmax.f32 %v290_v49, %v99_v43 }
  0x26   :  { %19275 = vst [vmem:[#allocation6_spill] sm:$0xff] %v9626_v37  ;;  %v320_v53 = vmax.f32 %v306_v50, %v98_v48 }
  0x28   :  { %v336_v54 = vmax.f32 %v320_v53, %v228_v52 }
  0x2a   :  { %v9649_v56 = vmax.f32 %v336_v54, %v9646_v55 }
  0x2c   :  { %19277 = vst [vmem:[#allocation8_spill] sm:$0xff] %v9649_v56 }
  0xdb   :  { %v9663_v63 = vpop.f32.mrb[0].mxu0 }
  0xdc   :  { %19278 = vst [vmem:[#allocation9_spill] sm:$0xff] %v9663_v63  ;;  %v1640_v0 = vrot.slane %v9663_v63, 6  ;;  %v9666_v1 = vpop.f32.mrb[1].mxu0  ;;  %v600_v2 = vrot.slane %v9663_v63, 7 }
  0xdd   :  { %19279 = vst [vmem:[#allocation10_spill] sm:$0xff] %v9666_v1  ;;  %v1639_v3 = vrot.slane %v9666_v1, 6  ;;  %v599_v21 = vrot.slane %v9666_v1, 7 }
  0xde   :  { %617 = vrot.lane.b32.xlu0 %v600_v2, %s9469_s14 }
  0xdf   :  { %v9671_v4 = vpop.f32.mrb[2].mxu0  ;;  %v7705_v5 = vpack.i.bf16 %v1640_v0, %v1639_v3 }
  0xe0   :  { %19280 = vst [vmem:[#allocation11_spill] sm:$0xff] %v9671_v4  ;;  %v602_v6 = vrot.slane %v9671_v4, 7  ;;  %v9674_v7 = vpop.f32.mrb[3].mxu0  ;;  %v1642_v8 = vrot.slane %v9671_v4, 6 }
  0xe1   :  { %19281 = vst [vmem:[#allocation12_spill] sm:$0xff] %v9674_v7  ;;  %v601_v9 = vrot.slane %v9674_v7, 7  ;;  %v1641_v14 = vrot.slane %v9674_v7, 6 }
  0xe2   :  { %7706 = vrot.lane.b32.xlu0 %v7705_v5, %s9470_s15  ;;  %621 = vrot.lane.b32.xlu1 %v602_v6, %s9469_s14 }
  0xe3   :  { %v9680_v10 = vpop.f32.mrb[4].mxu0 }
  0xe4   :  { %19282 = vst [vmem:[#allocation13_spill] sm:$0xff] %v9680_v10  ;;  %v9682_v11 = vpop.f32.mrb[5].mxu0  ;;  %v1644_v12 = vrot.slane %v9680_v10, 6  ;;  %v604_v17 = vrot.slane %v9680_v10, 7 }
  0xe5   :  { %19283 = vst [vmem:[#allocation14_spill] sm:$0xff] %v9682_v11  ;;  %v603_v18 = vrot.slane %v9682_v11, 7  ;;  %v1643_v28 = vrot.slane %v9682_v11, 6 }
  0xe6   :  { %1661 = vrot.lane.b32.xlu0 %v1642_v8, %s9470_s15  ;;  %619 = vrot.lane.b32.xlu1 %v601_v9, %s9469_s14 }
  0xe7   :  { %v9687_v13 = vpop.f32.mrb[6].mxu0 }
  0xe8   :  { %19284 = vst [vmem:[#allocation15_spill] sm:$0xff] %v9687_v13  ;;  %v9690_v15 = vpop.f32.mrb[7].mxu0  ;;  %v1646_v24 = vrot.slane %v9687_v13, 6  ;;  %v606_v31 = vrot.slane %v9687_v13, 7 }
  0xe9   :  { %19285 = vst [vmem:[#allocation16_spill] sm:$0xff] %v9690_v15  ;;  %v605_v32 = vrot.slane %v9690_v15, 7  ;;  %v1645_v38 = vrot.slane %v9690_v15, 6 }
  0xea   :  { %1659 = vrot.lane.b32.xlu1 %v1641_v14, %s9470_s15  ;;  %1665 = vrot.lane.b32.xlu0 %v1644_v12, %s9470_s15 }
  0xeb   :  { %v9694_v16 = vpop.f32.mrb[8].mxu0 }
  0xec   :  { %19286 = vst [vmem:[#allocation17_spill] sm:$0xff] %v9694_v16  ;;  %v1648_v19 = vrot.slane %v9694_v16, 6  ;;  %v9699_v20 = vpop.f32.mrb[9].mxu0  ;;  %v608_v34 = vrot.slane %v9694_v16, 7 }
  0xed   :  { %19287 = vst [vmem:[#allocation18_spill] sm:$0xff] %v9699_v20  ;;  %v607_v22 = vrot.slane %v9699_v20, 7  ;;  %v1647_v23 = vrot.slane %v9699_v20, 6 }
  0xee   :  { %625 = vrot.lane.b32.xlu1 %v604_v17, %s9469_s14  ;;  %623 = vrot.lane.b32.xlu0 %v603_v18, %s9469_s14 }
  0xef   :  { %v7715_v25 = vpack.i.bf16 %v1648_v19, %v1647_v23  ;;  %v7710_v26 = vpack.i.bf16 %v607_v22, %v599_v21  ;;  %v9707_v27 = vpop.f32.mrb[10].mxu0 }
  0xf0   :  { %19288 = vst [vmem:[#allocation19_spill] sm:$0xff] %v9707_v27  ;;  %v9710_v29 = vpop.f32.mrb[11].mxu0  ;;  %v610_v40 = vrot.slane %v9707_v27, 7  ;;  %v1650_v41 = vrot.slane %v9707_v27, 6 }
  0xf1   :  { %19289 = vst [vmem:[#allocation20_spill] sm:$0xff] %v9710_v29  ;;  %v609_v42 = vrot.slane %v9710_v29, 7  ;;  %v1649_v43 = vrot.slane %v9710_v29, 6 }
  0xf2   :  { %1663 = vrot.lane.b32.xlu1 %v1643_v28, %s9470_s15  ;;  %1669 = vrot.lane.b32.xlu0 %v1646_v24, %s9470_s15 }
  0xf3   :  { %v9714_v30 = vpop.f32.mrb[12].mxu0 }
  0xf4   :  { %19290 = vst [vmem:[#allocation21_spill] sm:$0xff] %v9714_v30  ;;  %v9718_v33 = vpop.f32.mrb[13].mxu0  ;;  %v612_v44 = vrot.slane %v9714_v30, 7  ;;  %v1652_v45 = vrot.slane %v9714_v30, 6 }
  0xf5   :  { %19291 = vst [vmem:[#allocation22_spill] sm:$0xff] %v9718_v33  ;;  %v611_v46 = vrot.slane %v9718_v33, 7  ;;  %v1651_v47 = vrot.slane %v9718_v33, 6 }
  0xf6   :  { %629 = vrot.lane.b32.xlu1 %v606_v31, %s9469_s14  ;;  %627 = vrot.lane.b32.xlu0 %v605_v32, %s9469_s14 }
  0xf7   :  { %v9723_v35 = vpop.f32.mrb[14].mxu0 }
  0xf8   :  { %19292 = vst [vmem:[#allocation23_spill] sm:$0xff] %v9723_v35  ;;  %v9726_v39 = vpop.f32.mrb[15].mxu0  ;;  %v614_v48 = vrot.slane %v9723_v35, 7  ;;  %v1654_v49 = vrot.slane %v9723_v35, 6 }
  0xf9   :  { %19293 = vst [vmem:[#allocation24_spill] sm:$0xff] %v9726_v39  ;;  %v613_v50 = vrot.slane %v9726_v39, 7  ;;  %v1653_v51 = vrot.slane %v9726_v39, 6 }
  0xfa   :  { %1667 = vrot.lane.b32.xlu1 %v1645_v38, %s9470_s15  ;;  %633 = vrot.lane.b32.xlu0 %v608_v34, %s9469_s14 }
  0xfe   :  { %7716 = vrot.lane.b32.xlu1 %v7715_v25, %s9470_s15  ;;  %7711 = vrot.lane.b32.xlu0 %v7710_v26, %s9469_s14  ;;  %v18343_v26 = vmov 0.0  }
 0x102   :  { %1677 = vrot.lane.b32.xlu1 %v1650_v41, %s9470_s15  ;;  %637 = vrot.lane.b32.xlu0 %v610_v40, %s9469_s14 }
 0x106   :  { %1675 = vrot.lane.b32.xlu0 %v1649_v43, %s9470_s15  ;;  %635 = vrot.lane.b32.xlu1 %v609_v42, %s9469_s14 }
 0x10a   :  { %1681 = vrot.lane.b32.xlu1 %v1652_v45, %s9470_s15  ;;  %641 = vrot.lane.b32.xlu0 %v612_v44, %s9469_s14 }
 0x10e   :  { %1679 = vrot.lane.b32.xlu0 %v1651_v47, %s9470_s15  ;;  %639 = vrot.lane.b32.xlu1 %v611_v46, %s9469_s14 }
 0x112   :  { %1685 = vrot.lane.b32.xlu1 %v1654_v49, %s9470_s15  ;;  %645 = vrot.lane.b32.xlu0 %v614_v48, %s9469_s14 }
 0x116   :  { %1683 = vrot.lane.b32.xlu0 %v1653_v51, %s9470_s15  ;;  %643 = vrot.lane.b32.xlu1 %v613_v50, %s9469_s14 }
 0x150   :  { %v618_v52 = vpop.permute.xlu0 %617 }
 0x151   :  { %v9757_v53 = vsel %vm148_vm1, 0.0, %v618_v52  ;;  %v9760_v54 = vsel %vm148_vm1, %v618_v52, 0.0 }
 0x152   :  { %19294 = vst [vmem:[#allocation25_spill] sm:$0xff] %v9757_v53  ;;  %v821_v57 = vrot.slane %v9760_v54, 2  ;;  %v820_v58 = vrot.slane %v9757_v53, 2 }
 0x154   :  { %v7707_v59 = vpop.permute.xlu0 %7706  ;;  %v622_v60 = vpop.permute.xlu1 %621  ;;  %v9765_v61 = vsel %vm814_vm2, %v820_v58, %v821_v57 }
 0x155   :  { %v7709_v62 = vunpack.i.h.bf16 %v7707_v59  ;;  %v7708_v0 = vunpack.i.l.bf16 %v7707_v59  ;;  %v9768_v2 = vsel %vm148_vm1, 0.0, %v622_v60  ;;  %v9771_v3 = vsel %vm148_vm1, %v622_v60, 0.0  ;;  %7431 = vmatprep.mubr.msk.f32.mxu0 %vm1122_vm3, %v9765_v61 }
 0x156   :  { %19295 = vst [vmem:[#allocation26_spill] sm:$0xff] %v9768_v2  ;;  %v827_v6 = vrot.slane %v9771_v3, 2  ;;  %v826_v8 = vrot.slane %v9768_v2, 2 }
 0x157   :  { %v9776_v5 = vsel %vm1703_vm4, %v7708_v0, 0.0  ;;  %v9781_v9 = vsel %vm1703_vm4, 0.0, %v7709_v62  ;;  %v9784_v12 = vsel %vm1703_vm4, 0.0, %v7708_v0  ;;  %v9789_v18 = vsel %vm1703_vm4, %v7709_v62, 0.0 }
 0x158   :  { %19296 = vst [vmem:[#allocation27_spill] sm:$0xff] %v9781_v9  ;;  %19297 = vst [vmem:[#allocation28_spill] sm:$0xff] %v9784_v12  ;;  %v9786_v14 = vpop.permute.xlu0 %1661  ;;  %v620_v17 = vpop.permute.xlu1 %619  ;;  %v1761_v22 = vrot.slane %v9776_v5, 1  ;;  %v1833_v23 = vrot.slane %v9776_v5, 2  ;;  %v7725_v28 = vpack.i.bf16 %v9784_v12, %v18343_v26  ;;  %v9804_v31 = vsel %vm814_vm2, %v826_v8, %v827_v6 }
 0x159   :  { %19298 = vst [vmem:[#allocation29_spill] sm:$0xff] %v9789_v18  ;;  %v9792_v19 = vsel %vm148_vm1, 0.0, %v620_v17  ;;  %v9795_v21 = vsel %vm148_vm1, %v620_v17, 0.0  ;;  %v1760_v32 = vrot.slane %v9784_v12, 1  ;;  %v1763_v34 = vrot.slane %v9781_v9, 1 }
 0x15a   :  { %19299 = vst [vmem:[#allocation30_spill] sm:$0xff] %v9792_v19  ;;  %v823_v24 = vrot.slane %v9792_v19, 2  ;;  %v824_v25 = vrot.slane %v9795_v21, 2  ;;  %v18336_v42 = vrot.slane %v9789_v18, 1  ;;  %v1832_v43 = vrot.slane %v9784_v12, 2  ;;  %7726 = vrot.lane.b32.xlu0 %v7725_v28, %s9472_s16 }
 0x15b   :  { %v1835_v44 = vrot.slane %v9781_v9, 2  ;;  %v9824_v45 = vsel %vm724_vm5, %v1760_v32, %v1761_v22  ;;  %v18334_v47 = vrot.slane %v9789_v18, 2  ;;  %v1908_v48 = vrot.slane %v9776_v5, 3 }
 0x15c   :  { %v9808_v38 = vpop.permute.xlu1 %1659  ;;  %v9810_v40 = vpop.permute.xlu0 %1665  ;;  %v9813_v41 = vsel %vm814_vm2, %v823_v24, %v824_v25  ;;  %19300 = vst [vmem:[#allocation31_spill] sm:$0xff] %v9824_v45  ;;  %v9829_v46 = vsel %vm724_vm5, %v1763_v34, %v18336_v42  ;;  %v9836_v50 = vsel %vm814_vm2, %v1832_v43, %v1833_v23  ;;  %v1907_v58 = vrot.slane %v9784_v12, 3 }
 0x15d   :  { %7432 = vmatmul.mubr.msk.f32.vlgmr.msra.gmra.mrb[16].mxu0 %vm1122_vm3, %v9813_v41  ;;  %v7740_v49 = vpack.i.bf16 %v9829_v46, %v9824_v45  ;;  %19301 = vst [vmem:[#allocation32_spill] sm:$0xff] %v9836_v50  ;;  %v9841_v57 = vsel %vm814_vm2, %v1835_v44, %v18334_v47  ;;  %v1910_v59 = vrot.slane %v9781_v9, 3  ;;  %v18335_v60 = vrot.slane %v9789_v18, 3 }
 0x15e   :  { %7434 = vmatprep.mubr.msk.f32.mxu0 %vm1122_vm3, %v9804_v31  ;;  %19302 = vst [vmem:[#allocation33_spill] sm:$0xff] %v9841_v57  ;;  %v7745_v23 = vpack.i.bf16 %v9841_v57, %v9836_v50  ;;  %v9870_v34 = vsel %vm1904_vm6, %v1907_v58, %v1908_v48  ;;  %v1986_v35 = vrot.slane %v9776_v5, 4  ;;  %v1988_v27 = vrot.slane %v9781_v9, 4 }
 0x15f   :  { %7741 = vrot.lane.b32.xlu0 %v7740_v49, %s9472_s16  ;;  %19305 = vst [vmem:[#allocation36_spill] sm:$0xff] %v9870_v34  ;;  %v9875_v43 = vsel %vm1904_vm6, %v1910_v59, %v18335_v60  ;;  %v1989_v16 = vrot.slane %v9789_v18, 4  ;;  %v9983_v63 = vsel %vm1703_vm4, %v9786_v14, 0.0  ;;  %v19322_v33 = vrot.slane %v9789_v18, 1 }
 0x160   :  { %v626_v51 = vpop.permute.xlu1 %625  ;;  %v624_v52 = vpop.permute.xlu0 %623  ;;  %19306 = vst [vmem:[#allocation37_spill] sm:$0xff] %v9875_v43  ;;  %v9888_v48 = vpack.i.bf16 %v9875_v43, %v9870_v34  ;;  %19321 = vst [vmem:[#allocation52_spill] sm:$0xff] %v9983_v63  ;;  %v733_v15 = vrot.slane %v9792_v19, 1  ;;  %v731_v43 = vrot.slane %v9760_v54, 1 }
 0x161   :  { %v9848_v62 = vsel %vm148_vm1, 0.0, %v626_v51  ;;  %v9851_v0 = vsel %vm148_vm1, %v626_v51, 0.0  ;;  %v9854_v6 = vsel %vm148_vm1, 0.0, %v624_v52  ;;  %v9857_v8 = vsel %vm148_vm1, %v624_v52, 0.0 }
 0x162   :  { %19303 = vst [vmem:[#allocation34_spill] sm:$0xff] %v9848_v62  ;;  %19304 = vst [vmem:[#allocation35_spill] sm:$0xff] %v9854_v6  ;;  %v833_v17 = vrot.slane %v9851_v0, 2  ;;  %v830_v22 = vrot.slane %v9857_v8, 2  ;;  %v829_v24 = vrot.slane %v9854_v6, 2  ;;  %v832_v32 = vrot.slane %v9848_v62, 2 }
 0x163   :  { %7746 = vrot.lane.b32.xlu0 %v7745_v23, %s9470_s15  ;;  %v9891_v51 = vrot.slane %v18343_v26, 1  ;;  %v9945_v1 = vsel %vm1982_vm7, %v1988_v27, %v1989_v16  ;;  %v7775_v27 = vpack.i.bf16 %v9768_v2, %v9792_v19 }
 0x164   :  { %v9864_v25 = vpop.permute.xlu1 %1663  ;;  %v9866_v28 = vpop.permute.xlu0 %1669  ;;  %v9879_v44 = vsel %vm814_vm2, %v829_v24, %v830_v22  ;;  %v9882_v49 = vsel %vm814_vm2, %v832_v32, %v833_v17  ;;  %19316 = vst [vmem:[#allocation47_spill] sm:$0xff] %v9945_v1 }
 0x165   :  { %19307 = vst [vmem:[#allocation38_spill] sm:$0xff] %v9882_v49  ;;  %7435 = vmatmul.mubr.msk.f32.gmra.mrb[18].mxu0 %vm1122_vm3, %v9879_v44  ;;  %19308 = vst [vmem:[#allocation39_spill] sm:$0xff] %v9891_v51  ;;  %v7755_v60 = vpack.i.bf16 %v9824_v45, %v9891_v51 }
 0x166   :  { %7437 = vmatprep.mubr.msk.f32.mxu0 %vm1122_vm3, %v9882_v49 }
 0x167   :  { %7751 = vrot.lane.b32.xlu0 %v9888_v48, %s9469_s14 }
 0x168   :  { %v630_v52 = vpop.permute.xlu1 %629  ;;  %v628_v58 = vpop.permute.xlu0 %627 }
 0x169   :  { %v9898_v59 = vsel %vm148_vm1, 0.0, %v630_v52  ;;  %v9901_v17 = vsel %vm148_vm1, %v630_v52, 0.0  ;;  %v9904_v22 = vsel %vm148_vm1, 0.0, %v628_v58  ;;  %v9907_v23 = vsel %vm148_vm1, %v628_v58, 0.0 }
 0x16a   :  { %19309 = vst [vmem:[#allocation40_spill] sm:$0xff] %v9904_v22  ;;  %v978_v24 = vrot.slane %v9898_v59, 2  ;;  %v979_v32 = vrot.slane %v9901_v17, 2  ;;  %v836_v47 = vrot.slane %v9907_v23, 2  ;;  %v835_v42 = vrot.slane %v9904_v22, 2 }
 0x16b   :  { %v9916_v52 = vrot.slane %v18343_v26, 2  ;;  %v1985_v58 = vrot.slane %v9784_v12, 4  ;;  %7756 = vrot.lane.b32.xlu0 %v7755_v60, %s9470_s15 }
 0x16c   :  { %v634_v30 = vpop.permute.xlu0 %633  ;;  %v9930_v26 = vsel %vm814_vm2, %v978_v24, %v979_v32  ;;  %v9934_v4 = vsel %vm814_vm2, %v835_v42, %v836_v47  ;;  %v9947_v24 = vpop.permute.xlu1 %1667 }
 0x16d   :  { %19310 = vst [vmem:[#allocation41_spill] sm:$0xff] %v9916_v52  ;;  %v9924_v13 = vsel %vm148_vm1, 0.0, %v634_v30  ;;  %v9927_v10 = vsel %vm148_vm1, %v634_v30, 0.0  ;;  %19313 = vst [vmem:[#allocation44_spill] sm:$0xff] %v9930_v26  ;;  %v7760_v7 = vpack.i.bf16 %v9836_v50, %v9916_v52  ;;  %7438 = vmatmul.mubr.msk.f32.gmra.mrb[20].mxu0 %vm1122_vm3, %v9934_v4  ;;  %v9942_v30 = vsel %vm1982_vm7, %v1985_v58, %v1986_v35 }
 0x16e   :  { %19311 = vst [vmem:[#allocation42_spill] sm:$0xff] %v9924_v13  ;;  %19312 = vst [vmem:[#allocation43_spill] sm:$0xff] %v9927_v10  ;;  %v842_v5 = vrot.slane %v9927_v10, 2  ;;  %v841_v60 = vrot.slane %v9924_v13, 2  ;;  %7440 = vmatprep.mubr.msk.f32.mxu0 %vm1122_vm3, %v9930_v26  ;;  %v7765_v32 = vpack.i.bf16 %v9945_v1, %v9942_v30  ;;  %v9961_v35 = vsel %vm1703_vm4, %v9808_v38, 0.0 }
 0x16f   :  { %19314 = vst [vmem:[#allocation45_spill] sm:$0xff] %v9934_v4  ;;  %19315 = vst [vmem:[#allocation46_spill] sm:$0xff] %v9942_v30  ;;  %7761 = vrot.lane.b32.xlu0 %v7760_v7, %s9469_s14  ;;  %v9974_v58 = vrot.slane %v9961_v35, 1  ;;  %v9991_v20 = vrot.slane %v9961_v35, 2  ;;  %v10001_v50 = vrot.slane %v9983_v63, 2  ;;  %v10113_v30 = vsel %vm1703_vm4, %v9864_v25, 0.0 }
 0x170   :  { %v9952_v42 = vpop.permute.xlu0 %7711  ;;  %v9955_v47 = vsel %vm814_vm2, %v841_v60, %v842_v5  ;;  %19318 = vst [vmem:[#allocation49_spill] sm:$0xff] %v9961_v35  ;;  %v9969_v7 = vpop.permute.xlu1 %7716  ;;  %19343 = vst [vmem:[#allocation73_spill] sm:$0xff] %v10113_v30 }
 0x171   :  { %19317 = vst [vmem:[#allocation48_spill] sm:$0xff] %v9952_v42  ;;  %v7713_v16 = vunpack.i.l.bf16 %v9952_v42  ;;  %7441 = vmatmul.mubr.msk.f32.gmra.mrb[22].mxu0 %vm1122_vm3, %v9916_v52  ;;  %19319 = vst [vmem:[#allocation50_spill] sm:$0xff] %v9974_v58  ;;  %v7800_v29 = vpack.i.bf16 %v9974_v58, %v19322_v33  ;;  %v730_v33 = vrot.slane %v9757_v53, 1  ;;  %v19348_v42 = vrot.slane %v9789_v18, 3 }
 0x172   :  { %7443 = vmatprep.mubr.msk.f32.mxu0 %vm1122_vm3, %v9955_v47  ;;  %19323 = vst [vmem:[#allocation53_spill] sm:$0xff] %v9991_v20  ;;  %19324 = vst [vmem:[#allocation54_spill] sm:$0xff] %v10001_v50 }
 0x173   :  { %7766 = vrot.lane.b32.xlu0 %v7765_v32, %s9472_s16  ;;  %v9977_v5 = vsel %vm148_vm1, 0.0, %v7713_v16  ;;  %v679_v60 = vsel %vm148_vm1, %v7713_v16, 0.0  ;;  %v734_v16 = vrot.slane %v9795_v21, 1  ;;  %v7805_v21 = vpack.i.bf16 %v10001_v50, %v9991_v20 }
 0x174   :  { %19320 = vst [vmem:[#allocation51_spill] sm:$0xff] %v9977_v5  ;;  %v728_v32 = vrot.slane %v679_v60, 1  ;;  %v7720_v39 = vpack.i.bf16 %v9757_v53, %v9977_v5  ;;  %v727_v11 = vrot.slane %v9977_v5, 1  ;;  %v9996_v56 = vpop.permute.xlu1 %1677  ;;  %v818_v34 = vrot.slane %v679_v60, 2 }
 0x175   :  { %v10019_v54 = vsel %vm724_vm5, %v730_v33, %v731_v43 }
 0x176   :  { %7721 = vrot.lane.b32.xlu1 %v7720_v39, %s9469_s14  ;;  %v10006_v19 = vsel %vm724_vm5, %v727_v11, %v728_v32  ;;  %v10013_v39 = vsel %vm724_vm5, %v733_v15, %v734_v16  ;;  %19327 = vst [vmem:[#allocation57_spill] sm:$0xff] %v10019_v54  ;;  %v10031_v16 = vsel %vm1703_vm4, 0.0, %v9808_v38  ;;  %v10052_v38 = vrot.slane %v9961_v35, 3 }
 0x177   :  { %7776 = vrot.lane.b32.xlu0 %v7775_v27, %s9469_s14  ;;  %19325 = vst [vmem:[#allocation55_spill] sm:$0xff] %v10006_v19  ;;  %v7730_v45 = vpack.i.bf16 %v10006_v19, %v9891_v51  ;;  %19326 = vst [vmem:[#allocation56_spill] sm:$0xff] %v10013_v39  ;;  %v7815_v32 = vpack.i.bf16 %v10013_v39, %v10019_v54  ;;  %v638_v19 = vpop.permute.xlu0 %637  ;;  %v1913_v33 = vrot.slane %v10031_v16, 3  ;;  %v1838_v13 = vrot.slane %v10031_v16, 2 }
 0x178   :  { %v636_v11 = vpop.permute.xlu1 %635  ;;  %19329 = vst [vmem:[#allocation59_spill] sm:$0xff] %v10031_v16  ;;  %19332 = vst [vmem:[#allocation62_spill] sm:$0xff] %v10052_v38  ;;  %v7785_v54 = vpack.i.bf16 %v10031_v16, %v9781_v9  ;;  %v10122_v55 = vsel %vm148_vm1, 0.0, %v638_v19 }
 0x179   :  { %v10104_v9 = vsel %vm148_vm1, %v636_v11, 0.0  ;;  %19345 = vst [vmem:[#allocation75_spill] sm:$0xff] %v10122_v55  ;;  %v10126_v10 = vsel %vm148_vm1, 0.0, %v636_v11  ;;  %v1766_v11 = vrot.slane %v10031_v16, 1 }
 0x17a   :  { %7731 = vrot.lane.b32.xlu1 %v7730_v45, %s9472_s16  ;;  %v10036_v45 = vpack.i.bf16 %v9813_v41, %v9765_v61  ;;  %v10061_v41 = vsel %vm1904_vm6, %v1913_v33, %v10052_v38  ;;  %19341 = vst [vmem:[#allocation71_spill] sm:$0xff] %v10104_v9  ;;  %19346 = vst [vmem:[#allocation76_spill] sm:$0xff] %v10126_v10  ;;  %v844_v49 = vrot.slane %v10126_v10, 2 }
 0x17b   :  { %7801 = vrot.lane.b32.xlu0 %v7800_v29, %s9472_s16  ;;  %v817_v29 = vrot.slane %v9977_v5, 2  ;;  %19334 = vst [vmem:[#allocation64_spill] sm:$0xff] %v10061_v41 }
 0x17c   :  { %v10042_v43 = vpop.permute.xlu1 %1681 }
 0x17d   :  { %v10022_v60 = vsel %vm814_vm2, %v817_v29, %v818_v34  ;;  %v10040_v34 = vsel %vm1703_vm4, 0.0, %v9786_v14  ;;  %19331 = vst [vmem:[#allocation61_spill] sm:$0xff] %v10042_v43  ;;  %v10056_v14 = vrot.slane %v9983_v63, 3 }
 0x17e   :  { %19328 = vst [vmem:[#allocation58_spill] sm:$0xff] %v10022_v60  ;;  %v7735_v15 = vpack.i.bf16 %v10022_v60, %v9916_v52  ;;  %19330 = vst [vmem:[#allocation60_spill] sm:$0xff] %v10040_v34  ;;  %v1916_v61 = vrot.slane %v10040_v34, 3  ;;  %v7795_v12 = vpack.i.bf16 %v10040_v34, %v10031_v16  ;;  %v10101_v60 = vsel %vm1703_vm4, 0.0, %v9810_v40 }
 0x17f   :  { %7806 = vrot.lane.b32.xlu0 %v7805_v21, %s9470_s15  ;;  %v10047_v21 = vpop.permute.xlu0 %1675  ;;  %19333 = vst [vmem:[#allocation63_spill] sm:$0xff] %v10056_v14  ;;  %19340 = vst [vmem:[#allocation70_spill] sm:$0xff] %v10101_v60  ;;  %v1769_v18 = vrot.slane %v10040_v34, 1 }
 0x180   :  { %7736 = vrot.lane.b32.xlu1 %v7735_v15, %s9470_s15  ;;  %v10066_v29 = vsel %vm1904_vm6, %v1916_v61, %v10056_v14 }
 0x181   :  { %19335 = vst [vmem:[#allocation65_spill] sm:$0xff] %v10066_v29  ;;  %v10070_v15 = vpack.i.bf16 %v10066_v29, %v10061_v41  ;;  %v10095_v41 = vsel %vm148_vm1, %v638_v19, 0.0 }
 0x182   :  { %19339 = vst [vmem:[#allocation69_spill] sm:$0xff] %v10095_v41  ;;  %v848_v36 = vrot.slane %v10095_v41, 2 }
 0x183   :  { %7816 = vrot.lane.b32.xlu0 %v7815_v32, %s9472_s16  ;;  %v642_v39 = vpop.permute.xlu0 %641 }
 0x184   :  { %7771 = vrot.lane.b32.xlu1 %v9888_v48, %s9472_s16  ;;  %v640_v48 = vpop.permute.xlu1 %639  ;;  %v10117_v29 = vsel %vm148_vm1, %v642_v39, 0.0  ;;  %v10136_v37 = vsel %vm148_vm1, 0.0, %v642_v39  ;;  %v10153_v39 = vrot.slane %v10113_v30, 3 }
 0x185   :  { %19344 = vst [vmem:[#allocation74_spill] sm:$0xff] %v10117_v29  ;;  %v10130_v53 = vsel %vm148_vm1, %v640_v48, 0.0  ;;  %19349 = vst [vmem:[#allocation78_spill] sm:$0xff] %v10136_v37  ;;  %v854_v19 = vrot.slane %v10117_v29, 2 }
 0x186   :  { %19347 = vst [vmem:[#allocation77_spill] sm:$0xff] %v10130_v53  ;;  %19353 = vst [vmem:[#allocation82_spill] sm:$0xff] %v10153_v39 }
 0x187   :  { %7821 = vrot.lane.b32.xlu0 %v10036_v45, %s9470_s15  ;;  %v10089_v61 = vpop.permute.xlu0 %1679 }
 0x188   :  { %7781 = vrot.lane.b32.xlu1 %v7775_v27, %s9470_s15  ;;  %v10079_v27 = vpack.i.bf16 %v9848_v62, %v9854_v6  ;;  %v10085_v33 = vpop.permute.xlu1 %1685  ;;  %19338 = vst [vmem:[#allocation68_spill] sm:$0xff] %v10089_v61  ;;  %v847_v61 = vrot.slane %v10122_v55, 2 }
 0x189   :  { %19337 = vst [vmem:[#allocation67_spill] sm:$0xff] %v10085_v33  ;;  %v1841_v33 = vrot.slane %v10040_v34, 2 }
 0x18b   :  { %7831 = vrot.lane.b32.xlu0 %v7815_v32, %s9469_s14  ;;  %v10083_v32 = vsel %vm1703_vm4, 0.0, %v9864_v25  ;;  %v845_v25 = vrot.slane %v10104_v9, 2  ;;  %v646_v26 = vpop.permute.xlu0 %645 }
 0x18c   :  { %7786 = vrot.lane.b32.xlu1 %v7785_v54, %s9472_s16  ;;  %19336 = vst [vmem:[#allocation66_spill] sm:$0xff] %v10083_v32  ;;  %v7890_v5 = vpack.i.bf16 %v10083_v32, %v10040_v34  ;;  %v10140_v41 = vsel %vm148_vm1, 0.0, %v646_v26  ;;  %v7900_v29 = vpack.i.bf16 %v10101_v60, %v10083_v32 }
 0x18d   :  { %19350 = vst [vmem:[#allocation79_spill] sm:$0xff] %v10140_v41  ;;  %v981_v43 = vrot.slane %v10140_v41, 2  ;;  %v1772_v41 = vrot.slane %v10083_v32, 1 }
 0x18f   :  { %7871 = vrot.lane.b32.xlu0 %v10070_v15, %s9472_s16 }
 0x190   :  { %7791 = vrot.lane.b32.xlu1 %v7785_v54, %s9470_s15  ;;  %v10109_v54 = vsel %vm1703_vm4, %v9810_v40, 0.0  ;;  %v644_v40 = vpop.permute.xlu1 %643 }
 0x191   :  { %19342 = vst [vmem:[#allocation72_spill] sm:$0xff] %v10109_v54  ;;  %v10145_v9 = vsel %vm148_vm1, %v644_v40, 0.0  ;;  %v10167_v4 = vsel %vm148_vm1, 0.0, %v644_v40  ;;  %v7915_v40 = vpack.i.bf16 %v10153_v39, %v10056_v14 }
 0x192   :  { %19351 = vst [vmem:[#allocation80_spill] sm:$0xff] %v10145_v9  ;;  %19356 = vst [vmem:[#allocation85_spill] sm:$0xff] %v10167_v4 }
 0x193   :  { %7886 = vrot.lane.b32.xlu0 %v10079_v27, %s9470_s15 }
 0x194   :  { %7796 = vrot.lane.b32.xlu1 %v7795_v12, %s9469_s14  ;;  %v7810_v12 = vpack.i.bf16 %v10052_v38, %v19348_v42  ;;  %v10150_v42 = vrot.slane %v9983_v63, 1  ;;  %v10156_v38 = vsel %vm148_vm1, 0.0, %v640_v48  ;;  %v857_v48 = vrot.slane %v10145_v9, 2 }
 0x195   :  { %19354 = vst [vmem:[#allocation83_spill] sm:$0xff] %v10156_v38  ;;  %v10222_v9 = vrot.slane %v10109_v54, 1 }
 0x196   :  { %19352 = vst [vmem:[#allocation81_spill] sm:$0xff] %v10150_v42 }
 0x197   :  { %7891 = vrot.lane.b32.xlu0 %v7890_v5, %s9472_s16  ;;  %19361 = vst [vmem:[#allocation90_spill] sm:$0xff] %v10222_v9 }
 0x198   :  { %7811 = vrot.lane.b32.xlu1 %v7810_v12, %s9469_s14  ;;  %v10163_v12 = vsel %vm148_vm1, %v646_v26, 0.0  ;;  %v10180_v26 = vsel %vm724_vm5, %v1769_v18, %v10150_v42  ;;  %v10197_v18 = vsel %vm814_vm2, %v847_v61, %v848_v36  ;;  %v10213_v36 = vsel %vm814_vm2, %v1841_v33, %v10001_v50 }
 0x199   :  { %19355 = vst [vmem:[#allocation84_spill] sm:$0xff] %v10163_v12  ;;  %19359 = vst [vmem:[#allocation88_spill] sm:$0xff] %v10213_v36 }
 0x19b   :  { %7896 = vrot.lane.b32.xlu0 %v7890_v5, %s9470_s15  ;;  %v851_v5 = vrot.slane %v10130_v53, 2  ;;  %v1768_v53 = vsel %vm724_vm5, %v1766_v11, %v9974_v58  ;;  %v10190_v11 = vsel %vm814_vm2, %v1838_v13, %v9991_v20  ;;  %v982_v58 = vrot.slane %v10163_v12, 2 }
 0x19c   :  { %7826 = vrot.lane.b32.xlu1 %v10036_v45, %s9472_s16  ;;  %19357 = vst [vmem:[#allocation86_spill] sm:$0xff] %v10190_v11  ;;  %v850_v45 = vrot.slane %v10156_v38, 2  ;;  %v7835_v14 = vpack.i.bf16 %v10180_v26, %v1768_v53  ;;  %v856_v20 = vrot.slane %v10167_v4, 2  ;;  %v1775_v13 = vrot.slane %v10101_v60, 1  ;;  %v52_v4 = vld [vmem:[%s18324_s1] sm:$0xff] }
 0x19d   :  { %v7840_v33 = vpack.i.bf16 %v10213_v36, %v10190_v11  ;;  %v10246_v12 = vrot.slane %v10113_v30, 2 }
 0x19e   :  { %v10216_v61 = vsel %vm814_vm2, %v850_v45, %v851_v5  ;;  %v10233_v5 = vpack.i.bf16 %v9879_v44, %v9804_v31  ;;  %v10240_v45 = vsel %vm814_vm2, %v856_v20, %v857_v48  ;;  %v10255_v20 = vsel %vm814_vm2, %v981_v43, %v982_v58 }
 0x19f   :  { %7901 = vrot.lane.b32.xlu0 %v7900_v29, %s9469_s14  ;;  %v10186_v29 = vsel %vm814_vm2, %v844_v49, %v845_v25  ;;  %v10202_v49 = vrot.slane %v10113_v30, 1  ;;  %v853_v25 = vrot.slane %v10136_v37, 2  ;;  %19360 = vst [vmem:[#allocation89_spill] sm:$0xff] %v10216_v61  ;;  %19363 = vst [vmem:[#allocation92_spill] sm:$0xff] %v10240_v45  ;;  %v10260_v44 = vsel %vm724_vm5, %v1775_v13, %v10222_v9 }
 0x1a0   :  { %7444 = vmatmul.mubr.msk.f32.gmra.mrb[24].mxu0 %vm1122_vm3, %v10186_v29  ;;  %7836 = vrot.lane.b32.xlu1 %v7835_v14, %s9472_s16  ;;  %19364 = vst [vmem:[#allocation93_spill] sm:$0xff] %v10246_v12  ;;  %19365 = vst [vmem:[#allocation94_spill] sm:$0xff] %v10255_v20  ;;  %v10264_v48 = vrot.slane %v10109_v54, 2  ;;  %v19367_v14 = vrot.slane %v9901_v17, 1  ;;  %v19368_v31 = vrot.slane %v9898_v59, 1  ;;  %v1919_v13 = vrot.slane %v10083_v32, 3 }
 0x1a1   :  { %19358 = vst [vmem:[#allocation87_spill] sm:$0xff] %v10202_v49  ;;  %7446 = vmatprep.mubr.msk.f32.mxu0 %vm1122_vm3, %v10197_v18 }
 0x1a2   :  { %19366 = vst [vmem:[#allocation95_spill] sm:$0xff] %v10264_v48 }
 0x1a3   :  { %7916 = vrot.lane.b32.xlu0 %v7915_v40, %s9469_s14  ;;  %v10227_v40 = vsel %vm814_vm2, %v853_v25, %v854_v19  ;;  %v1774_v19 = vsel %vm724_vm5, %v1772_v41, %v10202_v49  ;;  %v1844_v25 = vrot.slane %v10083_v32, 2  ;;  %v1847_v41 = vrot.slane %v10101_v60, 2 }
 0x1a4   :  { %19362 = vst [vmem:[#allocation91_spill] sm:$0xff] %v10227_v40  ;;  %7447 = vmatmul.mubr.msk.f32.gmra.mrb[26].mxu0 %vm1122_vm3, %v10216_v61  ;;  %7841 = vrot.lane.b32.xlu1 %v7840_v33, %s9470_s15  ;;  %v7940_v58 = vpack.i.bf16 %v10260_v44, %v1774_v19  ;;  %v1922_v33 = vrot.slane %v10101_v60, 3 }
 0x1a5   :  { %7449 = vmatprep.mubr.msk.f32.mxu0 %vm1122_vm3, %v10227_v40  ;;  %v10271_v40 = vsel %vm724_vm5, %v19368_v31, %v19367_v14  ;;  %v10278_v43 = vsel %vm814_vm2, %v1844_v25, %v10246_v12  ;;  %v10288_v17 = vsel %vm814_vm2, %v1847_v41, %v10264_v48  ;;  %v10292_v14 = vrot.slane %v10109_v54, 3 }
 0x1a6   :  { %19369 = vst [vmem:[#allocation96_spill] sm:$0xff] %v10271_v40  ;;  %19370 = vst [vmem:[#allocation97_spill] sm:$0xff] %v10278_v43  ;;  %v7945_v25 = vpack.i.bf16 %v10288_v17, %v10278_v43  ;;  %v7850_v31 = vpack.i.bf16 %v1768_v53, %v9829_v46  ;;  %v1991_v41 = vrot.slane %v10031_v16, 4  ;;  %v1994_v53 = vrot.slane %v10040_v34, 4 }
 0x1a7   :  { %7931 = vrot.lane.b32.xlu0 %v10233_v5, %s9472_s16  ;;  %19371 = vst [vmem:[#allocation98_spill] sm:$0xff] %v10288_v17  ;;  %19372 = vst [vmem:[#allocation99_spill] sm:$0xff] %v10292_v14  ;;  %v1995_v46 = vrot.slane %v9983_v63, 4 }
 0x1a8   :  { %7450 = vmatmul.mubr.msk.f32.gmra.mrb[28].mxu0 %vm1122_vm3, %v10240_v45  ;;  %7846 = vrot.lane.b32.xlu1 %v10070_v15, %s9469_s14  ;;  %v10301_v15 = vsel %vm1904_vm6, %v1919_v13, %v10153_v39  ;;  %v7855_v13 = vpack.i.bf16 %v10190_v11, %v9841_v57  ;;  %v1998_v11 = vrot.slane %v10113_v30, 4 }
 0x1a9   :  { %7452 = vmatprep.mubr.msk.f32.mxu0 %vm1122_vm3, %v10255_v20  ;;  %19373 = vst [vmem:[#allocation100_spill] sm:$0xff] %v10301_v15  ;;  %v10309_v20 = vsel %vm1904_vm6, %v1922_v33, %v10292_v14  ;;  %v10326_v33 = vsel %vm1982_vm7, %v1994_v53, %v1995_v46  ;;  %v7960_v53 = vpack.i.bf16 %v10278_v43, %v10213_v36  ;;  %v19409_v36 = vld [vmem:[#allocation45_spill] sm:$0xff] }
 0x1aa   :  { %19374 = vst [vmem:[#allocation101_spill] sm:$0xff] %v10309_v20  ;;  %v10313_v50 = vpack.i.bf16 %v10309_v20, %v10301_v15  ;;  %19376 = vst [vmem:[#allocation103_spill] sm:$0xff] %v10326_v33  ;;  %v7955_v20 = vpack.i.bf16 %v1774_v19, %v10180_v26  ;;  %v1997_v15 = vrot.slane %v10083_v32, 4  ;;  %v19423_v32 = vld [vmem:[#allocation42_spill] sm:$0xff] }
 0x1ab   :  { %7941 = vrot.lane.b32.xlu0 %v7940_v58, %s9472_s16  ;;  %v1992_v58 = vrot.slane %v9961_v35, 4 }
 0x1ac   :  { %7453 = vmatmul.mubr.msk.f32.gmra.mrb[30].mxu0 %vm1122_vm3, %v9916_v52  ;;  %7851 = vrot.lane.b32.xlu1 %v7850_v31, %s9470_s15  ;;  %v10340_v26 = vsel %vm1982_vm7, %v1997_v15, %v1998_v11  ;;  %v7905_v15 = vpack.i.bf16 %v10202_v49, %v10150_v42 }
 0x1ad   :  { %19377 = vst [vmem:[#allocation104_spill] sm:$0xff] %v10340_v26  ;;  %v7980_v11 = vpack.i.bf16 %v10340_v26, %v10326_v33 }
 0x1af   :  { %7946 = vrot.lane.b32.xlu0 %v7945_v25, %s9470_s15  ;;  %v10322_v25 = vsel %vm1982_vm7, %v1991_v41, %v1992_v58  ;;  %v2000_v41 = vrot.slane %v10101_v60, 4  ;;  %v2001_v58 = vrot.slane %v10109_v54, 4  ;;  %v19417_v54 = vmov 0.0  }
 0x1b0   :  { %19375 = vst [vmem:[#allocation102_spill] sm:$0xff] %v10322_v25  ;;  %7856 = vrot.lane.b32.xlu1 %v7855_v13, %s9469_s14  ;;  %v7860_v39 = vpack.i.bf16 %v10326_v33, %v10322_v25  ;;  %v7875_v46 = vpack.i.bf16 %v10322_v25, %v9945_v1  ;;  %v739_v13 = vrot.slane %v9854_v6, 1  ;;  %v19395_v6 = vld [vmem:[#allocation68_spill] sm:$0xff]  ;;  %v10515_v61 = vrot.slane %v19417_v54, 7 }
 0x1b1   :  { %v10345_v19 = vsel %vm1982_vm7, %v2000_v41, %v2001_v58  ;;  %v740_v41 = vrot.slane %v9857_v8, 1  ;;  %v10370_v58 = vpop.permute.xlu0 %1683  ;;  %v746_v8 = vrot.slane %v9907_v23, 1  ;;  %v8045_v34 = vpack.i.bf16 %v19423_v32, %v19417_v54 }
 0x1b2   :  { %19378 = vst [vmem:[#allocation105_spill] sm:$0xff] %v10345_v19  ;;  %19380 = vst [vmem:[#allocation107_spill] sm:$0xff] %v10370_v58  ;;  %v10499_v63 = vsel %vm1703_vm4, %v10370_v58, 0.0 }
 0x1b3   :  { %7951 = vrot.lane.b32.xlu0 %v10313_v50, %s9469_s14  ;;  %19414 = vst [vmem:[#allocation131_spill] sm:$0xff] %v10499_v63  ;;  %19418 = vst [vmem:[#allocation134_spill] sm:$0xff] %v10515_v61 }
 0x1b4   :  { %7861 = vrot.lane.b32.xlu1 %v7860_v39, %s9472_s16  ;;  %v7965_v39 = vpack.i.bf16 %v10345_v19, %v10340_v26  ;;  %v743_v26 = vrot.slane %v9851_v0, 1 }
 0x1b7   :  { %7956 = vrot.lane.b32.xlu0 %v7955_v20, %s9470_s15 }
 0x1b8   :  { %7866 = vrot.lane.b32.xlu1 %v7850_v31, %s9469_s14  ;;  %v10360_v31 = vsel %vm1703_vm4, %v9866_v28, 0.0 }
 0x1b9   :  { %19379 = vst [vmem:[#allocation106_spill] sm:$0xff] %v10360_v31 }
 0x1bb   :  { %7961 = vrot.lane.b32.xlu0 %v7960_v53, %s9469_s14  ;;  %v10374_v53 = vpack.i.bf16 %v9898_v59, %v9904_v22  ;;  %v742_v59 = vrot.slane %v9848_v62, 1 }
 0x1bc   :  { %7876 = vrot.lane.b32.xlu1 %v7875_v46, %s9470_s15  ;;  %v745_v46 = vrot.slane %v9904_v22, 1  ;;  %v10391_v22 = vsel %vm1703_vm4, %v10047_v21, 0.0 }
 0x1bd   :  { %19382 = vst [vmem:[#allocation109_spill] sm:$0xff] %v10391_v22 }
 0x1be   :  { %v10410_v62 = vsel %vm724_vm5, %v745_v46, %v746_v8  ;;  %v10432_v8 = vsel %vm1703_vm4, %v9996_v56, 0.0 }
 0x1bf   :  { %7966 = vrot.lane.b32.xlu0 %v7965_v39, %s9472_s16  ;;  %v2310_v39 = vrot.slane %v10360_v31, 1  ;;  %19388 = vst [vmem:[#allocation114_spill] sm:$0xff] %v10410_v62  ;;  %19393 = vst [vmem:[#allocation119_spill] sm:$0xff] %v10432_v8  ;;  %v10459_v33 = vrot.slane %v10432_v8, 1 }
 0x1c0   :  { %7881 = vrot.lane.b32.xlu1 %v10079_v27, %s9469_s14  ;;  %v736_v27 = vrot.slane %v9768_v2, 1  ;;  %v10440_v2 = vsel %vm1703_vm4, %v19395_v6, 0.0 }
 0x1c1   :  { %v10400_v43 = vpack.i.bf16 %v9891_v51, %v2310_v39  ;;  %19396 = vst [vmem:[#allocation121_spill] sm:$0xff] %v10440_v2  ;;  %19402 = vst [vmem:[#allocation124_spill] sm:$0xff] %v10459_v33  ;;  %v10545_v16 = vrot.slane %v10440_v2, 1 }
 0x1c3   :  { %7971 = vrot.lane.b32.xlu0 %v7955_v20, %s9469_s14  ;;  %v737_v20 = vrot.slane %v9771_v3, 1  ;;  %v10385_v3 = vsel %vm724_vm5, %v739_v13, %v740_v41  ;;  %19385 = vst [vmem:[#allocation112_spill] sm:$0xff] %v10400_v43  ;;  %v19386_v13 = vunpack.i.h.bf16 %v9969_v7  ;;  %19425 = vst [vmem:[#allocation139_spill] sm:$0xff] %v10545_v16 }
 0x1c4   :  { %7906 = vrot.lane.b32.xlu1 %v7905_v15, %s9472_s16  ;;  %v7910_v15 = vpack.i.bf16 %v10264_v48, %v10246_v12  ;;  %19381 = vst [vmem:[#allocation108_spill] sm:$0xff] %v10385_v3  ;;  %v19411_v48 = vld [vmem:[#allocation61_spill] sm:$0xff] }
 0x1c5   :  { %v10395_v23 = vsel %vm724_vm5, %v736_v27, %v737_v20  ;;  %v10405_v41 = vsel %vm1703_vm4, %v19386_v13, 0.0  ;;  %v10419_v27 = vsel %vm1703_vm4, 0.0, %v9866_v28  ;;  %v10423_v20 = vsel %vm724_vm5, %v742_v59, %v743_v26  ;;  %v19397_v26 = vld [vmem:[#allocation67_spill] sm:$0xff] }
 0x1c6   :  { %19383 = vst [vmem:[#allocation110_spill] sm:$0xff] %v10395_v23  ;;  %19387 = vst [vmem:[#allocation113_spill] sm:$0xff] %v10405_v41  ;;  %v7920_v0 = vpack.i.bf16 %v10385_v3, %v10395_v23  ;;  %v10427_v13 = vsel %vm1703_vm4, %v9947_v24, 0.0  ;;  %v8030_v28 = vpack.i.bf16 %v10410_v62, %v10423_v20  ;;  %v10444_v59 = vsel %vm1703_vm4, %v19397_v26, 0.0 }
 0x1c7   :  { %7981 = vrot.lane.b32.xlu0 %v7980_v11, %s9470_s15  ;;  %19390 = vst [vmem:[#allocation116_spill] sm:$0xff] %v10419_v27  ;;  %19391 = vst [vmem:[#allocation117_spill] sm:$0xff] %v10423_v20  ;;  %v2309_v46 = vrot.slane %v10419_v27, 1  ;;  %v19399_v3 = vrot.slane %v10405_v41, 3  ;;  %v10455_v62 = vsel %vm1703_vm4, 0.0, %v9947_v24  ;;  %v10463_v25 = vsel %vm1703_vm4, 0.0, %v19397_v26 }
 0x1c8   :  { %7911 = vrot.lane.b32.xlu1 %v7910_v15, %s9470_s15  ;;  %v10413_v15 = vrot.slane %v10391_v22, 3  ;;  %19392 = vst [vmem:[#allocation118_spill] sm:$0xff] %v10427_v13  ;;  %19398 = vst [vmem:[#allocation67_spill] sm:$0xff] %v10444_v59  ;;  %v10473_v24 = vrot.slane %v10432_v8, 2  ;;  %v10476_v20 = vrot.slane %v10432_v8, 3  ;;  %v19408_v26 = vld [vmem:[#allocation38_spill] sm:$0xff] }
 0x1c9   :  { %19401 = vst [vmem:[#allocation123_spill] sm:$0xff] %v10455_v62  ;;  %19403 = vst [vmem:[#allocation125_spill] sm:$0xff] %v10463_v25  ;;  %v10485_v57 = vpack.i.bf16 %v19409_v36, %v19408_v26  ;;  %v10492_v49 = vsel %vm1703_vm4, %v19411_v48, 0.0  ;;  %v10495_v30 = vrot.slane %v10444_v59, 1  ;;  %v10504_v36 = vsel %vm724_vm5, %v2309_v46, %v2310_v39 }
 0x1ca   :  { %19389 = vst [vmem:[#allocation115_spill] sm:$0xff] %v10413_v15  ;;  %v10451_v23 = vpack.i.bf16 %v10413_v15, %v19399_v3  ;;  %v10470_v3 = vld [vmem:[%s18324_s1 + $0x8] sm:$0xff]  ;;  %19404 = vst [vmem:[#allocation126_spill] sm:$0xff] %v10473_v24  ;;  %v10507_v26 = vrot.slane %v10440_v2, 2  ;;  %v2312_v12 = vrot.slane %v10463_v25, 1  ;;  %v19419_v35 = vrot.slane %v10427_v13, 1 }
 0x1cb   :  { %7986 = vrot.lane.b32.xlu0 %v10374_v53, %s9469_s14  ;;  %19405 = vst [vmem:[#allocation127_spill] sm:$0xff] %v10476_v20  ;;  %19412 = vst [vmem:[#allocation45_spill] sm:$0xff] %v10492_v49  ;;  %v117_v42 = vrot.slane %v10470_v3, 7  ;;  %v10524_v46 = vrot.slane %v10492_v49, 1  ;;  %v10539_v58 = vrot.slane %v10492_v49, 2  ;;  %v10815_v20 = vld [vmem:[%s18325_s2 + $0x28] sm:$0xff] }
 0x1cc   :  { %v10397_v11 = vpop.permute.xlu0 %7726  ;;  %7921 = vrot.lane.b32.xlu1 %v7920_v0, %s9472_s16  ;;  %19400 = vst [vmem:[#allocation122_spill] sm:$0xff] %v10451_v23  ;;  %v10479_v23 = vrot.slane %v10440_v2, 3  ;;  %19413 = vst [vmem:[#allocation130_spill] sm:$0xff] %v10495_v30  ;;  %v10521_v39 = vpack.i.bf16 %v10504_v36, %v19419_v35  ;;  %v2185_v35 = vrot.slane %v10455_v62, 3  ;;  %v10549_v45 = vsel %vm724_vm5, %v2312_v12, %v10495_v30 }
 0x1cd   :  { %19384 = vst [vmem:[#allocation111_spill] sm:$0xff] %v10397_v11  ;;  %19415 = vst [vmem:[#allocation132_spill] sm:$0xff] %v10507_v26  ;;  %v7728_v6 = vunpack.i.l.bf16 %v10397_v11  ;;  %v10560_v11 = vrot.slane %v10499_v63, 2  ;;  %v19429_v12 = vrot.slane %v10499_v63, 1  ;;  %v150_v2 = vsel %vm148_vm1, -inf, %v117_v42  ;;  %v9428_v42 = vld [vmem:[%s18323_s0 + $0x10] sm:$0xff] }
 0x1ce   :  { %19406 = vst [vmem:[#allocation128_spill] sm:$0xff] %v10479_v23  ;;  %19420 = vst [vmem:[#allocation135_spill] sm:$0xff] %v10521_v39 }
 0x1cf   :  { %8011 = vrot.lane.b32.xlu0 %v10400_v43, %s9472_s16  ;;  %19421 = vst [vmem:[#allocation136_spill] sm:$0xff] %v10524_v46  ;;  %19424 = vst [vmem:[#allocation138_spill] sm:$0xff] %v10539_v58  ;;  %v10568_v30 = vpack.i.bf16 %v10549_v45, %v19429_v12  ;;  %v116_v12 = vrot.slane %v52_v4, 7 }
 0x1d0   :  { %7926 = vrot.lane.b32.xlu1 %v10233_v5, %s9470_s15  ;;  %v10488_v5 = vrot.slane %v10391_v22, 1  ;;  %19426 = vst [vmem:[#allocation140_spill] sm:$0xff] %v10549_v45  ;;  %19428 = vst [vmem:[#allocation142_spill] sm:$0xff] %v10560_v11 }
 0x1d1   :  { %v10434_v43 = vpop.permute.xlu0 %7741  ;;  %19430 = vst [vmem:[#allocation143_spill] sm:$0xff] %v10568_v30  ;;  %v10586_v30 = vsel %vm1122_vm3, %v10515_v61, %v7728_v6 }
 0x1d2   :  { %19394 = vst [vmem:[#allocation120_spill] sm:$0xff] %v10434_v43  ;;  %19410 = vst [vmem:[#allocation38_spill] sm:$0xff] %v10488_v5 }
 0x1d3   :  { %8031 = vrot.lane.b32.xlu0 %v8030_v28, %s9472_s16  ;;  %19434 = vst [vmem:[#allocation147_spill] sm:$0xff] %v10586_v30 }
 0x1d4   :  { %7936 = vrot.lane.b32.xlu1 %v7920_v0, %s9469_s14  ;;  %v54_v0 = vld [vmem:[%s18324_s1 + $0x10] sm:$0xff] }
 0x1d5   :  { %v10481_v1 = vpop.permute.xlu0 %7746  ;;  %v118_v23 = vrot.slane %v54_v0, 7  ;;  %v231_v11 = vmax.f32 %v9428_v42, %v54_v0 }
 0x1d6   :  { %19407 = vst [vmem:[#allocation129_spill] sm:$0xff] %v10481_v1  ;;  %v10512_v1 = vrot.slane %v10427_v13, 3 }
 0x1d7   :  { %8036 = vrot.lane.b32.xlu0 %v10485_v57, %s9470_s15 }
 0x1d8   :  { %19416 = vst [vmem:[#allocation133_spill] sm:$0xff] %v10512_v1  ;;  %7976 = vrot.lane.b32.xlu1 %v10313_v50, %s9472_s16  ;;  %v10577_v8 = vsel %vm1904_vm6, %v2185_v35, %v10512_v1  ;;  %v10580_v50 = vrot.slane %v19417_v54, 4  ;;  %v9427_v35 = vld [vmem:[%s18323_s0 + $0x8] sm:$0xff]  ;;  %v19436_v1 = vunpack.i.h.bf16 %v9969_v7 }
 0x1d9   :  { %v10526_v43 = vpop.permute.xlu0 %7751  ;;  %19432 = vst [vmem:[#allocation145_spill] sm:$0xff] %v10577_v8 }
 0x1da   :  { %19422 = vst [vmem:[#allocation137_spill] sm:$0xff] %v10526_v43  ;;  %v10557_v43 = vrot.slane %v10360_v31, 3  ;;  %19433 = vst [vmem:[#allocation146_spill] sm:$0xff] %v10580_v50  ;;  %v2575_v0 = vsel %vm1122_vm3, %v10580_v50, %v7728_v6  ;;  %v149_v50 = vsel %vm148_vm1, -inf, %v116_v12  ;;  %v10666_v12 = vld [vmem:[%s18326_s3] sm:$0xff] }
 0x1db   :  { %8046 = vrot.lane.b32.xlu0 %v8045_v34, %s9470_s15  ;;  %v2385_v34 = vrot.slane %v10419_v27, 3 }
 0x1dc   :  { %19427 = vst [vmem:[#allocation141_spill] sm:$0xff] %v10557_v43  ;;  %7991 = vrot.lane.b32.xlu1 %v10374_v53, %s9470_s15 }
 0x1dd   :  { %v10570_v26 = vpop.permute.xlu0 %7756  ;;  %v10600_v61 = vsel %vm1904_vm6, %v2385_v34, %v10557_v43  ;;  %v55_v34 = vld [vmem:[%s18324_s1 + $0x18] sm:$0xff]  ;;  %v9429_v43 = vld [vmem:[%s18323_s0] sm:$0xff] }
 0x1de   :  { %19431 = vst [vmem:[#allocation144_spill] sm:$0xff] %v10570_v26  ;;  %v7758_v49 = vunpack.i.l.bf16 %v10570_v26  ;;  %v230_v26 = vmax.f32 %v9427_v35, %v10470_v3  ;;  %19435 = vst [vmem:[#allocation148_spill] sm:$0xff] %v10600_v61  ;;  %v10609_v3 = vsel %vm1703_vm4, 0.0, %v19436_v1  ;;  %v8070_v35 = vpack.i.bf16 %v10600_v61, %v10577_v8 }
 0x1df   :  { %8051 = vrot.lane.b32.xlu0 %v8030_v28, %s9469_s14  ;;  %v151_v28 = vsel %vm148_vm1, -inf, %v118_v23  ;;  %19437 = vst [vmem:[#allocation149_spill] sm:$0xff] %v10609_v3  ;;  %v7995_v23 = vpack.i.bf16 %v10455_v62, %v10101_v60  ;;  %v2083_v1 = vrot.slane %v10455_v62, 1  ;;  %v229_v61 = vmax.f32 %v9429_v43, %v52_v4 }
 0x1e0   :  { %v3138_v63 = vsel %vm1138_vm8, %v10586_v30, %v7758_v49  ;;  %v2590_v42 = vsel %vm1138_vm8, %v2575_v0, %v7758_v49  ;;  %v246_v45 = vmax.f32 %v230_v26, %v150_v2  ;;  %v69_v49 = vld [vmem:[%s18325_s2 + $0x8] sm:$0xff]  ;;  %v119_v0 = vrot.slane %v55_v34, 7  ;;  %v56_v2 = vld [vmem:[%s18324_s1 + $0x20] sm:$0xff] }
 0x1e1   :  { %v10611_v53 = vpop.permute.xlu0 %7761  ;;  %7996 = vrot.lane.b32.xlu1 %v7995_v23, %s9472_s16  ;;  %v8080_v4 = vpack.i.bf16 %v10609_v3, %v19417_v54  ;;  %v10660_v26 = vrot.slane %v10427_v13, 2  ;;  %v120_v46 = vrot.slane %v56_v2, 7 }
 0x1e2   :  { %19438 = vst [vmem:[#allocation150_spill] sm:$0xff] %v10611_v53  ;;  %v7763_v30 = vunpack.i.l.bf16 %v10611_v53 }
 0x1e3   :  { %8071 = vrot.lane.b32.xlu0 %v8070_v35, %s9472_s16  ;;  %v247_v35 = vmax.f32 %v231_v11, %v151_v28  ;;  %v2134_v11 = vrot.slane %v10455_v62, 2  ;;  %19443 = vst [vmem:[#allocation154_spill] sm:$0xff] %v10660_v26  ;;  %v245_v28 = vmax.f32 %v229_v61, %v149_v50  ;;  %v85_v50 = vld [vmem:[%s18326_s3 + $0x8] sm:$0xff] }
 0x1e4   :  { %v10631_v53 = vsel %vm1154_vm9, %v3138_v63, %v7763_v30  ;;  %v10634_v6 = vsel %vm1154_vm9, %v2590_v42, %v7763_v30  ;;  %v10648_v63 = vld [vmem:[%s18325_s2 + $0x10] sm:$0xff]  ;;  %v19442_v30 = vrot.slane %v10427_v13, 1  ;;  %v262_v42 = vmax.f32 %v246_v45, %v69_v49 }
 0x1e5   :  { %19439 = vst [vmem:[#allocation151_spill] sm:$0xff] %v10631_v53  ;;  %19440 = vst [vmem:[#allocation152_spill] sm:$0xff] %v10634_v6  ;;  %v10640_v58 = vpop.permute.xlu0 %7766  ;;  %3475 = vmatprep.mubr.f32.mxu0 %v10634_v6  ;;  %v9430_v6 = vld [vmem:[%s18323_s0 + $0x18] sm:$0xff]  ;;  %8001 = vrot.lane.b32.xlu1 %v7995_v23, %s9470_s15  ;;  %v263_v53 = vmax.f32 %v247_v35, %v10648_v63  ;;  %v10687_v23 = vrot.slane %v10444_v59, 3  ;;  %v10693_v35 = vsel %vm814_vm2, %v2134_v11, %v10660_v26 }
 0x1e6   :  { %19441 = vst [vmem:[#allocation153_spill] sm:$0xff] %v10640_v58  ;;  %v10656_v43 = vsel %vm724_vm5, %v2083_v1, %v19442_v30  ;;  %v232_v1 = vmax.f32 %v9430_v6, %v55_v34  ;;  %v2388_v30 = vrot.slane %v10463_v25, 3  ;;  %v152_v58 = vsel %vm148_vm1, -inf, %v119_v0  ;;  %19446 = vst [vmem:[#allocation157_spill] sm:$0xff] %v10693_v35  ;;  %v9431_v34 = vld [vmem:[%s18323_s0 + $0x20] sm:$0xff] }
 0x1e7   :  { %8081 = vrot.lane.b32.xlu0 %v8080_v4, %s9469_s14  ;;  %v68_v4 = vld [vmem:[%s18325_s2] sm:$0xff]  ;;  %v8085_v45 = vpack.i.bf16 %v10656_v43, %v10222_v9  ;;  %19445 = vst [vmem:[#allocation156_spill] sm:$0xff] %v10687_v23  ;;  %v8005_v6 = vpack.i.bf16 %v10419_v27, %v10455_v62  ;;  %v181_v0 = vrot.slane %v10666_v12, 7  ;;  %v233_v25 = vmax.f32 %v9431_v34, %v56_v2 }
 0x1e8   :  { %v248_v9 = vmax.f32 %v232_v1, %v152_v58  ;;  %v10703_v16 = vsel %vm1904_vm6, %v2388_v30, %v10687_v23  ;;  %v182_v60 = vrot.slane %v85_v50, 7  ;;  %v278_v11 = vmax.f32 %v263_v53, %v69_v49  ;;  %v10709_v58 = vpop.permute.xlu1 %7721  ;;  %v10718_v30 = vld [vmem:[%s18326_s3 + $0x10] sm:$0xff]  ;;  %v19452_v49 = vld [vmem:[#allocation48_spill] sm:$0xff] }
 0x1e9   :  { %v10678_v61 = vpop.permute.xlu0 %7776  ;;  %8006 = vrot.lane.b32.xlu1 %v8005_v6, %s9469_s14  ;;  %19447 = vst [vmem:[#allocation158_spill] sm:$0xff] %v10703_v16  ;;  %v153_v59 = vsel %vm148_vm1, -inf, %v120_v46  ;;  %19448 = vst [vmem:[#allocation159_spill] sm:$0xff] %v10709_v58  ;;  %v8090_v2 = vpack.i.bf16 %v10660_v26, %v10693_v35  ;;  %v19450_v53 = vunpack.i.l.bf16 %v9969_v7  ;;  %v7714_v34 = vunpack.i.h.bf16 %v19452_v49 }
 0x1ea   :  { %19444 = vst [vmem:[#allocation155_spill] sm:$0xff] %v10678_v61  ;;  %v277_v61 = vmax.f32 %v262_v42, %v68_v4  ;;  %v57_v42 = vld [vmem:[%s18324_s1 + $0x28] sm:$0xff]  ;;  %v8015_v6 = vpack.i.bf16 %v9891_v51, %v10271_v40  ;;  %v3351_v58 = vrot.slane %v10703_v16, 1  ;;  %v249_v49 = vmax.f32 %v233_v25, %v153_v59 }
 0x1eb   :  { %8086 = vrot.lane.b32.xlu0 %v8085_v45, %s9472_s16  ;;  %v261_v45 = vmax.f32 %v245_v28, %v68_v4  ;;  %v10723_v46 = vsel %vm1703_vm4, 0.0, %v19450_v53  ;;  %v2363_v28 = vrot.slane %v10419_v27, 2  ;;  %v2364_v4 = vrot.slane %v10360_v31, 2 }
 0x1ec   :  { %19451 = vst [vmem:[#allocation161_spill] sm:$0xff] %v10723_v46  ;;  %v3352_v53 = vrot.slane %v10687_v23, 1  ;;  %v292_v26 = vmax.f32 %v277_v61, %v85_v50  ;;  %v121_v48 = vrot.slane %v57_v42, 7  ;;  %v183_v40 = vrot.slane %v10718_v30, 7  ;;  %v10749_v59 = vpop.permute.xlu1 %7731  ;;  %v10754_v61 = vld [vmem:[%s18325_s2 + $0x20] sm:$0xff] }
 0x1ed   :  { %v10711_v1 = vpop.permute.xlu0 %7801  ;;  %8016 = vrot.lane.b32.xlu1 %v8015_v6, %s9469_s14  ;;  %v293_v51 = vmax.f32 %v278_v11, %v10718_v30  ;;  %v213_v23 = vsel %vm148_vm1, -inf, %v181_v0  ;;  %v214_v25 = vsel %vm148_vm1, -inf, %v182_v60  ;;  %19455 = vst [vmem:[#allocation163_spill] sm:$0xff] %v10749_v59  ;;  %v9432_v11 = vld [vmem:[%s18323_s0 + $0x28] sm:$0xff]  ;;  %v10763_v0 = vsel %vm148_vm1, %v7714_v34, 0.0 }
 0x1ee   :  { %19449 = vst [vmem:[#allocation160_spill] sm:$0xff] %v10711_v1  ;;  %v71_v1 = vld [vmem:[%s18325_s2 + $0x18] sm:$0xff]  ;;  %v10744_v37 = vsel %vm724_vm5, %v3351_v58, %v3352_v53  ;;  %v234_v6 = vmax.f32 %v9432_v11, %v57_v42  ;;  %v10760_v58 = vsel %vm148_vm1, 0.0, %v7714_v34  ;;  %v10767_v60 = vsel %vm814_vm2, %v2363_v28, %v2364_v4  ;;  %v10779_v11 = vld [vmem:[%s18326_s3 + $0x20] sm:$0xff] }
 0x1ef   :  { %8091 = vrot.lane.b32.xlu0 %v8090_v2, %s9470_s15  ;;  %v264_v54 = vmax.f32 %v248_v9, %v71_v1  ;;  %v8105_v2 = vpack.i.bf16 %v10609_v3, %v10723_v46  ;;  %19454 = vst [vmem:[#allocation162_spill] sm:$0xff] %v10744_v37  ;;  %v291_v9 = vmax.f32 %v261_v45, %v10666_v12  ;;  %19456 = vst [vmem:[#allocation164_spill] sm:$0xff] %v10760_v58  ;;  %v10773_v53 = vld [vmem:[%s18326_s3 + $0x18] sm:$0xff] }
 0x1f0   :  { %19457 = vst [vmem:[#allocation165_spill] sm:$0xff] %v10767_v60  ;;  %v307_v45 = vmax.f32 %v292_v26, %v10666_v12  ;;  %v265_v34 = vmax.f32 %v249_v49, %v10754_v61  ;;  %v10786_v26 = vsel %vm148_vm1, -inf, %v183_v40  ;;  %v308_v12 = vmax.f32 %v293_v51, %v85_v50 }
 0x1f1   :  { %v10739_v38 = vpop.permute.xlu0 %7806  ;;  %v279_v42 = vmax.f32 %v264_v54, %v10648_v63  ;;  %8021 = vrot.lane.b32.xlu1 %v10521_v39, %s9472_s16  ;;  %v58_v54 = vld [vmem:[%s18324_s1 + $0x30] sm:$0xff]  ;;  %v8110_v28 = vpack.i.bf16 %v10723_v46, %v10419_v27  ;;  %v838_v40 = vrot.slane %v10760_v58, 2  ;;  %v839_v51 = vrot.slane %v10763_v0, 2 }
 0x1f2   :  { %19453 = vst [vmem:[#allocation48_spill] sm:$0xff] %v10739_v38  ;;  %v10803_v50 = vpop.permute.xlu1 %7736  ;;  %v10806_v39 = vpack.i.bf16 %v2364_v4, %v10767_v60  ;;  %v321_v38 = vmax.f32 %v291_v9, %v213_v23  ;;  %v185_v59 = vrot.slane %v10779_v11, 7  ;;  %v280_v16 = vmax.f32 %v265_v34, %v71_v1  ;;  %v10820_v4 = vld [vmem:[%s18326_s3 + $0x28] sm:$0xff] }
 0x1f3   :  { %8106 = vrot.lane.b32.xlu0 %v8105_v2, %s9472_s16  ;;  %v154_v2 = vsel %vm148_vm1, -inf, %v121_v48  ;;  %v19459_v48 = vunpack.i.l.bf16 %v9969_v7  ;;  %19460 = vst [vmem:[#allocation167_spill] sm:$0xff] %v10803_v50  ;;  %v322_v7 = vmax.f32 %v307_v45, %v214_v25  ;;  %v122_v9 = vrot.slane %v58_v54, 7 }
 0x1f4   :  { %19461 = vst [vmem:[#allocation168_spill] sm:$0xff] %v10806_v39  ;;  %v250_v49 = vmax.f32 %v234_v6, %v154_v2  ;;  %v323_v6 = vmax.f32 %v308_v12, %v10786_v26  ;;  %v19463_v34 = vrot.slane %v10405_v41, 2  ;;  %v1778_v50 = vrot.slane %v10723_v46, 1 }
 0x1f5   :  { %v10791_v63 = vpop.permute.xlu0 %7816  ;;  %v10799_v37 = vsel %vm1703_vm4, %v19459_v48, 0.0  ;;  %v294_v48 = vmax.f32 %v279_v42, %v10773_v53  ;;  %8026 = vrot.lane.b32.xlu1 %v10806_v39, %s9470_s15  ;;  %v1781_v39 = vrot.slane %v10609_v3, 1  ;;  %v4057_v12 = vrot.slane %v321_v38, 6 }
 0x1f6   :  { %19458 = vst [vmem:[#allocation166_spill] sm:$0xff] %v10791_v63  ;;  %v184_v63 = vrot.slane %v10773_v53, 7  ;;  %v1779_v1 = vrot.slane %v10799_v37, 1  ;;  %v8115_v2 = vpack.i.bf16 %v19463_v34, %v9916_v52  ;;  %v10835_v60 = vpop.permute.xlu1 %7771  ;;  %v186_v45 = vrot.slane %v10820_v4, 7 }
 0x1f7   :  { %8111 = vrot.lane.b32.xlu0 %v8110_v28, %s9470_s15  ;;  %v10833_v28 = vsel %vm814_vm2, %v838_v40, %v839_v51  ;;  %19464 = vst [vmem:[#allocation170_spill] sm:$0xff] %v10835_v60  ;;  %v266_v15 = vmax.f32 %v250_v49, %v10815_v20  ;;  %v10845_v40 = vmax.f32 %v322_v7, %v213_v23  ;;  %v155_v60 = vsel %vm148_vm1, -inf, %v122_v9 }
 0x1f8   :  { %v309_v51 = vmax.f32 %v294_v48, %v10718_v30  ;;  %v295_v34 = vmax.f32 %v280_v16, %v10779_v11  ;;  %v338_v38 = vmax.f32 %v323_v6, %v214_v25  ;;  %v1851_v49 = vrot.slane %v10799_v37, 2 }
 0x1f9   :  { %v10827_v42 = vpop.permute.xlu0 %7821  ;;  %19465 = vst [vmem:[#allocation171_spill] sm:$0xff] %v10845_v40  ;;  %8041 = vrot.lane.b32.xlu1 %v10485_v57, %s9472_s16  ;;  %v8055_v52 = vpack.i.bf16 %v10656_v43, %v10260_v44  ;;  %v10862_v16 = vsel %vm724_vm5, %v1778_v50, %v1779_v1  ;;  %v19469_v30 = vrot.slane %v10405_v41, 1  ;;  %v1850_v25 = vrot.slane %v10723_v46, 2  ;;  %v63_v50 = vld [vmem:[%s18324_s1 + $0x58] sm:$0xff] }
 0x1fa   :  { %19462 = vst [vmem:[#allocation169_spill] sm:$0xff] %v10827_v42  ;;  %v9433_v42 = vld [vmem:[%s18323_s0 + $0x30] sm:$0xff]  ;;  %v10859_v7 = vpop.permute.xlu1 %7781  ;;  %v1853_v48 = vrot.slane %v10609_v3, 2  ;;  %v10872_v44 = vsel %vm148_vm1, -inf, %v184_v63  ;;  %v281_v43 = vmax.f32 %v266_v15, %v10754_v61  ;;  %v10879_v1 = vmax.f32 %v295_v34, %v10773_v53 }
 0x1fb   :  { %v235_v24 = vmax.f32 %v9433_v42, %v58_v54  ;;  %8116 = vrot.lane.b32.xlu0 %v8115_v2, %s9470_s15  ;;  %v19467_v42 = vld [vmem:[#allocation44_spill] sm:$0xff]  ;;  %v10867_v57 = vsel %vm724_vm5, %v1781_v39, %v19469_v30  ;;  %v324_v6 = vmax.f32 %v309_v51, %v10872_v44  ;;  %v4059_v39 = vrot.slane %v338_v38, 6 }
 0x1fc   :  { %v8130_v23 = vpack.i.bf16 %v10833_v28, %v19467_v42  ;;  %19468 = vst [vmem:[#allocation44_spill] sm:$0xff] %v10859_v7  ;;  %v10883_v2 = vsel %vm148_vm1, -inf, %v185_v59  ;;  %v10886_v63 = vsel %vm148_vm1, -inf, %v186_v45  ;;  %v10895_v61 = vsel %vm1703_vm4, 0.0, %v4057_v12  ;;  %v10905_v59 = vld [vmem:[%s18324_s1 + $0x50] sm:$0xff] }
 0x1fd   :  { %v10855_v54 = vpop.permute.xlu0 %7831  ;;  %v251_v9 = vmax.f32 %v235_v24, %v155_v60  ;;  %8056 = vrot.lane.b32.xlu1 %v8055_v52, %s9470_s15  ;;  %v10892_v24 = vpack.i.bf16 %v10867_v57, %v10862_v16  ;;  %19471 = vst [vmem:[#allocation174_spill] sm:$0xff] %v10895_v61  ;;  %v10900_v60 = vld [vmem:[%s18324_s1 + $0x48] sm:$0xff]  ;;  %v8060_v45 = vpack.i.bf16 %v10693_v35, %v10288_v17  ;;  %v19474_v34 = vrot.slane %v10405_v41, 2 }
 0x1fe   :  { %19466 = vst [vmem:[#allocation172_spill] sm:$0xff] %v10855_v54  ;;  %v10907_v53 = vpop.permute.xlu1 %7786  ;;  %v10912_v51 = vsel %vm814_vm2, %v1850_v25, %v1851_v49  ;;  %v296_v42 = vmax.f32 %v281_v43, %v10820_v4  ;;  %v2207_v61 = vrot.slane %v10427_v13, 4  ;;  %v2206_v49 = vrot.slane %v10455_v62, 4 }
 0x1ff   :  { %8131 = vrot.lane.b32.xlu0 %v8130_v23, %s9472_s16  ;;  %19472 = vst [vmem:[#allocation175_spill] sm:$0xff] %v10907_v53  ;;  %19473 = vst [vmem:[#allocation176_spill] sm:$0xff] %v10912_v51  ;;  %v10917_v38 = vsel %vm814_vm2, %v1853_v48, %v19474_v34  ;;  %v9434_v23 = vld [vmem:[%s18325_s2 + $0x30] sm:$0xff]  ;;  %v10931_v25 = vsel %vm1703_vm4, %v4057_v12, 0.0  ;;  %v19477_v48 = vrot.slane %v10845_v40, 6  ;;  %v325_v34 = vmax.f32 %v10879_v1, %v10883_v2  ;;  %v10950_v12 = vld [vmem:[%s18324_s1 + $0x40] sm:$0xff] }
 0x200   :  { %19475 = vst [vmem:[#allocation177_spill] sm:$0xff] %v10917_v38  ;;  %v267_v30 = vmax.f32 %v251_v9, %v9434_v23  ;;  %19476 = vst [vmem:[#allocation178_spill] sm:$0xff] %v10931_v25  ;;  %v10939_v9 = vmax.f32 %v324_v6, %v10786_v26  ;;  %v10945_v23 = vsel %vm1703_vm4, 0.0, %v4059_v39  ;;  %v125_v25 = vrot.slane %v10900_v60, 7 }
 0x201   :  { %v10888_v15 = vpop.permute.xlu0 %7871  ;;  %v10936_v43 = vsel %vm1703_vm4, 0.0, %v19477_v48  ;;  %8061 = vrot.lane.b32.xlu1 %v8060_v45, %s9469_s14  ;;  %19479 = vst [vmem:[#allocation180_spill] sm:$0xff] %v10945_v23  ;;  %v126_v48 = vrot.slane %v10905_v59, 7  ;;  %v10958_v26 = vpack.i.bf16 %v10917_v38, %v10912_v51  ;;  %v127_v6 = vrot.slane %v63_v50, 7 }
 0x202   :  { %19470 = vst [vmem:[#allocation173_spill] sm:$0xff] %v10888_v15  ;;  %19478 = vst [vmem:[#allocation179_spill] sm:$0xff] %v10936_v43  ;;  %v2004_v1 = vrot.slane %v10799_v37, 4  ;;  %v10961_v45 = vpop.permute.xlu1 %7791  ;;  %v2003_v17 = vrot.slane %v10723_v46, 4  ;;  %v10965_v23 = vsel %vm1703_vm4, %v4059_v39, 0.0  ;;  %v10968_v43 = vmax.f32 %v296_v42, %v10779_v11  ;;  %v10986_v11 = vld [vmem:[%s18324_s1 + $0x60] sm:$0xff] }
 0x203   :  { %8151 = vrot.lane.b32.xlu0 %v10892_v24, %s9470_s15  ;;  %19481 = vst [vmem:[#allocation182_spill] sm:$0xff] %v10961_v45  ;;  %19482 = vst [vmem:[#allocation183_spill] sm:$0xff] %v10965_v23  ;;  %v10971_v40 = vmax.f32 %v267_v30, %v10815_v20  ;;  %v10976_v38 = vsel %vm1982_vm7, %v2206_v49, %v2207_v61  ;;  %v124_v51 = vrot.slane %v10950_v12, 7  ;;  %v2440_v20 = vrot.slane %v10360_v31, 4  ;;  %v9436_v30 = vld [vmem:[%s18323_s0 + $0x50] sm:$0xff]  ;;  %v11002_v23 = vld [vmem:[%s18324_s1 + $0x68] sm:$0xff] }
 0x204   :  { %v2439_v61 = vrot.slane %v10419_v27, 4  ;;  %v158_v42 = vsel %vm148_vm1, -inf, %v125_v25  ;;  %v239_v49 = vmax.f32 %v9436_v30, %v10905_v59  ;;  %v8165_v25 = vpack.i.bf16 %v10862_v16, %v10504_v36  ;;  %v9438_v36 = vld [vmem:[%s18326_s3 + $0x30] sm:$0xff] }
 0x205   :  { %v10954_v35 = vpop.permute.xlu0 %7886  ;;  %8066 = vrot.lane.b32.xlu1 %v8055_v52, %s9469_s14  ;;  %v159_v45 = vsel %vm148_vm1, -inf, %v126_v48  ;;  %v160_v7 = vsel %vm148_vm1, -inf, %v127_v6  ;;  %v8075_v30 = vpack.i.bf16 %v10976_v38, %v10345_v19  ;;  %v11019_v54 = vmax.f32 %v325_v34, %v10872_v44  ;;  %v11029_v6 = vld [vmem:[%s18324_s1 + $0x70] sm:$0xff]  ;;  %v9439_v44 = vld [vmem:[%s18323_s0 + $0x40] sm:$0xff] }
 0x206   :  { %19480 = vst [vmem:[#allocation181_spill] sm:$0xff] %v10954_v35  ;;  %v9435_v35 = vld [vmem:[%s18323_s0 + $0x48] sm:$0xff]  ;;  %v11010_v59 = vpop.permute.xlu1 %7796  ;;  %v297_v16 = vmax.f32 %v10971_v40, %v9438_v36  ;;  %v128_v48 = vrot.slane %v10986_v11, 7  ;;  %v237_v34 = vmax.f32 %v9439_v44, %v10950_v12  ;;  %v2441_v40 = vsel %vm1982_vm7, %v2439_v61, %v2440_v20  ;;  %v19487_v44 = vld [vmem:[#allocation69_spill] sm:$0xff] }
 0x207   :  { %8156 = vrot.lane.b32.xlu0 %v10958_v26, %s9469_s14  ;;  %v238_v39 = vmax.f32 %v9435_v35, %v10900_v60  ;;  %v9437_v35 = vld [vmem:[%s18323_s0 + $0x58] sm:$0xff]  ;;  %19484 = vst [vmem:[#allocation185_spill] sm:$0xff] %v11010_v59  ;;  %v130_v59 = vrot.slane %v11029_v6, 7  ;;  %v757_v12 = vrot.slane %v10122_v55, 1  ;;  %v748_v61 = vrot.slane %v10760_v58, 1 }
 0x208   :  { %v240_v60 = vmax.f32 %v9437_v35, %v63_v50  ;;  %v11015_v50 = vsel %vm1982_vm7, %v2003_v17, %v2004_v1  ;;  %v157_v17 = vsel %vm148_vm1, -inf, %v124_v51  ;;  %v129_v1 = vrot.slane %v11002_v23, 7 }
 0x209   :  { %v11004_v52 = vpop.permute.xlu0 %7891  ;;  %19485 = vst [vmem:[#allocation186_spill] sm:$0xff] %v11015_v50  ;;  %8076 = vrot.lane.b32.xlu1 %v8075_v30, %s9470_s15  ;;  %v11040_v36 = vmax.f32 %v238_v39, %v158_v42  ;;  %v11042_v35 = vmax.f32 %v239_v49, %v159_v45  ;;  %v8175_v51 = vpack.i.bf16 %v11015_v50, %v2441_v40  ;;  %v161_v45 = vsel %vm148_vm1, -inf, %v128_v48  ;;  %v11067_v49 = vld [vmem:[%s18326_s3 + $0x40] sm:$0xff]  ;;  %v9441_v30 = vld [vmem:[%s18323_s0 + $0x68] sm:$0xff]  ;;  %v19489_v40 = vld [vmem:[#allocation71_spill] sm:$0xff] }
 0x20a   :  { %19483 = vst [vmem:[#allocation184_spill] sm:$0xff] %v11004_v52  ;;  %v11044_v19 = vmax.f32 %v240_v60, %v160_v7  ;;  %v758_v52 = vrot.slane %v19487_v44, 1  ;;  %v11052_v53 = vpop.permute.xlu1 %7811  ;;  %v8095_v39 = vpack.i.bf16 %v10577_v8, %v10292_v14  ;;  %v9440_v7 = vld [vmem:[%s18323_s0 + $0x60] sm:$0xff]  ;;  %v749_v42 = vrot.slane %v10763_v0, 1  ;;  %v9442_v0 = vld [vmem:[%s18323_s0 + $0x70] sm:$0xff]  ;;  %s9476_s0 = smov 112  }
 0x20b   :  { %8166 = vrot.lane.b32.xlu0 %v8165_v25, %s9469_s14  ;;  %19488 = vst [vmem:[#allocation69_spill] sm:$0xff] %v11052_v53  ;;  %v241_v20 = vmax.f32 %v9440_v7, %v10986_v11  ;;  %v162_v60 = vsel %vm148_vm1, -inf, %v129_v1  ;;  %v242_v48 = vmax.f32 %v9441_v30, %v11002_v23  ;;  %v754_v11 = vrot.slane %v10126_v10, 1  ;;  %v19490_v7 = vld [vmem:[#allocation43_spill] sm:$0xff] }
 0x20c   :  { %v755_v44 = vrot.slane %v19489_v40, 1  ;;  %v751_v1 = vrot.slane %v19423_v32, 1  ;;  %v11087_v23 = vpack.i.bf16 %v10122_v55, %v10126_v10  ;;  %v253_v30 = vmax.f32 %v237_v34, %v157_v17  ;;  %v79_v40 = vld [vmem:[%s18325_s2 + $0x58] sm:$0xff]  ;;  %v76_v17 = vld [vmem:[%s18325_s2 + $0x40] sm:$0xff]  ;;  %v11110_v10 = vld [vmem:[%s18326_s3 + $0x48] sm:$0xff] }
 0x20d   :  { %v11046_v25 = vpop.permute.xlu0 %7896  ;;  %8096 = vrot.lane.b32.xlu1 %v8095_v39, %s9469_s14  ;;  %v77_v39 = vld [vmem:[%s18325_s2 + $0x48] sm:$0xff]  ;;  %v8100_v55 = vpack.i.bf16 %v19423_v32, %v10760_v58  ;;  %v189_v34 = vrot.slane %v11067_v49, 7  ;;  %v11119_v32 = vsel %vm724_vm5, %v748_v61, %v749_v42  ;;  %v11122_v58 = vmax.f32 %v297_v16, %v10820_v4  ;;  %v11140_v4 = vld [vmem:[%s18326_s3 + $0x58] sm:$0xff] }
 0x20e   :  { %19486 = vst [vmem:[#allocation187_spill] sm:$0xff] %v11046_v25  ;;  %v752_v25 = vrot.slane %v19490_v7, 1  ;;  %v11099_v7 = vpop.permute.xlu1 %7826  ;;  %19494 = vst [vmem:[#allocation189_spill] sm:$0xff] %v11119_v32  ;;  %v272_v16 = vmax.f32 %v11044_v19, %v79_v40 }
 0x20f   :  { %8176 = vrot.lane.b32.xlu0 %v8175_v51, %s9470_s15  ;;  %v243_v51 = vmax.f32 %v9442_v0, %v11029_v6  ;;  %v163_v6 = vsel %vm148_vm1, -inf, %v130_v59  ;;  %v11097_v0 = vsel %vm724_vm5, %v757_v12, %v758_v52  ;;  %19493 = vst [vmem:[#allocation188_spill] sm:$0xff] %v11099_v7  ;;  %v270_v59 = vmax.f32 %v11040_v36, %v77_v39  ;;  %v78_v52 = vld [vmem:[%s18325_s2 + $0x50] sm:$0xff] }
 0x210   :  { %19492 = vst [vmem:[#allocation43_spill] sm:$0xff] %v11097_v0  ;;  %v257_v12 = vmax.f32 %v241_v20, %v161_v45  ;;  %v271_v36 = vmax.f32 %v11042_v35, %v78_v52  ;;  %v80_v45 = vld [vmem:[%s18325_s2 + $0x60] sm:$0xff]  ;;  %v258_v20 = vmax.f32 %v242_v48, %v162_v60  ;;  %v11134_v7 = vsel %vm724_vm5, %v754_v11, %v755_v44  ;;  %v81_v35 = vld [vmem:[%s18325_s2 + $0x68] sm:$0xff] }
 0x211   :  { %v11083_v53 = vpop.permute.xlu0 %7901  ;;  %19495 = vst [vmem:[#allocation190_spill] sm:$0xff] %v11134_v7  ;;  %8101 = vrot.lane.b32.xlu1 %v8100_v55, %s9469_s14  ;;  %v259_v61 = vmax.f32 %v243_v51, %v163_v6  ;;  %v11147_v42 = vsel %vm724_vm5, %v751_v1, %v752_v25  ;;  %v8215_v55 = vpack.i.bf16 %v11097_v0, %v11134_v7  ;;  %v190_v44 = vrot.slane %v11110_v10, 7  ;;  %v19667_v0 = vld [vmem:[#allocation129_spill] sm:$0xff] }
 0x212   :  { %19491 = vst [vmem:[#allocation71_spill] sm:$0xff] %v11083_v53  ;;  %v11127_v53 = vld [vmem:[%s18326_s3 + $0x50] sm:$0xff]  ;;  %19496 = vst [vmem:[#allocation191_spill] sm:$0xff] %v11147_v42  ;;  %v269_v11 = vmax.f32 %v253_v30, %v76_v17  ;;  %v11156_v19 = vpop.permute.xlu1 %7836  ;;  %v8120_v15 = vpack.i.bf16 %v11147_v42, %v11119_v32  ;;  %v284_v51 = vmax.f32 %v270_v59, %v76_v17  ;;  %v11163_v6 = vsel %vm1703_vm4, 0.0, %v9996_v56  ;;  %v96_v32 = vld [vmem:[%s18326_s3 + $0x60] sm:$0xff] }
 0x213   :  { %8181 = vrot.lane.b32.xlu0 %v11087_v23, %s9469_s14  ;;  %19498 = vst [vmem:[#allocation193_spill] sm:$0xff] %v11156_v19  ;;  %v191_v25 = vrot.slane %v11127_v53, 7  ;;  %v273_v1 = vmax.f32 %v257_v12, %v80_v45  ;;  %19499 = vst [vmem:[#allocation194_spill] sm:$0xff] %v11163_v6  ;;  %v11167_v48 = vsel %vm148_vm1, -inf, %v189_v34  ;;  %v285_v30 = vmax.f32 %v271_v36, %v77_v39  ;;  %v19500_v59 = vld [vmem:[#allocation5_spill] sm:$0xff] }
 0x214   :  { %v274_v17 = vmax.f32 %v258_v20, %v81_v35  ;;  %v286_v56 = vmax.f32 %v272_v16, %v78_v52  ;;  %v11181_v39 = vsel %vm1703_vm4, 0.0, %v10047_v21  ;;  %v11186_v19 = vmax.f32 %v269_v11, %v11067_v49 }
 0x215   :  { %v11149_v60 = vpop.permute.xlu0 %7916  ;;  %8121 = vrot.lane.b32.xlu1 %v8120_v15, %s9472_s16  ;;  %19501 = vst [vmem:[#allocation5_spill] sm:$0xff] %v11181_v39  ;;  %v11189_v15 = vsel %vm148_vm1, -inf, %v190_v44  ;;  %v8125_v52 = vpack.i.bf16 %v9955_v47, %v10833_v28  ;;  %v1787_v16 = vrot.slane %v11163_v6, 1  ;;  %v11198_v21 = vsel %vm148_vm1, -inf, %v191_v25 }
 0x216   :  { %19497 = vst [vmem:[#allocation192_spill] sm:$0xff] %v11149_v60  ;;  %v192_v60 = vrot.slane %v11140_v4, 7  ;;  %v11193_v20 = vpop.permute.xlu1 %7841  ;;  %v287_v12 = vmax.f32 %v273_v1, %v79_v40  ;;  %v19504_v11 = vpack.i.bf16 %v10197_v18, %v10186_v29  ;;  %v301_v44 = vmax.f32 %v285_v30, %v11127_v53  ;;  %v97_v40 = vld [vmem:[%s18326_s3 + $0x68] sm:$0xff] }
 0x217   :  { %8216 = vrot.lane.b32.xlu0 %v8215_v55, %s9472_s16  ;;  %v9443_v55 = vld [vmem:[%s18325_s2 + $0x70] sm:$0xff]  ;;  %19503 = vst [vmem:[#allocation196_spill] sm:$0xff] %v11193_v20  ;;  %v288_v20 = vmax.f32 %v274_v17, %v80_v45  ;;  %v302_v25 = vmax.f32 %v286_v56, %v11140_v4  ;;  %v11225_v30 = vsel %vm724_vm5, %v1787_v16, %v10459_v33  ;;  %v1856_v17 = vrot.slane %v11181_v39, 2 }
 0x218   :  { %v275_v34 = vmax.f32 %v259_v61, %v9443_v55  ;;  %v300_v61 = vmax.f32 %v284_v51, %v11110_v10  ;;  %v193_v55 = vrot.slane %v96_v32, 7  ;;  %v11206_v28 = vsel %vm148_vm1, -inf, %v192_v60 }
 0x219   :  { %v11183_v36 = vpop.permute.xlu0 %7931  ;;  %8126 = vrot.lane.b32.xlu1 %v8125_v52, %s9470_s15  ;;  %v1784_v51 = vrot.slane %v11181_v39, 1  ;;  %v8230_v60 = vpack.i.bf16 %v11134_v7, %v11147_v42  ;;  %v1859_v56 = vrot.slane %v11163_v6, 2  ;;  %v303_v52 = vmax.f32 %v287_v12, %v96_v32 }
 0x21a   :  { %19502 = vst [vmem:[#allocation195_spill] sm:$0xff] %v11183_v36  ;;  %v289_v1 = vmax.f32 %v275_v34, %v81_v35  ;;  %v11215_v36 = vrot.slane %v10391_v22, 2  ;;  %v11221_v45 = vpop.permute.xlu1 %7846  ;;  %v1926_v35 = vrot.slane %v10799_v37, 3  ;;  %v1925_v34 = vrot.slane %v10723_v46, 3  ;;  %v9444_v37 = vld [vmem:[%s18326_s3 + $0x70] sm:$0xff]  ;;  %v19792_v31 = vld [vmem:[#allocation193_spill] sm:$0xff] }
 0x21b   :  { %8221 = vrot.lane.b32.xlu0 %v19504_v11, %s9470_s15  ;;  %19507 = vst [vmem:[#allocation199_spill] sm:$0xff] %v11221_v45  ;;  %v314_v7 = vmax.f32 %v300_v61, %v11067_v49  ;;  %v194_v42 = vrot.slane %v97_v40, 7  ;;  %v304_v45 = vmax.f32 %v288_v20, %v97_v40  ;;  %v11238_v16 = vsel %vm724_vm5, %v1784_v51, %v10488_v5  ;;  %v19511_v61 = vld [vmem:[#allocation126_spill] sm:$0xff] }
 0x21c   :  { %19505 = vst [vmem:[#allocation197_spill] sm:$0xff] %v11215_v36  ;;  %v315_v12 = vmax.f32 %v301_v44, %v11110_v10  ;;  %v11248_v49 = vpack.i.bf16 %v11225_v30, %v11238_v16  ;;  %v11258_v10 = vsel %vm814_vm2, %v1859_v56, %v19511_v61  ;;  %v1931_v44 = vrot.slane %v11181_v39, 3 }
 0x21d   :  { %v11217_v11 = vpop.permute.xlu0 %7941  ;;  %8136 = vrot.lane.b32.xlu1 %v10892_v24, %s9472_s16  ;;  %v11254_v24 = vsel %vm814_vm2, %v1856_v17, %v11215_v36  ;;  %19512 = vst [vmem:[#allocation203_spill] sm:$0xff] %v11258_v10  ;;  %v1934_v51 = vrot.slane %v11163_v6, 3  ;;  %v19514_v17 = vrot.slane %v10405_v41, 3  ;;  %v330_v56 = vmax.f32 %v314_v7, %v11189_v15 }
 0x21e   :  { %19506 = vst [vmem:[#allocation198_spill] sm:$0xff] %v11217_v11  ;;  %v1928_v11 = vrot.slane %v10609_v3, 3  ;;  %v11250_v20 = vpop.permute.xlu1 %7851  ;;  %19510 = vst [vmem:[#allocation202_spill] sm:$0xff] %v11254_v24  ;;  %v225_v8 = vsel %vm148_vm1, -inf, %v193_v55  ;;  %v226_v14 = vsel %vm148_vm1, -inf, %v194_v42  ;;  %v19685_v13 = vpack.i.bf16 %v11238_v16, %v10867_v57  ;;  %v19690_v16 = vld [vmem:[#allocation150_spill] sm:$0xff] }
 0x21f   :  { %8231 = vrot.lane.b32.xlu0 %v8230_v60, %s9469_s14  ;;  %v305_v60 = vmax.f32 %v289_v1, %v9444_v37  ;;  %19509 = vst [vmem:[#allocation201_spill] sm:$0xff] %v11250_v20  ;;  %v316_v1 = vmax.f32 %v302_v25, %v11127_v53  ;;  %v317_v37 = vmax.f32 %v303_v52, %v11140_v4  ;;  %v2010_v52 = vrot.slane %v10391_v22, 4 }
 0x220   :  { %v11272_v20 = vsel %vm1904_vm6, %v1928_v11, %v19514_v17  ;;  %v318_v53 = vmax.f32 %v304_v45, %v96_v32  ;;  %v331_v4 = vmax.f32 %v315_v12, %v11198_v21  ;;  %v11285_v11 = vpack.i.bf16 %v11258_v10, %v11254_v24  ;;  %v19518_v32 = vld [vmem:[#allocation115_spill] sm:$0xff] }
 0x221   :  { %v11244_v46 = vpop.permute.xlu0 %7946  ;;  %19515 = vst [vmem:[#allocation205_spill] sm:$0xff] %v11272_v20  ;;  %8141 = vrot.lane.b32.xlu1 %v10958_v26, %s9470_s15  ;;  %v319_v25 = vmax.f32 %v305_v60, %v97_v40  ;;  %v11293_v55 = vsel %vm1904_vm6, %v1931_v44, %v19518_v32  ;;  %v19520_v26 = vld [vmem:[#allocation127_spill] sm:$0xff]  ;;  %v2009_v45 = vrot.slane %v11181_v39, 4  ;;  %v19523_v60 = vmax.f32 %v11122_v58, %v19500_v59 }
 0x222   :  { %19508 = vst [vmem:[#allocation200_spill] sm:$0xff] %v11244_v46  ;;  %v11267_v46 = vsel %vm1904_vm6, %v1925_v34, %v1926_v35  ;;  %v11287_v7 = vpop.permute.xlu1 %7856  ;;  %19519 = vst [vmem:[#allocation208_spill] sm:$0xff] %v11293_v55  ;;  %v11297_v40 = vsel %vm1904_vm6, %v1934_v51, %v19520_v26  ;;  %v19522_v34 = vmax.f32 %v10968_v43, %v10886_v63  ;;  %v2007_v10 = vrot.slane %v10405_v41, 4  ;;  %v19526_v59 = vld [vmem:[#allocation7_spill] sm:$0xff] }
 0x223   :  { %8236 = vrot.lane.b32.xlu0 %v11248_v49, %s9472_s16  ;;  %19513 = vst [vmem:[#allocation204_spill] sm:$0xff] %v11267_v46  ;;  %19517 = vst [vmem:[#allocation207_spill] sm:$0xff] %v11287_v7  ;;  %v8145_v42 = vpack.i.bf16 %v11272_v20, %v11267_v46  ;;  %v342_v17 = vmax.f32 %v19523_v60, %v10886_v63  ;;  %v332_v20 = vmax.f32 %v316_v1, %v11206_v28  ;;  %v19561_v46 = vld [vmem:[#allocation74_spill] sm:$0xff]  ;;  %v19570_v26 = vmov 0.0   ;;  %v19604_v7 = vld [vmem:[#allocation139_spill] sm:$0xff] }
 0x224   :  { %19521 = vst [vmem:[#allocation209_spill] sm:$0xff] %v11297_v40  ;;  %v341_v12 = vmax.f32 %v19522_v34, %v10883_v2  ;;  %v333_v44 = vmax.f32 %v317_v37, %v225_v8  ;;  %v329_v51 = vmax.f32 %v11186_v19, %v11167_v48  ;;  %v334_v32 = vmax.f32 %v318_v53, %v226_v14 }
 0x225   :  { %v11281_v35 = vpop.permute.xlu0 %7951  ;;  %8146 = vrot.lane.b32.xlu1 %v8145_v42, %s9469_s14  ;;  %v2006_v2 = vrot.slane %v10609_v3, 4  ;;  %v19524_v43 = vrot.slane %v10939_v9, 6  ;;  %v4061_v63 = vrot.slane %v11019_v54, 6  ;;  %v335_v1 = vmax.f32 %v319_v25, %v19526_v59 }
 0x226   :  { %19516 = vst [vmem:[#allocation206_spill] sm:$0xff] %v11281_v35  ;;  %v8245_v19 = vpack.i.bf16 %v11297_v40, %v11293_v55  ;;  %v11328_v53 = vmax.f32 %v330_v56, %v11167_v48  ;;  %v345_v34 = vmax.f32 %v331_v4, %v11189_v15  ;;  %v11331_v60 = vpop.permute.xlu1 %7861  ;;  %v11336_v24 = vsel %vm1982_vm7, %v2009_v45, %v2010_v52  ;;  %v19535_v52 = vld [vmem:[#allocation6_spill] sm:$0xff] }
 0x227   :  { %8241 = vrot.lane.b32.xlu0 %v11285_v11, %s9470_s15  ;;  %v11319_v58 = vsel %vm1703_vm4, 0.0, %v19524_v43  ;;  %19529 = vst [vmem:[#allocation212_spill] sm:$0xff] %v11331_v60  ;;  %v8160_v43 = vpack.i.bf16 %v11015_v50, %v10976_v38  ;;  %19530 = vst [vmem:[#allocation213_spill] sm:$0xff] %v11336_v24  ;;  %v19531_v54 = vrot.slane %v10939_v9, 6  ;;  %v4062_v59 = vrot.slane %v341_v12, 6  ;;  %v19580_v50 = vld [vmem:[#allocation121_spill] sm:$0xff] }
 0x228   :  { %19525 = vst [vmem:[#allocation210_spill] sm:$0xff] %v11319_v58  ;;  %19528 = vst [vmem:[#allocation211_spill] sm:$0xff] %v11328_v53  ;;  %v346_v40 = vmax.f32 %v332_v20, %v11198_v21  ;;  %v347_v48 = vmax.f32 %v333_v44, %v11206_v28  ;;  %v4063_v15 = vrot.slane %v342_v17, 6  ;;  %v4065_v56 = vrot.slane %v329_v51, 6 }
 0x229   :  { %v11323_v37 = vpop.permute.xlu0 %7956  ;;  %v11341_v25 = vsel %vm1703_vm4, %v19531_v54, 0.0  ;;  %v348_v4 = vmax.f32 %v334_v32, %v225_v8  ;;  %8161 = vrot.lane.b32.xlu1 %v8160_v43, %s9472_s16  ;;  %v11348_v38 = vsel %vm1982_vm7, %v2006_v2, %v2007_v10  ;;  %v11351_v9 = vsel %vm1703_vm4, 0.0, %v4061_v63 }
 0x22a   :  { %19527 = vst [vmem:[#allocation7_spill] sm:$0xff] %v11323_v37  ;;  %19532 = vst [vmem:[#allocation214_spill] sm:$0xff] %v11341_v25  ;;  %v18601_v45 = vrot.slane %v19535_v52, 6  ;;  %v349_v12 = vmax.f32 %v335_v1, %v226_v14  ;;  %v11358_v21 = vpack.i.bf16 %v11336_v24, %v11348_v38  ;;  %v11361_v28 = vsel %vm1703_vm4, %v4061_v63, 0.0  ;;  %v11364_v10 = vpop.permute.xlu1 %7866 }
 0x22b   :  { %8246 = vrot.lane.b32.xlu0 %v8245_v19, %s9469_s14  ;;  %19533 = vst [vmem:[#allocation215_spill] sm:$0xff] %v11348_v38  ;;  %19534 = vst [vmem:[#allocation216_spill] sm:$0xff] %v11351_v9  ;;  %v4067_v20 = vrot.slane %v345_v34, 6  ;;  %v11369_v17 = vsel %vm1703_vm4, 0.0, %v4062_v59  ;;  %v11372_v14 = vsel %vm1703_vm4, %v4062_v59, 0.0  ;;  %v4068_v44 = vrot.slane %v346_v40, 6 }
 0x22c   :  { %19537 = vst [vmem:[#allocation218_spill] sm:$0xff] %v11361_v28  ;;  %19538 = vst [vmem:[#allocation219_spill] sm:$0xff] %v11364_v10  ;;  %v4069_v51 = vrot.slane %v347_v48, 6  ;;  %v11379_v63 = vsel %vm1703_vm4, 0.0, %v4063_v15  ;;  %v11382_v1 = vsel %vm1703_vm4, %v4063_v15, 0.0  ;;  %v11385_v34 = vsel %vm1703_vm4, 0.0, %v4065_v56 }
 0x22d   :  { %v11354_v54 = vpop.permute.xlu0 %7961  ;;  %19540 = vst [vmem:[#allocation221_spill] sm:$0xff] %v11369_v17  ;;  %19541 = vst [vmem:[#allocation222_spill] sm:$0xff] %v11372_v14  ;;  %v4070_v43 = vrot.slane %v348_v4, 6  ;;  %8171 = vrot.lane.b32.xlu1 %v8145_v42, %s9472_s16  ;;  %v11391_v40 = vsel %vm1703_vm4, 0.0, %v18601_v45  ;;  %v11394_v59 = vsel %vm1703_vm4, %v4065_v56, 0.0  ;;  %v4071_v48 = vrot.slane %v349_v12, 6 }
 0x22e   :  { %19536 = vst [vmem:[#allocation217_spill] sm:$0xff] %v11354_v54  ;;  %19543 = vst [vmem:[#allocation224_spill] sm:$0xff] %v11379_v63  ;;  %v19549_v15 = vrot.slane %v11328_v53, 6  ;;  %v11404_v4 = vsel %vm1703_vm4, 0.0, %v4067_v20  ;;  %v11407_v42 = vsel %vm1703_vm4, %v4067_v20, 0.0  ;;  %v11412_v45 = vsel %vm1703_vm4, 0.0, %v4068_v44 }
 0x22f   :  { %8261 = vrot.lane.b32.xlu0 %v11358_v21, %s9472_s16  ;;  %19544 = vst [vmem:[#allocation225_spill] sm:$0xff] %v11382_v1  ;;  %19545 = vst [vmem:[#allocation226_spill] sm:$0xff] %v11385_v34  ;;  %v11415_v56 = vsel %vm1703_vm4, %v4068_v44, 0.0  ;;  %v11418_v12 = vsel %vm1703_vm4, 0.0, %v4069_v51  ;;  %v11425_v52 = vsel %vm1703_vm4, 0.0, %v4070_v43  ;;  %v11428_v20 = vsel %vm1703_vm4, %v4070_v43, 0.0 }
 0x230   :  { %v11366_v32 = vpop.f32.mrb[16].mxu0  ;;  %19546 = vst [vmem:[#allocation227_spill] sm:$0xff] %v11391_v40  ;;  %19547 = vst [vmem:[#allocation228_spill] sm:$0xff] %v11394_v59  ;;  %v19560_v40 = vld [vmem:[#allocation78_spill] sm:$0xff]  ;;  %v764_v24 = vrot.slane %v19561_v46, 1  ;;  %v11435_v44 = vsel %vm1703_vm4, 0.0, %v4071_v48 }
 0x231   :  { %19539 = vst [vmem:[#allocation220_spill] sm:$0xff] %v11366_v32  ;;  %v11376_v2 = vpop.f32.mrb[17].mxu0  ;;  %v11396_v8 = vpop.permute.xlu0 %7966  ;;  %v11401_v32 = vsel %vm1703_vm4, 0.0, %v19549_v15  ;;  %19551 = vst [vmem:[#allocation231_spill] sm:$0xff] %v11404_v4  ;;  %v11421_v15 = vsel %vm1703_vm4, %v4069_v51, 0.0  ;;  %v763_v55 = vrot.slane %v19560_v40, 1  ;;  %8186 = vrot.lane.b32.xlu1 %v11087_v23, %s9470_s15 }
 0x232   :  { %19542 = vst [vmem:[#allocation223_spill] sm:$0xff] %v11376_v2  ;;  %19548 = vst [vmem:[#allocation229_spill] sm:$0xff] %v11396_v8  ;;  %v11409_v2 = vpop.permute.xlu1 %7876  ;;  %v19563_v51 = vld [vmem:[#allocation83_spill] sm:$0xff]  ;;  %v19564_v1 = vld [vmem:[#allocation77_spill] sm:$0xff]  ;;  %v2016_v4 = vrot.slane %v19580_v50, 4  ;;  %v7764_v50 = vunpack.i.h.bf16 %v19690_v16 }
 0x233   :  { %19550 = vst [vmem:[#allocation230_spill] sm:$0xff] %v11401_v32  ;;  %19552 = vst [vmem:[#allocation232_spill] sm:$0xff] %v11407_v42  ;;  %8271 = vrot.lane.b32.xlu0 %v8245_v19, %s9472_s16  ;;  %v760_v38 = vrot.slane %v19563_v51, 1  ;;  %v761_v19 = vrot.slane %v19564_v1, 1  ;;  %v11443_v43 = vpack.i.bf16 %v19560_v40, %v19563_v51  ;;  %v19567_v46 = vld [vmem:[#allocation61_spill] sm:$0xff]  ;;  %v11457_v1 = vrot.slane %v19570_v26, 3 }
 0x234   :  { %19553 = vst [vmem:[#allocation233_spill] sm:$0xff] %v11409_v2  ;;  %19554 = vst [vmem:[#allocation234_spill] sm:$0xff] %v11412_v45  ;;  %v19572_v32 = vld [vmem:[#allocation119_spill] sm:$0xff]  ;;  %v19573_v53 = vld [vmem:[#allocation45_spill] sm:$0xff]  ;;  %v11469_v58 = vsel %vm724_vm5, %v763_v55, %v764_v24  ;;  %v8210_v45 = vpack.i.bf16 %v19511_v61, %v11215_v36 }
 0x235   :  { %19555 = vst [vmem:[#allocation235_spill] sm:$0xff] %v11415_v56  ;;  %19556 = vst [vmem:[#allocation236_spill] sm:$0xff] %v11418_v12  ;;  %v11439_v63 = vpop.permute.xlu0 %7971  ;;  %v11461_v40 = vrot.slane %v19573_v53, 3  ;;  %v19575_v51 = vld [vmem:[#allocation85_spill] sm:$0xff]  ;;  %v19578_v42 = vld [vmem:[#allocation68_spill] sm:$0xff] }
 0x236   :  { %19557 = vst [vmem:[#allocation237_spill] sm:$0xff] %v11421_v15  ;;  %19558 = vst [vmem:[#allocation238_spill] sm:$0xff] %v11425_v52  ;;  %v11450_v52 = vsel %vm1703_vm4, 0.0, %v19567_v46  ;;  %v11452_v23 = vpop.permute.xlu1 %7881  ;;  %v11473_v26 = vsel %vm1703_vm4, 0.0, %v19578_v42  ;;  %v19583_v9 = vld [vmem:[#allocation67_spill] sm:$0xff]  ;;  %v19587_v42 = vld [vmem:[#allocation84_spill] sm:$0xff]  ;;  %v8195_v46 = vpack.i.bf16 %v11181_v39, %v10609_v3 }
 0x237   :  { %19559 = vst [vmem:[#allocation239_spill] sm:$0xff] %v11428_v20  ;;  %19562 = vst [vmem:[#allocation74_spill] sm:$0xff] %v11435_v44  ;;  %v11446_v20 = vsel %vm1703_vm4, %v4071_v48, 0.0  ;;  %v8190_v44 = vpack.i.bf16 %v11163_v6, %v11181_v39  ;;  %v766_v48 = vrot.slane %v19575_v51, 1  ;;  %8286 = vrot.lane.b32.xlu0 %v11443_v43, %s9470_s15  ;;  %v2443_v15 = vrot.slane %v19583_v9, 4  ;;  %v19584_v12 = vld [vmem:[#allocation79_spill] sm:$0xff] }
 0x238   :  { %19565 = vst [vmem:[#allocation77_spill] sm:$0xff] %v11439_v63  ;;  %19566 = vst [vmem:[#allocation240_spill] sm:$0xff] %v11446_v20  ;;  %v19576_v20 = vld [vmem:[#allocation80_spill] sm:$0xff]  ;;  %v11477_v28 = vpop.f32.mrb[18].mxu0  ;;  %v8290_v55 = vpack.i.bf16 %v11450_v52, %v11473_v26  ;;  %v19588_v59 = vld [vmem:[#allocation107_spill] sm:$0xff]  ;;  %v1793_v8 = vrot.slane %v11450_v52, 1  ;;  %v8295_v37 = vpack.i.bf16 %v11473_v26, %v11163_v6 }
 0x239   :  { %19568 = vst [vmem:[#allocation61_spill] sm:$0xff] %v11450_v52  ;;  %19569 = vst [vmem:[#allocation241_spill] sm:$0xff] %v11452_v23  ;;  %v767_v25 = vrot.slane %v19576_v20, 1  ;;  %8191 = vrot.lane.b32.xlu1 %v8190_v44, %s9472_s16  ;;  %v11480_v20 = vsel %vm724_vm5, %v760_v38, %v761_v19  ;;  %v11484_v56 = vpop.permute.xlu0 %7981  ;;  %v11486_v24 = vpop.f32.mrb[19].mxu0  ;;  %v11493_v34 = vsel %vm1703_vm4, 0.0, %v19588_v59  ;;  %v19594_v17 = vld [vmem:[#allocation65_spill] sm:$0xff] }
 0x23a   :  { %19571 = vst [vmem:[#allocation242_spill] sm:$0xff] %v11457_v1  ;;  %19574 = vst [vmem:[#allocation243_spill] sm:$0xff] %v11461_v40  ;;  %v11498_v19 = vpop.permute.xlu1 %7906  ;;  %v1790_v59 = vrot.slane %v11473_v26, 1  ;;  %v1862_v3 = vrot.slane %v11473_v26, 2  ;;  %v1865_v14 = vrot.slane %v11450_v52, 2  ;;  %v19673_v39 = vld [vmem:[#allocation141_spill] sm:$0xff]  ;;  %v7839_v1 = vunpack.i.h.bf16 %v19792_v31 }
 0x23b   :  { %19577 = vst [vmem:[#allocation80_spill] sm:$0xff] %v11469_v58  ;;  %19579 = vst [vmem:[#allocation68_spill] sm:$0xff] %v11473_v26  ;;  %8291 = vrot.lane.b32.xlu0 %v8290_v55, %s9472_s16 }
 0x23c   :  { %19581 = vst [vmem:[#allocation244_spill] sm:$0xff] %v11477_v28  ;;  %19582 = vst [vmem:[#allocation245_spill] sm:$0xff] %v11480_v20  ;;  %v19590_v28 = vld [vmem:[#allocation131_spill] sm:$0xff]  ;;  %v11533_v10 = vsel %vm724_vm5, %v1790_v59, %v19604_v7 }
 0x23d   :  { %19585 = vst [vmem:[#allocation79_spill] sm:$0xff] %v11484_v56  ;;  %19586 = vst [vmem:[#allocation246_spill] sm:$0xff] %v11486_v24  ;;  %v11496_v38 = vrot.slane %v19590_v28, 3  ;;  %v11504_v24 = vsel %vm724_vm5, %v766_v48, %v767_v25  ;;  %8196 = vrot.lane.b32.xlu1 %v8195_v46, %s9470_s15  ;;  %v11518_v54 = vpop.permute.xlu0 %7986  ;;  %v19602_v46 = vrot.slane %v10405_v41, 1  ;;  %v19607_v41 = vld [vmem:[#allocation132_spill] sm:$0xff]  ;;  %v19613_v25 = vld [vmem:[#allocation125_spill] sm:$0xff] }
 0x23e   :  { %19589 = vst [vmem:[#allocation84_spill] sm:$0xff] %v11493_v34  ;;  %19592 = vst [vmem:[#allocation247_spill] sm:$0xff] %v11498_v19  ;;  %v11522_v56 = vpop.permute.xlu1 %7911  ;;  %v2442_v35 = vrot.slane %v19613_v25, 4  ;;  %v1940_v48 = vrot.slane %v11450_v52, 3 }
 0x23f   :  { %19591 = vst [vmem:[#allocation107_spill] sm:$0xff] %v11496_v38  ;;  %19593 = vst [vmem:[#allocation248_spill] sm:$0xff] %v11504_v24  ;;  %v8205_v60 = vpack.i.bf16 %v10488_v5, %v19602_v46  ;;  %8296 = vrot.lane.b32.xlu0 %v8295_v37, %s9470_s15  ;;  %v11542_v46 = vsel %vm814_vm2, %v1862_v3, %v19607_v41  ;;  %v19609_v5 = vld [vmem:[#allocation138_spill] sm:$0xff]  ;;  %v2012_v37 = vrot.slane %v11163_v6, 4  ;;  %v19669_v24 = vld [vmem:[#allocation28_spill] sm:$0xff] }
 0x240   :  { %19600 = vst [vmem:[#allocation65_spill] sm:$0xff] %v11518_v54  ;;  %19601 = vst [vmem:[#allocation249_spill] sm:$0xff] %v11522_v56  ;;  %v19605_v54 = vld [vmem:[#allocation136_spill] sm:$0xff]  ;;  %v11546_v61 = vsel %vm814_vm2, %v1865_v14, %v19609_v5  ;;  %v11551_v59 = vpop.f32.mrb[20].mxu0  ;;  %v8305_v14 = vpack.i.bf16 %v19604_v7, %v10459_v33 }
 0x241   :  { %8201 = vrot.lane.b32.xlu1 %v8190_v44, %s9469_s14  ;;  %v11538_v56 = vsel %vm724_vm5, %v1793_v8, %v19605_v54  ;;  %19608 = vst [vmem:[#allocation251_spill] sm:$0xff] %v11542_v46  ;;  %19610 = vst [vmem:[#allocation252_spill] sm:$0xff] %v11546_v61  ;;  %v11549_v19 = vpop.permute.xlu0 %8011  ;;  %v2015_v44 = vrot.slane %v11473_v26, 4  ;;  %v1937_v8 = vrot.slane %v11473_v26, 3  ;;  %v11559_v23 = vpop.f32.mrb[21].mxu0  ;;  %v11578_v7 = vpack.i.bf16 %v11546_v61, %v11542_v46  ;;  %v19621_v61 = vld [vmem:[#allocation128_spill] sm:$0xff] }
 0x242   :  { %19606 = vst [vmem:[#allocation250_spill] sm:$0xff] %v11538_v56  ;;  %19611 = vst [vmem:[#allocation253_spill] sm:$0xff] %v11549_v19  ;;  %v11557_v3 = vpop.permute.xlu1 %7921  ;;  %v8310_v19 = vpack.i.bf16 %v19609_v5, %v19607_v41  ;;  %v11571_v63 = vpack.i.bf16 %v11538_v56, %v11533_v10  ;;  %v19677_v56 = vld [vmem:[#allocation73_spill] sm:$0xff]  ;;  %v19684_v6 = vld [vmem:[#allocation144_spill] sm:$0xff] }
 0x243   :  { %19612 = vst [vmem:[#allocation254_spill] sm:$0xff] %v11551_v59  ;;  %19614 = vst [vmem:[#allocation255_spill] sm:$0xff] %v11557_v3  ;;  %8301 = vrot.lane.b32.xlu0 %v8290_v55, %s9469_s14  ;;  %v19616_v3 = vld [vmem:[#allocation46_spill] sm:$0xff]  ;;  %v19617_v55 = vrot.slane %v19572_v32, 4  ;;  %v11597_v46 = vsel %vm1904_vm6, %v1937_v8, %v19621_v61  ;;  %v11601_v59 = vsel %vm1904_vm6, %v1940_v48, %v11461_v40  ;;  %v19628_v61 = vld [vmem:[#allocation27_spill] sm:$0xff]  ;;  %v7748_v40 = vunpack.i.l.bf16 %v19667_v0 }
 0x244   :  { %19615 = vst [vmem:[#allocation256_spill] sm:$0xff] %v11559_v23  ;;  %v11592_v23 = vsel %vm1982_vm7, %v2015_v44, %v2016_v4  ;;  %19622 = vst [vmem:[#allocation259_spill] sm:$0xff] %v11597_v46  ;;  %v11603_v2 = vpop.f32.mrb[22].mxu0  ;;  %v2018_v4 = vrot.slane %v11450_v52, 4  ;;  %v11616_v48 = vpack.i.bf16 %v19584_v12, %v19575_v51  ;;  %v11635_v51 = vpack.i.bf16 %v11601_v59, %v11597_v46  ;;  %v19640_v46 = vld [vmem:[#allocation146_spill] sm:$0xff] }
 0x245   :  { %8206 = vrot.lane.b32.xlu1 %v8205_v60, %s9472_s16  ;;  %v11587_v5 = vsel %vm1982_vm7, %v2012_v37, %v19617_v55  ;;  %v11589_v41 = vpop.permute.xlu0 %8031  ;;  %19620 = vst [vmem:[#allocation258_spill] sm:$0xff] %v11592_v23  ;;  %v2444_v60 = vsel %vm1982_vm7, %v2442_v35, %v2443_v15  ;;  %19623 = vst [vmem:[#allocation260_spill] sm:$0xff] %v11601_v59  ;;  %v2366_v37 = vrot.slane %v19613_v25, 2  ;;  %v2367_v55 = vrot.slane %v19583_v9, 2  ;;  %v11611_v15 = vpop.f32.mrb[23].mxu0  ;;  %v19696_v9 = vld [vmem:[#allocation63_spill] sm:$0xff] }
 0x246   :  { %19618 = vst [vmem:[#allocation46_spill] sm:$0xff] %v11587_v5  ;;  %19619 = vst [vmem:[#allocation257_spill] sm:$0xff] %v11589_v41  ;;  %v11605_v33 = vpop.permute.xlu1 %7926  ;;  %v2209_v35 = vrot.slane %v11493_v34, 4  ;;  %v11623_v8 = vpack.i.bf16 %v11592_v23, %v11587_v5  ;;  %v19629_v41 = vld [vmem:[#allocation29_spill] sm:$0xff]  ;;  %v2188_v44 = vrot.slane %v11493_v34, 3  ;;  %v7759_v22 = vunpack.i.h.bf16 %v19684_v6 }
 0x247   :  { %19624 = vst [vmem:[#allocation261_spill] sm:$0xff] %v11603_v2  ;;  %19625 = vst [vmem:[#allocation262_spill] sm:$0xff] %v11605_v33  ;;  %8306 = vrot.lane.b32.xlu0 %v8305_v14, %s9472_s16  ;;  %v11641_v23 = vsel %vm814_vm2, %v2366_v37, %v2367_v55  ;;  %v19637_v2 = vrot.slane %v19573_v53, 4  ;;  %v2086_v37 = vrot.slane %v11493_v34, 1 }
 0x248   :  { %19626 = vst [vmem:[#allocation263_spill] sm:$0xff] %v11611_v15  ;;  %v19630_v15 = vrot.slane %v19629_v41, 2  ;;  %19633 = vst [vmem:[#allocation264_spill] sm:$0xff] %v11635_v51  ;;  %v19641_v51 = vld [vmem:[#allocation111_spill] sm:$0xff]  ;;  %v11677_v62 = vpack.i.bf16 %v2367_v55, %v11641_v23  ;;  %v19661_v55 = vld [vmem:[#allocation142_spill] sm:$0xff] }
 0x249   :  { %8211 = vrot.lane.b32.xlu1 %v8210_v45, %s9470_s15  ;;  %v11631_v14 = vpop.permute.xlu0 %8036  ;;  %19635 = vst [vmem:[#allocation266_spill] sm:$0xff] %v11641_v23  ;;  %v19654_v23 = vld [vmem:[#allocation133_spill] sm:$0xff]  ;;  %v19689_v6 = vunpack.i.h.bf16 %v19641_v51  ;;  %v19694_v51 = vpack.i.bf16 %v19616_v3, %v19613_v25 }
 0x24a   :  { %v11629_v33 = vpack.i.bf16 %v19630_v15, %v2444_v60  ;;  %19632 = vst [vmem:[#allocation29_spill] sm:$0xff] %v11631_v14  ;;  %v11638_v45 = vpop.permute.xlu1 %7936  ;;  %v11648_v60 = vsel %vm1982_vm7, %v2018_v4, %v19637_v2  ;;  %v19639_v15 = vrot.slane %v19590_v28, 4  ;;  %v2137_v14 = vrot.slane %v11493_v34, 2  ;;  %19647 = vst [vmem:[#allocation268_spill] sm:$0xff] %v11677_v62  ;;  %v19653_v4 = vld [vmem:[#allocation49_spill] sm:$0xff] }
 0x24b   :  { %19634 = vst [vmem:[#allocation265_spill] sm:$0xff] %v11638_v45  ;;  %19638 = vst [vmem:[#allocation267_spill] sm:$0xff] %v11648_v60  ;;  %8311 = vrot.lane.b32.xlu0 %v8310_v19, %s9470_s15  ;;  %v19642_v2 = vpack.i.bf16 %v10186_v29, %v9955_v47 }
 0x24c   :  { %19631 = vst [vmem:[#allocation27_spill] sm:$0xff] %v11629_v33  ;;  %v2211_v59 = vsel %vm1982_vm7, %v2209_v35, %v19639_v15  ;;  %v19643_v35 = vrot.slane %v19587_v42, 1  ;;  %v19644_v15 = vrot.slane %v19584_v12, 1  ;;  %v19650_v42 = vld [vmem:[#allocation120_spill] sm:$0xff]  ;;  %v11711_v62 = vsel %vm814_vm2, %v2137_v14, %v19661_v55  ;;  %v19701_v55 = vld [vmem:[#allocation99_spill] sm:$0xff] }
 0x24d   :  { %8226 = vrot.lane.b32.xlu1 %v19642_v2, %s9472_s16  ;;  %v11674_v5 = vpop.permute.xlu0 %8046  ;;  %v11680_v47 = vpack.i.bf16 %v2211_v59, %v11648_v60  ;;  %v11686_v2 = vsel %vm1904_vm6, %v2188_v44, %v11496_v38  ;;  %v7744_v12 = vunpack.i.h.bf16 %v19650_v42  ;;  %v19656_v60 = vld [vmem:[#allocation89_spill] sm:$0xff]  ;;  %v19658_v44 = vld [vmem:[#allocation158_spill] sm:$0xff] }
 0x24e   :  { %v11672_v45 = vsel %vm724_vm5, %v19644_v15, %v19643_v35  ;;  %19646 = vst [vmem:[#allocation111_spill] sm:$0xff] %v11674_v5  ;;  %19649 = vst [vmem:[#allocation270_spill] sm:$0xff] %v11686_v2  ;;  %v7743_v35 = vunpack.i.l.bf16 %v19650_v42  ;;  %v11690_v15 = vpop.permute.xlu1 %7976  ;;  %v19655_v5 = vld [vmem:[#allocation148_spill] sm:$0xff]  ;;  %v19657_v29 = vpack.i.bf16 %v19656_v60, %v10197_v18  ;;  %v19659_v42 = vrot.slane %v19590_v28, 1  ;;  %v19698_v28 = vld [vmem:[#allocation82_spill] sm:$0xff] }
 0x24f   :  { %19645 = vst [vmem:[#allocation146_spill] sm:$0xff] %v11672_v45  ;;  %19648 = vst [vmem:[#allocation269_spill] sm:$0xff] %v11680_v47  ;;  %v7749_v18 = vunpack.i.h.bf16 %v19667_v0  ;;  %v2539_v32 = vsel %vm1122_vm3, %v19628_v61, %v7744_v12  ;;  %v2576_v45 = vsel %vm1122_vm3, %v19640_v46, %v19689_v6  ;;  %v19695_v6 = vld [vmem:[#allocation62_spill] sm:$0xff]  ;;  %v3259_v53 = vrot.slane %v19698_v28, 1  ;;  %v19699_v38 = vld [vmem:[#allocation153_spill] sm:$0xff] }
 0x250   :  { %19651 = vst [vmem:[#allocation120_spill] sm:$0xff] %v11690_v15  ;;  %8326 = vrot.lane.b32.xlu0 %v19657_v29, %s9472_s16  ;;  %v11707_v15 = vsel %vm724_vm5, %v2086_v37, %v19659_v42  ;;  %19662 = vst [vmem:[#allocation148_spill] sm:$0xff] %v11711_v62  ;;  %v19676_v42 = vld [vmem:[#allocation52_spill] sm:$0xff]  ;;  %v3285_v62 = vrot.slane %v19655_v5, 1  ;;  %v3286_v28 = vrot.slane %v19673_v39, 1  ;;  %v563_v39 = vld [vmem:[%s18328_s5 + $0x80] sm:$0xff] }
 0x251   :  { %19660 = vst [vmem:[#allocation133_spill] sm:$0xff] %v11707_v15  ;;  %8251 = vrot.lane.b32.xlu1 %v11248_v49, %s9470_s15  ;;  %v11722_v37 = vpop.permute.xlu0 %8051  ;;  %v19678_v49 = vld [vmem:[#allocation137_spill] sm:$0xff]  ;;  %v2551_v57 = vsel %vm1138_vm8, %v2539_v32, %v7749_v18  ;;  %v3250_v32 = vrot.slane %v19696_v9, 1  ;;  %v19697_v18 = vld [vmem:[#allocation100_spill] sm:$0xff]  ;;  %v3277_v9 = vrot.slane %v19654_v23, 1 }
 0x252   :  { %19666 = vst [vmem:[#allocation89_spill] sm:$0xff] %v11722_v37  ;;  %v11731_v47 = vpop.permute.xlu1 %7991  ;;  %v7754_v54 = vunpack.i.h.bf16 %v19678_v49  ;;  %v7753_v14 = vunpack.i.l.bf16 %v19678_v49  ;;  %v3258_v16 = vrot.slane %v19697_v18, 1  ;;  %v19773_v29 = vld [vmem:[#allocation185_spill] sm:$0xff]  ;;  %v19785_v37 = vld [vmem:[#allocation187_spill] sm:$0xff]  ;;  %v19793_v19 = vld [vmem:[#allocation264_spill] sm:$0xff] }
 0x253   :  { %19668 = vst [vmem:[#allocation158_spill] sm:$0xff] %v11731_v47  ;;  %v19801_v18 = vld [vmem:[#allocation199_spill] sm:$0xff] }
 0x254   :  { %8351 = vrot.lane.b32.xlu0 %v11571_v63, %s9470_s15  ;;  %v11803_v36 = vsel %vm1154_vm9, %v2551_v57, %v7754_v54  ;;  %v7768_v54 = vunpack.i.l.bf16 %v19699_v38 }
 0x255   :  { %8256 = vrot.lane.b32.xlu1 %v11285_v11, %s9469_s14  ;;  %v11757_v0 = vpop.permute.xlu0 %8071  ;;  %19692 = vst [vmem:[#allocation144_spill] sm:$0xff] %v11803_v36  ;;  %v19693_v11 = vld [vmem:[#allocation64_spill] sm:$0xff] }
 0x256   :  { %19679 = vst [vmem:[#allocation129_spill] sm:$0xff] %v11757_v0  ;;  %v11761_v26 = vpop.permute.xlu1 %7996  ;;  %v3240_v47 = vrot.slane %v19693_v11, 1 }
 0x257   :  { %19680 = vst [vmem:[#allocation52_spill] sm:$0xff] %v11761_v26  ;;  %v19709_v26 = vrot.slane %v19594_v17, 1 }
 0x258   :  { %8356 = vrot.lane.b32.xlu0 %v11578_v7, %s9469_s14 }
 0x259   :  { %8266 = vrot.lane.b32.xlu1 %v19685_v13, %s9469_s14  ;;  %v11788_v49 = vpop.permute.xlu0 %8081  ;;  %v2538_v13 = vsel %vm1122_vm3, %v19669_v24, %v7743_v35  ;;  %v3241_v35 = vrot.slane %v19695_v6, 1  ;;  %v19703_v6 = vld [vmem:[#allocation145_spill] sm:$0xff] }
 0x25a   :  { %19688 = vst [vmem:[#allocation73_spill] sm:$0xff] %v11788_v49  ;;  %v11799_v33 = vpop.permute.xlu1 %8001  ;;  %v2550_v12 = vsel %vm1138_vm8, %v2538_v13, %v7748_v40  ;;  %v7769_v40 = vunpack.i.h.bf16 %v19699_v38  ;;  %v19700_v13 = vld [vmem:[#allocation101_spill] sm:$0xff]  ;;  %v3276_v49 = vrot.slane %v19703_v6, 1  ;;  %v2591_v38 = vsel %vm1138_vm8, %v2576_v45, %v7759_v22  ;;  %v564_v22 = vld [vmem:[%s18328_s5 + $0x88] sm:$0xff] }
 0x25b   :  { %19691 = vst [vmem:[#allocation137_spill] sm:$0xff] %v11799_v33  ;;  %v3267_v57 = vrot.slane %v19700_v13, 1  ;;  %v3268_v33 = vrot.slane %v19701_v55, 1  ;;  %v19706_v6 = vpack.i.bf16 %v11533_v10, %v11225_v30  ;;  %v11845_v45 = vsel %vm1154_vm9, %v2591_v38, %v7764_v50  ;;  %v548_v50 = vld [vmem:[%s18328_s5 + $0x8] sm:$0xff]  ;;  %v19711_v38 = vld [vmem:[#allocation36_spill] sm:$0xff]  ;;  %v575_v13 = vld [vmem:[%s18328_s5 + $0xe0] sm:$0xff] }
 0x25c   :  { %8366 = vrot.lane.b32.xlu0 %v19694_v51, %s9470_s15  ;;  %19707 = vst [vmem:[#allocation63_spill] sm:$0xff] %v11845_v45  ;;  %v11854_v30 = vsel %vm724_vm5, %v19709_v26, %v3250_v32  ;;  %v7491_v10 = vpack.c.bf16 %v564_v22, %v563_v39  ;;  %v19715_v32 = vld [vmem:[#allocation37_spill] sm:$0xff]  ;;  %v11881_v55 = vsel %vm724_vm5, %v3276_v49, %v3277_v9  ;;  %v565_v9 = vld [vmem:[%s18328_s5 + $0x90] sm:$0xff] }
 0x25d   :  { %8276 = vrot.lane.b32.xlu1 %v11358_v21, %s9470_s15  ;;  %v11820_v51 = vpop.permute.xlu0 %8086  ;;  %v11830_v21 = vsel %vm1154_vm9, %v2550_v12, %v7753_v14  ;;  %v11849_v12 = vsel %vm724_vm5, %v3240_v47, %v3241_v35  ;;  %19710 = vst [vmem:[#allocation153_spill] sm:$0xff] %v11854_v30  ;;  %v11866_v47 = vsel %vm1122_vm3, %v19711_v38, %v7768_v54  ;;  %19716 = vst [vmem:[#allocation37_spill] sm:$0xff] %v11881_v55  ;;  %v19718_v54 = vld [vmem:[#allocation155_spill] sm:$0xff]  ;;  %v550_v55 = vld [vmem:[%s18328_s5 + $0x18] sm:$0xff] }
 0x25e   :  { %19702 = vst [vmem:[#allocation150_spill] sm:$0xff] %v11820_v51  ;;  %v11826_v0 = vpop.permute.xlu1 %8006  ;;  %19705 = vst [vmem:[#allocation62_spill] sm:$0xff] %v11830_v21  ;;  %v11869_v35 = vsel %vm724_vm5, %v3258_v16, %v3259_v53  ;;  %v11872_v26 = vsel %vm724_vm5, %v3267_v57, %v3268_v33  ;;  %v11878_v22 = vsel %vm1122_vm3, %v19715_v32, %v7769_v40  ;;  %v19719_v53 = vld [vmem:[#allocation163_spill] sm:$0xff]  ;;  %v19720_v57 = vld [vmem:[#allocation166_spill] sm:$0xff]  ;;  %7492 = vmatprep.subr.bf16.mxu1 %v7491_v10 }
 0x25f   :  { %19704 = vst [vmem:[#allocation64_spill] sm:$0xff] %v11826_v0  ;;  %19708 = vst [vmem:[#allocation82_spill] sm:$0xff] %v11849_v12  ;;  %v11884_v14 = vsel %vm724_vm5, %v3285_v62, %v3286_v28  ;;  %v7734_v16 = vunpack.i.h.bf16 %v19719_v53  ;;  %v7733_v33 = vunpack.i.l.bf16 %v19719_v53  ;;  %v7778_v40 = vunpack.i.l.bf16 %v19718_v54  ;;  %v566_v28 = vld [vmem:[%s18328_s5 + $0x98] sm:$0xff]  ;;  %v19723_v10 = vld [vmem:[#allocation159_spill] sm:$0xff] }
 0x260   :  { %8371 = vrot.lane.b32.xlu0 %v19706_v6, %s9469_s14  ;;  %v547_v6 = vld [vmem:[%s18328_s5] sm:$0xff]  ;;  %19712 = vst [vmem:[#allocation99_spill] sm:$0xff] %v11869_v35  ;;  %19713 = vst [vmem:[#allocation36_spill] sm:$0xff] %v11872_v26  ;;  %v7818_v26 = vunpack.i.l.bf16 %v19720_v57  ;;  %v7819_v62 = vunpack.i.h.bf16 %v19720_v57  ;;  %v7724_v32 = vunpack.i.h.bf16 %v19723_v10  ;;  %v19725_v57 = vpack.i.bf16 %v11469_v58, %v11480_v20  ;;  %v19726_v12 = vld [vmem:[#allocation160_spill] sm:$0xff] }
 0x261   :  { %8281 = vrot.lane.b32.xlu1 %v11443_v43, %s9469_s14  ;;  %v11874_v43 = vpop.permute.xlu0 %8091  ;;  %v7493_v39 = vpack.c.bf16 %v548_v50, %v547_v6  ;;  %19717 = vst [vmem:[#allocation272_spill] sm:$0xff] %v11884_v14  ;;  %v19722_v6 = vld [vmem:[#allocation167_spill] sm:$0xff]  ;;  %v19724_v53 = vld [vmem:[#allocation169_spill] sm:$0xff]  ;;  %v7723_v30 = vunpack.i.l.bf16 %v19723_v10  ;;  %v7804_v36 = vunpack.i.h.bf16 %v19726_v12  ;;  %v19732_v51 = vld [vmem:[#allocation170_spill] sm:$0xff] }
 0x262   :  { %19714 = vst [vmem:[#allocation271_spill] sm:$0xff] %v11874_v43  ;;  %v11890_v35 = vpop.permute.xlu1 %8016  ;;  %v7739_v50 = vunpack.i.h.bf16 %v19722_v6  ;;  %v7738_v49 = vunpack.i.l.bf16 %v19722_v6  ;;  %v7824_v38 = vunpack.i.h.bf16 %v19724_v53  ;;  %v7823_v6 = vunpack.i.l.bf16 %v19724_v53  ;;  %v549_v14 = vld [vmem:[%s18328_s5 + $0x10] sm:$0xff]  ;;  %v19731_v0 = vld [vmem:[#allocation25_spill] sm:$0xff] }
 0x263   :  { %19721 = vst [vmem:[#allocation155_spill] sm:$0xff] %v11890_v35  ;;  %7494 = vmatpush3.bf16.msra.mxu1 %v7493_v39  ;;  %v7495_v39 = vpack.c.bf16 %v566_v28, %v565_v9  ;;  %v7803_v53 = vunpack.i.l.bf16 %v19726_v12  ;;  %v7497_v45 = vpack.c.bf16 %v550_v55, %v549_v14  ;;  %v19728_v9 = vld [vmem:[#allocation48_spill] sm:$0xff]  ;;  %v19730_v35 = vld [vmem:[#allocation51_spill] sm:$0xff]  ;;  %v1125_v10 = vsel %vm1122_vm3, %v19731_v0, %v7818_v26  ;;  %v567_v55 = vld [vmem:[%s18328_s5 + $0xa0] sm:$0xff] }
 0x264   :  { %8381 = vrot.lane.b32.xlu0 %v11623_v8, %s9470_s15  ;;  %v7808_v28 = vunpack.i.l.bf16 %v19728_v9  ;;  %v1124_v43 = vsel %vm1122_vm3, %v19730_v35, %v7734_v16  ;;  %v7774_v15 = vunpack.i.h.bf16 %v19732_v51  ;;  %v568_v14 = vld [vmem:[%s18328_s5 + $0xa8] sm:$0xff] }
 0x265   :  { %8316 = vrot.lane.b32.xlu1 %v19725_v57, %s9472_s16  ;;  %v11920_v21 = vpop.permute.xlu0 %8106  ;;  %v1123_v57 = vsel %vm1122_vm3, 0.0, %v7733_v33  ;;  %7496 = vmatprep.subr.bf16.mxu1 %v7495_v39  ;;  %v1140_v35 = vsel %vm1138_vm8, %v1124_v43, %v7739_v50  ;;  %v19734_v26 = vld [vmem:[#allocation30_spill] sm:$0xff]  ;;  %v7773_v33 = vunpack.i.l.bf16 %v19732_v51  ;;  %v1141_v43 = vsel %vm1138_vm8, %v1125_v10, %v7823_v6  ;;  %v19743_v6 = vld [vmem:[#allocation173_spill] sm:$0xff] }
 0x266   :  { %19727 = vst [vmem:[#allocation163_spill] sm:$0xff] %v11920_v21  ;;  %v11924_v27 = vpop.permute.xlu1 %8021  ;;  %v11940_v12 = vsel %vm1138_vm8, %v1123_v57, %v7738_v49  ;;  %v1126_v16 = vsel %vm1122_vm3, %v19734_v26, %v7819_v62  ;;  %v7499_v21 = vpack.c.bf16 %v568_v14, %v567_v55  ;;  %v552_v49 = vld [vmem:[%s18328_s5 + $0x28] sm:$0xff]  ;;  %v3045_v51 = vsel %vm1122_vm3, %v19653_v4, %v7804_v36  ;;  %v553_v14 = vld [vmem:[%s18328_s5 + $0x30] sm:$0xff] }
 0x267   :  { %19729 = vst [vmem:[#allocation166_spill] sm:$0xff] %v11924_v27  ;;  %7498 = vmatpush3.bf16.msra.mxu1 %v7497_v45  ;;  %19733 = vst [vmem:[#allocation167_spill] sm:$0xff] %v11940_v12  ;;  %v19735_v45 = vld [vmem:[#allocation91_spill] sm:$0xff]  ;;  %v551_v27 = vld [vmem:[%s18328_s5 + $0x20] sm:$0xff]  ;;  %v1142_v50 = vsel %vm1138_vm8, %v1126_v16, %v7824_v38  ;;  %v11969_v26 = vsel %vm1138_vm8, %v3045_v51, %v7808_v28  ;;  %v11975_v36 = vsel %vm1154_vm9, %v11940_v12, %v7723_v30 }
 0x268   :  { %8386 = vrot.lane.b32.xlu0 %v11616_v48, %s9469_s14  ;;  %v19736_v39 = vpack.i.bf16 %v19735_v45, %v19656_v60  ;;  %v11962_v60 = vsel %vm1122_vm3, %v19629_v41, %v7803_v53  ;;  %7500 = vmatprep.subr.bf16.mxu1 %v7499_v21  ;;  %v7501_v38 = vpack.c.bf16 %v552_v49, %v551_v27  ;;  %v7874_v53 = vunpack.i.h.bf16 %v19743_v6  ;;  %v19744_v16 = vld [vmem:[#allocation94_spill] sm:$0xff]  ;;  %v569_v28 = vld [vmem:[%s18328_s5 + $0xb0] sm:$0xff]  ;;  %v570_v27 = vld [vmem:[%s18328_s5 + $0xb8] sm:$0xff] }
 0x269   :  { %19737 = vst [vmem:[#allocation159_spill] sm:$0xff] %v11962_v60  ;;  %v11965_v57 = vpop.permute.xlu0 %8111  ;;  %19741 = vst [vmem:[#allocation48_spill] sm:$0xff] %v11975_v36  ;;  %v11978_v41 = vsel %vm1154_vm9, %v1140_v35, %v7724_v32  ;;  %v7873_v10 = vunpack.i.l.bf16 %v19743_v6  ;;  %v11991_v21 = vsel %vm1154_vm9, %v1141_v43, %v7778_v40  ;;  %v19746_v30 = vunpack.i.h.bf16 %v19718_v54  ;;  %v19748_v35 = vld [vmem:[#allocation175_spill] sm:$0xff]  ;;  %v554_v54 = vld [vmem:[%s18328_s5 + $0x38] sm:$0xff] }
 0x26a   :  { %8321 = vrot.lane.b32.xlu1 %v19736_v39, %s9470_s15  ;;  %19738 = vst [vmem:[#allocation169_spill] sm:$0xff] %v11965_v57  ;;  %v11971_v39 = vpop.permute.xlu1 %8026  ;;  %19742 = vst [vmem:[#allocation51_spill] sm:$0xff] %v11978_v41  ;;  %v7789_v49 = vunpack.i.h.bf16 %v19748_v35  ;;  %v19749_v51 = vld [vmem:[#allocation43_spill] sm:$0xff]  ;;  %v1555_v40 = vld [vmem:[%s18329_s6 + $0x80] sm:$0xff]  ;;  %v7788_v62 = vunpack.i.l.bf16 %v19748_v35  ;;  %v7505_v60 = vpack.c.bf16 %v554_v54, %v553_v14 }
 0x26b   :  { %19740 = vst [vmem:[#allocation160_spill] sm:$0xff] %v11971_v39  ;;  %19745 = vst [vmem:[#allocation25_spill] sm:$0xff] %v11991_v21  ;;  %v11996_v32 = vsel %vm1154_vm9, %v1142_v50, %v19746_v30  ;;  %v19750_v6 = vpack.i.bf16 %v11480_v20, %v19749_v51  ;;  %7502 = vmatpush3.bf16.msra.mxu1 %v7501_v38  ;;  %v19751_v43 = vld [vmem:[#allocation32_spill] sm:$0xff]  ;;  %v19753_v30 = vld [vmem:[#allocation33_spill] sm:$0xff] }
 0x26c   :  { %1014 = vrot.lane.b32.xlu0 %v19744_v16, %s9472_s16  ;;  %19747 = vst [vmem:[#allocation170_spill] sm:$0xff] %v11996_v32  ;;  %v7503_v16 = vpack.c.bf16 %v570_v27, %v569_v28  ;;  %v12014_v50 = vsel %vm1122_vm3, %v19751_v43, %v7773_v33  ;;  %v12018_v38 = vsel %vm1122_vm3, %v19753_v30, %v7774_v15  ;;  %v19754_v28 = vld [vmem:[#allocation172_spill] sm:$0xff]  ;;  %v1556_v20 = vld [vmem:[%s18329_s6 + $0x88] sm:$0xff]  ;;  %v1539_v33 = vld [vmem:[%s18329_s6] sm:$0xff] }
 0x26d   :  { %19752 = vst [vmem:[#allocation30_spill] sm:$0xff] %v12014_v50  ;;  %v12023_v55 = vpop.permute.xlu0 %8116  ;;  %v19756_v51 = vld [vmem:[#allocation44_spill] sm:$0xff]  ;;  %v19757_v50 = vld [vmem:[#allocation182_spill] sm:$0xff]  ;;  %v7531_v27 = vpack.c.bf16 %v1556_v20, %v1555_v40  ;;  %v571_v20 = vld [vmem:[%s18328_s5 + $0xc0] sm:$0xff] }
 0x26e   :  { %8331 = vrot.lane.b32.xlu1 %v19750_v6, %s9469_s14  ;;  %19755 = vst [vmem:[#allocation173_spill] sm:$0xff] %v12023_v55  ;;  %v7793_v15 = vunpack.i.l.bf16 %v19757_v50  ;;  %v12031_v30 = vpop.permute.xlu1 %8041  ;;  %7504 = vmatprep.subr.bf16.mxu1 %v7503_v16  ;;  %v7794_v6 = vunpack.i.h.bf16 %v19757_v50  ;;  %v19759_v35 = vld [vmem:[#allocation184_spill] sm:$0xff]  ;;  %v1540_v43 = vld [vmem:[%s18329_s6 + $0x8] sm:$0xff]  ;;  %v19767_v41 = vld [vmem:[#allocation69_spill] sm:$0xff] }
 0x26f   :  { %19758 = vst [vmem:[#allocation94_spill] sm:$0xff] %v12031_v30  ;;  %v19760_v14 = vld [vmem:[#allocation140_spill] sm:$0xff]  ;;  %v19762_v16 = vld [vmem:[#allocation86_spill] sm:$0xff]  ;;  %v7893_v21 = vunpack.i.l.bf16 %v19759_v35  ;;  %v7814_v36 = vunpack.i.h.bf16 %v19767_v41  ;;  %7506 = vmatpush3.bf16.msra.mxu1 %v7505_v60  ;;  %v7533_v12 = vpack.c.bf16 %v1540_v43, %v1539_v33  ;;  %7532 = vmatprep.subr.bf16.mxu0 %v7531_v27  ;;  %v1557_v60 = vld [vmem:[%s18329_s6 + $0x90] sm:$0xff]  ;;  %v12085_v43 = vsel %vm1122_vm3, %v19616_v3, %v7788_v62 }
 0x270   :  { %v19761_v54 = vpack.i.bf16 %v19628_v61, %v19760_v14  ;;  %v12050_v40 = vsel %vm1122_vm3, %v19762_v16, %v7873_v10  ;;  %v19763_v50 = vld [vmem:[#allocation88_spill] sm:$0xff]  ;;  %v19765_v14 = vld [vmem:[#allocation59_spill] sm:$0xff]  ;;  %v572_v10 = vld [vmem:[%s18328_s5 + $0xc8] sm:$0xff]  ;;  %v12097_v24 = vsel %vm1138_vm8, %v11866_v47, %v7793_v15  ;;  %v19774_v62 = vunpack.i.h.bf16 %v19759_v35 }
 0x271   :  { %v12054_v61 = vsel %vm1122_vm3, %v19763_v50, %v7874_v53  ;;  %v555_v53 = vld [vmem:[%s18328_s5 + $0x40] sm:$0xff]  ;;  %v556_v16 = vld [vmem:[%s18328_s5 + $0x48] sm:$0xff]  ;;  %v19768_v50 = vld [vmem:[#allocation188_spill] sm:$0xff]  ;;  %v12075_v30 = vpop.permute.xlu0 %8131  ;;  %7534 = vmatpush3.bf16.msra.mxu0 %v7533_v12 }
 0x272   :  { %8421 = vrot.lane.b32.xlu0 %v19761_v54, %s9469_s14  ;;  %19764 = vst [vmem:[#allocation175_spill] sm:$0xff] %v12054_v61  ;;  %v19766_v54 = vrot.slane %v19765_v14, 7  ;;  %8336 = vrot.lane.b32.xlu1 %v11571_v63, %s9472_s16  ;;  %19769 = vst [vmem:[#allocation32_spill] sm:$0xff] %v12075_v30  ;;  %v7507_v63 = vpack.c.bf16 %v572_v10, %v571_v20  ;;  %v1558_v33 = vld [vmem:[%s18329_s6 + $0x98] sm:$0xff]  ;;  %v19770_v55 = vld [vmem:[#allocation47_spill] sm:$0xff]  ;;  %v12093_v20 = vpop.permute.xlu1 %8056  ;;  %v7509_v10 = vpack.c.bf16 %v556_v16, %v555_v53 }
 0x273   :  { %v12089_v57 = vsel %vm1122_vm3, %v19770_v55, %v7789_v49  ;;  %v19771_v39 = vld [vmem:[#allocation181_spill] sm:$0xff]  ;;  %19772 = vst [vmem:[#allocation33_spill] sm:$0xff] %v12093_v20  ;;  %v19775_v55 = vld [vmem:[#allocation66_spill] sm:$0xff]  ;;  %v19777_v27 = vld [vmem:[#allocation27_spill] sm:$0xff]  ;;  %v12121_v53 = vsel %vm1138_vm8, %v11878_v22, %v7794_v6  ;;  %v7535_v59 = vpack.c.bf16 %v1558_v33, %v1557_v60  ;;  %v12138_v22 = vsel %vm1154_vm9, %v11969_v26, %v7814_v36 }
 0x274   :  { %v12059_v32 = vsel %vm1122_vm3, %v19766_v54, %v7789_v49  ;;  %v7828_v54 = vunpack.i.l.bf16 %v19768_v50  ;;  %v19776_v49 = vrot.slane %v19775_v55, 7  ;;  %7508 = vmatprep.subr.bf16.mxu1 %v7507_v63  ;;  %v1541_v47 = vld [vmem:[%s18329_s6 + $0x10] sm:$0xff]  ;;  %v1542_v12 = vld [vmem:[%s18329_s6 + $0x18] sm:$0xff]  ;;  %v19784_v33 = vld [vmem:[#allocation102_spill] sm:$0xff] }
 0x275   :  { %v573_v15 = vld [vmem:[%s18328_s5 + $0xd0] sm:$0xff]  ;;  %v19778_v16 = vld [vmem:[#allocation60_spill] sm:$0xff]  ;;  %7510 = vmatpush3.bf16.msra.mxu1 %v7509_v10  ;;  %v12140_v6 = vpop.permute.xlu0 %8151  ;;  %v19783_v10 = vld [vmem:[#allocation57_spill] sm:$0xff]  ;;  %7536 = vmatprep.subr.bf16.mxu0 %v7535_v59  ;;  %v19795_v59 = vunpack.i.l.bf16 %v19756_v51 }
 0x276   :  { %v12106_v30 = vsel %vm1122_vm3, %v19776_v49, %v19774_v62  ;;  %8426 = vrot.lane.b32.xlu0 %v19777_v27, %s9470_s15  ;;  %v19779_v62 = vrot.slane %v19778_v16, 7  ;;  %v7829_v27 = vunpack.i.h.bf16 %v19768_v50  ;;  %8341 = vrot.lane.b32.xlu1 %v11578_v7, %s9470_s15  ;;  %v12131_v49 = vpop.f32.mrb[24].mxu0  ;;  %v574_v3 = vld [vmem:[%s18328_s5 + $0xd8] sm:$0xff]  ;;  %19781 = vst [vmem:[#allocation182_spill] sm:$0xff] %v12140_v6  ;;  %v7537_v50 = vpack.c.bf16 %v1542_v12, %v1541_v47  ;;  %v557_v7 = vld [vmem:[%s18328_s5 + $0x50] sm:$0xff] }
 0x277   :  { %19780 = vst [vmem:[#allocation44_spill] sm:$0xff] %v12131_v49  ;;  %v7511_v20 = vpack.c.bf16 %v574_v3, %v573_v15  ;;  %v1172_v60 = vsel %vm1122_vm3, %v19783_v10, %v7828_v54  ;;  %v12151_v49 = vsel %vm1122_vm3, %v19784_v33, %v7893_v21  ;;  %v19786_v6 = vld [vmem:[#allocation195_spill] sm:$0xff]  ;;  %v558_v3 = vld [vmem:[%s18328_s5 + $0x58] sm:$0xff]  ;;  %v1559_v54 = vld [vmem:[%s18329_s6 + $0xa0] sm:$0xff]  ;;  %v19788_v47 = vunpack.i.h.bf16 %v19759_v35 }
 0x278   :  { %v12126_v63 = vsel %vm1122_vm3, %v19779_v62, %v7893_v21  ;;  %v12142_v62 = vpop.f32.mrb[25].mxu0  ;;  %v7933_v45 = vunpack.i.l.bf16 %v19786_v6  ;;  %v1560_v21 = vld [vmem:[%s18329_s6 + $0xa8] sm:$0xff]  ;;  %v19789_v12 = vld [vmem:[#allocation103_spill] sm:$0xff]  ;;  %7538 = vmatpush3.bf16.msra.mxu0 %v7537_v50  ;;  %v7838_v35 = vunpack.i.l.bf16 %v19792_v31  ;;  %v1188_v33 = vsel %vm1138_vm8, %v1172_v60, %v19795_v59  ;;  %v19796_v26 = vld [vmem:[#allocation56_spill] sm:$0xff] }
 0x279   :  { %19782 = vst [vmem:[#allocation184_spill] sm:$0xff] %v12142_v62  ;;  %v12156_v62 = vpop.permute.xlu1 %8061  ;;  %v12171_v15 = vsel %vm1122_vm3, %v19789_v12, %v19788_v47  ;;  %v19791_v36 = vld [vmem:[#allocation143_spill] sm:$0xff]  ;;  %v12183_v47 = vpop.f32.mrb[26].mxu0  ;;  %7512 = vmatprep.subr.bf16.mxu1 %v7511_v20  ;;  %v1543_v12 = vld [vmem:[%s18329_s6 + $0x20] sm:$0xff]  ;;  %v1544_v50 = vld [vmem:[%s18329_s6 + $0x28] sm:$0xff]  ;;  %v1173_v31 = vsel %vm1122_vm3, %v19796_v26, %v7829_v27  ;;  %v7513_v10 = vpack.c.bf16 %v558_v3, %v557_v7  ;;  %v7849_v3 = vunpack.i.h.bf16 %v19801_v18 }
 0x27a   :  { %19787 = vst [vmem:[#allocation140_spill] sm:$0xff] %v12156_v62  ;;  %8431 = vrot.lane.b32.xlu0 %v19791_v36, %s9472_s16  ;;  %8346 = vrot.lane.b32.xlu1 %v19793_v19, %s9469_s14  ;;  %19794 = vst [vmem:[#allocation86_spill] sm:$0xff] %v12183_v47  ;;  %v19797_v62 = vld [vmem:[#allocation196_spill] sm:$0xff]  ;;  %v7934_v47 = vunpack.i.h.bf16 %v19786_v6  ;;  %v12198_v20 = vpop.permute.xlu0 %8156  ;;  %v12200_v36 = vpop.f32.mrb[27].mxu0  ;;  %v7539_v4 = vpack.c.bf16 %v1560_v21, %v1559_v54  ;;  %v576_v60 = vld [vmem:[%s18328_s5 + $0xe8] sm:$0xff]  ;;  %v7848_v6 = vunpack.i.l.bf16 %v19801_v18  ;;  %v19807_v18 = vunpack.i.h.bf16 %v19756_v51 }
 0x27b   :  { %v7843_v41 = vunpack.i.l.bf16 %v19797_v62  ;;  %19798 = vst [vmem:[#allocation88_spill] sm:$0xff] %v12198_v20  ;;  %19799 = vst [vmem:[#allocation188_spill] sm:$0xff] %v12200_v36  ;;  %v19800_v59 = vld [vmem:[#allocation192_spill] sm:$0xff]  ;;  %v7844_v26 = vunpack.i.h.bf16 %v19797_v62  ;;  %v19803_v20 = vld [vmem:[#allocation110_spill] sm:$0xff]  ;;  %7514 = vmatpush3.bf16.msra.mxu1 %v7513_v10  ;;  %v7541_v21 = vpack.c.bf16 %v1544_v50, %v1543_v12  ;;  %v19805_v36 = vunpack.i.h.bf16 %v19754_v28  ;;  %v12237_v12 = vpop.f32.mrb[28].mxu0 }
 0x27c   :  { %v1174_v7 = vsel %vm1122_vm3, %v19803_v20, %v7933_v45  ;;  %v19804_v54 = vld [vmem:[#allocation268_spill] sm:$0xff]  ;;  %v559_v27 = vld [vmem:[%s18328_s5 + $0x60] sm:$0xff]  ;;  %v560_v62 = vld [vmem:[%s18328_s5 + $0x68] sm:$0xff]  ;;  %v12232_v45 = vsel %vm1138_vm8, %v1173_v31, %v19807_v18  ;;  %19808 = vst [vmem:[#allocation185_spill] sm:$0xff] %v12237_v12  ;;  %7540 = vmatprep.subr.bf16.mxu0 %v7539_v4  ;;  %v7515_v50 = vpack.c.bf16 %v576_v60, %v575_v13  ;;  %v12246_v31 = vpop.f32.mrb[29].mxu0 }
 0x27d   :  { %v12211_v61 = vpop.permute.xlu1 %8066  ;;  %v2540_v20 = vsel %vm1122_vm3, %v19765_v14, %v7838_v35  ;;  %19811 = vst [vmem:[#allocation57_spill] sm:$0xff] %v12246_v31  ;;  %7542 = vmatpush3.bf16.msra.mxu0 %v7541_v21  ;;  %v1562_v4 = vld [vmem:[%s18329_s6 + $0xb8] sm:$0xff]  ;;  %v1545_v13 = vld [vmem:[%s18329_s6 + $0x30] sm:$0xff]  ;;  %v7517_v31 = vpack.c.bf16 %v560_v62, %v559_v27 }
 0x27e   :  { %19802 = vst [vmem:[#allocation47_spill] sm:$0xff] %v12211_v61  ;;  %8436 = vrot.lane.b32.xlu0 %v19804_v54, %s9470_s15  ;;  %v12227_v61 = vsel %vm1154_vm9, %v1188_v33, %v19805_v36  ;;  %8361 = vrot.lane.b32.xlu1 %v11623_v8, %s9472_s16  ;;  %v2541_v36 = vsel %vm1122_vm3, %v19778_v16, %v7839_v1  ;;  %v19809_v33 = vld [vmem:[#allocation198_spill] sm:$0xff]  ;;  %v1561_v8 = vld [vmem:[%s18329_s6 + $0xb0] sm:$0xff]  ;;  %v19812_v1 = vunpack.i.l.bf16 %v19771_v39  ;;  %v19814_v60 = vld [vmem:[#allocation108_spill] sm:$0xff] }
 0x27f   :  { %19806 = vst [vmem:[#allocation181_spill] sm:$0xff] %v12227_v61  ;;  %v7943_v51 = vunpack.i.l.bf16 %v19809_v33  ;;  %v12244_v61 = vpop.permute.xlu0 %8166  ;;  %v1175_v21 = vsel %vm1122_vm3, %v19814_v60, %v7934_v47  ;;  %v2552_v18 = vsel %vm1138_vm8, %v2540_v20, %v7843_v41  ;;  %v7944_v10 = vunpack.i.h.bf16 %v19809_v33  ;;  %7516 = vmatprep.subr.bf16.mxu1 %v7515_v50  ;;  %v1546_v16 = vld [vmem:[%s18329_s6 + $0x38] sm:$0xff]  ;;  %v19817_v33 = vld [vmem:[#allocation201_spill] sm:$0xff]  ;;  %v19819_v60 = vld [vmem:[#allocation58_spill] sm:$0xff] }
 0x280   :  { %19810 = vst [vmem:[#allocation27_spill] sm:$0xff] %v12244_v61  ;;  %v12260_v35 = vsel %vm1138_vm8, %v1174_v7, %v19812_v1  ;;  %v577_v7 = vld [vmem:[%s18328_s5 + $0xf0] sm:$0xff]  ;;  %v578_v47 = vld [vmem:[%s18328_s5 + $0xf8] sm:$0xff]  ;;  %v12278_v41 = vsel %vm1154_vm9, %v2552_v18, %v7848_v6  ;;  %v2553_v20 = vsel %vm1138_vm8, %v2541_v36, %v7844_v26  ;;  %v7854_v50 = vunpack.i.h.bf16 %v19817_v33  ;;  %v19823_v61 = vld [vmem:[#allocation206_spill] sm:$0xff]  ;;  %7518 = vmatpush3.bf16.msra.mxu1 %v7517_v31 }
 0x281   :  { %19813 = vst [vmem:[#allocation102_spill] sm:$0xff] %v12260_v35  ;;  %v12266_v12 = vpop.permute.xlu1 %8076  ;;  %19816 = vst [vmem:[#allocation195_spill] sm:$0xff] %v12278_v41  ;;  %v19818_v27 = vld [vmem:[#allocation200_spill] sm:$0xff]  ;;  %v12289_v54 = vsel %vm1154_vm9, %v2553_v20, %v7849_v3  ;;  %v7543_v26 = vpack.c.bf16 %v1562_v4, %v1561_v8  ;;  %v7545_v6 = vpack.c.bf16 %v1546_v16, %v1545_v13  ;;  %v561_v36 = vld [vmem:[%s18328_s5 + $0x70] sm:$0xff]  ;;  %v19824_v18 = vunpack.i.h.bf16 %v19771_v39 }
 0x282   :  { %19815 = vst [vmem:[#allocation187_spill] sm:$0xff] %v12266_v12  ;;  %v7949_v62 = vunpack.i.h.bf16 %v19818_v27  ;;  %v7948_v1 = vunpack.i.l.bf16 %v19818_v27  ;;  %v19820_v14 = vld [vmem:[#allocation248_spill] sm:$0xff]  ;;  %19822 = vst [vmem:[#allocation103_spill] sm:$0xff] %v12289_v54  ;;  %v7953_v12 = vunpack.i.l.bf16 %v19823_v61  ;;  %8376 = vrot.lane.b32.xlu1 %v19793_v19, %s9472_s16  ;;  %v7954_v20 = vunpack.i.h.bf16 %v19823_v61  ;;  %v1563_v16 = vld [vmem:[%s18329_s6 + $0xc0] sm:$0xff] }
 0x283   :  { %v19821_v28 = vpack.i.bf16 %v19819_v60, %v19820_v14  ;;  %v12300_v27 = vsel %vm1138_vm8, %v1175_v21, %v19824_v18  ;;  %v12304_v60 = vpop.permute.xlu0 %8176  ;;  %v7519_v35 = vpack.c.bf16 %v578_v47, %v577_v7  ;;  %v562_v19 = vld [vmem:[%s18328_s5 + $0x78] sm:$0xff]  ;;  %v1564_v39 = vld [vmem:[%s18329_s6 + $0xc8] sm:$0xff]  ;;  %v2542_v31 = vsel %vm1122_vm3, %v19775_v55, %v7943_v51  ;;  %7544 = vmatprep.subr.bf16.mxu0 %v7543_v26  ;;  %v1547_v4 = vld [vmem:[%s18329_s6 + $0x40] sm:$0xff] }
 0x284   :  { %19826 = vst [vmem:[#allocation193_spill] sm:$0xff] %v12304_v60  ;;  %v7853_v61 = vunpack.i.l.bf16 %v19817_v33  ;;  %v1548_v13 = vld [vmem:[%s18329_s6 + $0x48] sm:$0xff]  ;;  %v3243_v21 = vrot.slane %v12278_v41, 1  ;;  %v3126_v33 = vsel %vm1138_vm8, %v12059_v32, %v7854_v50  ;;  %v19829_v18 = vld [vmem:[#allocation92_spill] sm:$0xff]  ;;  %7546 = vmatpush3.bf16.msra.mxu0 %v7545_v6  ;;  %v7547_v32 = vpack.c.bf16 %v1564_v39, %v1563_v16 }
 0x285   :  { %8441 = vrot.lane.b32.xlu0 %v19821_v28, %s9472_s16  ;;  %v19825_v28 = vld [vmem:[#allocation207_spill] sm:$0xff]  ;;  %v12318_v8 = vpop.permute.xlu1 %8096  ;;  %v19828_v47 = vld [vmem:[#allocation70_spill] sm:$0xff]  ;;  %v19830_v55 = vpack.i.bf16 %v19731_v0, %v19829_v18  ;;  %v19831_v60 = vld [vmem:[#allocation212_spill] sm:$0xff]  ;;  %7520 = vmatprep.subr.bf16.mxu1 %v7519_v35  ;;  %v2593_v16 = vsel %vm1138_vm8, %v12089_v57, %v7854_v50  ;;  %v19836_v39 = vpack.i.bf16 %v19820_v14, %v11469_v58 }
 0x286   :  { %v7859_v3 = vunpack.i.h.bf16 %v19825_v28  ;;  %19827 = vst [vmem:[#allocation264_spill] sm:$0xff] %v12318_v8  ;;  %v2543_v51 = vsel %vm1122_vm3, %v19828_v47, %v7944_v10  ;;  %v7858_v26 = vunpack.i.l.bf16 %v19825_v28  ;;  %v2554_v8 = vsel %vm1138_vm8, %v2542_v31, %v7948_v1  ;;  %8391 = vrot.lane.b32.xlu1 %v11616_v48, %s9470_s15  ;;  %v19835_v35 = vld [vmem:[#allocation7_spill] sm:$0xff]  ;;  %7548 = vmatprep.subr.bf16.mxu0 %v7547_v32  ;;  %v19841_v57 = vld [vmem:[#allocation217_spill] sm:$0xff] }
 0x287   :  { %v2555_v41 = vsel %vm1138_vm8, %v2543_v51, %v7949_v62  ;;  %v7863_v7 = vunpack.i.l.bf16 %v19831_v60  ;;  %v7521_v10 = vpack.c.bf16 %v562_v19, %v561_v36  ;;  %v12343_v28 = vsel %vm1154_vm9, %v2554_v8, %v7953_v12  ;;  %v12346_v0 = vpop.permute.xlu0 %8181  ;;  %v1565_v62 = vld [vmem:[%s18329_s6 + $0xd0] sm:$0xff] }
 0x288   :  { %19832 = vst [vmem:[#allocation56_spill] sm:$0xff] %v12343_v28  ;;  %v7864_v47 = vunpack.i.h.bf16 %v19831_v60  ;;  %v12352_v1 = vsel %vm1154_vm9, %v2555_v41, %v7954_v20  ;;  %v12355_v48 = vsel %vm1154_vm9, %v3126_v33, %v7859_v3  ;;  %v7959_v6 = vunpack.i.h.bf16 %v19835_v35  ;;  %v1566_v60 = vld [vmem:[%s18329_s6 + $0xd8] sm:$0xff]  ;;  %v1549_v41 = vld [vmem:[%s18329_s6 + $0x50] sm:$0xff] }
 0x289   :  { %8446 = vrot.lane.b32.xlu0 %v19830_v55, %s9470_s15  ;;  %v7549_v55 = vpack.c.bf16 %v1548_v13, %v1547_v4  ;;  %19833 = vst [vmem:[#allocation196_spill] sm:$0xff] %v12352_v1  ;;  %19834 = vst [vmem:[#allocation192_spill] sm:$0xff] %v12355_v48  ;;  %v7958_v12 = vunpack.i.l.bf16 %v19835_v35  ;;  %v12359_v36 = vpop.permute.xlu1 %8101  ;;  %7522 = vmatpush3.bf16.msra.mxu1 %v7521_v10  ;;  %v1550_v20 = vld [vmem:[%s18329_s6 + $0x58] sm:$0xff]  ;;  %v2592_v19 = vsel %vm1138_vm8, %v12085_v43, %v7853_v61  ;;  %v1569_v33 = vld [vmem:[%s18329_s6 + $0xf0] sm:$0xff] }
 0x28a   :  { %v12379_v31 = vsel %vm1154_vm9, %v2592_v19, %v7858_v26  ;;  %v12382_v8 = vsel %vm1154_vm9, %v2593_v16, %v7859_v3  ;;  %v19839_v13 = vrot.slane %v12138_v22, 1  ;;  %v7963_v50 = vunpack.i.l.bf16 %v19841_v57  ;;  %v19843_v19 = vld [vmem:[#allocation219_spill] sm:$0xff]  ;;  %v19903_v1 = vld [vmem:[#allocation265_spill] sm:$0xff] }
 0x28b   :  { %7550 = vmatpush3.bf16.msra.mxu0 %v7549_v55  ;;  %19837 = vst [vmem:[#allocation199_spill] sm:$0xff] %v12379_v31  ;;  %19838 = vst [vmem:[#allocation110_spill] sm:$0xff] %v12382_v8  ;;  %v19842_v61 = vpack.i.bf16 %v19640_v46, %v11493_v34  ;;  %v2623_v3 = vsel %vm1122_vm3, %v19693_v11, %v7863_v7  ;;  %v7964_v26 = vunpack.i.h.bf16 %v19841_v57  ;;  %v12400_v22 = vpop.permute.xlu0 %8216  ;;  %v7868_v16 = vunpack.i.l.bf16 %v19843_v19 }
 0x28c   :  { %v12388_v43 = vsel %vm724_vm5, %v3243_v21, %v19839_v13  ;;  %v7551_v21 = vpack.c.bf16 %v1566_v60, %v1565_v62  ;;  %v7553_v10 = vpack.c.bf16 %v1550_v20, %v1549_v41  ;;  %v2624_v32 = vsel %vm1122_vm3, %v19594_v17, %v7864_v47  ;;  %v19845_v62 = vld [vmem:[#allocation269_spill] sm:$0xff] }
 0x28d   :  { %8456 = vrot.lane.b32.xlu0 %v19836_v39, %s9469_s14  ;;  %19840 = vst [vmem:[#allocation198_spill] sm:$0xff] %v12388_v43  ;;  %8396 = vrot.lane.b32.xlu1 %v19842_v61, %s9472_s16  ;;  %v3128_v55 = vsel %vm1138_vm8, %v12126_v63, %v7958_v12  ;;  %v3130_v35 = vsel %vm1138_vm8, %v12106_v30, %v7959_v6  ;;  %v19844_v39 = vld [vmem:[#allocation247_spill] sm:$0xff]  ;;  %v12410_v11 = vpop.permute.xlu1 %8121  ;;  %v7869_v7 = vunpack.i.h.bf16 %v19843_v19  ;;  %v1567_v17 = vld [vmem:[%s18329_s6 + $0xe0] sm:$0xff]  ;;  %v1568_v30 = vld [vmem:[%s18329_s6 + $0xe8] sm:$0xff]  ;;  %v19846_v60 = vunpack.i.l.bf16 %v19785_v37 }
 0x28e   :  { %v7908_v13 = vunpack.i.l.bf16 %v19844_v39  ;;  %7552 = vmatprep.subr.bf16.mxu0 %v7551_v21  ;;  %v2594_v63 = vsel %vm1138_vm8, %v12151_v49, %v7958_v12  ;;  %v2595_v47 = vsel %vm1138_vm8, %v12171_v15, %v7959_v6  ;;  %v19847_v20 = vld [vmem:[#allocation233_spill] sm:$0xff]  ;;  %v19848_v21 = vpack.i.bf16 %v11493_v34, %v11450_v52 }
 0x28f   :  { %v2638_v41 = vsel %vm1138_vm8, %v2623_v3, %v19846_v60  ;;  %v7879_v57 = vunpack.i.h.bf16 %v19847_v20  ;;  %v7878_v61 = vunpack.i.l.bf16 %v19847_v20  ;;  %7554 = vmatpush3.bf16.msra.mxu0 %v7553_v10  ;;  %v12435_v19 = vsel %vm1154_vm9, %v2594_v63, %v7963_v50  ;;  %v12441_v12 = vpop.permute.xlu0 %8221  ;;  %v1551_v3 = vld [vmem:[%s18329_s6 + $0x60] sm:$0xff]  ;;  %v1552_v60 = vld [vmem:[%s18329_s6 + $0x68] sm:$0xff] }
 0x290   :  { %19849 = vst [vmem:[#allocation108_spill] sm:$0xff] %v12435_v19  ;;  %v19850_v49 = vunpack.i.h.bf16 %v19785_v37  ;;  %v7909_v6 = vunpack.i.h.bf16 %v19844_v39  ;;  %19851 = vst [vmem:[#allocation201_spill] sm:$0xff] %v12441_v12  ;;  %v12450_v10 = vsel %vm1154_vm9, %v2595_v47, %v7964_v26  ;;  %v12453_v63 = vsel %vm1154_vm9, %v3128_v55, %v7963_v50  ;;  %v19855_v39 = vld [vmem:[#allocation249_spill] sm:$0xff] }
 0x291   :  { %8471 = vrot.lane.b32.xlu0 %v19845_v62, %s9472_s16  ;;  %8401 = vrot.lane.b32.xlu1 %v19848_v21, %s9470_s15  ;;  %19852 = vst [vmem:[#allocation200_spill] sm:$0xff] %v12450_v10  ;;  %19853 = vst [vmem:[#allocation58_spill] sm:$0xff] %v12453_v63  ;;  %v12456_v37 = vsel %vm1154_vm9, %v3130_v35, %v7964_v26  ;;  %v7913_v20 = vunpack.i.l.bf16 %v19855_v39  ;;  %v12461_v21 = vpop.permute.xlu1 %8126  ;;  %v12468_v47 = vsel %vm1154_vm9, %v12097_v24, %v7868_v16  ;;  %v19858_v50 = vld [vmem:[#allocation229_spill] sm:$0xff]  ;;  %v19859_v35 = vld [vmem:[#allocation79_spill] sm:$0xff] }
 0x292   :  { %v2639_v15 = vsel %vm1138_vm8, %v2624_v32, %v19850_v49  ;;  %19854 = vst [vmem:[#allocation206_spill] sm:$0xff] %v12456_v37  ;;  %v3046_v32 = vsel %vm1122_vm3, %v19676_v42, %v7908_v13  ;;  %19856 = vst [vmem:[#allocation207_spill] sm:$0xff] %v12461_v21  ;;  %v7555_v49 = vpack.c.bf16 %v1568_v30, %v1567_v17  ;;  %v7969_v55 = vunpack.i.h.bf16 %v19858_v50  ;;  %v1570_v17 = vld [vmem:[%s18329_s6 + $0xf8] sm:$0xff]  ;;  %v1553_v24 = vld [vmem:[%s18329_s6 + $0x70] sm:$0xff] }
 0x293   :  { %19857 = vst [vmem:[#allocation92_spill] sm:$0xff] %v12468_v47  ;;  %v7968_v26 = vunpack.i.l.bf16 %v19858_v50  ;;  %v7983_v51 = vunpack.i.l.bf16 %v19859_v35  ;;  %v19860_v13 = vpack.i.bf16 %v19658_v44, %v11686_v2  ;;  %v1554_v16 = vld [vmem:[%s18329_s6 + $0x78] sm:$0xff]  ;;  %v12488_v30 = vsel %vm1154_vm9, %v12121_v53, %v7869_v7  ;;  %v19863_v47 = vld [vmem:[#allocation77_spill] sm:$0xff]  ;;  %v19894_v37 = vld [vmem:[#allocation242_spill] sm:$0xff] }
 0x294   :  { %19861 = vst [vmem:[#allocation212_spill] sm:$0xff] %v12488_v30  ;;  %v19862_v50 = vpack.i.bf16 %v19613_v25, %v11493_v34  ;;  %7556 = vmatprep.subr.bf16.mxu0 %v7555_v49  ;;  %v2684_v4 = vsel %vm1138_vm8, %v12018_v38, %v7878_v61  ;;  %v2685_v43 = vsel %vm1138_vm8, %v12050_v40, %v7879_v57  ;;  %v7974_v14 = vunpack.i.h.bf16 %v19863_v47  ;;  %v12503_v30 = vpop.permute.xlu0 %8231  ;;  %v19897_v34 = vld [vmem:[#allocation257_spill] sm:$0xff] }
 0x295   :  { %8481 = vrot.lane.b32.xlu0 %v19860_v13, %s9472_s16  ;;  %v7557_v13 = vpack.c.bf16 %v1552_v60, %v1551_v3  ;;  %v7973_v53 = vunpack.i.l.bf16 %v19863_v47  ;;  %v3047_v7 = vsel %vm1122_vm3, %v19677_v56, %v7909_v6  ;;  %19864 = vst [vmem:[#allocation7_spill] sm:$0xff] %v12503_v30  ;;  %v19865_v49 = vunpack.i.h.bf16 %v19728_v9  ;;  %v12509_v61 = vpop.permute.xlu1 %8136  ;;  %v19982_v30 = vld [vmem:[#allocation250_spill] sm:$0xff] }
 0x296   :  { %8406 = vrot.lane.b32.xlu1 %v19862_v50, %s9469_s14  ;;  %v3066_v38 = vsel %vm1138_vm8, %v3047_v7, %v7913_v20  ;;  %19866 = vst [vmem:[#allocation217_spill] sm:$0xff] %v12509_v61  ;;  %v7559_v40 = vpack.c.bf16 %v1570_v17, %v1569_v33  ;;  %v7561_v57 = vpack.c.bf16 %v1554_v16, %v1553_v24  ;;  %v19868_v6 = vunpack.i.l.bf16 %v19773_v29  ;;  %v19871_v50 = vld [vmem:[#allocation100_spill] sm:$0xff]  ;;  %v19872_v33 = vld [vmem:[#allocation101_spill] sm:$0xff]  ;;  %v19875_v7 = vld [vmem:[#allocation130_spill] sm:$0xff] }
 0x297   :  { %v3065_v3 = vsel %vm1138_vm8, %v3046_v32, %v19865_v49  ;;  %7558 = vmatpush3.bf16.msra.mxu0 %v7557_v13  ;;  %v19867_v47 = vpack.i.bf16 %v19655_v5, %v19654_v23  ;;  %v19870_v32 = vld [vmem:[#allocation175_spill] sm:$0xff]  ;;  %v12525_v13 = vsel %vm1122_vm3, %v19871_v50, %v7968_v26  ;;  %v12529_v17 = vsel %vm1122_vm3, %v19872_v33, %v7969_v55  ;;  %v19873_v24 = vld [vmem:[#allocation241_spill] sm:$0xff] }
 0x298   :  { %v12519_v9 = vsel %vm1154_vm9, %v2684_v4, %v19868_v6  ;;  %v2686_v20 = vsel %vm1138_vm8, %v19870_v32, %v7983_v51  ;;  %v7884_v16 = vunpack.i.h.bf16 %v19873_v24  ;;  %v7883_v5 = vunpack.i.l.bf16 %v19873_v24  ;;  %v19874_v23 = vld [vmem:[#allocation49_spill] sm:$0xff]  ;;  %7560 = vmatprep.subr.bf16.mxu0 %v7559_v40  ;;  %v12546_v32 = vpop.permute.xlu0 %8236 }
 0x299   :  { %8486 = vrot.lane.b32.xlu0 %v19867_v47, %s9469_s14  ;;  %19869 = vst [vmem:[#allocation219_spill] sm:$0xff] %v12519_v9  ;;  %v19876_v4 = vpack.i.bf16 %v19874_v23, %v19875_v7  ;;  %v19877_v51 = vunpack.i.h.bf16 %v19773_v29  ;;  %v19879_v26 = vunpack.i.l.bf16 %v19800_v59  ;;  %v19880_v47 = vld [vmem:[#allocation255_spill] sm:$0xff]  ;;  %19881 = vst [vmem:[#allocation269_spill] sm:$0xff] %v12546_v32  ;;  %v12549_v50 = vsel %vm1154_vm9, %v2638_v41, %v7973_v53  ;;  %v19885_v23 = vld [vmem:[#allocation262_spill] sm:$0xff] }
 0x29a   :  { %v7923_v6 = vunpack.i.l.bf16 %v19880_v47  ;;  %19882 = vst [vmem:[#allocation233_spill] sm:$0xff] %v12549_v50  ;;  %v12552_v33 = vsel %vm1154_vm9, %v2639_v15, %v7974_v14  ;;  %v19884_v40 = vunpack.i.h.bf16 %v19800_v59  ;;  %v7924_v24 = vunpack.i.h.bf16 %v19880_v47  ;;  %v19890_v14 = vld [vmem:[#allocation65_spill] sm:$0xff]  ;;  %v19979_v32 = vld [vmem:[#allocation70_spill] sm:$0xff] }
 0x29b   :  { %8411 = vrot.lane.b32.xlu1 %v19876_v4, %s9472_s16  ;;  %v12540_v49 = vsel %vm1154_vm9, %v2685_v43, %v19877_v51  ;;  %v3084_v55 = vsel %vm1154_vm9, %v3065_v3, %v19879_v26  ;;  %19883 = vst [vmem:[#allocation249_spill] sm:$0xff] %v12552_v33  ;;  %v7984_v43 = vunpack.i.h.bf16 %v19859_v35  ;;  %v7928_v3 = vunpack.i.l.bf16 %v19885_v23  ;;  %v12560_v4 = vpop.permute.xlu1 %8141  ;;  %7562 = vmatpush3.bf16.msra.mxu0 %v7561_v57  ;;  %v19887_v51 = vld [vmem:[#allocation71_spill] sm:$0xff]  ;;  %v19891_v35 = vld [vmem:[#allocation122_spill] sm:$0xff]  ;;  %v19892_v47 = vld [vmem:[#allocation253_spill] sm:$0xff] }
 0x29c   :  { %19878 = vst [vmem:[#allocation247_spill] sm:$0xff] %v12540_v49  ;;  %v3085_v29 = vsel %vm1154_vm9, %v3066_v38, %v19884_v40  ;;  %19886 = vst [vmem:[#allocation229_spill] sm:$0xff] %v12560_v4  ;;  %v19888_v26 = vunpack.i.l.bf16 %v19887_v51  ;;  %v7989_v15 = vunpack.i.h.bf16 %v19890_v14  ;;  %v7988_v59 = vunpack.i.l.bf16 %v19890_v14  ;;  %v19893_v57 = vld [vmem:[#allocation120_spill] sm:$0xff] }
 0x29d   :  { %v7929_v53 = vunpack.i.h.bf16 %v19885_v23  ;;  %8511 = vrot.lane.b32.xlu0 %v19891_v35, %s9469_s14  ;;  %v3253_v38 = vrot.slane %v3084_v55, 1  ;;  %v8014_v40 = vunpack.i.h.bf16 %v19892_v47  ;;  %v8013_v60 = vunpack.i.l.bf16 %v19892_v47  ;;  %v12582_v35 = vpop.permute.xlu0 %8241  ;;  %v19899_v55 = vld [vmem:[#allocation26_spill] sm:$0xff]  ;;  %v19900_v47 = vld [vmem:[#allocation29_spill] sm:$0xff] }
 0x29e   :  { %v12565_v41 = vsel %vm1154_vm9, %v2686_v20, %v19888_v26  ;;  %v7978_v48 = vunpack.i.l.bf16 %v19893_v57  ;;  %v19895_v20 = vld [vmem:[#allocation146_spill] sm:$0xff]  ;;  %v3262_v63 = vrot.slane %v3085_v29, 1  ;;  %v8034_v23 = vunpack.i.h.bf16 %v19897_v34  ;;  %19898 = vst [vmem:[#allocation77_spill] sm:$0xff] %v12582_v35  ;;  %v19902_v29 = vld [vmem:[#allocation35_spill] sm:$0xff]  ;;  %v19977_v35 = vld [vmem:[#allocation157_spill] sm:$0xff] }
 0x29f   :  { %19889 = vst [vmem:[#allocation79_spill] sm:$0xff] %v12565_v41  ;;  %v19896_v26 = vpack.i.bf16 %v19894_v37, %v19895_v20  ;;  %v8033_v33 = vunpack.i.l.bf16 %v19897_v34  ;;  %v1127_v50 = vsel %vm1122_vm3, %v19899_v55, %v7923_v6  ;;  %v8039_v41 = vunpack.i.h.bf16 %v19900_v47  ;;  %v12588_v9 = vpop.permute.xlu1 %8146  ;;  %v19904_v20 = vld [vmem:[#allocation243_spill] sm:$0xff] }
 0x2a0   :  { %v8038_v49 = vunpack.i.l.bf16 %v19900_v47  ;;  %19901 = vst [vmem:[#allocation175_spill] sm:$0xff] %v12588_v9  ;;  %v1128_v14 = vsel %vm1122_vm3, %v19902_v29, %v7924_v24  ;;  %v7939_v58 = vunpack.i.h.bf16 %v19903_v1  ;;  %v7938_v34 = vunpack.i.l.bf16 %v19903_v1  ;;  %v19908_v24 = vld [vmem:[#allocation106_spill] sm:$0xff]  ;;  %v19909_v1 = vld [vmem:[#allocation91_spill] sm:$0xff] }
 0x2a1   :  { %8416 = vrot.lane.b32.xlu1 %v19896_v26, %s9469_s14  ;;  %v1143_v26 = vsel %vm1138_vm8, %v1127_v50, %v7928_v3  ;;  %v19905_v10 = vpack.i.bf16 %v11686_v2, %v19904_v20  ;;  %v1144_v6 = vsel %vm1138_vm8, %v1128_v14, %v7929_v53  ;;  %v19906_v55 = vrot.slane %v12289_v54, 1  ;;  %v19925_v2 = vld [vmem:[#allocation156_spill] sm:$0xff]  ;;  %v19947_v54 = vld [vmem:[#allocation118_spill] sm:$0xff] }
 0x2a2   :  { %v12606_v50 = vsel %vm1122_vm3, 0.0, %v8014_v40  ;;  %v12610_v3 = vsel %vm1122_vm3, %v19908_v24, %v8013_v60  ;;  %v19910_v29 = vpack.i.bf16 %v19829_v18, %v19909_v1  ;;  %v19912_v14 = vrot.slane %v12343_v28, 1  ;;  %v19915_v40 = vld [vmem:[#allocation171_spill] sm:$0xff]  ;;  %v19919_v18 = vld [vmem:[#allocation34_spill] sm:$0xff]  ;;  %v1587_v28 = vld [vmem:[%s18329_s6 + $0x180] sm:$0xff] }
 0x2a3   :  { %8521 = vrot.lane.b32.xlu0 %v19905_v10, %s9469_s14  ;;  %v12603_v47 = vsel %vm724_vm5, %v19906_v55, %v3253_v38  ;;  %v19911_v10 = vld [vmem:[#allocation97_spill] sm:$0xff]  ;;  %v12623_v55 = vpop.permute.xlu0 %8246  ;;  %v19916_v20 = vrot.slane %v19915_v40, 6  ;;  %v1129_v1 = vsel %vm1122_vm3, %v19919_v18, %v8033_v33  ;;  %v19951_v31 = vunpack.i.h.bf16 %v19887_v51 }
 0x2a4   :  { %19907 = vst [vmem:[#allocation100_spill] sm:$0xff] %v12603_v47  ;;  %v2671_v53 = vsel %vm1122_vm3, %v19911_v10, %v7978_v48  ;;  %v12621_v38 = vsel %vm724_vm5, %v19912_v14, %v3262_v63  ;;  %19914 = vst [vmem:[#allocation241_spill] sm:$0xff] %v12623_v55  ;;  %v12631_v47 = vsel %vm1154_vm9, %v1143_v26, %v7883_v5  ;;  %v7979_v10 = vunpack.i.h.bf16 %v19893_v57  ;;  %v12638_v63 = vpop.permute.xlu1 %8161  ;;  %v19924_v26 = vld [vmem:[#allocation53_spill] sm:$0xff]  ;;  %v19928_v57 = vld [vmem:[#allocation102_spill] sm:$0xff] }
 0x2a5   :  { %8451 = vrot.lane.b32.xlu1 %v19910_v29, %s9472_s16  ;;  %19913 = vst [vmem:[#allocation101_spill] sm:$0xff] %v12621_v38  ;;  %v12628_v60 = vsel %vm1703_vm4, %v19916_v20, 0.0  ;;  %19918 = vst [vmem:[#allocation255_spill] sm:$0xff] %v12631_v47  ;;  %v19920_v29 = vld [vmem:[#allocation40_spill] sm:$0xff]  ;;  %v12641_v14 = vsel %vm1154_vm9, %v1144_v6, %v7884_v16  ;;  %v1145_v40 = vsel %vm1138_vm8, %v1129_v1, %v8038_v49  ;;  %v19923_v38 = vld [vmem:[#allocation89_spill] sm:$0xff]  ;;  %v19980_v4 = vrot.slane %v19979_v32, 7 }
 0x2a6   :  { %19917 = vst [vmem:[#allocation49_spill] sm:$0xff] %v12628_v60  ;;  %v1130_v48 = vsel %vm1122_vm3, %v19920_v29, %v8034_v23  ;;  %19921 = vst [vmem:[#allocation262_spill] sm:$0xff] %v12638_v63  ;;  %v8053_v5 = vunpack.i.l.bf16 %v19923_v38  ;;  %v19926_v33 = vpack.i.bf16 %v19924_v26, %v19925_v2  ;;  %v12652_v23 = vsel %vm1154_vm9, %v12232_v45, %v7938_v34  ;;  %v19930_v49 = vld [vmem:[#allocation28_spill] sm:$0xff]  ;;  %v19933_v1 = vld [vmem:[#allocation179_spill] sm:$0xff] }
 0x2a7   :  { %19922 = vst [vmem:[#allocation71_spill] sm:$0xff] %v12641_v14  ;;  %v1146_v20 = vsel %vm1138_vm8, %v1130_v48, %v8039_v41  ;;  %19927 = vst [vmem:[#allocation65_spill] sm:$0xff] %v12652_v23  ;;  %v12656_v18 = vsel %vm1154_vm9, %v19928_v57, %v7939_v58  ;;  %v2687_v16 = vsel %vm1138_vm8, %v2671_v53, %v7984_v43  ;;  %v19931_v41 = vld [vmem:[#allocation133_spill] sm:$0xff]  ;;  %v4148_v29 = vrot.slane %v19933_v1, 1  ;;  %v19934_v48 = vld [vmem:[#allocation180_spill] sm:$0xff]  ;;  %v12671_v57 = vpop.permute.xlu0 %8261 }
 0x2a8   :  { %8531 = vrot.lane.b32.xlu0 %v19926_v33, %s9469_s14  ;;  %19929 = vst [vmem:[#allocation122_spill] sm:$0xff] %v12656_v18  ;;  %v19932_v6 = vpack.i.bf16 %v19930_v49, %v19931_v41  ;;  %v4151_v26 = vrot.slane %v19934_v48, 1  ;;  %v19935_v33 = vld [vmem:[#allocation183_spill] sm:$0xff]  ;;  %19938 = vst [vmem:[#allocation120_spill] sm:$0xff] %v12671_v57  ;;  %v12674_v43 = vsel %vm1154_vm9, %v1145_v40, %v7988_v59  ;;  %v12682_v19 = vpop.permute.xlu1 %8171  ;;  %v1588_v59 = vld [vmem:[%s18329_s6 + $0x188] sm:$0xff]  ;;  %v19956_v18 = vrot.slane %v12628_v60, 1 }
 0x2a9   :  { %v12667_v45 = vrot.slane %v19935_v33, 1  ;;  %19939 = vst [vmem:[#allocation257_spill] sm:$0xff] %v12674_v43  ;;  %v12677_v53 = vsel %vm1154_vm9, %v1146_v20, %v7989_v15  ;;  %19942 = vst [vmem:[#allocation29_spill] sm:$0xff] %v12682_v19  ;;  %v19943_v40 = vld [vmem:[#allocation98_spill] sm:$0xff]  ;;  %v19945_v20 = vld [vmem:[#allocation52_spill] sm:$0xff]  ;;  %v12702_v43 = vsel %vm1154_vm9, %v12300_v27, %v8053_v5  ;;  %v12707_v14 = vsel %vm1154_vm9, %v2687_v16, %v19951_v31 }
 0x2aa   :  { %8461 = vrot.lane.b32.xlu1 %v19932_v6, %s9470_s15  ;;  %19940 = vst [vmem:[#allocation26_spill] sm:$0xff] %v12677_v53  ;;  %v12692_v15 = vsel %vm1122_vm3, %v19943_v40, %v7979_v10  ;;  %v7999_v58 = vunpack.i.h.bf16 %v19945_v20  ;;  %v19946_v6 = vld [vmem:[#allocation129_spill] sm:$0xff]  ;;  %v19948_v53 = vld [vmem:[#allocation72_spill] sm:$0xff]  ;;  %19950 = vst [vmem:[#allocation265_spill] sm:$0xff] %v12702_v43  ;;  %v7998_v10 = vunpack.i.l.bf16 %v19945_v20  ;;  %v7563_v23 = vpack.c.bf16 %v1588_v59, %v1587_v28 }
 0x2ab   :  { %19936 = vst [vmem:[#allocation253_spill] sm:$0xff] %v12667_v45  ;;  %19944 = vst [vmem:[#allocation35_spill] sm:$0xff] %v12692_v15  ;;  %v8073_v2 = vunpack.i.l.bf16 %v19946_v6  ;;  %v19949_v8 = vpack.i.bf16 %v19947_v54, %v19948_v53  ;;  %v19953_v40 = vld [vmem:[#allocation31_spill] sm:$0xff]  ;;  %v19954_v15 = vld [vmem:[#allocation148_spill] sm:$0xff]  ;;  %v12721_v27 = vsel %vm724_vm5, %v4151_v26, %v12667_v45  ;;  %v12724_v31 = vpop.permute.xlu0 %8271  ;;  %v8074_v7 = vunpack.i.h.bf16 %v19946_v6 }
 0x2ac   :  { %19952 = vst [vmem:[#allocation106_spill] sm:$0xff] %v12707_v14  ;;  %v19955_v47 = vpack.i.bf16 %v19953_v40, %v19954_v15  ;;  %19958 = vst [vmem:[#allocation97_spill] sm:$0xff] %v12721_v27  ;;  %v19959_v51 = vld [vmem:[#allocation221_spill] sm:$0xff]  ;;  %v19961_v16 = vld [vmem:[#allocation222_spill] sm:$0xff]  ;;  %v12731_v52 = vpop.permute.xlu1 %8186  ;;  %7564 = vmatprep.subr.bf16.mxu1 %v7563_v23 }
 0x2ad   :  { %8541 = vrot.lane.b32.xlu0 %v19949_v8, %s9472_s16  ;;  %v12717_v8 = vsel %vm724_vm5, %v4148_v29, %v19956_v18  ;;  %v4160_v5 = vrot.slane %v19959_v51, 1  ;;  %19960 = vst [vmem:[#allocation171_spill] sm:$0xff] %v12724_v31  ;;  %v12727_v20 = vrot.slane %v19961_v16, 1  ;;  %v19963_v14 = vld [vmem:[#allocation226_spill] sm:$0xff]  ;;  %v19964_v40 = vld [vmem:[#allocation228_spill] sm:$0xff]  ;;  %19965 = vst [vmem:[#allocation40_spill] sm:$0xff] %v12731_v52  ;;  %v12755_v49 = vsel %vm1122_vm3, %v19977_v35, %v8073_v2 }
 0x2ae   :  { %8466 = vrot.lane.b32.xlu1 %v19955_v47, %s9469_s14  ;;  %19957 = vst [vmem:[#allocation91_spill] sm:$0xff] %v12717_v8  ;;  %v4163_v43 = vrot.slane %v19963_v14, 1  ;;  %v4164_v47 = vrot.slane %v19964_v40, 1  ;;  %v19966_v18 = vld [vmem:[#allocation234_spill] sm:$0xff]  ;;  %v19967_v19 = vld [vmem:[#allocation235_spill] sm:$0xff]  ;;  %v19969_v26 = vld [vmem:[#allocation236_spill] sm:$0xff] }
 0x2af   :  { %19962 = vst [vmem:[#allocation34_spill] sm:$0xff] %v12727_v20  ;;  %v4172_v29 = vrot.slane %v19966_v18, 1  ;;  %v12735_v57 = vrot.slane %v19967_v19, 1  ;;  %v4175_v45 = vrot.slane %v19969_v26, 1  ;;  %v19970_v34 = vld [vmem:[#allocation237_spill] sm:$0xff]  ;;  %v19972_v31 = vld [vmem:[#allocation123_spill] sm:$0xff]  ;;  %v12781_v6 = vsel %vm724_vm5, %v4160_v5, %v12727_v20 }
 0x2b0   :  { %v12739_v63 = vrot.slane %v19970_v34, 1  ;;  %v19973_v55 = vrot.slane %v19972_v31, 7  ;;  %v19974_v28 = vld [vmem:[#allocation119_spill] sm:$0xff]  ;;  %v19975_v59 = vld [vmem:[#allocation109_spill] sm:$0xff]  ;;  %19978 = vst [vmem:[#allocation102_spill] sm:$0xff] %v12755_v49  ;;  %v12777_v49 = vpop.permute.xlu0 %8286  ;;  %19990 = vst [vmem:[#allocation52_spill] sm:$0xff] %v12781_v6 }
 0x2b1   :  { %19968 = vst [vmem:[#allocation53_spill] sm:$0xff] %v12735_v57  ;;  %v19976_v52 = vpack.i.bf16 %v19974_v28, %v19975_v59  ;;  %v19983_v28 = vpack.i.bf16 %v19931_v41, %v19982_v30  ;;  %v19986_v23 = vld [vmem:[#allocation105_spill] sm:$0xff]  ;;  %19989 = vst [vmem:[#allocation98_spill] sm:$0xff] %v12777_v49  ;;  %v12784_v30 = vsel %vm724_vm5, %v4163_v43, %v4164_v47  ;;  %v12788_v59 = vpop.permute.xlu1 %8191  ;;  %v19996_v5 = vld [vmem:[#allocation131_spill] sm:$0xff] }
 0x2b2   :  { %19971 = vst [vmem:[#allocation156_spill] sm:$0xff] %v12739_v63  ;;  %v12744_v38 = vsel %vm1122_vm3, %v19973_v55, %v7999_v58  ;;  %v12760_v55 = vsel %vm1122_vm3, %v19980_v4, %v7998_v10  ;;  %v12773_v35 = vsel %vm1122_vm3, %v19986_v23, %v7999_v58  ;;  %v19988_v2 = vld [vmem:[#allocation137_spill] sm:$0xff]  ;;  %19991 = vst [vmem:[#allocation129_spill] sm:$0xff] %v12784_v30  ;;  %v19998_v43 = vld [vmem:[#allocation174_spill] sm:$0xff] }
 0x2b3   :  { %8551 = vrot.lane.b32.xlu0 %v19976_v52, %s9472_s16  ;;  %8476 = vrot.lane.b32.xlu1 %v19983_v28, %s9469_s14  ;;  %v19984_v52 = vld [vmem:[#allocation104_spill] sm:$0xff]  ;;  %19987 = vst [vmem:[#allocation133_spill] sm:$0xff] %v12773_v35  ;;  %v8004_v32 = vunpack.i.h.bf16 %v19988_v2  ;;  %v8003_v4 = vunpack.i.l.bf16 %v19988_v2  ;;  %v19992_v28 = vld [vmem:[#allocation150_spill] sm:$0xff]  ;;  %19993 = vst [vmem:[#allocation118_spill] sm:$0xff] %v12788_v59  ;;  %v12792_v58 = vsel %vm724_vm5, %v4172_v29, %v12735_v57  ;;  %v4220_v47 = vrot.slane %v19998_v43, 2 }
 0x2b4   :  { %v12769_v9 = vsel %vm1122_vm3, %v19984_v52, %v7998_v10  ;;  %v8089_v10 = vunpack.i.h.bf16 %v19992_v28  ;;  %v8088_v52 = vunpack.i.l.bf16 %v19992_v28  ;;  %19994 = vst [vmem:[#allocation72_spill] sm:$0xff] %v12792_v58  ;;  %v12796_v23 = vsel %vm724_vm5, %v4175_v45, %v12739_v63  ;;  %v19999_v20 = vld [vmem:[#allocation178_spill] sm:$0xff]  ;;  %v20000_v29 = vld [vmem:[#allocation216_spill] sm:$0xff] }
 0x2b5   :  { %19985 = vst [vmem:[#allocation28_spill] sm:$0xff] %v12769_v9  ;;  %19995 = vst [vmem:[#allocation31_spill] sm:$0xff] %v12796_v23  ;;  %v19997_v2 = vpack.i.bf16 %v19613_v25, %v19996_v5  ;;  %v4221_v35 = vrot.slane %v19999_v20, 2  ;;  %v4223_v28 = vrot.slane %v19933_v1, 2  ;;  %v4232_v57 = vrot.slane %v20000_v29, 2  ;;  %v20001_v45 = vld [vmem:[#allocation218_spill] sm:$0xff]  ;;  %v12817_v25 = vpop.permute.xlu0 %8291  ;;  %v12831_v12 = vpop.permute.xlu1 %8196 }
 0x2b6   :  { %v12810_v63 = vrot.slane %v20001_v45, 2  ;;  %v4235_v59 = vrot.slane %v19959_v51, 2  ;;  %20004 = vst [vmem:[#allocation250_spill] sm:$0xff] %v12817_v25  ;;  %v20006_v9 = vld [vmem:[#allocation165_spill] sm:$0xff]  ;;  %20009 = vst [vmem:[#allocation137_spill] sm:$0xff] %v12831_v12  ;;  %v12835_v5 = vpack.i.bf16 %v12796_v23, %v12792_v58  ;;  %v12839_v49 = vsel %vm1138_vm8, %v12529_v17, %v8004_v32  ;;  %v20017_v58 = vld [vmem:[#allocation166_spill] sm:$0xff] }
 0x2b7   :  { %8561 = vrot.lane.b32.xlu0 %v19997_v2, %s9472_s16  ;;  %8491 = vrot.lane.b32.xlu1 %v19845_v62, %s9470_s15  ;;  %v12814_v2 = vrot.slane %v19961_v16, 2  ;;  %v12823_v62 = vsel %vm1138_vm8, %v12525_v13, %v8003_v4  ;;  %v12827_v1 = vsel %vm1122_vm3, %v20006_v9, %v8074_v7  ;;  %20011 = vst [vmem:[#allocation165_spill] sm:$0xff] %v12839_v49  ;;  %v20012_v7 = vld [vmem:[#allocation271_spill] sm:$0xff]  ;;  %v20013_v51 = vld [vmem:[#allocation81_spill] sm:$0xff]  ;;  %v20014_v16 = vld [vmem:[#allocation50_spill] sm:$0xff] }
 0x2b8   :  { %20002 = vst [vmem:[#allocation228_spill] sm:$0xff] %v12810_v63  ;;  %20005 = vst [vmem:[#allocation104_spill] sm:$0xff] %v12823_v62  ;;  %v3049_v13 = vsel %vm1122_vm3, %v19972_v31, %v8089_v10  ;;  %v3048_v9 = vsel %vm1122_vm3, %v19948_v53, %v8088_v52  ;;  %v8093_v4 = vunpack.i.l.bf16 %v20012_v7  ;;  %v20015_v61 = vpack.i.bf16 %v20013_v51, %v20014_v16  ;;  %v20018_v17 = vld [vmem:[#allocation136_spill] sm:$0xff]  ;;  %v20025_v16 = vld [vmem:[#allocation231_spill] sm:$0xff] }
 0x2b9   :  { %20003 = vst [vmem:[#allocation157_spill] sm:$0xff] %v12814_v2  ;;  %20007 = vst [vmem:[#allocation105_spill] sm:$0xff] %v12827_v1  ;;  %v12851_v23 = vsel %vm814_vm2, %v4220_v47, %v4221_v35  ;;  %v8024_v1 = vunpack.i.h.bf16 %v20017_v58  ;;  %v20019_v32 = vpack.i.bf16 %v19931_v41, %v20018_v17  ;;  %v20020_v10 = vrot.slane %v12628_v60, 2  ;;  %v12871_v51 = vpop.permute.xlu0 %8296  ;;  %v20026_v47 = vld [vmem:[#allocation232_spill] sm:$0xff]  ;;  %v12892_v49 = vpop.permute.xlu1 %8201  ;;  %v20035_v25 = vld [vmem:[#allocation163_spill] sm:$0xff] }
 0x2ba   :  { %20010 = vst [vmem:[#allocation150_spill] sm:$0xff] %v12835_v5  ;;  %20016 = vst [vmem:[#allocation81_spill] sm:$0xff] %v12851_v23  ;;  %v12865_v52 = vsel %vm814_vm2, %v4232_v57, %v12810_v63  ;;  %v4244_v35 = vrot.slane %v20025_v16, 2  ;;  %v12875_v41 = vrot.slane %v20026_v47, 2  ;;  %v1619_v57 = vld [vmem:[%s18329_s6 + $0x280] sm:$0xff]  ;;  %v8023_v63 = vunpack.i.l.bf16 %v20017_v58  ;;  %v20037_v31 = vld [vmem:[#allocation116_spill] sm:$0xff] }
 0x2bb   :  { %8571 = vrot.lane.b32.xlu0 %v20015_v61, %s9470_s15  ;;  %8496 = vrot.lane.b32.xlu1 %v20019_v32, %s9472_s16  ;;  %v12861_v53 = vsel %vm814_vm2, %v4223_v28, %v20020_v10  ;;  %20022 = vst [vmem:[#allocation166_spill] sm:$0xff] %v12865_v52  ;;  %v12869_v61 = vsel %vm814_vm2, %v4235_v59, %v12814_v2  ;;  %20024 = vst [vmem:[#allocation273_spill] sm:$0xff] %v12871_v51  ;;  %v4247_v32 = vrot.slane %v19966_v18, 2  ;;  %v1620_v59 = vld [vmem:[%s18329_s6 + $0x288] sm:$0xff]  ;;  %v20029_v10 = vld [vmem:[#allocation155_spill] sm:$0xff] }
 0x2bc   :  { %20021 = vst [vmem:[#allocation50_spill] sm:$0xff] %v12861_v53  ;;  %20023 = vst [vmem:[#allocation136_spill] sm:$0xff] %v12869_v61  ;;  %v12879_v28 = vrot.slane %v19967_v19, 2  ;;  %v12888_v2 = vunpack.i.h.bf16 %v20029_v10  ;;  %v20032_v62 = vunpack.i.h.bf16 %v19855_v39  ;;  %v12901_v12 = vsel %vm1138_vm8, %v3049_v13, %v8093_v4  ;;  %v20040_v51 = vld [vmem:[#allocation160_spill] sm:$0xff] }
 0x2bd   :  { %20027 = vst [vmem:[#allocation274_spill] sm:$0xff] %v12875_v41  ;;  %20031 = vst [vmem:[#allocation277_spill] sm:$0xff] %v12892_v49  ;;  %v8109_v19 = vunpack.i.h.bf16 %v20035_v25  ;;  %v3051_v7 = vsel %vm1122_vm3, %v20037_v31, %v8024_v1  ;;  %v8108_v39 = vunpack.i.l.bf16 %v20035_v25  ;;  %v7595_v4 = vpack.c.bf16 %v1620_v59, %v1619_v57  ;;  %v12934_v59 = vpop.permute.xlu1 %8206 }
 0x2be   :  { %20028 = vst [vmem:[#allocation275_spill] sm:$0xff] %v12879_v28  ;;  %20030 = vst [vmem:[#allocation276_spill] sm:$0xff] %v12888_v2  ;;  %v12897_v21 = vsel %vm1138_vm8, %v3048_v9, %v20032_v62  ;;  %v20036_v2 = vld [vmem:[#allocation135_spill] sm:$0xff]  ;;  %v20038_v62 = vld [vmem:[#allocation142_spill] sm:$0xff]  ;;  %v12923_v1 = vsel %vm814_vm2, %v4244_v35, %v12875_v41  ;;  %v12927_v25 = vsel %vm814_vm2, %v4247_v32, %v12879_v28  ;;  %v4296_v58 = vrot.slane %v19999_v20, 3 }
 0x2bf   :  { %20033 = vst [vmem:[#allocation278_spill] sm:$0xff] %v12897_v21  ;;  %20034 = vst [vmem:[#allocation279_spill] sm:$0xff] %v12901_v12  ;;  %8581 = vrot.lane.b32.xlu0 %v20036_v2, %s9470_s15  ;;  %v20039_v9 = vpack.i.bf16 %v20038_v62, %v19954_v15  ;;  %v8029_v12 = vunpack.i.h.bf16 %v20040_v51  ;;  %v8028_v2 = vunpack.i.l.bf16 %v20040_v51  ;;  %v12919_v21 = vpop.permute.xlu0 %8301  ;;  %v4295_v51 = vrot.slane %v19998_v43, 3  ;;  %7596 = vmatprep.subr.bf16.mxu0 %v7595_v4  ;;  %v20047_v35 = vld [vmem:[#allocation124_spill] sm:$0xff]  ;;  %v20048_v41 = vld [vmem:[#allocation38_spill] sm:$0xff] }
 0x2c0   :  { %20041 = vst [vmem:[#allocation163_spill] sm:$0xff] %v12919_v21  ;;  %20042 = vst [vmem:[#allocation135_spill] sm:$0xff] %v12923_v1  ;;  %v20049_v15 = vpack.i.bf16 %v20047_v35, %v20048_v41  ;;  %v20050_v32 = vld [vmem:[#allocation210_spill] sm:$0xff]  ;;  %v20054_v4 = vld [vmem:[#allocation141_spill] sm:$0xff]  ;;  %v12966_v62 = vsel %vm1122_vm3, %v19640_v46, %v8108_v39 }
 0x2c1   :  { %8501 = vrot.lane.b32.xlu1 %v20039_v9, %s9470_s15  ;;  %20043 = vst [vmem:[#allocation160_spill] sm:$0xff] %v12927_v25  ;;  %v12931_v9 = vsel %vm1122_vm3, %v19947_v54, %v8023_v63  ;;  %20046 = vst [vmem:[#allocation281_spill] sm:$0xff] %v12934_v59  ;;  %v4304_v28 = vrot.slane %v20050_v32, 3  ;;  %v20051_v21 = vld [vmem:[#allocation214_spill] sm:$0xff]  ;;  %v4307_v54 = vrot.slane %v20000_v29, 3  ;;  %v12948_v63 = vrot.slane %v20001_v45, 3  ;;  %v12983_v10 = vpop.permute.xlu1 %8211 }
 0x2c2   :  { %20044 = vst [vmem:[#allocation280_spill] sm:$0xff] %v12931_v9  ;;  %v12944_v49 = vrot.slane %v20051_v21, 3  ;;  %v20055_v9 = vpack.i.bf16 %v19894_v37, %v20054_v4  ;;  %v20057_v41 = vld [vmem:[#allocation211_spill] sm:$0xff]  ;;  %20060 = vst [vmem:[#allocation282_spill] sm:$0xff] %v12966_v62  ;;  %v12970_v57 = vsel %vm1138_vm8, %v12610_v3, %v8029_v12  ;;  %v12973_v4 = vsel %vm1138_vm8, %v3051_v7, %v8028_v2  ;;  %v20159_v37 = vld [vmem:[#allocation90_spill] sm:$0xff] }
 0x2c3   :  { %8591 = vrot.lane.b32.xlu0 %v20049_v15, %s9470_s15  ;;  %20053 = vst [vmem:[#allocation38_spill] sm:$0xff] %v12948_v63  ;;  %v12957_v15 = vpack.i.bf16 %v12927_v25, %v12923_v1  ;;  %v20058_v35 = vrot.slane %v20057_v41, 6  ;;  %20061 = vst [vmem:[#allocation283_spill] sm:$0xff] %v12970_v57  ;;  %v12976_v1 = vpop.permute.xlu0 %8306  ;;  %v20065_v25 = vld [vmem:[#allocation186_spill] sm:$0xff]  ;;  %v12986_v39 = vsel %vm1904_vm6, %v4295_v51, %v4296_v58  ;;  %v4145_v12 = vrot.slane %v19998_v43, 1  ;;  %v20069_v7 = vld [vmem:[#allocation143_spill] sm:$0xff] }
 0x2c4   :  { %20052 = vst [vmem:[#allocation124_spill] sm:$0xff] %v12944_v49  ;;  %20062 = vst [vmem:[#allocation284_spill] sm:$0xff] %v12973_v4  ;;  %v12980_v41 = vsel %vm1122_vm3, %v20065_v25, %v8109_v19  ;;  %v4146_v3 = vrot.slane %v19999_v20, 1  ;;  %v12994_v2 = vsel %vm1904_vm6, %v4304_v28, %v12944_v49  ;;  %v12998_v19 = vsel %vm1904_vm6, %v4307_v54, %v12948_v63  ;;  %v20072_v25 = vld [vmem:[#allocation230_spill] sm:$0xff] }
 0x2c5   :  { %8506 = vrot.lane.b32.xlu1 %v20055_v9, %s9469_s14  ;;  %20056 = vst [vmem:[#allocation141_spill] sm:$0xff] %v12957_v15  ;;  %v12962_v59 = vsel %vm1703_vm4, %v20058_v35, 0.0  ;;  %v20063_v9 = vld [vmem:[#allocation173_spill] sm:$0xff]  ;;  %20064 = vst [vmem:[#allocation285_spill] sm:$0xff] %v12976_v1  ;;  %v4316_v35 = vrot.slane %v20072_v25, 3  ;;  %v20073_v51 = vld [vmem:[#allocation94_spill] sm:$0xff] }
 0x2c6   :  { %20059 = vst [vmem:[#allocation211_spill] sm:$0xff] %v12962_v59  ;;  %v8118_v13 = vunpack.i.l.bf16 %v20063_v9  ;;  %20066 = vst [vmem:[#allocation186_spill] sm:$0xff] %v12980_v41  ;;  %v20074_v9 = vld [vmem:[#allocation128_spill] sm:$0xff]  ;;  %v4319_v28 = vrot.slane %v20025_v16, 3  ;;  %v13010_v49 = vrot.slane %v20026_v47, 3  ;;  %v13024_v41 = vpop.permute.xlu1 %8226  ;;  %v20085_v58 = vld [vmem:[#allocation54_spill] sm:$0xff] }
 0x2c7   :  { %20067 = vst [vmem:[#allocation286_spill] sm:$0xff] %v12983_v10  ;;  %20068 = vst [vmem:[#allocation287_spill] sm:$0xff] %v12986_v39  ;;  %8601 = vrot.lane.b32.xlu0 %v20069_v7, %s9470_s15  ;;  %v20075_v10 = vld [vmem:[#allocation127_spill] sm:$0xff]  ;;  %v13018_v1 = vpop.permute.xlu0 %8311  ;;  %v4157_v62 = vrot.slane %v20000_v29, 1  ;;  %v20106_v15 = vld [vmem:[#allocation140_spill] sm:$0xff] }
 0x2c8   :  { %20070 = vst [vmem:[#allocation143_spill] sm:$0xff] %v12994_v2  ;;  %20071 = vst [vmem:[#allocation288_spill] sm:$0xff] %v12998_v19  ;;  %v20076_v7 = vpack.i.bf16 %v20074_v9, %v20075_v10  ;;  %v13014_v54 = vsel %vm1138_vm8, %v12606_v50, %v8118_v13  ;;  %v20081_v9 = vld [vmem:[#allocation33_spill] sm:$0xff]  ;;  %v13029_v50 = vsel %vm724_vm5, %v4145_v12, %v4146_v3  ;;  %v13042_v10 = vrot.slane %v20051_v21, 1  ;;  %v20090_v12 = vld [vmem:[#allocation107_spill] sm:$0xff] }
 0x2c9   :  { %20077 = vst [vmem:[#allocation94_spill] sm:$0xff] %v13010_v49  ;;  %20078 = vst [vmem:[#allocation289_spill] sm:$0xff] %v13014_v54  ;;  %v20084_v13 = vld [vmem:[#allocation93_spill] sm:$0xff]  ;;  %v20087_v54 = vrot.slane %v12962_v59, 3  ;;  %v20091_v3 = vpack.i.bf16 %v19658_v44, %v20090_v12  ;;  %v4166_v2 = vrot.slane %v20072_v25, 1  ;;  %v4169_v44 = vrot.slane %v20025_v16, 1 }
 0x2ca   :  { %8516 = vrot.lane.b32.xlu1 %v20076_v7, %s9469_s14  ;;  %20080 = vst [vmem:[#allocation290_spill] sm:$0xff] %v13018_v1  ;;  %20082 = vst [vmem:[#allocation291_spill] sm:$0xff] %v13024_v41  ;;  %v20086_v57 = vpack.i.bf16 %v20084_v13, %v20085_v58  ;;  %v4154_v7 = vrot.slane %v20050_v32, 1  ;;  %v13054_v58 = vrot.slane %v20001_v45, 1  ;;  %v20095_v13 = vld [vmem:[#allocation239_spill] sm:$0xff]  ;;  %v20101_v12 = vunpack.i.h.bf16 %v20081_v9  ;;  %v13081_v19 = vpop.permute.xlu1 %8251 }
 0x2cb   :  { %20083 = vst [vmem:[#allocation292_spill] sm:$0xff] %v13029_v50  ;;  %v13038_v4 = vsel %vm1904_vm6, %v4316_v35, %v20087_v54  ;;  %20089 = vst [vmem:[#allocation54_spill] sm:$0xff] %v13042_v10  ;;  %v20094_v35 = vld [vmem:[#allocation238_spill] sm:$0xff]  ;;  %v13058_v1 = vrot.slane %v20095_v13, 3  ;;  %v13060_v41 = vpop.permute.xlu0 %8326  ;;  %v20105_v29 = vld [vmem:[#allocation39_spill] sm:$0xff] }
 0x2cc   :  { %8611 = vrot.lane.b32.xlu0 %v20086_v57, %s9469_s14  ;;  %20088 = vst [vmem:[#allocation93_spill] sm:$0xff] %v13038_v4  ;;  %v13051_v57 = vsel %vm1904_vm6, %v4319_v28, %v13010_v49  ;;  %20093 = vst [vmem:[#allocation294_spill] sm:$0xff] %v13054_v58  ;;  %v4328_v54 = vrot.slane %v20094_v35, 3  ;;  %v20099_v28 = vunpack.i.l.bf16 %v20081_v9  ;;  %v20108_v9 = vld [vmem:[#allocation168_spill] sm:$0xff]  ;;  %v13100_v63 = vsel %vm724_vm5, %v4154_v7, %v13042_v10 }
 0x2cd   :  { %20092 = vst [vmem:[#allocation293_spill] sm:$0xff] %v13051_v57  ;;  %20096 = vst [vmem:[#allocation295_spill] sm:$0xff] %v13058_v1  ;;  %v20133_v10 = vld [vmem:[#allocation268_spill] sm:$0xff] }
 0x2ce   :  { %8526 = vrot.lane.b32.xlu1 %v20091_v3, %s9469_s14  ;;  %20097 = vst [vmem:[#allocation296_spill] sm:$0xff] %v13060_v41  ;;  %v13066_v3 = vrot.slane %v20026_v47, 1  ;;  %v13072_v49 = vsel %vm1138_vm8, %v12760_v55, %v20099_v28  ;;  %v13078_v41 = vsel %vm1138_vm8, %v12744_v38, %v20101_v12  ;;  %20104 = vst [vmem:[#allocation300_spill] sm:$0xff] %v13081_v19  ;;  %v4379_v47 = vrot.slane %v20050_v32, 4  ;;  %v20158_v28 = vld [vmem:[#allocation201_spill] sm:$0xff] }
 0x2cf   :  { %20100 = vst [vmem:[#allocation298_spill] sm:$0xff] %v13072_v49  ;;  %20102 = vst [vmem:[#allocation299_spill] sm:$0xff] %v13078_v41  ;;  %v20109_v12 = vpack.i.bf16 %v19677_v56, %v19676_v42  ;;  %v13104_v49 = vsel %vm724_vm5, %v4157_v62, %v13054_v58  ;;  %v13107_v20 = vpop.permute.xlu0 %8351  ;;  %v13111_v38 = vsel %vm1904_vm6, %v4328_v54, %v13058_v1  ;;  %v20115_v56 = vrot.slane %v12962_v59, 1  ;;  %v20119_v1 = vld [vmem:[#allocation132_spill] sm:$0xff] }
 0x2d0   :  { %20098 = vst [vmem:[#allocation297_spill] sm:$0xff] %v13066_v3  ;;  %8621 = vrot.lane.b32.xlu0 %v20108_v9, %s9469_s14  ;;  %20110 = vst [vmem:[#allocation168_spill] sm:$0xff] %v13100_v63  ;;  %v13120_v7 = vsel %vm724_vm5, %v4169_v44, %v13066_v3  ;;  %v4376_v62 = vrot.slane %v19934_v48, 4  ;;  %v4377_v9 = vrot.slane %v19935_v33, 4  ;;  %v4380_v54 = vrot.slane %v20051_v21, 4 }
 0x2d1   :  { %20111 = vst [vmem:[#allocation301_spill] sm:$0xff] %v13104_v49  ;;  %20113 = vst [vmem:[#allocation302_spill] sm:$0xff] %v13107_v20  ;;  %v13116_v42 = vsel %vm724_vm5, %v4166_v2, %v20115_v56  ;;  %v20120_v2 = vld [vmem:[#allocation126_spill] sm:$0xff]  ;;  %v4178_v3 = vrot.slane %v20094_v35, 1  ;;  %v13137_v41 = vrot.slane %v20095_v13, 1  ;;  %v4226_v20 = vrot.slane %v19934_v48, 2 }
 0x2d2   :  { %8536 = vrot.lane.b32.xlu1 %v20109_v12, %s9472_s16  ;;  %20114 = vst [vmem:[#allocation303_spill] sm:$0xff] %v13111_v38  ;;  %20116 = vst [vmem:[#allocation304_spill] sm:$0xff] %v13116_v42  ;;  %v13122_v12 = vpop.permute.xlu1 %8256  ;;  %v20121_v56 = vpack.i.bf16 %v20119_v1, %v20120_v2  ;;  %v20125_v1 = vpack.i.bf16 %v19908_v24, %v20037_v31  ;;  %v13160_v45 = vsel %vm1982_vm7, %v4376_v62, %v4377_v9  ;;  %v20136_v62 = vld [vmem:[#allocation121_spill] sm:$0xff] }
 0x2d3   :  { %20117 = vst [vmem:[#allocation305_spill] sm:$0xff] %v13120_v7  ;;  %20118 = vst [vmem:[#allocation306_spill] sm:$0xff] %v13122_v12  ;;  %v13149_v55 = vpop.permute.xlu0 %8356  ;;  %v13155_v12 = vpack.i.bf16 %v13120_v7, %v13116_v42  ;;  %v13163_v24 = vsel %vm1982_vm7, %v4379_v47, %v4380_v54  ;;  %v13172_v42 = vsel %vm724_vm5, %v4178_v3, %v13137_v41  ;;  %v4391_v7 = vrot.slane %v20072_v25, 4  ;;  %v20135_v47 = vld [vmem:[#allocation45_spill] sm:$0xff] }
 0x2d4   :  { %8631 = vrot.lane.b32.xlu0 %v20121_v56, %s9469_s14  ;;  %20122 = vst [vmem:[#allocation132_spill] sm:$0xff] %v13137_v41  ;;  %20127 = vst [vmem:[#allocation126_spill] sm:$0xff] %v13149_v55  ;;  %v4389_v56 = vrot.slane %v19964_v40, 4  ;;  %v4392_v9 = vrot.slane %v12962_v59, 4  ;;  %v20137_v54 = vpack.i.bf16 %v20135_v47, %v20136_v62  ;;  %v13182_v31 = vrot.slane %v19935_v33, 2 }
 0x2d5   :  { %20128 = vst [vmem:[#allocation307_spill] sm:$0xff] %v13155_v12  ;;  %20130 = vst [vmem:[#allocation309_spill] sm:$0xff] %v13160_v45  ;;  %v13186_v2 = vrot.slane %v20051_v21, 2  ;;  %v20144_v41 = vpack.i.bf16 %v12721_v27, %v12717_v8  ;;  %v4400_v58 = vrot.slane %v19969_v26, 4  ;;  %v4401_v47 = vrot.slane %v19970_v34, 4  ;;  %v20145_v21 = vld [vmem:[#allocation41_spill] sm:$0xff] }
 0x2d6   :  { %8546 = vrot.lane.b32.xlu1 %v20125_v1, %s9472_s16  ;;  %v13157_v19 = vpop.permute.xlu1 %8266  ;;  %20131 = vst [vmem:[#allocation310_spill] sm:$0xff] %v13163_v24  ;;  %v4388_v1 = vrot.slane %v19963_v14, 4  ;;  %20134 = vst [vmem:[#allocation268_spill] sm:$0xff] %v13172_v42  ;;  %v4403_v55 = vrot.slane %v20094_v35, 4  ;;  %v13220_v44 = vsel %vm1982_vm7, %v4391_v7, %v4392_v9  ;;  %v4239_v8 = vrot.slane %v19964_v40, 2  ;;  %v20160_v12 = vld [vmem:[#allocation87_spill] sm:$0xff] }
 0x2d7   :  { %20129 = vst [vmem:[#allocation308_spill] sm:$0xff] %v13157_v19  ;;  %20138 = vst [vmem:[#allocation311_spill] sm:$0xff] %v13182_v31  ;;  %v13191_v19 = vpop.permute.xlu0 %8366  ;;  %v4250_v9 = vrot.slane %v19969_v26, 2  ;;  %v20226_v27 = vld [vmem:[#allocation154_spill] sm:$0xff] }
 0x2d8   :  { %8641 = vrot.lane.b32.xlu0 %v20133_v10, %s9469_s14  ;;  %v4229_v10 = vrot.slane %v20050_v32, 2  ;;  %20139 = vst [vmem:[#allocation312_spill] sm:$0xff] %v13186_v2  ;;  %20140 = vst [vmem:[#allocation313_spill] sm:$0xff] %v13191_v19  ;;  %v13204_v3 = vsel %vm1982_vm7, %v4388_v1, %v4389_v56  ;;  %v20146_v56 = vld [vmem:[#allocation67_spill] sm:$0xff] }
 0x2d9   :  { %20143 = vst [vmem:[#allocation316_spill] sm:$0xff] %v13204_v3  ;;  %v20147_v1 = vpack.i.bf16 %v20145_v21, %v20146_v56  ;;  %20148 = vst [vmem:[#allocation317_spill] sm:$0xff] %v13220_v44  ;;  %v4241_v56 = vrot.slane %v20072_v25, 2  ;;  %v20333_v25 = vld [vmem:[#allocation282_spill] sm:$0xff]  ;;  %v20341_v32 = vld [vmem:[#allocation75_spill] sm:$0xff] }
 0x2da   :  { %8556 = vrot.lane.b32.xlu1 %v20137_v54, %s9472_s16  ;;  %v13195_v54 = vpack.i.bf16 %v13163_v24, %v13160_v45  ;;  %v13199_v62 = vpop.permute.xlu1 %8276  ;;  %v4404_v24 = vrot.slane %v20095_v13, 4  ;;  %v4238_v45 = vrot.slane %v19963_v14, 2 }
 0x2db   :  { %20142 = vst [vmem:[#allocation315_spill] sm:$0xff] %v13199_v62  ;;  %v13228_v62 = vsel %vm814_vm2, %v4229_v10, %v13186_v2  ;;  %v13230_v19 = vpop.permute.xlu0 %8371  ;;  %v4253_v10 = vrot.slane %v20094_v35, 2  ;;  %v13244_v2 = vrot.slane %v20095_v13, 2  ;;  %v20165_v35 = vrot.slane %v12962_v59, 2 }
 0x2dc   :  { %20141 = vst [vmem:[#allocation314_spill] sm:$0xff] %v13195_v54  ;;  %8651 = vrot.lane.b32.xlu0 %v20144_v41, %s9473_s17  ;;  %v13224_v41 = vsel %vm814_vm2, %v4226_v20, %v13182_v31  ;;  %20150 = vst [vmem:[#allocation319_spill] sm:$0xff] %v13228_v62  ;;  %v13240_v20 = vrot.slane %v19970_v34, 2  ;;  %v13257_v42 = vsel %vm1982_vm7, %v4403_v55, %v4404_v24  ;;  %v20182_v59 = vunpack.i.l.bf16 %v20073_v51 }
 0x2dd   :  { %20149 = vst [vmem:[#allocation318_spill] sm:$0xff] %v13224_v41  ;;  %20151 = vst [vmem:[#allocation320_spill] sm:$0xff] %v13230_v19  ;;  %v20155_v19 = vpack.i.bf16 %v12784_v30, %v12781_v6  ;;  %v20161_v6 = vpack.i.bf16 %v20159_v37, %v20160_v12  ;;  %v13273_v24 = vsel %vm814_vm2, %v4238_v45, %v4239_v8  ;;  %v20170_v45 = vld [vmem:[#allocation179_spill] sm:$0xff]  ;;  %v20172_v12 = vld [vmem:[#allocation112_spill] sm:$0xff] }
 0x2de   :  { %8566 = vrot.lane.b32.xlu1 %v20147_v1, %s9472_s16  ;;  %v13236_v7 = vpop.permute.xlu1 %8281  ;;  %20153 = vst [vmem:[#allocation322_spill] sm:$0xff] %v13240_v20  ;;  %20154 = vst [vmem:[#allocation323_spill] sm:$0xff] %v13244_v2  ;;  %v20162_v1 = vld [vmem:[#allocation207_spill] sm:$0xff]  ;;  %v13278_v31 = vsel %vm814_vm2, %v4241_v56, %v20165_v35  ;;  %v13291_v8 = vsel %vm814_vm2, %v4253_v10, %v13244_v2  ;;  %v4298_v35 = vrot.slane %v20170_v45, 3  ;;  %v20174_v37 = vld [vmem:[#allocation221_spill] sm:$0xff] }
 0x2df   :  { %20152 = vst [vmem:[#allocation321_spill] sm:$0xff] %v13236_v7  ;;  %v13254_v7 = vsel %vm1982_vm7, %v4400_v58, %v4401_v47  ;;  %20157 = vst [vmem:[#allocation325_spill] sm:$0xff] %v13257_v42  ;;  %v13270_v55 = vpop.permute.xlu0 %8381  ;;  %v4301_v47 = vrot.slane %v19934_v48, 3  ;;  %v13299_v58 = vrot.slane %v19935_v33, 3  ;;  %v4310_v13 = vrot.slane %v20174_v37, 3  ;;  %v20175_v2 = vld [vmem:[#allocation222_spill] sm:$0xff] }
 0x2e0   :  { %8661 = vrot.lane.b32.xlu0 %v20155_v19, %s9473_s17  ;;  %20156 = vst [vmem:[#allocation324_spill] sm:$0xff] %v13254_v7  ;;  %20163 = vst [vmem:[#allocation201_spill] sm:$0xff] %v13270_v55  ;;  %v13287_v19 = vsel %vm814_vm2, %v4250_v9, %v13240_v20  ;;  %v13305_v9 = vpack.i.bf16 %v13278_v31, %v13273_v24  ;;  %v13311_v20 = vrot.slane %v20175_v2, 3  ;;  %v20177_v56 = vld [vmem:[#allocation7_spill] sm:$0xff]  ;;  %v20183_v48 = vld [vmem:[#allocation117_spill] sm:$0xff] }
 0x2e1   :  { %20164 = vst [vmem:[#allocation90_spill] sm:$0xff] %v13273_v24  ;;  %20166 = vst [vmem:[#allocation87_spill] sm:$0xff] %v13278_v31  ;;  %v1176_v55 = vsel %vm1122_vm3, %v20183_v48, %v20182_v59  ;;  %v20191_v24 = vld [vmem:[#allocation139_spill] sm:$0xff]  ;;  %v20196_v48 = vld [vmem:[#allocation158_spill] sm:$0xff] }
 0x2e2   :  { %8576 = vrot.lane.b32.xlu1 %v20161_v6, %s9470_s15  ;;  %v13281_v6 = vpop.permute.xlu1 %8316  ;;  %20168 = vst [vmem:[#allocation326_spill] sm:$0xff] %v13287_v19  ;;  %20169 = vst [vmem:[#allocation327_spill] sm:$0xff] %v13291_v8  ;;  %v20192_v41 = vpack.i.bf16 %v20018_v17, %v20191_v24  ;;  %v20205_v17 = vpack.i.bf16 %v12869_v61, %v12865_v52  ;;  %v20210_v31 = vld [vmem:[#allocation89_spill] sm:$0xff]  ;;  %v20322_v52 = vunpack.i.l.bf16 %v20158_v28 }
 0x2e3   :  { %20167 = vst [vmem:[#allocation207_spill] sm:$0xff] %v13281_v6  ;;  %20171 = vst [vmem:[#allocation328_spill] sm:$0xff] %v13299_v58  ;;  %v13315_v33 = vpop.permute.xlu0 %8386  ;;  %v20186_v6 = vrot.slane %v12628_v60, 3  ;;  %v20211_v61 = vunpack.i.h.bf16 %v20210_v31  ;;  %v4374_v31 = vrot.slane %v12628_v60, 4  ;;  %v20247_v60 = vld [vmem:[#allocation197_spill] sm:$0xff] }
 0x2e4   :  { %8671 = vrot.lane.b32.xlu0 %v12835_v5, %s9473_s17  ;;  %20173 = vst [vmem:[#allocation112_spill] sm:$0xff] %v13305_v9  ;;  %20176 = vst [vmem:[#allocation329_spill] sm:$0xff] %v13311_v20  ;;  %v4314_v5 = vrot.slane %v19964_v40, 3  ;;  %v13325_v9 = vpack.i.bf16 %v13291_v8, %v13287_v19  ;;  %v20185_v40 = vld [vmem:[#allocation224_spill] sm:$0xff]  ;;  %v13344_v8 = vsel %vm1904_vm6, %v4301_v47, %v13299_v58  ;;  %v20197_v19 = vunpack.i.l.bf16 %v20196_v48  ;;  %v20198_v58 = vld [vmem:[#allocation235_spill] sm:$0xff] }
 0x2e5   :  { %20178 = vst [vmem:[#allocation7_spill] sm:$0xff] %v13315_v33  ;;  %v20184_v33 = vpack.i.bf16 %v12861_v53, %v12851_v23  ;;  %20188 = vst [vmem:[#allocation332_spill] sm:$0xff] %v13344_v8  ;;  %v20230_v8 = vld [vmem:[#allocation218_spill] sm:$0xff] }
 0x2e6   :  { %8586 = vrot.lane.b32.xlu1 %v20172_v12, %s9470_s15  ;;  %v4313_v12 = vrot.slane %v19963_v14, 3  ;;  %v13321_v10 = vpop.permute.xlu1 %8321  ;;  %20181 = vst [vmem:[#allocation331_spill] sm:$0xff] %v13325_v9  ;;  %v1192_v53 = vsel %vm1138_vm8, %v1176_v55, %v20197_v19  ;;  %v13369_v9 = vrot.slane %v20198_v58, 3 }
 0x2e7   :  { %20180 = vst [vmem:[#allocation330_spill] sm:$0xff] %v13321_v10  ;;  %v13340_v10 = vsel %vm1904_vm6, %v4298_v35, %v20186_v6  ;;  %v13357_v6 = vsel %vm1904_vm6, %v4310_v13, %v13311_v20  ;;  %v13359_v47 = vpop.permute.xlu0 %1014  ;;  %v20203_v20 = vld [vmem:[#allocation114_spill] sm:$0xff]  ;;  %v13390_v13 = vrot.slane %v19970_v34, 3 }
 0x2e8   :  { %8681 = vrot.lane.b32.xlu0 %v20184_v33, %s9472_s16  ;;  %20187 = vst [vmem:[#allocation117_spill] sm:$0xff] %v13340_v10  ;;  %20193 = vst [vmem:[#allocation139_spill] sm:$0xff] %v13357_v6  ;;  %v13362_v35 = vsel %vm1904_vm6, %v4313_v12, %v4314_v5  ;;  %v4322_v33 = vrot.slane %v19966_v18, 3  ;;  %v20202_v12 = vunpack.i.h.bf16 %v20073_v51  ;;  %v20215_v51 = vunpack.i.h.bf16 %v20196_v48 }
 0x2e9   :  { %20194 = vst [vmem:[#allocation333_spill] sm:$0xff] %v13359_v47  ;;  %20195 = vst [vmem:[#allocation334_spill] sm:$0xff] %v13362_v35  ;;  %v20216_v47 = vld [vmem:[#allocation241_spill] sm:$0xff]  ;;  %v20219_v35 = vld [vmem:[#allocation32_spill] sm:$0xff] }
 0x2ea   :  { %8596 = vrot.lane.b32.xlu1 %v20192_v41, %s9470_s15  ;;  %20199 = vst [vmem:[#allocation158_spill] sm:$0xff] %v13369_v9  ;;  %v13372_v41 = vpop.permute.xlu1 %8331  ;;  %v1177_v19 = vsel %vm1122_vm3, %v20203_v20, %v20202_v12  ;;  %20206 = vst [vmem:[#allocation114_spill] sm:$0xff] %v13390_v13  ;;  %v20208_v20 = vld [vmem:[#allocation130_spill] sm:$0xff]  ;;  %v13409_v24 = vsel %vm1904_vm6, %v4322_v33, %v13369_v9  ;;  %v20220_v33 = vunpack.i.l.bf16 %v20219_v35  ;;  %v20221_v9 = vld [vmem:[#allocation96_spill] sm:$0xff]  ;;  %v20244_v42 = vunpack.i.h.bf16 %v20219_v35 }
 0x2eb   :  { %20200 = vst [vmem:[#allocation335_spill] sm:$0xff] %v13372_v41  ;;  %v4325_v41 = vrot.slane %v19969_v26, 3  ;;  %v20209_v12 = vpack.i.bf16 %v19640_v46, %v20208_v20  ;;  %v13405_v55 = vpop.permute.xlu0 %8421  ;;  %20214 = vst [vmem:[#allocation336_spill] sm:$0xff] %v13409_v24  ;;  %v1193_v34 = vsel %vm1138_vm8, %v1177_v19, %v20215_v51  ;;  %v20222_v19 = vld [vmem:[#allocation141_spill] sm:$0xff]  ;;  %v4494_v20 = vrot.slane %v20185_v40, 1  ;;  %v20355_v24 = vld [vmem:[#allocation186_spill] sm:$0xff] }
 0x2ec   :  { %8691 = vrot.lane.b32.xlu0 %v20205_v17, %s9472_s16  ;;  %v13403_v17 = vsel %vm1154_vm9, %v1192_v53, %v20211_v61  ;;  %20213 = vst [vmem:[#allocation89_spill] sm:$0xff] %v13405_v55  ;;  %v20218_v53 = vld [vmem:[#allocation178_spill] sm:$0xff]  ;;  %v4373_v55 = vrot.slane %v20170_v45, 4  ;;  %v1178_v48 = vsel %vm1122_vm3, %v20221_v9, %v20220_v33  ;;  %v20229_v9 = vld [vmem:[#allocation216_spill] sm:$0xff]  ;;  %v4385_v45 = vrot.slane %v20174_v37, 4 }
 0x2ed   :  { %20212 = vst [vmem:[#allocation130_spill] sm:$0xff] %v13403_v17  ;;  %v4371_v61 = vrot.slane %v20218_v53, 4  ;;  %v13430_v51 = vsel %vm1904_vm6, %v4325_v41, %v13390_v13  ;;  %v20227_v17 = vld [vmem:[#allocation95_spill] sm:$0xff]  ;;  %v4382_v33 = vrot.slane %v20229_v9, 4  ;;  %v4386_v41 = vrot.slane %v20175_v2, 4  ;;  %v20278_v13 = vld [vmem:[#allocation118_spill] sm:$0xff] }
 0x2ee   :  { %8606 = vrot.lane.b32.xlu1 %v20209_v12, %s9470_s15  ;;  %v4370_v12 = vrot.slane %v19998_v43, 4  ;;  %v13418_v6 = vpop.permute.xlu1 %8336  ;;  %20223 = vst [vmem:[#allocation178_spill] sm:$0xff] %v13430_v51  ;;  %v20228_v10 = vpack.i.bf16 %v20226_v27, %v20227_v17  ;;  %v20235_v27 = vld [vmem:[#allocation111_spill] sm:$0xff]  ;;  %v20248_v37 = vpack.i.bf16 %v20247_v60, %v20145_v21  ;;  %v4398_v60 = vrot.slane %v20198_v58, 4  ;;  %v20297_v21 = vld [vmem:[#allocation194_spill] sm:$0xff] }
 0x2ef   :  { %20217 = vst [vmem:[#allocation241_spill] sm:$0xff] %v13418_v6  ;;  %v20224_v6 = vld [vmem:[#allocation225_spill] sm:$0xff]  ;;  %v13447_v5 = vpop.permute.xlu0 %8426  ;;  %v20298_v23 = vrot.slane %v20297_v21, 7  ;;  %v13783_v9 = vld [vmem:[%s18329_s6 + $0x1c8] sm:$0xff] }
 0x2f0   :  { %8701 = vrot.lane.b32.xlu0 %v20222_v19, %s9472_s16  ;;  %v13435_v53 = vrot.slane %v20224_v6, 1  ;;  %v4383_v19 = vrot.slane %v20230_v8, 4  ;;  %20232 = vst [vmem:[#allocation96_spill] sm:$0xff] %v13447_v5  ;;  %v20233_v6 = vld [vmem:[#allocation155_spill] sm:$0xff]  ;;  %v13464_v40 = vsel %vm1982_vm7, %v4370_v12, %v4371_v61  ;;  %v20245_v8 = vld [vmem:[#allocation189_spill] sm:$0xff] }
 0x2f1   :  { %v20234_v59 = vunpack.i.l.bf16 %v20233_v6  ;;  %20239 = vst [vmem:[#allocation95_spill] sm:$0xff] %v13464_v40  ;;  %v1179_v12 = vsel %vm1122_vm3, %v20245_v8, %v20244_v42  ;;  %v4394_v42 = vrot.slane %v20025_v16, 4  ;;  %v20254_v8 = vld [vmem:[#allocation232_spill] sm:$0xff] }
 0x2f2   :  { %20225 = vst [vmem:[#allocation32_spill] sm:$0xff] %v13435_v53  ;;  %8616 = vrot.lane.b32.xlu1 %v20228_v10, %s9469_s14  ;;  %v20236_v10 = vunpack.i.l.bf16 %v20235_v27  ;;  %v13459_v2 = vpop.permute.xlu1 %8341  ;;  %v4395_v6 = vrot.slane %v20254_v8, 4  ;;  %v13518_v8 = vld [vmem:[%s18329_s6 + $0x100] sm:$0xff] }
 0x2f3   :  { %v13452_v7 = vsel %vm1154_vm9, %v1193_v34, %v20234_v59  ;;  %20238 = vst [vmem:[#allocation154_spill] sm:$0xff] %v13459_v2  ;;  %v20240_v34 = vld [vmem:[#allocation242_spill] sm:$0xff]  ;;  %v13497_v35 = vpop.permute.xlu0 %8431  ;;  %v13540_v2 = vld [vmem:[%s18329_s6 + $0x190] sm:$0xff] }
 0x2f4   :  { %v1194_v17 = vsel %vm1138_vm8, %v1178_v48, %v20236_v10  ;;  %v20241_v59 = vpack.i.bf16 %v12986_v39, %v20240_v34  ;;  %v13472_v48 = vsel %vm1982_vm7, %v4373_v55, %v4374_v31  ;;  %v13476_v10 = vsel %vm724_vm5, %v4494_v20, %v13435_v53  ;;  %20253 = vst [vmem:[#allocation339_spill] sm:$0xff] %v13497_v35  ;;  %v20260_v34 = vld [vmem:[#allocation143_spill] sm:$0xff] }
 0x2f5   :  { %20242 = vst [vmem:[#allocation155_spill] sm:$0xff] %v13472_v48  ;;  %20243 = vst [vmem:[#allocation337_spill] sm:$0xff] %v13476_v10  ;;  %v13492_v31 = vsel %vm1982_vm7, %v4382_v33, %v4383_v19  ;;  %v13495_v20 = vsel %vm1982_vm7, %v4385_v45, %v4386_v41  ;;  %v4397_v53 = vrot.slane %v19966_v18, 4  ;;  %v13508_v19 = vpack.i.bf16 %v13472_v48, %v13464_v40  ;;  %v20259_v45 = vld [vmem:[#allocation288_spill] sm:$0xff] }
 0x2f6   :  { %8711 = vrot.lane.b32.xlu0 %v20241_v59, %s9474_s18  ;;  %8626 = vrot.lane.b32.xlu1 %v20248_v37, %s9469_s14  ;;  %v20249_v59 = vld [vmem:[#allocation276_spill] sm:$0xff]  ;;  %20251 = vst [vmem:[#allocation197_spill] sm:$0xff] %v13492_v31  ;;  %20252 = vst [vmem:[#allocation338_spill] sm:$0xff] %v13495_v20  ;;  %v20257_v33 = vunpack.i.h.bf16 %v20235_v27  ;;  %v13523_v37 = vld [vmem:[%s18329_s6 + $0x108] sm:$0xff]  ;;  %v13565_v58 = vsel %vm1982_vm7, %v4394_v42, %v4395_v6  ;;  %v20280_v6 = vunpack.i.l.bf16 %v12410_v11 }
 0x2f7   :  { %v13489_v55 = vsel %vm1154_vm9, %v1194_v17, %v20249_v59  ;;  %v13504_v17 = vpop.permute.xlu1 %8346  ;;  %20256 = vst [vmem:[#allocation341_spill] sm:$0xff] %v13508_v19  ;;  %v13545_v48 = vld [vmem:[%s18329_s6 + $0x198] sm:$0xff]  ;;  %v20270_v59 = vunpack.i.l.bf16 %v20177_v56  ;;  %v13562_v27 = vpop.permute.xlu0 %8436  ;;  %20273 = vst [vmem:[#allocation342_spill] sm:$0xff] %v13565_v58  ;;  %v13802_v19 = vld [vmem:[%s18329_s6 + $0x140] sm:$0xff] }
 0x2f8   :  { %20250 = vst [vmem:[#allocation189_spill] sm:$0xff] %v13489_v55  ;;  %20255 = vst [vmem:[#allocation340_spill] sm:$0xff] %v13504_v17  ;;  %v1195_v41 = vsel %vm1138_vm8, %v1179_v12, %v20257_v33  ;;  %v20261_v17 = vpack.i.bf16 %v20259_v45, %v20260_v34  ;;  %v20262_v12 = vunpack.i.l.bf16 %v12359_v36  ;;  %v20263_v33 = vld [vmem:[#allocation167_spill] sm:$0xff]  ;;  %v20265_v40 = vld [vmem:[#allocation40_spill] sm:$0xff] }
 0x2f9   :  { %v20266_v45 = vld [vmem:[#allocation142_spill] sm:$0xff]  ;;  %v13560_v61 = vsel %vm1154_vm9, %v1195_v41, %v20270_v59  ;;  %v20281_v42 = vld [vmem:[#allocation164_spill] sm:$0xff]  ;;  %v20286_v59 = vpack.i.bf16 %v13029_v50, %v20105_v29  ;;  %v20294_v29 = vunpack.i.h.bf16 %v12410_v11  ;;  %v20303_v11 = vunpack.i.h.bf16 %v12359_v36 }
 0x2fa   :  { %8721 = vrot.lane.b32.xlu0 %v20261_v17, %s9474_s18  ;;  %v13535_v35 = vsel %vm1154_vm9, %v20263_v33, %v20262_v12  ;;  %v20267_v34 = vld [vmem:[#allocation138_spill] sm:$0xff]  ;;  %v13555_v12 = vpack.i.bf16 %v13495_v20, %v13492_v31  ;;  %20271 = vst [vmem:[#allocation142_spill] sm:$0xff] %v13560_v61  ;;  %v13568_v17 = vsel %vm1982_vm7, %v4397_v53, %v4398_v60  ;;  %v20277_v20 = vld [vmem:[#allocation28_spill] sm:$0xff] }
 0x2fb   :  { %20264 = vst [vmem:[#allocation167_spill] sm:$0xff] %v13535_v35  ;;  %v20268_v5 = vpack.i.bf16 %v20266_v45, %v20267_v34  ;;  %20272 = vst [vmem:[#allocation138_spill] sm:$0xff] %v13562_v27  ;;  %v20275_v34 = vld [vmem:[#allocation33_spill] sm:$0xff]  ;;  %v13578_v41 = vpop.permute.xlu1 %8361  ;;  %v1131_v53 = vsel %vm1122_vm3, %v20281_v42, %v20280_v6  ;;  %v20283_v6 = vpack.i.bf16 %v13051_v57, %v13038_v4  ;;  %v20284_v42 = vunpack.i.l.bf16 %v20162_v1  ;;  %v20285_v27 = vld [vmem:[#allocation250_spill] sm:$0xff] }
 0x2fc   :  { %20269 = vst [vmem:[#allocation40_spill] sm:$0xff] %v13555_v12  ;;  %20274 = vst [vmem:[#allocation343_spill] sm:$0xff] %v13568_v17  ;;  %v20276_v45 = vunpack.i.l.bf16 %v20275_v34  ;;  %v20287_v57 = vunpack.i.l.bf16 %v20106_v15  ;;  %v20289_v4 = vmov 0.0   ;;  %v13634_v12 = vpop.permute.xlu0 %8441  ;;  %v20293_v35 = vld [vmem:[#allocation133_spill] sm:$0xff]  ;;  %v20299_v17 = vunpack.i.l.bf16 %v20278_v13 }
 0x2fd   :  { %8636 = vrot.lane.b32.xlu1 %v20268_v5, %s9469_s14  ;;  %20279 = vst [vmem:[#allocation33_spill] sm:$0xff] %v13578_v41  ;;  %v13589_v5 = vld [vmem:[%s18329_s6 + $0x110] sm:$0xff]  ;;  %v1147_v60 = vsel %vm1138_vm8, %v1131_v53, %v20284_v42  ;;  %v13621_v53 = vpack.i.bf16 %v19998_v43, %v20289_v4  ;;  %v13626_v42 = vld [vmem:[%s18329_s6 + $0x1a0] sm:$0xff]  ;;  %20291 = vst [vmem:[#allocation164_spill] sm:$0xff] %v13634_v12  ;;  %v20307_v36 = vpack.i.bf16 %v13029_v50, %v13111_v38 }
 0x2fe   :  { %v2596_v31 = vsel %vm1138_vm8, %v20277_v20, %v20276_v45  ;;  %v13594_v20 = vld [vmem:[%s18329_s6 + $0x118] sm:$0xff]  ;;  %v20282_v45 = vld [vmem:[#allocation98_spill] sm:$0xff]  ;;  %8731 = vrot.lane.b32.xlu0 %v20283_v6, %s9474_s18  ;;  %v20313_v38 = vpack.i.bf16 %v13104_v49, %v13100_v63  ;;  %v20391_v50 = vld [vmem:[#allocation121_spill] sm:$0xff] }
 0x2ff   :  { %v13617_v6 = vsel %vm1154_vm9, %v2596_v31, %v20287_v57  ;;  %20290 = vst [vmem:[#allocation118_spill] sm:$0xff] %v13621_v53  ;;  %v20292_v31 = vunpack.i.h.bf16 %v20275_v34  ;;  %v20295_v43 = vld [vmem:[#allocation42_spill] sm:$0xff]  ;;  %v20300_v57 = vld [vmem:[#allocation5_spill] sm:$0xff] }
 0x300   :  { %20288 = vst [vmem:[#allocation28_spill] sm:$0xff] %v13617_v6  ;;  %v1132_v53 = vsel %vm1122_vm3, %v20295_v43, %v20294_v29  ;;  %v20296_v6 = vunpack.i.h.bf16 %v20278_v13  ;;  %v20301_v61 = vrot.slane %v20300_v57, 7  ;;  %v13665_v43 = vsel %vm1154_vm9, %v1147_v60, %v20303_v11  ;;  %v13696_v11 = vld [vmem:[%s18329_s6 + $0x1b0] sm:$0xff]  ;;  %v20432_v49 = vld [vmem:[#allocation213_spill] sm:$0xff] }
 0x301   :  { %8646 = vrot.lane.b32.xlu1 %v20286_v59, %s9473_s17  ;;  %v13631_v59 = vld [vmem:[%s18329_s6 + $0x1a8] sm:$0xff]  ;;  %v2597_v4 = vsel %vm1138_vm8, %v20293_v35, %v20292_v31  ;;  %v13660_v35 = vpop.permute.xlu1 %8376  ;;  %20304 = vst [vmem:[#allocation250_spill] sm:$0xff] %v13665_v43  ;;  %v20305_v29 = vunpack.i.h.bf16 %v20162_v1  ;;  %v20320_v43 = vunpack.i.l.bf16 %v12346_v0 }
 0x302   :  { %v13651_v41 = vsel %vm1122_vm3, %v20298_v23, %v20296_v6  ;;  %v13658_v34 = vsel %vm1122_vm3, %v20301_v61, %v20299_v17  ;;  %20302 = vst [vmem:[#allocation98_spill] sm:$0xff] %v13660_v35  ;;  %v13673_v23 = vld [vmem:[%s18329_s6 + $0x120] sm:$0xff]  ;;  %v8444_v61 = vunpack.i.h.bf16 %v13634_v12  ;;  %8741 = vrot.lane.b32.xlu0 %v20307_v36, %s9474_s18  ;;  %v20308_v17 = vunpack.i.h.bf16 %v20106_v15  ;;  %v20315_v15 = vld [vmem:[#allocation76_spill] sm:$0xff]  ;;  %v13765_v35 = vld [vmem:[%s18329_s6 + $0x208] sm:$0xff] }
 0x303   :  { %v1148_v31 = vsel %vm1138_vm8, %v1132_v53, %v20305_v29  ;;  %v13691_v53 = vld [vmem:[%s18329_s6 + $0x128] sm:$0xff]  ;;  %v13701_v29 = vld [vmem:[%s18329_s6 + $0x1b8] sm:$0xff]  ;;  %v20310_v36 = vunpack.i.h.bf16 %v20285_v27  ;;  %v20314_v12 = vunpack.i.l.bf16 %v12400_v22  ;;  %v20316_v6 = vunpack.i.l.bf16 %v20285_v27  ;;  %20325 = vst [vmem:[#allocation346_spill] sm:$0xff] %v13765_v35 }
 0x304   :  { %v13684_v1 = vsel %vm1154_vm9, %v2597_v4, %v20308_v17  ;;  %v20311_v17 = vld [vmem:[#allocation61_spill] sm:$0xff] }
 0x305   :  { %20309 = vst [vmem:[#allocation133_spill] sm:$0xff] %v13684_v1  ;;  %v20312_v10 = vrot.slane %v20311_v17, 7  ;;  %8656 = vrot.lane.b32.xlu1 %v20313_v38, %s9473_s17  ;;  %v1133_v4 = vsel %vm1122_vm3, %v20315_v15, %v20314_v12  ;;  %v20317_v1 = vld [vmem:[#allocation68_spill] sm:$0xff]  ;;  %v13733_v38 = vsel %vm1154_vm9, %v1148_v31, %v20320_v43  ;;  %v13743_v12 = vld [vmem:[%s18329_s6 + $0x130] sm:$0xff] }
 0x306   :  { %v20318_v17 = vrot.slane %v20317_v1, 7  ;;  %20321 = vst [vmem:[#allocation76_spill] sm:$0xff] %v13733_v38  ;;  %v1149_v15 = vsel %vm1138_vm8, %v1133_v4, %v20322_v52  ;;  %v13760_v4 = vld [vmem:[%s18329_s6 + $0x200] sm:$0xff]  ;;  %8751 = vrot.lane.b32.xlu0 %v13195_v54, %s9470_s15  ;;  %v20327_v31 = vld [vmem:[#allocation55_spill] sm:$0xff]  ;;  %v20331_v1 = vld [vmem:[#allocation182_spill] sm:$0xff] }
 0x307   :  { %v13709_v60 = vsel %vm1122_vm3, %v20312_v10, %v20310_v36  ;;  %v13728_v36 = vpop.permute.xlu0 %8446  ;;  %20324 = vst [vmem:[#allocation345_spill] sm:$0xff] %v13760_v4  ;;  %v1171_v52 = vsel %vm1122_vm3, %v20327_v31, %v8444_v61  ;;  %v13778_v38 = vld [vmem:[%s18329_s6 + $0x1c0] sm:$0xff]  ;;  %v20329_v61 = vunpack.i.h.bf16 %v12346_v0  ;;  %v20332_v14 = vunpack.i.l.bf16 %v20331_v1  ;;  %v13807_v0 = vld [vmem:[%s18329_s6 + $0x148] sm:$0xff] }
 0x308   :  { %v13726_v10 = vsel %vm1122_vm3, %v20318_v17, %v20316_v6  ;;  %20319 = vst [vmem:[#allocation42_spill] sm:$0xff] %v13728_v36  ;;  %v13748_v6 = vld [vmem:[%s18329_s6 + $0x138] sm:$0xff]  ;;  %v13750_v17 = vpop.permute.xlu1 %8391  ;;  %v8449_v43 = vunpack.i.h.bf16 %v13728_v36  ;;  %v20328_v36 = vld [vmem:[#allocation307_spill] sm:$0xff]  ;;  %v20354_v63 = vunpack.i.h.bf16 %v20331_v1 }
 0x309   :  { %20323 = vst [vmem:[#allocation344_spill] sm:$0xff] %v13750_v17  ;;  %8666 = vrot.lane.b32.xlu1 %v20328_v36, %s9473_s17  ;;  %v13791_v31 = vsel %vm1154_vm9, %v1149_v15, %v20329_v61  ;;  %v2598_v30 = vsel %vm1138_vm8, %v20333_v25, %v20332_v14  ;;  %v20337_v17 = vld [vmem:[#allocation88_spill] sm:$0xff]  ;;  %v20352_v25 = vpack.i.bf16 %v13220_v44, %v13204_v3 }
 0x30a   :  { %v1187_v54 = vsel %vm1138_vm8, %v1171_v52, %v8449_v43  ;;  %20330 = vst [vmem:[#allocation55_spill] sm:$0xff] %v13791_v31  ;;  %v20335_v43 = vld [vmem:[#allocation172_spill] sm:$0xff]  ;;  %v20338_v36 = vunpack.i.l.bf16 %v20337_v17  ;;  %v20340_v31 = vunpack.i.h.bf16 %v12400_v22  ;;  %v2599_v51 = vsel %vm1138_vm8, %v20355_v24, %v20354_v63  ;;  %v13896_v63 = vld [vmem:[%s18329_s6 + $0x150] sm:$0xff]  ;;  %v20363_v24 = vld [vmem:[#allocation285_spill] sm:$0xff] }
 0x30b   :  { %v13809_v15 = vpop.permute.xlu0 %8456  ;;  %v20336_v52 = vunpack.i.l.bf16 %v20335_v43  ;;  %8761 = vrot.lane.b32.xlu0 %v20352_v25, %s9470_s15  ;;  %v20359_v1 = vunpack.i.h.bf16 %v20337_v17  ;;  %20361 = vst [vmem:[#allocation186_spill] sm:$0xff] %v13896_v63  ;;  %v20366_v25 = vld [vmem:[#allocation109_spill] sm:$0xff]  ;;  %v20369_v17 = vld [vmem:[#allocation286_spill] sm:$0xff] }
 0x30c   :  { %20334 = vst [vmem:[#allocation182_spill] sm:$0xff] %v13809_v15  ;;  %v13817_v14 = vsel %vm1154_vm9, %v2598_v30, %v20338_v36  ;;  %v1134_v55 = vsel %vm1122_vm3, %v20341_v32, %v20340_v31  ;;  %v13828_v15 = vld [vmem:[%s18329_s6 + $0x290] sm:$0xff]  ;;  %v20345_v36 = vld [vmem:[#allocation281_spill] sm:$0xff]  ;;  %v13842_v32 = vpop.permute.xlu1 %8396  ;;  %v20347_v31 = vunpack.i.h.bf16 %v20158_v28  ;;  %v13864_v28 = vld [vmem:[%s18329_s6 + $0x1d8] sm:$0xff] }
 0x30d   :  { %v1203_v61 = vsel %vm1154_vm9, %v1187_v54, %v20336_v52  ;;  %20339 = vst [vmem:[#allocation282_spill] sm:$0xff] %v13817_v14  ;;  %20342 = vst [vmem:[#allocation172_spill] sm:$0xff] %v13828_v15  ;;  %v13833_v54 = vld [vmem:[%s18329_s6 + $0x298] sm:$0xff]  ;;  %v13838_v30 = vld [vmem:[%s18329_s6 + $0x210] sm:$0xff]  ;;  %v8209_v22 = vunpack.i.h.bf16 %v20345_v36  ;;  %v8208_v43 = vunpack.i.l.bf16 %v20345_v36  ;;  %v13891_v26 = vsel %vm1154_vm9, %v2599_v51, %v20359_v1 }
 0x30e   :  { %20343 = vst [vmem:[#allocation88_spill] sm:$0xff] %v13833_v54  ;;  %20344 = vst [vmem:[#allocation75_spill] sm:$0xff] %v13838_v30  ;;  %1313 = vmatprep.mubr.f32.mxu1 %v1203_v61  ;;  %v13847_v52 = vsel %vm1138_vm8, %v1134_v55, %v20347_v31  ;;  %v13854_v14 = vld [vmem:[%s18329_s6 + $0x218] sm:$0xff]  ;;  %v13859_v36 = vld [vmem:[%s18329_s6 + $0x1d0] sm:$0xff]  ;;  %v20365_v51 = vpack.c.bf16 %v13523_v37, %v13518_v8 }
 0x30f   :  { %20346 = vst [vmem:[#allocation281_spill] sm:$0xff] %v13842_v32  ;;  %20348 = vst [vmem:[#allocation347_spill] sm:$0xff] %v13847_v52  ;;  %v20351_v31 = vld [vmem:[#allocation48_spill] sm:$0xff]  ;;  %v13905_v21 = vpop.permute.xlu0 %8471  ;;  %v13917_v52 = vld [vmem:[%s18329_s6 + $0x2a0] sm:$0xff]  ;;  %v3055_v8 = vsel %vm1122_vm3, %v20366_v25, %v8209_v22 }
 0x310   :  { %20349 = vst [vmem:[#allocation348_spill] sm:$0xff] %v13854_v14  ;;  %1314 = vmatmul.mubr.f32.vlgmr.msra.gmra.mrb[0].mxu1 %v20351_v31  ;;  %v20356_v61 = vld [vmem:[#allocation268_spill] sm:$0xff]  ;;  %v20358_v31 = vld [vmem:[#allocation181_spill] sm:$0xff]  ;;  %20360 = vst [vmem:[#allocation48_spill] sm:$0xff] %v13891_v26  ;;  %v13931_v1 = vpop.permute.xlu1 %8401  ;;  %v20371_v26 = vpack.c.bf16 %v13545_v48, %v13540_v2  ;;  %v20396_v14 = vpack.c.bf16 %v13594_v20, %v13589_v5 }
 0x311   :  { %v20357_v4 = vpack.i.bf16 %v19640_v46, %v20356_v61  ;;  %1318 = vmatprep.mubr.f32.mxu1 %v20358_v31  ;;  %v13901_v46 = vld [vmem:[%s18329_s6 + $0x158] sm:$0xff]  ;;  %v8308_v31 = vunpack.i.l.bf16 %v20363_v24  ;;  %20364 = vst [vmem:[#allocation285_spill] sm:$0xff] %v13905_v21  ;;  %7566 = vmatpush3.bf16.msra.mxu1 %v20365_v51  ;;  %v20367_v37 = vld [vmem:[#allocation113_spill] sm:$0xff]  ;;  %v8213_v21 = vunpack.i.l.bf16 %v20369_v17  ;;  %v20373_v32 = vld [vmem:[#allocation291_spill] sm:$0xff] }
 0x312   :  { %20362 = vst [vmem:[#allocation181_spill] sm:$0xff] %v13901_v46  ;;  %v13928_v51 = vsel %vm1122_vm3, %v20367_v37, %v8208_v43  ;;  %20370 = vst [vmem:[#allocation113_spill] sm:$0xff] %v13931_v1  ;;  %7568 = vmatprep.subr.bf16.mxu1 %v20371_v26  ;;  %v13939_v55 = vld [vmem:[%s18329_s6 + $0x220] sm:$0xff]  ;;  %v8228_v3 = vunpack.i.l.bf16 %v20373_v32  ;;  %v20374_v22 = vld [vmem:[#allocation51_spill] sm:$0xff] }
 0x313   :  { %8676 = vrot.lane.b32.xlu1 %v20357_v4, %s9473_s17  ;;  %v8309_v4 = vunpack.i.h.bf16 %v20363_v24  ;;  %v13922_v24 = vld [vmem:[%s18329_s6 + $0x2a8] sm:$0xff]  ;;  %20368 = vst [vmem:[#allocation109_spill] sm:$0xff] %v13928_v51  ;;  %20372 = vst [vmem:[#allocation349_spill] sm:$0xff] %v13939_v55  ;;  %v20375_v43 = vld [vmem:[#allocation325_spill] sm:$0xff] }
 0x314   :  { %1319 = vmatmul.mubr.f32.gmra.mrb[2].mxu1 %v20374_v22  ;;  %v20376_v25 = vld [vmem:[#allocation324_spill] sm:$0xff]  ;;  %v20379_v2 = vld [vmem:[#allocation217_spill] sm:$0xff]  ;;  %v13958_v22 = vld [vmem:[%s18329_s6 + $0x228] sm:$0xff] }
 0x315   :  { %v20377_v37 = vpack.i.bf16 %v20375_v43, %v20376_v25  ;;  %v20380_v48 = vunpack.i.l.bf16 %v20379_v2  ;;  %v20381_v61 = vld [vmem:[#allocation161_spill] sm:$0xff]  ;;  %20382 = vst [vmem:[#allocation291_spill] sm:$0xff] %v13958_v22  ;;  %v13968_v51 = vld [vmem:[%s18329_s6 + $0x1e8] sm:$0xff]  ;;  %v20389_v43 = vunpack.i.l.bf16 %v20278_v13  ;;  %v20390_v15 = vld [vmem:[#allocation215_spill] sm:$0xff]  ;;  %v3057_v35 = vsel %vm1122_vm3, %v20391_v50, %v8309_v4  ;;  %7570 = vmatpush3.bf16.msra.mxu1 %v20396_v14 }
 0x316   :  { %v20386_v25 = vld [vmem:[#allocation65_spill] sm:$0xff]  ;;  %v14008_v50 = vld [vmem:[%s18329_s6 + $0x168] sm:$0xff]  ;;  %v20399_v4 = vpack.c.bf16 %v13631_v59, %v13626_v42  ;;  %v20400_v5 = vld [vmem:[#allocation175_spill] sm:$0xff]  ;;  %v20412_v22 = vunpack.i.h.bf16 %v20379_v2 }
 0x317   :  { %8771 = vrot.lane.b32.xlu0 %v20377_v37, %s9470_s15  ;;  %v2544_v30 = vsel %vm1122_vm3, %v20381_v61, %v20380_v48  ;;  %v13963_v37 = vld [vmem:[%s18329_s6 + $0x1e0] sm:$0xff]  ;;  %v20384_v61 = vld [vmem:[#allocation318_spill] sm:$0xff]  ;;  %1323 = vmatprep.mubr.f32.mxu1 %v20386_v25  ;;  %v13985_v54 = vsel %vm1122_vm3, %v20390_v15, %v20389_v43  ;;  %v8229_v25 = vunpack.i.h.bf16 %v20373_v32  ;;  %v14013_v32 = vpop.permute.xlu1 %8406  ;;  %v20401_v20 = vunpack.i.l.bf16 %v20400_v5  ;;  %v14035_v42 = vld [vmem:[%s18329_s6 + $0x2b8] sm:$0xff] }
 0x318   :  { %v20385_v48 = vpack.i.bf16 %v13228_v62, %v20384_v61  ;;  %v20387_v1 = vld [vmem:[#allocation229_spill] sm:$0xff]  ;;  %v20392_v62 = vld [vmem:[#allocation119_spill] sm:$0xff]  ;;  %v20394_v61 = vld [vmem:[#allocation290_spill] sm:$0xff]  ;;  %20398 = vst [vmem:[#allocation65_spill] sm:$0xff] %v14013_v32  ;;  %7572 = vmatprep.subr.bf16.mxu1 %v20399_v4 }
 0x319   :  { %v20388_v63 = vunpack.i.l.bf16 %v20387_v1  ;;  %v14003_v15 = vld [vmem:[%s18329_s6 + $0x160] sm:$0xff]  ;;  %v20403_v59 = vld [vmem:[#allocation296_spill] sm:$0xff]  ;;  %v20418_v2 = vunpack.i.h.bf16 %v20387_v1 }
 0x31a   :  { %8686 = vrot.lane.b32.xlu1 %v20385_v48, %s9472_s16  ;;  %v13991_v48 = vsel %vm1122_vm3, %v20392_v62, %v8308_v31  ;;  %v14011_v62 = vsel %vm1138_vm8, %v3055_v8, %v8213_v21  ;;  %v14030_v21 = vld [vmem:[%s18329_s6 + $0x2b0] sm:$0xff]  ;;  %v8329_v8 = vunpack.i.h.bf16 %v20403_v59  ;;  %v20404_v4 = vld [vmem:[#allocation25_spill] sm:$0xff] }
 0x31b   :  { %v2556_v46 = vsel %vm1138_vm8, %v2544_v30, %v20388_v63  ;;  %20393 = vst [vmem:[#allocation51_spill] sm:$0xff] %v13991_v48  ;;  %v8313_v30 = vunpack.i.l.bf16 %v20394_v61  ;;  %v13995_v63 = vpop.permute.xlu0 %8481  ;;  %20397 = vst [vmem:[#allocation161_spill] sm:$0xff] %v14011_v62  ;;  %1324 = vmatmul.mubr.f32.gmra.mrb[4].mxu1 %v20404_v4  ;;  %v20406_v31 = vld [vmem:[#allocation179_spill] sm:$0xff]  ;;  %v20416_v48 = vld [vmem:[#allocation190_spill] sm:$0xff]  ;;  %v20417_v4 = vpack.c.bf16 %v13691_v53, %v13673_v23 }
 0x31c   :  { %20395 = vst [vmem:[#allocation217_spill] sm:$0xff] %v13995_v63  ;;  %v14021_v14 = vsel %vm1154_vm9, %v2556_v46, %v20401_v20  ;;  %v8328_v46 = vunpack.i.l.bf16 %v20403_v59  ;;  %v20405_v20 = vld [vmem:[#allocation180_spill] sm:$0xff]  ;;  %v20408_v62 = vld [vmem:[#allocation191_spill] sm:$0xff]  ;;  %v1181_v55 = vsel %vm1122_vm3, %v20416_v48, %v8229_v25  ;;  %v20434_v17 = vld [vmem:[#allocation265_spill] sm:$0xff] }
 0x31d   :  { %20402 = vst [vmem:[#allocation229_spill] sm:$0xff] %v14021_v14  ;;  %v20407_v43 = vpack.i.bf16 %v20405_v20, %v20406_v31  ;;  %v1180_v32 = vsel %vm1122_vm3, %v20408_v62, %v8228_v3  ;;  %v20409_v63 = vld [vmem:[#allocation112_spill] sm:$0xff]  ;;  %v20410_v14 = vld [vmem:[#allocation122_spill] sm:$0xff]  ;;  %v20413_v31 = vld [vmem:[#allocation149_spill] sm:$0xff]  ;;  %v14064_v62 = vsel %vm1138_vm8, %v3057_v35, %v8313_v30  ;;  %7574 = vmatpush3.bf16.msra.mxu1 %v20417_v4  ;;  %v14095_v30 = vpop.permute.xlu1 %8411  ;;  %v20421_v4 = vunpack.i.l.bf16 %v20265_v40 }
 0x31e   :  { %8696 = vrot.lane.b32.xlu1 %v20409_v63, %s9472_s16  ;;  %1328 = vmatprep.mubr.f32.mxu1 %v20410_v14  ;;  %v14061_v3 = vld [vmem:[%s18329_s6 + $0x230] sm:$0xff]  ;;  %20414 = vst [vmem:[#allocation215_spill] sm:$0xff] %v14064_v62  ;;  %v14081_v35 = vld [vmem:[%s18329_s6 + $0x238] sm:$0xff]  ;;  %20420 = vst [vmem:[#allocation119_spill] sm:$0xff] %v14095_v30  ;;  %v20431_v30 = vunpack.i.h.bf16 %v20278_v13 }
 0x31f   :  { %8781 = vrot.lane.b32.xlu0 %v20407_v43, %s9475_s29  ;;  %v2545_v43 = vsel %vm1122_vm3, %v20413_v31, %v20412_v22  ;;  %v14066_v14 = vpop.permute.xlu0 %8486  ;;  %v14086_v48 = vld [vmem:[%s18329_s6 + $0x1f0] sm:$0xff]  ;;  %v14091_v23 = vld [vmem:[%s18329_s6 + $0x1f8] sm:$0xff]  ;;  %v20423_v31 = vunpack.i.h.bf16 %v20400_v5 }
 0x320   :  { %20415 = vst [vmem:[#allocation121_spill] sm:$0xff] %v14066_v14  ;;  %v2557_v22 = vsel %vm1138_vm8, %v2545_v43, %v20418_v2  ;;  %v20419_v53 = vld [vmem:[#allocation300_spill] sm:$0xff]  ;;  %v1196_v43 = vsel %vm1138_vm8, %v1180_v32, %v20421_v4  ;;  %v20422_v2 = vpack.c.bf16 %v13701_v29, %v13696_v11  ;;  %v14111_v14 = vld [vmem:[%s18329_s6 + $0x170] sm:$0xff]  ;;  %v20425_v4 = vld [vmem:[#allocation170_spill] sm:$0xff]  ;;  %v2586_v59 = vsel %vm1122_vm3, %v20432_v49, %v20431_v30 }
 0x321   :  { %v8254_v1 = vunpack.i.h.bf16 %v20419_v53  ;;  %v8253_v25 = vunpack.i.l.bf16 %v20419_v53  ;;  %v14106_v62 = vsel %vm1154_vm9, %v2557_v22, %v20423_v31  ;;  %v14116_v53 = vld [vmem:[%s18329_s6 + $0x178] sm:$0xff]  ;;  %1329 = vmatmul.mubr.f32.gmra.mrb[6].mxu1 %v20425_v4  ;;  %v20427_v29 = vld [vmem:[#allocation221_spill] sm:$0xff]  ;;  %v20429_v22 = vld [vmem:[#allocation43_spill] sm:$0xff]  ;;  %v20437_v49 = vunpack.i.h.bf16 %v20177_v56 }
 0x322   :  { %7576 = vmatprep.subr.bf16.mxu1 %v20422_v2  ;;  %20424 = vst [vmem:[#allocation175_spill] sm:$0xff] %v14106_v62  ;;  %v20426_v11 = vld [vmem:[#allocation224_spill] sm:$0xff]  ;;  %v1182_v31 = vsel %vm1122_vm3, %v20429_v22, %v8328_v46  ;;  %v20430_v2 = vld [vmem:[#allocation245_spill] sm:$0xff]  ;;  %v20433_v4 = vld [vmem:[#allocation331_spill] sm:$0xff]  ;;  %1333 = vmatprep.mubr.f32.mxu1 %v20434_v17  ;;  %v20438_v17 = vpack.c.bf16 %v13748_v6, %v13743_v12  ;;  %v20442_v6 = vunpack.i.h.bf16 %v20282_v45 }
 0x323   :  { %v20428_v5 = vpack.i.bf16 %v20426_v11, %v20427_v29  ;;  %v1183_v26 = vsel %vm1122_vm3, %v20430_v2, %v8329_v8  ;;  %8706 = vrot.lane.b32.xlu1 %v20433_v4, %s9472_s16  ;;  %v14145_v46 = vpop.permute.xlu0 %8511  ;;  %v14150_v30 = vsel %vm1154_vm9, %v1196_v43, %v20437_v49  ;;  %v14161_v22 = vsel %vm1138_vm8, %v13658_v34, %v8253_v25  ;;  %v14167_v43 = vpop.permute.xlu1 %8416  ;;  %v20444_v49 = vld [vmem:[#allocation302_spill] sm:$0xff] }
 0x324   :  { %20436 = vst [vmem:[#allocation296_spill] sm:$0xff] %v14145_v46  ;;  %7578 = vmatpush3.bf16.msra.mxu1 %v20438_v17  ;;  %20439 = vst [vmem:[#allocation25_spill] sm:$0xff] %v14161_v22  ;;  %v14165_v56 = vsel %vm1138_vm8, %v13651_v41, %v8254_v1  ;;  %v20441_v2 = vunpack.i.l.bf16 %v20282_v45  ;;  %v20443_v34 = vpack.c.bf16 %v13783_v9, %v13778_v38  ;;  %v8353_v41 = vunpack.i.l.bf16 %v20444_v49  ;;  %v14195_v9 = vld [vmem:[%s18329_s6 + $0x2c0] sm:$0xff]  ;;  %v14200_v38 = vld [vmem:[%s18329_s6 + $0x2c8] sm:$0xff] }
 0x325   :  { %8791 = vrot.lane.b32.xlu0 %v20428_v5, %s9475_s29  ;;  %v20435_v5 = vunpack.i.h.bf16 %v20265_v40  ;;  %20440 = vst [vmem:[#allocation191_spill] sm:$0xff] %v14165_v56  ;;  %v8419_v32 = vunpack.i.h.bf16 %v14167_v43  ;;  %v20445_v40 = vld [vmem:[#allocation255_spill] sm:$0xff]  ;;  %v2600_v45 = vsel %vm1138_vm8, %v13985_v54, %v8253_v25  ;;  %v20451_v54 = vld [vmem:[#allocation130_spill] sm:$0xff]  ;;  %v2601_v25 = vsel %vm1138_vm8, %v2586_v59, %v8254_v1  ;;  %v20496_v22 = vld [vmem:[#allocation257_spill] sm:$0xff] }
 0x326   :  { %v14172_v12 = vsel %vm1138_vm8, %v1182_v31, %v20441_v2  ;;  %7580 = vmatprep.subr.bf16.mxu1 %v20443_v34  ;;  %1334 = vmatmul.mubr.f32.gmra.mrb[8].mxu1 %v20445_v40  ;;  %v20446_v31 = vpack.i.bf16 %v19966_v18, %v20025_v16  ;;  %v20449_v34 = vld [vmem:[#allocation117_spill] sm:$0xff]  ;;  %v20456_v2 = vpack.c.bf16 %v13807_v0, %v13802_v19  ;;  %v20459_v59 = vld [vmem:[#allocation74_spill] sm:$0xff]  ;;  %v20460_v16 = vld [vmem:[#allocation240_spill] sm:$0xff] }
 0x327   :  { %v14139_v29 = vsel %vm1138_vm8, %v1181_v55, %v20435_v5  ;;  %v14177_v5 = vsel %vm1138_vm8, %v1183_v26, %v20442_v6  ;;  %v20447_v26 = vld [vmem:[#allocation306_spill] sm:$0xff]  ;;  %v20448_v6 = vld [vmem:[#allocation332_spill] sm:$0xff]  ;;  %1338 = vmatprep.mubr.f32.mxu1 %v20451_v54  ;;  %v20452_v55 = vld [vmem:[#allocation269_spill] sm:$0xff]  ;;  %v14216_v17 = vsel %vm1154_vm9, %v20263_v33, %v8419_v32  ;;  %v14218_v40 = vpop.permute.xlu0 %8521  ;;  %v4616_v1 = vrot.slane %v20459_v59, 4  ;;  %v14228_v46 = vpop.permute.xlu1 %8451 }
 0x328   :  { %v20453_v8 = vunpack.i.l.bf16 %v20452_v55  ;;  %20454 = vst [vmem:[#allocation112_spill] sm:$0xff] %v14216_v17  ;;  %20455 = vst [vmem:[#allocation122_spill] sm:$0xff] %v14218_v40  ;;  %7582 = vmatpush3.bf16.msra.mxu1 %v20456_v2  ;;  %v4617_v61 = vrot.slane %v20460_v16, 4  ;;  %3476 = vmatmul.mubr.f32.vlgmr.msra.gmra.mrb[32].mxu0 %v14216_v17  ;;  %v20461_v33 = vpack.c.bf16 %v13864_v28, %v13859_v36  ;;  %v20462_v32 = vunpack.i.l.bf16 %v20216_v47  ;;  %v20468_v2 = vld [vmem:[#allocation126_spill] sm:$0xff] }
 0x329   :  { %8801 = vrot.lane.b32.xlu0 %v20446_v31, %s9475_s29  ;;  %v20450_v31 = vpack.i.bf16 %v20448_v6, %v20449_v34  ;;  %v4497_v0 = vrot.slane %v20459_v59, 1  ;;  %v20466_v36 = vunpack.i.h.bf16 %v20444_v49  ;;  %v20472_v40 = vld [vmem:[#allocation46_spill] sm:$0xff]  ;;  %v4545_v44 = vrot.slane %v20459_v59, 2 }
 0x32a   :  { %v2546_v13 = vsel %vm1122_vm3, %v20300_v57, %v20453_v8  ;;  %7584 = vmatprep.subr.bf16.mxu1 %v20461_v33  ;;  %v14243_v8 = vrot.slane %v20460_v16, 1  ;;  %v20469_v33 = vld [vmem:[#allocation63_spill] sm:$0xff]  ;;  %v20548_v56 = vpack.c.bf16 %v13922_v24, %v13917_v52 }
 0x32b   :  { %8716 = vrot.lane.b32.xlu1 %v20450_v31, %s9474_s18  ;;  %v20457_v31 = vld [vmem:[#allocation77_spill] sm:$0xff]  ;;  %v14253_v28 = vsel %vm1138_vm8, %v13709_v60, %v20466_v36  ;;  %3480 = vmatprep.mubr.f32.mxu0 %v20469_v33  ;;  %v14270_v60 = vld [vmem:[%s18329_s6 + $0x248] sm:$0xff]  ;;  %v20474_v33 = vld [vmem:[#allocation139_spill] sm:$0xff] }
 0x32c   :  { %v20458_v18 = vunpack.i.l.bf16 %v20457_v31  ;;  %20464 = vst [vmem:[#allocation190_spill] sm:$0xff] %v14243_v8  ;;  %20467 = vst [vmem:[#allocation170_spill] sm:$0xff] %v14253_v28  ;;  %v20473_v36 = vld [vmem:[#allocation334_spill] sm:$0xff]  ;;  %v20479_v28 = vunpack.i.h.bf16 %v20447_v26  ;;  %3481 = vmatmul.mubr.f32.gmra.mrb[34].mxu0 %v14216_v17 }
 0x32e   :  { %v2558_v54 = vsel %vm1138_vm8, %v2546_v13, %v20458_v18  ;;  %v14247_v13 = vsel %vm1138_vm8, %v13726_v10, %v8353_v41  ;;  %v20471_v18 = vunpack.i.l.bf16 %v20285_v27  ;;  %v14265_v10 = vld [vmem:[%s18329_s6 + $0x240] sm:$0xff] }
 0x32f   :  { %v14237_v19 = vsel %vm1154_vm9, %v2558_v54, %v20462_v32  ;;  %20465 = vst [vmem:[#allocation300_spill] sm:$0xff] %v14247_v13  ;;  %v20470_v32 = vld [vmem:[#allocation71_spill] sm:$0xff]  ;;  %v20475_v54 = vpack.i.bf16 %v20473_v36, %v20474_v33  ;;  %v14289_v13 = vsel %vm1154_vm9, %v2601_v25, %v20479_v28  ;;  %v14305_v25 = vpop.permute.xlu0 %8531  ;;  %v20483_v28 = vld [vmem:[#allocation346_spill] sm:$0xff]  ;;  %v14312_v33 = vsel %vm1982_vm7, %v4616_v1, %v4617_v61 }
 0x330   :  { %20463 = vst [vmem:[#allocation149_spill] sm:$0xff] %v14237_v19  ;;  %1339 = vmatmul.mubr.f32.gmra.mrb[10].mxu1 %v20470_v32  ;;  %v2587_v57 = vsel %vm1122_vm3, %v20472_v40, %v20471_v18  ;;  %v20476_v32 = vpack.i.bf16 %v12986_v39, %v20459_v59  ;;  %v20477_v40 = vunpack.i.l.bf16 %v20447_v26  ;;  %20480 = vst [vmem:[#allocation245_spill] sm:$0xff] %v14289_v13  ;;  %v14315_v26 = vpop.permute.xlu1 %8461  ;;  %v20490_v13 = vld [vmem:[#allocation172_spill] sm:$0xff]  ;;  %v20493_v61 = vunpack.i.h.bf16 %v20452_v55  ;;  %v20494_v1 = vld [vmem:[#allocation194_spill] sm:$0xff] }
 0x331   :  { %8726 = vrot.lane.b32.xlu1 %v20475_v54, %s9474_s18  ;;  %v2602_v36 = vsel %vm1138_vm8, %v2587_v57, %v8353_v41  ;;  %v14295_v54 = vld [vmem:[%s18329_s6 + $0x2d0] sm:$0xff]  ;;  %1343 = vmatprep.mubr.f32.mxu1 %v13452_v7  ;;  %20482 = vst [vmem:[#allocation213_spill] sm:$0xff] %v14305_v25  ;;  %v20484_v57 = vld [vmem:[#allocation345_spill] sm:$0xff]  ;;  %20486 = vst [vmem:[#allocation331_spill] sm:$0xff] %v14312_v33 }
 0x332   :  { %8811 = vrot.lane.b32.xlu0 %v20476_v32, %s9475_s29  ;;  %v14283_v18 = vsel %vm1154_vm9, %v2600_v45, %v20477_v40  ;;  %v14300_v32 = vld [vmem:[%s18329_s6 + $0x2d8] sm:$0xff]  ;;  %v20481_v40 = vld [vmem:[#allocation313_spill] sm:$0xff]  ;;  %v20485_v41 = vpack.c.bf16 %v20483_v28, %v20484_v57  ;;  %20488 = vst [vmem:[#allocation265_spill] sm:$0xff] %v14315_v26  ;;  %v14325_v28 = vsel %vm724_vm5, %v4497_v0, %v14243_v8  ;;  %v20495_v39 = vld [vmem:[#allocation199_spill] sm:$0xff]  ;;  %v20508_v8 = vunpack.i.h.bf16 %v20216_v47 }
 0x333   :  { %20478 = vst [vmem:[#allocation43_spill] sm:$0xff] %v14283_v18  ;;  %v8369_v6 = vunpack.i.h.bf16 %v20481_v40  ;;  %v20489_v45 = vld [vmem:[#allocation88_spill] sm:$0xff]  ;;  %20492 = vst [vmem:[#allocation302_spill] sm:$0xff] %v14325_v28  ;;  %v2547_v57 = vsel %vm1122_vm3, %v20494_v1, %v20493_v61  ;;  %3485 = vmatprep.mubr.f32.mxu0 %v20495_v39  ;;  %v14347_v61 = vld [vmem:[%s18329_s6 + $0x250] sm:$0xff] }
 0x334   :  { %7598 = vmatpush3.bf16.msra.mxu0 %v20485_v41  ;;  %v20491_v7 = vpack.c.bf16 %v20489_v45, %v20490_v13  ;;  %1344 = vmatmul.mubr.f32.gmra.mrb[12].mxu1 %v20496_v22  ;;  %v20497_v13 = vunpack.i.l.bf16 %v20468_v2  ;;  %20500 = vst [vmem:[#allocation130_spill] sm:$0xff] %v14347_v61  ;;  %v14352_v39 = vld [vmem:[%s18329_s6 + $0x258] sm:$0xff]  ;;  %v20510_v22 = vunpack.i.h.bf16 %v20285_v27  ;;  %v20511_v40 = vld [vmem:[#allocation258_spill] sm:$0xff]  ;;  %v20513_v19 = vld [vmem:[#allocation189_spill] sm:$0xff] }
 0x335   :  { %1348 = vmatprep.mubr.f32.mxu1 %v20513_v19  ;;  %v20516_v25 = vld [vmem:[#allocation75_spill] sm:$0xff]  ;;  %v20518_v47 = vld [vmem:[#allocation30_spill] sm:$0xff]  ;;  %v20541_v28 = vld [vmem:[#allocation337_spill] sm:$0xff] }
 0x336   :  { %7600 = vmatprep.subr.bf16.mxu0 %v20491_v7  ;;  %v14337_v45 = vsel %vm1154_vm9, %v2602_v36, %v20497_v13  ;;  %v20499_v7 = vunpack.i.h.bf16 %v20457_v31  ;;  %v20501_v36 = vld [vmem:[#allocation178_spill] sm:$0xff]  ;;  %v20502_v31 = vld [vmem:[#allocation336_spill] sm:$0xff]  ;;  %v20551_v59 = vld [vmem:[#allocation253_spill] sm:$0xff] }
 0x337   :  { %20498 = vst [vmem:[#allocation255_spill] sm:$0xff] %v14337_v45  ;;  %v20503_v13 = vpack.i.bf16 %v20501_v36, %v20502_v31  ;;  %v2588_v45 = vsel %vm1122_vm3, %v20511_v40, %v20510_v22  ;;  %v20512_v31 = vld [vmem:[#allocation315_spill] sm:$0xff]  ;;  %v14391_v40 = vld [vmem:[%s18329_s6 + $0x2e0] sm:$0xff]  ;;  %v14396_v19 = vld [vmem:[%s18329_s6 + $0x2e8] sm:$0xff]  ;;  %v14398_v22 = vpop.permute.xlu1 %8466 }
 0x338   :  { %v2559_v0 = vsel %vm1138_vm8, %v2547_v57, %v20499_v7  ;;  %v20504_v57 = vld [vmem:[#allocation168_spill] sm:$0xff]  ;;  %v20505_v7 = vld [vmem:[#allocation97_spill] sm:$0xff]  ;;  %20520 = vst [vmem:[#allocation63_spill] sm:$0xff] %v14391_v40  ;;  %20521 = vst [vmem:[#allocation71_spill] sm:$0xff] %v14396_v19 }
 0x339   :  { %8736 = vrot.lane.b32.xlu1 %v20503_v13, %s9474_s18  ;;  %v20506_v41 = vpack.i.bf16 %v20504_v57, %v20505_v7  ;;  %v14368_v1 = vsel %vm1154_vm9, %v2559_v0, %v20508_v8  ;;  %v20515_v57 = vld [vmem:[#allocation348_spill] sm:$0xff]  ;;  %v14384_v8 = vsel %vm1138_vm8, %v20518_v47, %v8369_v6  ;;  %20522 = vst [vmem:[#allocation46_spill] sm:$0xff] %v14398_v22  ;;  %v20525_v6 = vld [vmem:[#allocation186_spill] sm:$0xff]  ;;  %v20527_v47 = vunpack.i.h.bf16 %v20444_v49  ;;  %v14412_v36 = vld [vmem:[%s18329_s6 + $0x260] sm:$0xff] }
 0x33a   :  { %20509 = vst [vmem:[#allocation269_spill] sm:$0xff] %v14368_v1  ;;  %v20517_v7 = vpack.c.bf16 %v20515_v57, %v20516_v25  ;;  %v20523_v25 = vld [vmem:[#allocation62_spill] sm:$0xff]  ;;  %v20524_v57 = vld [vmem:[#allocation181_spill] sm:$0xff]  ;;  %v20531_v13 = vunpack.i.h.bf16 %v20468_v2  ;;  %v14460_v1 = vld [vmem:[%s18329_s6 + $0x278] sm:$0xff] }
 0x33b   :  { %8821 = vrot.lane.b32.xlu0 %v20506_v41, %s9469_s14  ;;  %v14377_v41 = vpop.permute.xlu0 %8541  ;;  %3486 = vmatmul.mubr.f32.gmra.mrb[36].mxu0 %v20523_v25  ;;  %v2603_v0 = vsel %vm1138_vm8, %v2588_v45, %v20527_v47  ;;  %v14417_v25 = vld [vmem:[%s18329_s6 + $0x268] sm:$0xff]  ;;  %20544 = vst [vmem:[#allocation199_spill] sm:$0xff] %v14460_v1  ;;  %v20549_v40 = vld [vmem:[#allocation49_spill] sm:$0xff]  ;;  %v20553_v18 = vld [vmem:[#allocation207_spill] sm:$0xff]  ;;  %v14480_v61 = vpop.permute.xlu1 %8476 }
 0x33c   :  { %20514 = vst [vmem:[#allocation77_spill] sm:$0xff] %v14377_v41  ;;  %7602 = vmatpush3.bf16.msra.mxu0 %v20517_v7  ;;  %v20526_v7 = vpack.c.bf16 %v20524_v57, %v20525_v6  ;;  %v4542_v57 = vrot.slane %v20426_v11, 2  ;;  %v20528_v6 = vld [vmem:[#allocation225_spill] sm:$0xff]  ;;  %v20529_v49 = vld [vmem:[#allocation110_spill] sm:$0xff]  ;;  %v14427_v41 = vsel %vm1154_vm9, %v2603_v0, %v20531_v13  ;;  %v20550_v19 = vrot.slane %v20549_v40, 1  ;;  %20554 = vst [vmem:[#allocation315_spill] sm:$0xff] %v14480_v61 }
 0x33d   :  { %3490 = vmatprep.mubr.f32.mxu0 %v20529_v49  ;;  %v20530_v45 = vld [vmem:[#allocation26_spill] sm:$0xff]  ;;  %20532 = vst [vmem:[#allocation346_spill] sm:$0xff] %v14427_v41  ;;  %v14441_v49 = vld [vmem:[%s18329_s6 + $0x2f8] sm:$0xff]  ;;  %v20539_v13 = vld [vmem:[#allocation341_spill] sm:$0xff]  ;;  %7604 = vmatprep.subr.bf16.mxu0 %v20548_v56  ;;  %v20557_v52 = vrot.slane %v20528_v6, 2  ;;  %v8319_v61 = vunpack.i.h.bf16 %v20553_v18 }
 0x33e   :  { %7586 = vmatpush3.bf16.msra.mxu1 %v20526_v7  ;;  %v20533_v27 = vld [vmem:[#allocation210_spill] sm:$0xff]  ;;  %v14436_v7 = vld [vmem:[%s18329_s6 + $0x2f0] sm:$0xff]  ;;  %20537 = vst [vmem:[#allocation88_spill] sm:$0xff] %v14441_v49  ;;  %8746 = vrot.lane.b32.xlu1 %v20539_v13, %s9470_s15  ;;  %v20540_v0 = vld [vmem:[#allocation129_spill] sm:$0xff]  ;;  %v14477_v33 = vpack.i.bf16 %v20551_v59, %v20550_v19 }
 0x33f   :  { %1349 = vmatmul.mubr.f32.gmra.mrb[14].mxu1 %v20530_v45  ;;  %v20534_v55 = vld [vmem:[#allocation50_spill] sm:$0xff]  ;;  %20536 = vst [vmem:[#allocation345_spill] sm:$0xff] %v14436_v7  ;;  %v20538_v45 = vld [vmem:[#allocation321_spill] sm:$0xff]  ;;  %v20542_v2 = vpack.i.bf16 %v20540_v0, %v20541_v28  ;;  %v14455_v41 = vld [vmem:[%s18329_s6 + $0x270] sm:$0xff]  ;;  %v14467_v62 = vpop.permute.xlu0 %8551  ;;  %v8318_v0 = vunpack.i.l.bf16 %v20553_v18  ;;  %v14489_v24 = vsel %vm814_vm2, %v4542_v57, %v20557_v52 }
 0x340   :  { %v8283_v47 = vunpack.i.l.bf16 %v20538_v45  ;;  %20543 = vst [vmem:[#allocation172_spill] sm:$0xff] %v14455_v41  ;;  %v20546_v28 = vld [vmem:[#allocation142_spill] sm:$0xff]  ;;  %20547 = vst [vmem:[#allocation257_spill] sm:$0xff] %v14467_v62  ;;  %v20559_v19 = vld [vmem:[#allocation187_spill] sm:$0xff] }
 0x341   :  { %8831 = vrot.lane.b32.xlu0 %v20542_v2, %s9469_s14  ;;  %1353 = vmatprep.mubr.f32.mxu1 %v20546_v28  ;;  %20552 = vst [vmem:[#allocation258_spill] sm:$0xff] %v14477_v33  ;;  %v20555_v2 = vld [vmem:[#allocation144_spill] sm:$0xff]  ;;  %v20556_v28 = vpack.c.bf16 %v13968_v51, %v13963_v37  ;;  %20558 = vst [vmem:[#allocation189_spill] sm:$0xff] %v14489_v24  ;;  %v20560_v26 = vunpack.i.l.bf16 %v20559_v19  ;;  %v20561_v62 = vld [vmem:[#allocation35_spill] sm:$0xff]  ;;  %v20564_v37 = vrot.slane %v20549_v40, 3  ;;  %v20572_v51 = vrot.slane %v20460_v16, 2 }
 0x342   :  { %3491 = vmatmul.mubr.f32.gmra.mrb[38].mxu0 %v20555_v2  ;;  %v20562_v33 = vld [vmem:[#allocation108_spill] sm:$0xff]  ;;  %v20563_v22 = vld [vmem:[#allocation167_spill] sm:$0xff]  ;;  %v20576_v1 = vld [vmem:[#allocation349_spill] sm:$0xff] }
 0x343   :  { %7588 = vmatprep.subr.bf16.mxu1 %v20556_v28  ;;  %v2688_v59 = vsel %vm1138_vm8, %v20561_v62, %v20560_v26  ;;  %3495 = vmatprep.mubr.f32.mxu0 %v20562_v33  ;;  %v20565_v57 = vld [vmem:[#allocation91_spill] sm:$0xff]  ;;  %v20568_v2 = vld [vmem:[#allocation40_spill] sm:$0xff]  ;;  %v20569_v62 = vld [vmem:[#allocation150_spill] sm:$0xff] }
 0x344   :  { %1354 = vmatmul.mubr.f32.gmra.mrb[16].mxu1 %v20563_v22  ;;  %v14505_v28 = vpack.i.bf16 %v20565_v57, %v20564_v37  ;;  %v20567_v52 = vld [vmem:[#allocation335_spill] sm:$0xff]  ;;  %8756 = vrot.lane.b32.xlu1 %v20568_v2, %s9470_s15  ;;  %v14521_v37 = vsel %vm814_vm2, %v4545_v44, %v20572_v51  ;;  %v20584_v44 = vld [vmem:[#allocation104_spill] sm:$0xff]  ;;  %v20606_v24 = vld [vmem:[#allocation333_spill] sm:$0xff] }
 0x345   :  { %v8333_v56 = vunpack.i.l.bf16 %v20567_v52  ;;  %8841 = vrot.lane.b32.xlu0 %v20569_v62, %s9469_s14  ;;  %v20570_v26 = vld [vmem:[#allocation347_spill] sm:$0xff]  ;;  %20573 = vst [vmem:[#allocation75_spill] sm:$0xff] %v14521_v37  ;;  %1358 = vmatprep.mubr.f32.mxu1 %v14150_v30  ;;  %v5360_v30 = vrot.slane %v20533_v27, 7  ;;  %v20594_v62 = vld [vmem:[#allocation250_spill] sm:$0xff] }
 0x346   :  { %20566 = vst [vmem:[#allocation348_spill] sm:$0xff] %v14505_v28  ;;  %v14514_v33 = vsel %vm1154_vm9, %v20570_v26, %v8283_v47  ;;  %v14524_v28 = vpop.permute.xlu0 %8561  ;;  %v20575_v41 = vld [vmem:[#allocation291_spill] sm:$0xff]  ;;  %v20579_v26 = vld [vmem:[#allocation64_spill] sm:$0xff] }
 0x347   :  { %20574 = vst [vmem:[#allocation30_spill] sm:$0xff] %v14524_v28  ;;  %v20577_v40 = vpack.c.bf16 %v20575_v41, %v20576_v1  ;;  %v20580_v7 = vunpack.i.l.bf16 %v20579_v26  ;;  %v20582_v16 = vld [vmem:[#allocation47_spill] sm:$0xff]  ;;  %v20586_v28 = vld [vmem:[#allocation330_spill] sm:$0xff]  ;;  %v14544_v1 = vpop.permute.xlu1 %8491 }
 0x348   :  { %v20583_v18 = vunpack.i.l.bf16 %v20582_v16  ;;  %v8323_v34 = vunpack.i.l.bf16 %v20586_v28  ;;  %20587 = vst [vmem:[#allocation186_spill] sm:$0xff] %v14544_v1  ;;  %v20588_v41 = vld [vmem:[#allocation195_spill] sm:$0xff]  ;;  %1359 = vmatmul.mubr.f32.gmra.mrb[18].mxu1 %v20594_v62  ;;  %v20595_v1 = vld [vmem:[#allocation78_spill] sm:$0xff] }
 0x349   :  { %7606 = vmatpush3.bf16.msra.mxu0 %v20577_v40  ;;  %v14534_v22 = vsel %vm1154_vm9, %v2688_v59, %v20580_v7  ;;  %v20589_v40 = vld [vmem:[#allocation83_spill] sm:$0xff]  ;;  %v20590_v59 = vpack.c.bf16 %v14008_v50, %v14003_v15  ;;  %v20591_v7 = vunpack.i.h.bf16 %v20559_v19  ;;  %v4613_v15 = vrot.slane %v20426_v11, 4 }
 0x34a   :  { %20581 = vst [vmem:[#allocation62_spill] sm:$0xff] %v14534_v22  ;;  %v14540_v51 = vsel %vm1154_vm9, %v20584_v44, %v20583_v18  ;;  %3496 = vmatmul.mubr.f32.gmra.mrb[40].mxu0 %v20588_v41  ;;  %v1135_v47 = vsel %vm1122_vm3, %v20589_v40, %v8318_v0  ;;  %v20592_v22 = vld [vmem:[#allocation102_spill] sm:$0xff]  ;;  %v8324_v44 = vunpack.i.h.bf16 %v20586_v28  ;;  %v1136_v41 = vsel %vm1122_vm3, %v20595_v1, %v8319_v61  ;;  %v20596_v0 = vld [vmem:[#allocation179_spill] sm:$0xff]  ;;  %v20599_v28 = vld [vmem:[#allocation81_spill] sm:$0xff]  ;;  %v14584_v49 = vpop.permute.xlu0 %8571 }
 0x34b   :  { %20585 = vst [vmem:[#allocation181_spill] sm:$0xff] %v14540_v51  ;;  %7590 = vmatpush3.bf16.msra.mxu1 %v20590_v59  ;;  %v2689_v18 = vsel %vm1138_vm8, %v20592_v22, %v20591_v7  ;;  %v20593_v51 = vld [vmem:[#allocation200_spill] sm:$0xff]  ;;  %v8334_v50 = vunpack.i.h.bf16 %v20567_v52  ;;  %v20597_v19 = vld [vmem:[#allocation343_spill] sm:$0xff]  ;;  %v1213_v61 = vsel %vm1154_vm9, %v14139_v29, %v8333_v56  ;;  %v4614_v1 = vrot.slane %v20528_v6, 4  ;;  %v20602_v59 = vld [vmem:[#allocation262_spill] sm:$0xff] }
 0x34c   :  { %3500 = vmatprep.mubr.f32.mxu0 %v20593_v51  ;;  %v20598_v22 = vpack.i.bf16 %v20597_v19, %v13565_v58  ;;  %v20600_v51 = vld [vmem:[#allocation41_spill] sm:$0xff]  ;;  %v20603_v7 = vunpack.i.l.bf16 %v20602_v59  ;;  %v20605_v37 = vld [vmem:[#allocation7_spill] sm:$0xff]  ;;  %1363 = vmatprep.mubr.f32.mxu1 %v1213_v61  ;;  %v14590_v29 = vpack.i.bf16 %v5360_v30, %v20534_v55  ;;  %v20610_v56 = vunpack.i.h.bf16 %v20579_v26  ;;  %v20671_v19 = vld [vmem:[#allocation226_spill] sm:$0xff] }
 0x34d   :  { %v20601_v62 = vpack.i.bf16 %v20599_v28, %v20600_v51  ;;  %v20604_v40 = vld [vmem:[#allocation145_spill] sm:$0xff]  ;;  %v8388_v11 = vunpack.i.l.bf16 %v20605_v37  ;;  %v14598_v51 = vpop.permute.xlu1 %8496  ;;  %v1151_v61 = vsel %vm1138_vm8, %v1135_v47, %v8323_v34  ;;  %v20622_v34 = vld [vmem:[#allocation76_spill] sm:$0xff] }
 0x34e   :  { %8766 = vrot.lane.b32.xlu1 %v20598_v22, %s9470_s15  ;;  %v2627_v52 = vsel %vm1122_vm3, %v20604_v40, %v20603_v7  ;;  %v20607_v22 = vld [vmem:[#allocation146_spill] sm:$0xff]  ;;  %20609 = vst [vmem:[#allocation110_spill] sm:$0xff] %v14590_v29  ;;  %v14595_v40 = vsel %vm1154_vm9, %v2689_v18, %v20610_v56  ;;  %v8453_v7 = vunpack.i.l.bf16 %v14228_v46  ;;  %20612 = vst [vmem:[#allocation50_spill] sm:$0xff] %v14598_v51  ;;  %v20616_v30 = vld [vmem:[#allocation165_spill] sm:$0xff]  ;;  %v8284_v51 = vunpack.i.h.bf16 %v20538_v45 }
 0x34f   :  { %8851 = vrot.lane.b32.xlu0 %v20601_v62, %s9476_s0  ;;  %v1186_v58 = vsel %vm1122_vm3, %v20607_v22, %v20606_v24  ;;  %v20608_v62 = vpack.c.bf16 %v14035_v42, %v14030_v21  ;;  %20611 = vst [vmem:[#allocation26_spill] sm:$0xff] %v14595_v40  ;;  %v20613_v24 = vld [vmem:[#allocation103_spill] sm:$0xff]  ;;  %v20614_v21 = vpack.c.bf16 %v14091_v23, %v14086_v48  ;;  %v20615_v42 = vunpack.i.h.bf16 %v20582_v16  ;;  %v20618_v18 = vld [vmem:[#allocation193_spill] sm:$0xff]  ;;  %v1636_v45 = vld [vmem:[%s18329_s6 + $0x308] sm:$0xff] }
 0x350   :  { %3501 = vmatmul.mubr.f32.gmra.mrb[42].mxu0 %v20613_v24  ;;  %v20619_v22 = vunpack.i.l.bf16 %v20618_v18  ;;  %v20621_v24 = vld [vmem:[#allocation28_spill] sm:$0xff]  ;;  %1364 = vmatmul.mubr.f32.gmra.mrb[20].mxu1 %v20622_v34  ;;  %v1152_v48 = vsel %vm1138_vm8, %v1136_v41, %v8324_v44  ;;  %v20623_v23 = vld [vmem:[#allocation311_spill] sm:$0xff]  ;;  %v20624_v47 = vld [vmem:[#allocation169_spill] sm:$0xff] }
 0x351   :  { %7608 = vmatprep.subr.bf16.mxu0 %v20608_v62  ;;  %7592 = vmatprep.subr.bf16.mxu1 %v20614_v21  ;;  %v14609_v26 = vsel %vm1154_vm9, %v20616_v30, %v20615_v42  ;;  %v20620_v62 = vld [vmem:[#allocation105_spill] sm:$0xff]  ;;  %v20625_v21 = vunpack.i.l.bf16 %v20624_v47  ;;  %v20628_v44 = vld [vmem:[#allocation166_spill] sm:$0xff]  ;;  %v20629_v41 = vld [vmem:[#allocation319_spill] sm:$0xff]  ;;  %v14646_v47 = vpop.permute.xlu0 %8581 }
 0x352   :  { %20617 = vst [vmem:[#allocation321_spill] sm:$0xff] %v14609_v26  ;;  %v2690_v56 = vsel %vm1138_vm8, %v20620_v62, %v20619_v22  ;;  %3505 = vmatprep.mubr.f32.mxu0 %v20621_v24  ;;  %v1635_v30 = vld [vmem:[%s18329_s6 + $0x300] sm:$0xff]  ;;  %v20626_v22 = vld [vmem:[#allocation182_spill] sm:$0xff]  ;;  %v20630_v34 = vpack.i.bf16 %v20628_v44, %v20629_v41  ;;  %v14643_v26 = vsel %vm1982_vm7, %v4613_v15, %v4614_v1  ;;  %v8454_v1 = vunpack.i.h.bf16 %v14228_v46  ;;  %v20647_v29 = vld [vmem:[#allocation55_spill] sm:$0xff] }
 0x353   :  { %v2642_v42 = vsel %vm1138_vm8, %v2627_v52, %v20625_v21  ;;  %v8458_v62 = vunpack.i.l.bf16 %v20626_v22  ;;  %v20627_v24 = vld [vmem:[#allocation118_spill] sm:$0xff]  ;;  %v1214_v52 = vsel %vm1154_vm9, %v14172_v12, %v8334_v50  ;;  %v20631_v21 = vld [vmem:[#allocation111_spill] sm:$0xff]  ;;  %20633 = vst [vmem:[#allocation341_spill] sm:$0xff] %v14643_v26  ;;  %v20634_v40 = vld [vmem:[#allocation201_spill] sm:$0xff]  ;;  %v20635_v12 = vpack.c.bf16 %v14081_v35, %v14061_v3 }
 0x354   :  { %8776 = vrot.lane.b32.xlu1 %v20627_v24, %s9475_s29  ;;  %8861 = vrot.lane.b32.xlu0 %v20630_v34, %s9476_s0  ;;  %v20632_v16 = vunpack.i.l.bf16 %v20631_v21  ;;  %v14649_v24 = vsel %vm1154_vm9, %v1151_v61, %v8284_v51  ;;  %v14652_v34 = vsel %vm1154_vm9, %v1152_v48, %v8388_v11  ;;  %v20636_v50 = vld [vmem:[#allocation73_spill] sm:$0xff]  ;;  %v20640_v51 = vld [vmem:[#allocation80_spill] sm:$0xff]  ;;  %v20641_v11 = vpack.c.bf16 %v14116_v53, %v14111_v14 }
 0x355   :  { %1368 = vmatprep.mubr.f32.mxu1 %v1214_v52  ;;  %7610 = vmatpush3.bf16.msra.mxu0 %v20635_v12  ;;  %v20639_v52 = vld [vmem:[#allocation56_spill] sm:$0xff]  ;;  %v1184_v61 = vsel %vm1122_vm3, %v20640_v51, %v8453_v7  ;;  %v20642_v3 = vld [vmem:[#allocation29_spill] sm:$0xff]  ;;  %v20650_v51 = vld [vmem:[#allocation27_spill] sm:$0xff]  ;;  %v14709_v26 = vpop.permute.xlu0 %8591 }
 0x356   :  { %v1202_v6 = vsel %vm1138_vm8, %v1186_v58, %v20632_v16  ;;  %v20637_v58 = vunpack.i.l.bf16 %v20636_v50  ;;  %v14663_v16 = vpop.permute.xlu1 %8501  ;;  %3506 = vmatmul.mubr.f32.gmra.mrb[44].mxu0 %v20639_v52  ;;  %7594 = vmatpush3.bf16.msra.mxu1 %v20641_v11  ;;  %v20643_v35 = vunpack.i.l.bf16 %v20642_v3  ;;  %v20644_v48 = vld [vmem:[#allocation176_spill] sm:$0xff]  ;;  %v20651_v11 = vunpack.i.l.bf16 %v20650_v51  ;;  %20659 = vst [vmem:[#allocation207_spill] sm:$0xff] %v14709_v26 }
 0x357   :  { %20638 = vst [vmem:[#allocation142_spill] sm:$0xff] %v14663_v16  ;;  %v20645_v12 = vld [vmem:[#allocation344_spill] sm:$0xff]  ;;  %1369 = vmatmul.mubr.f32.gmra.mrb[22].mxu1 %v20647_v29  ;;  %v20654_v29 = vld [vmem:[#allocation54_spill] sm:$0xff] }
 0x358   :  { %v14660_v15 = vsel %vm1154_vm9, %v2690_v56, %v20637_v58  ;;  %v2675_v21 = vsel %vm1122_vm3, %v20644_v48, %v20643_v35  ;;  %v14675_v56 = vpack.c.bf16 %v1636_v45, %v1635_v30  ;;  %v8393_v46 = vunpack.i.l.bf16 %v20645_v12  ;;  %v20646_v58 = vld [vmem:[#allocation133_spill] sm:$0xff]  ;;  %v20648_v52 = vld [vmem:[#allocation276_spill] sm:$0xff]  ;;  %8871 = vrot.lane.b32.xlu0 %v20409_v63, %s9476_s0 }
 0x359   :  { %3510 = vmatprep.mubr.f32.mxu0 %v20646_v58  ;;  %v14682_v7 = vsel %vm1154_vm9, %v1202_v6, %v20648_v52  ;;  %v14689_v16 = vsel %vm1154_vm9, %v2642_v42, %v20651_v11  ;;  %v20652_v45 = vld [vmem:[#allocation216_spill] sm:$0xff]  ;;  %v1215_v6 = vsel %vm1154_vm9, %v14177_v5, %v8458_v62  ;;  %v20658_v42 = vld [vmem:[#allocation298_spill] sm:$0xff]  ;;  %v20660_v63 = vpack.c.bf16 %v14200_v38, %v14195_v9  ;;  %v20668_v38 = vld [vmem:[#allocation241_spill] sm:$0xff] }
 0x35a   :  { %v20653_v35 = vpack.i.bf16 %v20652_v45, %v20533_v27  ;;  %v20656_v53 = vld [vmem:[#allocation140_spill] sm:$0xff]  ;;  %1373 = vmatprep.mubr.f32.mxu1 %v1215_v6  ;;  %v20662_v58 = vunpack.i.h.bf16 %v20618_v18  ;;  %v8459_v6 = vunpack.i.h.bf16 %v20626_v22  ;;  %v14723_v26 = vpop.permute.xlu1 %8506  ;;  %7628 = vmatprep.subr.bf16.mxu1 %v14675_v56  ;;  %v8338_v62 = vunpack.i.l.bf16 %v20668_v38  ;;  %v20675_v22 = vld [vmem:[#allocation299_spill] sm:$0xff]  ;;  %v14754_v18 = vpop.permute.xlu0 %8601 }
 0x35b   :  { %v20657_v52 = vunpack.i.l.bf16 %v20656_v53  ;;  %7612 = vmatprep.subr.bf16.mxu0 %v20660_v63  ;;  %v20661_v5 = vld [vmem:[#allocation324_spill] sm:$0xff]  ;;  %20665 = vst [vmem:[#allocation187_spill] sm:$0xff] %v14723_v26  ;;  %v8339_v63 = vunpack.i.h.bf16 %v20668_v38  ;;  %1374 = vmatmul.mubr.f32.gmra.mrb[24].mxu1 %v14514_v33  ;;  %v20670_v26 = vld [vmem:[#allocation230_spill] sm:$0xff]  ;;  %v20674_v33 = vunpack.i.h.bf16 %v20656_v53  ;;  %20677 = vst [vmem:[#allocation108_spill] sm:$0xff] %v14754_v18 }
 0x35c   :  { %8786 = vrot.lane.b32.xlu1 %v20653_v35, %s9475_s29  ;;  %v1200_v35 = vsel %vm1138_vm8, %v1184_v61, %v8393_v46  ;;  %v2691_v48 = vsel %vm1138_vm8, %v2675_v21, %v20662_v58  ;;  %v20664_v14 = vld [vmem:[#allocation96_spill] sm:$0xff]  ;;  %v8394_v21 = vunpack.i.h.bf16 %v20645_v12  ;;  %8881 = vrot.lane.b32.xlu0 %v20433_v4, %s9476_s0  ;;  %v20673_v12 = vunpack.i.h.bf16 %v20636_v50  ;;  %v20698_v18 = vld [vmem:[#allocation69_spill] sm:$0xff] }
 0x35d   :  { %v14706_v11 = vsel %vm1154_vm9, %v20658_v42, %v20657_v52  ;;  %v20663_v52 = vld [vmem:[#allocation89_spill] sm:$0xff]  ;;  %v8429_v30 = vunpack.i.h.bf16 %v20664_v14  ;;  %v20666_v61 = vld [vmem:[#allocation196_spill] sm:$0xff]  ;;  %v14752_v38 = vsel %vm1154_vm9, %v20675_v22, %v20674_v33  ;;  %v20678_v4 = vpack.c.bf16 %v14270_v60, %v14265_v10  ;;  %v20683_v22 = vld [vmem:[#allocation278_spill] sm:$0xff] }
 0x35e   :  { %v8424_v42 = vunpack.i.h.bf16 %v20663_v52  ;;  %3511 = vmatmul.mubr.f32.gmra.mrb[46].mxu0 %v20666_v61  ;;  %v20667_v46 = vld [vmem:[#allocation248_spill] sm:$0xff]  ;;  %20676 = vst [vmem:[#allocation35_spill] sm:$0xff] %v14752_v38  ;;  %v20684_v33 = vld [vmem:[#allocation159_spill] sm:$0xff]  ;;  %v8418_v10 = vunpack.i.l.bf16 %v14167_v43  ;;  %v14773_v60 = vpop.permute.xlu1 %8516 }
 0x35f   :  { %v1185_v9 = vsel %vm1122_vm3, %v20667_v46, %v8454_v1  ;;  %v20669_v58 = vld [vmem:[#allocation152_spill] sm:$0xff]  ;;  %v20672_v1 = vpack.i.bf16 %v20670_v26, %v20671_v19  ;;  %v1216_v46 = vsel %vm1154_vm9, %v1200_v35, %v8459_v6  ;;  %7614 = vmatpush3.bf16.msra.mxu0 %v20678_v4  ;;  %v5361_v35 = vrot.slane %v20652_v45, 7  ;;  %v20680_v6 = vld [vmem:[#allocation177_spill] sm:$0xff]  ;;  %20686 = vst [vmem:[#allocation167_spill] sm:$0xff] %v14773_v60  ;;  %v14807_v60 = vpop.permute.xlu0 %8611 }
 0x360   :  { %3515 = vmatprep.mubr.f32.mxu0 %v20669_v58  ;;  %v14746_v58 = vsel %vm1154_vm9, %v2691_v48, %v20673_v12  ;;  %1378 = vmatprep.mubr.f32.mxu1 %v1216_v46  ;;  %v20679_v48 = vunpack.i.h.bf16 %v20642_v3  ;;  %v20681_v12 = vld [vmem:[#allocation264_spill] sm:$0xff]  ;;  %v3063_v19 = vsel %vm1138_vm8, %v20684_v33, %v8429_v30  ;;  %v20687_v3 = vpack.c.bf16 %v14300_v32, %v14295_v54  ;;  %v20691_v33 = vld [vmem:[#allocation282_spill] sm:$0xff] }
 0x361   :  { %8796 = vrot.lane.b32.xlu1 %v20672_v1, %s9475_s29  ;;  %v1201_v1 = vsel %vm1138_vm8, %v1185_v9, %v8394_v21  ;;  %v20682_v26 = vunpack.i.l.bf16 %v20681_v12  ;;  %v20685_v9 = vld [vmem:[#allocation164_spill] sm:$0xff]  ;;  %v20688_v4 = vunpack.i.l.bf16 %v20512_v31  ;;  %1379 = vmatmul.mubr.f32.gmra.mrb[26].mxu1 %v14649_v24  ;;  %v14788_v43 = vsel %vm1154_vm9, %v14384_v8, %v8424_v42  ;;  %v20697_v8 = vld [vmem:[#allocation61_spill] sm:$0xff] }
 0x362   :  { %v2676_v53 = vsel %vm1122_vm3, %v20680_v6, %v20679_v48  ;;  %v8443_v21 = vunpack.i.l.bf16 %v20685_v9  ;;  %3516 = vmatmul.mubr.f32.gmra.mrb[48].mxu0 %v14216_v17  ;;  %7616 = vmatprep.subr.bf16.mxu0 %v20687_v3  ;;  %v20693_v3 = vld [vmem:[#allocation238_spill] sm:$0xff]  ;;  %v20696_v24 = vld [vmem:[#allocation68_spill] sm:$0xff]  ;;  %v2549_v42 = vsel %vm1122_vm3, %v20697_v8, %v8339_v63  ;;  %v20699_v54 = vunpack.i.l.bf16 %v20698_v18  ;;  %v20706_v8 = vld [vmem:[#allocation339_spill] sm:$0xff] }
 0x363   :  { %v3086_v46 = vsel %vm1154_vm9, %v20683_v22, %v20682_v26  ;;  %v2692_v48 = vsel %vm1138_vm8, %v2676_v53, %v20688_v4  ;;  %v20689_v26 = vld [vmem:[#allocation154_spill] sm:$0xff]  ;;  %3520 = vmatprep.mubr.f32.mxu0 %v20691_v33  ;;  %v20694_v53 = vld [vmem:[#allocation236_spill] sm:$0xff]  ;;  %8891 = vrot.lane.b32.xlu0 %v20539_v13, %s9473_s17  ;;  %v2548_v33 = vsel %vm1122_vm3, %v20696_v24, %v8338_v62  ;;  %v8434_v18 = vunpack.i.h.bf16 %v20706_v8  ;;  %v14821_v24 = vpop.permute.xlu1 %8526 }
 0x364   :  { %v8343_v6 = vunpack.i.l.bf16 %v20689_v26  ;;  %v20690_v22 = vld [vmem:[#allocation42_spill] sm:$0xff]  ;;  %v8344_v32 = vunpack.i.h.bf16 %v20689_v26  ;;  %v20695_v4 = vpack.i.bf16 %v20693_v3, %v20694_v53  ;;  %v3082_v26 = vsel %vm1154_vm9, %v3063_v19, %v20699_v54  ;;  %20707 = vst [vmem:[#allocation335_spill] sm:$0xff] %v14821_v24  ;;  %v20708_v19 = vld [vmem:[#allocation85_spill] sm:$0xff]  ;;  %v20715_v9 = vld [vmem:[#allocation340_spill] sm:$0xff] }
 0x365   :  { %v8448_v30 = vunpack.i.l.bf16 %v20690_v22  ;;  %v1217_v22 = vsel %vm1154_vm9, %v1201_v1, %v8418_v10  ;;  %v20702_v13 = vld [vmem:[#allocation318_spill] sm:$0xff]  ;;  %v20703_v1 = vld [vmem:[#allocation277_spill] sm:$0xff]  ;;  %v3271_v63 = vrot.slane %v3086_v46, 1  ;;  %v1137_v54 = vsel %vm1122_vm3, %v20708_v19, %v8443_v21 }
 0x366   :  { %8806 = vrot.lane.b32.xlu1 %v20695_v4, %s9475_s29  ;;  %1383 = vmatprep.mubr.f32.mxu1 %v1217_v22  ;;  %v20700_v4 = vld [vmem:[#allocation130_spill] sm:$0xff]  ;;  %v14813_v53 = vpack.i.bf16 %v5361_v35, %v20702_v13  ;;  %v20704_v10 = vunpack.i.l.bf16 %v20703_v1  ;;  %v20712_v35 = vunpack.i.h.bf16 %v20602_v59  ;;  %v8348_v50 = vunpack.i.l.bf16 %v20715_v9  ;;  %v20731_v46 = vld [vmem:[#allocation229_spill] sm:$0xff] }
 0x367   :  { %v20701_v3 = vpack.c.bf16 %v14352_v39, %v20700_v4  ;;  %3521 = vmatmul.mubr.f32.gmra.mrb[50].mxu0 %v14216_v17  ;;  %v20709_v39 = vld [vmem:[#allocation71_spill] sm:$0xff]  ;;  %v20713_v4 = vld [vmem:[#allocation204_spill] sm:$0xff]  ;;  %v8433_v24 = vunpack.i.l.bf16 %v20706_v8  ;;  %1384 = vmatmul.mubr.f32.gmra.mrb[28].mxu1 %v14652_v34  ;;  %v1153_v21 = vsel %vm1138_vm8, %v1137_v54, %v8448_v30  ;;  %v2560_v19 = vsel %vm1138_vm8, %v2548_v33, %v8343_v6  ;;  %v20722_v6 = vld [vmem:[#allocation265_spill] sm:$0xff]  ;;  %v14855_v54 = vpop.permute.xlu0 %8621 }
 0x368   :  { %v14818_v62 = vsel %vm1154_vm9, %v2692_v48, %v20704_v10  ;;  %v2628_v48 = vsel %vm1122_vm3, %v20713_v4, %v20712_v35  ;;  %v20714_v10 = vld [vmem:[#allocation312_spill] sm:$0xff]  ;;  %8901 = vrot.lane.b32.xlu0 %v20568_v2, %s9473_s17  ;;  %v2561_v8 = vsel %vm1138_vm8, %v2549_v42, %v8344_v32  ;;  %v3235_v35 = vrot.slane %v3082_v26, 1  ;;  %1388 = vmatprep.mubr.f32.mxu1 %v14682_v7  ;;  %v20730_v7 = vld [vmem:[#allocation46_spill] sm:$0xff] }
 0x369   :  { %7618 = vmatpush3.bf16.msra.mxu0 %v20701_v3  ;;  %20705 = vst [vmem:[#allocation91_spill] sm:$0xff] %v14818_v62  ;;  %v20710_v3 = vld [vmem:[#allocation63_spill] sm:$0xff]  ;;  %v20716_v17 = vld [vmem:[#allocation48_spill] sm:$0xff]  ;;  %v8349_v30 = vunpack.i.h.bf16 %v20715_v9  ;;  %v8464_v33 = vunpack.i.h.bf16 %v20722_v6  ;;  %v20724_v2 = vrot.slane %v20666_v61, 1  ;;  %v20729_v9 = vld [vmem:[#allocation125_spill] sm:$0xff] }
 0x36a   :  { %v20711_v22 = vpack.c.bf16 %v20709_v39, %v20710_v3  ;;  %3525 = vmatprep.mubr.f32.mxu0 %v20716_v17  ;;  %v20717_v39 = vld [vmem:[#allocation281_spill] sm:$0xff]  ;;  %v20718_v3 = vld [vmem:[#allocation292_spill] sm:$0xff] }
 0x36b   :  { %v8399_v59 = vunpack.i.h.bf16 %v20717_v39  ;;  %v20720_v17 = vld [vmem:[#allocation137_spill] sm:$0xff]  ;;  %v14863_v32 = vsel %vm724_vm5, %v20724_v2, %v3271_v63  ;;  %v20726_v42 = vld [vmem:[#allocation308_spill] sm:$0xff]  ;;  %3526 = vmatmul.mubr.f32.gmra.mrb[52].mxu0 %v20731_v46 }
 0x36c   :  { %7620 = vmatprep.subr.bf16.mxu0 %v20711_v22  ;;  %v20719_v22 = vpack.i.bf16 %v20565_v57, %v20718_v3  ;;  %v20721_v4 = vunpack.i.l.bf16 %v20720_v17  ;;  %v20723_v57 = vpack.c.bf16 %v14417_v25, %v14412_v36  ;;  %20725 = vst [vmem:[#allocation40_spill] sm:$0xff] %v14863_v32  ;;  %v20727_v26 = vunpack.i.l.bf16 %v20726_v42  ;;  %v20733_v61 = vld [vmem:[#allocation88_spill] sm:$0xff]  ;;  %v20734_v63 = vld [vmem:[#allocation345_spill] sm:$0xff]  ;;  %v20741_v32 = vld [vmem:[#allocation43_spill] sm:$0xff] }
 0x36d   :  { %v3061_v3 = vsel %vm1122_vm3, %v20729_v9, %v8434_v18  ;;  %v20732_v36 = vunpack.i.h.bf16 %v20605_v37  ;;  %v20739_v18 = vld [vmem:[#allocation131_spill] sm:$0xff]  ;;  %3530 = vmatprep.mubr.f32.mxu0 %v20741_v32  ;;  %v14893_v37 = vsel %vm1154_vm9, %v2560_v19, %v8348_v50  ;;  %v20747_v19 = vld [vmem:[#allocation52_spill] sm:$0xff]  ;;  %v20755_v32 = vunpack.i.h.bf16 %v20512_v31 }
 0x36e   :  { %8816 = vrot.lane.b32.xlu1 %v20719_v22, %s9469_s14  ;;  %v2644_v34 = vsel %vm1138_vm8, %v2628_v48, %v20721_v4  ;;  %7622 = vmatpush3.bf16.msra.mxu0 %v20723_v57  ;;  %v8469_v22 = vunpack.i.h.bf16 %v20730_v7  ;;  %v14873_v4 = vpop.permute.xlu1 %8536  ;;  %v20735_v57 = vpack.c.bf16 %v20733_v61, %v20734_v63  ;;  %v14889_v9 = vsel %vm1122_vm3, %v20739_v18, %v8433_v24  ;;  %v20745_v61 = vld [vmem:[#allocation202_spill] sm:$0xff]  ;;  %v1638_v24 = vld [vmem:[%s18329_s6 + $0x318] sm:$0xff] }
 0x36f   :  { %v14868_v48 = vsel %vm1154_vm9, %v2644_v34, %v20727_v26  ;;  %v1170_v25 = vsel %vm1154_vm9, %v1153_v21, %v20732_v36  ;;  %v20736_v34 = vld [vmem:[#allocation49_spill] sm:$0xff]  ;;  %20740 = vst [vmem:[#allocation291_spill] sm:$0xff] %v14889_v9  ;;  %20742 = vst [vmem:[#allocation349_spill] sm:$0xff] %v14893_v37  ;;  %v20743_v21 = vld [vmem:[#allocation171_spill] sm:$0xff] }
 0x370   :  { %20728 = vst [vmem:[#allocation150_spill] sm:$0xff] %v14868_v48  ;;  %7624 = vmatprep.subr.bf16.mxu0 %v20735_v57  ;;  %v20737_v2 = vrot.slane %v20736_v34, 2  ;;  %1389 = vmatmul.mubr.f32.gmra.mrb[30].mxu1 %v1170_v25  ;;  %v20744_v36 = vunpack.i.l.bf16 %v20743_v21  ;;  %v1637_v57 = vld [vmem:[%s18329_s6 + $0x310] sm:$0xff]  ;;  %v20746_v25 = vld [vmem:[#allocation242_spill] sm:$0xff]  ;;  %v20753_v34 = vld [vmem:[#allocation144_spill] sm:$0xff] }
 0x371   :  { %v14909_v50 = vsel %vm1122_vm3, %v20746_v25, %v8399_v59  ;;  %v20754_v9 = vrot.slane %v20753_v34, 1  ;;  %v20756_v25 = vld [vmem:[#allocation138_spill] sm:$0xff]  ;;  %3620 = vmatprep.mubr.f32.mxu1 %v14788_v43  ;;  %v20759_v34 = vld [vmem:[#allocation199_spill] sm:$0xff]  ;;  %v5359_v43 = vrot.slane %v20405_v20, 7 }
 0x372   :  { %v14885_v26 = vpack.i.bf16 %v20737_v2, %v20652_v45  ;;  %v2677_v63 = vsel %vm1122_vm3, %v20745_v61, %v20744_v36  ;;  %v20748_v2 = vld [vmem:[#allocation301_spill] sm:$0xff]  ;;  %v20750_v36 = vld [vmem:[#allocation342_spill] sm:$0xff]  ;;  %v8438_v48 = vunpack.i.l.bf16 %v20756_v25 }
 0x373   :  { %v20749_v18 = vpack.i.bf16 %v20747_v19, %v20748_v2  ;;  %v20751_v61 = vld [vmem:[#allocation317_spill] sm:$0xff]  ;;  %v2693_v59 = vsel %vm1138_vm8, %v2677_v63, %v20755_v32  ;;  %v14929_v19 = vpop.permute.xlu0 %8631  ;;  %v14946_v32 = vpop.permute.xlu1 %8546  ;;  %v20765_v2 = vld [vmem:[#allocation175_spill] sm:$0xff]  ;;  %v20771_v25 = vld [vmem:[#allocation98_spill] sm:$0xff] }
 0x374   :  { %20738 = vst [vmem:[#allocation347_spill] sm:$0xff] %v14885_v26  ;;  %v20752_v46 = vpack.i.bf16 %v20750_v36, %v20751_v61  ;;  %v14922_v26 = vsel %vm724_vm5, %v20754_v9, %v3235_v35  ;;  %20757 = vst [vmem:[#allocation64_spill] sm:$0xff] %v14929_v19  ;;  %v20760_v61 = vld [vmem:[#allocation172_spill] sm:$0xff]  ;;  %v20762_v9 = vld [vmem:[#allocation271_spill] sm:$0xff]  ;;  %3531 = vmatmul.mubr.f32.gmra.mrb[54].mxu0 %v20765_v2  ;;  %v8378_v2 = vunpack.i.l.bf16 %v20771_v25 }
 0x375   :  { %8826 = vrot.lane.b32.xlu1 %v20749_v18, %s9469_s14  ;;  %v2635_v18 = vsel %vm1138_vm8, %v14909_v50, %v8464_v33  ;;  %v20761_v35 = vpack.c.bf16 %v20759_v34, %v20760_v61  ;;  %v20763_v31 = vunpack.i.h.bf16 %v20762_v9  ;;  %v20764_v36 = vld [vmem:[#allocation280_spill] sm:$0xff]  ;;  %v20766_v19 = vld [vmem:[#allocation33_spill] sm:$0xff]  ;;  %v20767_v34 = vld [vmem:[#allocation119_spill] sm:$0xff] }
 0x376   :  { %8911 = vrot.lane.b32.xlu0 %v20752_v46, %s9473_s17  ;;  %v14934_v46 = vsel %vm1154_vm9, %v2561_v8, %v8349_v30  ;;  %v2651_v33 = vsel %vm1154_vm9, %v2635_v18, %v8469_v22  ;;  %v7631_v30 = vpack.c.bf16 %v1638_v24, %v1637_v57  ;;  %v20768_v9 = vld [vmem:[#allocation245_spill] sm:$0xff]  ;;  %v8573_v22 = vunpack.i.l.bf16 %v14584_v49  ;;  %v20772_v57 = vld [vmem:[#allocation307_spill] sm:$0xff] }
 0x377   :  { %20758 = vst [vmem:[#allocation47_spill] sm:$0xff] %v14934_v46  ;;  %7626 = vmatpush3.bf16.msra.mxu0 %v20761_v35  ;;  %v14943_v63 = vsel %vm1138_vm8, %v20764_v36, %v20763_v31  ;;  %v8414_v35 = vunpack.i.h.bf16 %v20767_v34  ;;  %3535 = vmatprep.mubr.f32.mxu0 %v20768_v9  ;;  %v20769_v36 = vunpack.i.h.bf16 %v20703_v1  ;;  %v20773_v24 = vld [vmem:[#allocation331_spill] sm:$0xff]  ;;  %v20774_v18 = vld [vmem:[#allocation325_spill] sm:$0xff]  ;;  %v20778_v9 = vunpack.i.h.bf16 %v20743_v21 }
 0x378   :  { %3621 = vmatmul.mubr.f32.vlgmr.msra.gmra.mrb[32].mxu1 %v2651_v33  ;;  %v20775_v8 = vpack.i.bf16 %v20773_v24, %v20774_v18  ;;  %v20776_v33 = vunpack.i.h.bf16 %v20681_v12  ;;  %v20777_v1 = vld [vmem:[#allocation279_spill] sm:$0xff]  ;;  %v14983_v24 = vpop.permute.xlu0 %8641  ;;  %v20785_v18 = vld [vmem:[#allocation205_spill] sm:$0xff] }
 0x379   :  { %v14957_v31 = vsel %vm1154_vm9, %v2693_v59, %v20769_v36  ;;  %8836 = vrot.lane.b32.xlu1 %v20772_v57, %s9469_s14  ;;  %v20779_v36 = vld [vmem:[#allocation203_spill] sm:$0xff]  ;;  %v8538_v57 = vunpack.i.l.bf16 %v14873_v4  ;;  %20782 = vst [vmem:[#allocation195_spill] sm:$0xff] %v14983_v24  ;;  %7630 = vmatpush3.bf16.msra.mxu1 %v14675_v56 }
 0x37a   :  { %20770 = vst [vmem:[#allocation104_spill] sm:$0xff] %v14957_v31  ;;  %8921 = vrot.lane.b32.xlu0 %v20775_v8, %s9473_s17  ;;  %v14972_v59 = vsel %vm1154_vm9, %v20777_v1, %v20776_v33  ;;  %v2678_v61 = vsel %vm1122_vm3, %v20779_v36, %v20778_v9  ;;  %v14979_v31 = vsel %vm1138_vm8, %v3061_v3, %v8438_v48  ;;  %v20781_v34 = vld [vmem:[#allocation219_spill] sm:$0xff]  ;;  %v20783_v8 = vld [vmem:[#allocation120_spill] sm:$0xff]  ;;  %v20786_v1 = vunpack.i.l.bf16 %v20634_v40  ;;  %v14994_v3 = vpop.permute.xlu1 %8556  ;;  %v20788_v9 = vld [vmem:[#allocation149_spill] sm:$0xff] }
 0x37b   :  { %20780 = vst [vmem:[#allocation330_spill] sm:$0xff] %v14979_v31  ;;  %3625 = vmatprep.mubr.f32.mxu1 %v20781_v34  ;;  %v20784_v12 = vunpack.i.l.bf16 %v20783_v8  ;;  %v8363_v48 = vunpack.i.l.bf16 %v20766_v19  ;;  %20787 = vst [vmem:[#allocation83_spill] sm:$0xff] %v14994_v3  ;;  %3536 = vmatmul.mubr.f32.gmra.mrb[56].mxu0 %v20788_v9  ;;  %v20789_v34 = vunpack.i.h.bf16 %v20720_v17  ;;  %v20790_v31 = vld [vmem:[#allocation218_spill] sm:$0xff]  ;;  %v20791_v24 = vld [vmem:[#allocation143_spill] sm:$0xff] }
 0x37c   :  { %v2694_v21 = vsel %vm1138_vm8, %v2678_v61, %v20786_v1  ;;  %7632 = vmatprep.subr.bf16.mxu1 %v7631_v30  ;;  %v20794_v56 = vld [vmem:[#allocation59_spill] sm:$0xff]  ;;  %v20797_v9 = vld [vmem:[#allocation92_spill] sm:$0xff] }
 0x37d   :  { %v2629_v33 = vsel %vm1122_vm3, %v20785_v18, %v20784_v12  ;;  %v20792_v18 = vunpack.i.h.bf16 %v20783_v8  ;;  %v20793_v12 = vld [vmem:[#allocation208_spill] sm:$0xff]  ;;  %v20795_v1 = vrot.slane %v20794_v56, 7  ;;  %v20796_v3 = vld [vmem:[#allocation255_spill] sm:$0xff]  ;;  %3626 = vmatmul.mubr.f32.gmra.mrb[34].mxu1 %v20797_v9  ;;  %v15018_v8 = vpack.i.bf16 %v5359_v43, %v20599_v28 }
 0x37e   :  { %v2645_v36 = vsel %vm1138_vm8, %v2629_v33, %v20789_v34  ;;  %3540 = vmatprep.mubr.f32.mxu0 %v20796_v3  ;;  %v20798_v33 = vunpack.i.h.bf16 %v20726_v42  ;;  %v20803_v9 = vpack.i.bf16 %v20533_v27, %v20405_v20  ;;  %v20804_v42 = vld [vmem:[#allocation163_spill] sm:$0xff]  ;;  %v20808_v17 = vld [vmem:[#allocation60_spill] sm:$0xff]  ;;  %7634 = vmatpush3.bf16.msra.mxu1 %v7631_v30  ;;  %v20817_v30 = vld [vmem:[#allocation346_spill] sm:$0xff] }
 0x37f   :  { %v2630_v61 = vsel %vm1122_vm3, %v20793_v12, %v20792_v18  ;;  %v3102_v62 = vsel %vm1122_vm3, %v20795_v1, %v8414_v35  ;;  %20799 = vst [vmem:[#allocation102_spill] sm:$0xff] %v15018_v8  ;;  %v20800_v35 = vld [vmem:[#allocation302_spill] sm:$0xff]  ;;  %v20801_v1 = vld [vmem:[#allocation268_spill] sm:$0xff]  ;;  %v20806_v28 = vld [vmem:[#allocation251_spill] sm:$0xff]  ;;  %v20809_v18 = vrot.slane %v20808_v17, 7 }
 0x380   :  { %v15015_v34 = vsel %vm1154_vm9, %v2645_v36, %v20798_v33  ;;  %v3127_v56 = vsel %vm1138_vm8, %v3102_v62, %v8573_v22  ;;  %v20802_v3 = vpack.i.bf16 %v20800_v35, %v20801_v1  ;;  %8931 = vrot.lane.b32.xlu0 %v20803_v9, %s9472_s16  ;;  %v20805_v36 = vunpack.i.l.bf16 %v20804_v42  ;;  %v20807_v22 = vld [vmem:[#allocation213_spill] sm:$0xff]  ;;  %v20810_v35 = vld [vmem:[#allocation247_spill] sm:$0xff]  ;;  %v15043_v1 = vpop.permute.xlu0 %8651  ;;  %v20819_v9 = vld [vmem:[#allocation320_spill] sm:$0xff] }
 0x381   :  { %v2679_v43 = vsel %vm1122_vm3, %v20806_v28, %v8378_v2  ;;  %v8534_v38 = vunpack.i.h.bf16 %v20807_v22  ;;  %3630 = vmatprep.mubr.f32.mxu1 %v20810_v35  ;;  %20811 = vst [vmem:[#allocation200_spill] sm:$0xff] %v15043_v1  ;;  %v20813_v2 = vld [vmem:[#allocation269_spill] sm:$0xff]  ;;  %v20818_v35 = vld [vmem:[#allocation212_spill] sm:$0xff]  ;;  %v20820_v1 = vunpack.i.l.bf16 %v20819_v9 }
 0x382   :  { %8846 = vrot.lane.b32.xlu1 %v20802_v3, %s9469_s14  ;;  %v15033_v33 = vsel %vm1154_vm9, %v2694_v21, %v20805_v36  ;;  %v3104_v3 = vsel %vm1122_vm3, %v20809_v18, %v8538_v57  ;;  %v8574_v21 = vunpack.i.h.bf16 %v14584_v49  ;;  %v15047_v36 = vpop.permute.xlu1 %8566  ;;  %3541 = vmatmul.mubr.f32.gmra.mrb[58].mxu0 %v20813_v2  ;;  %v20814_v28 = vld [vmem:[#allocation273_spill] sm:$0xff]  ;;  %v19129_v57 = vmov 0.0|0.0  }
 0x383   :  { %20812 = vst [vmem:[#allocation250_spill] sm:$0xff] %v15047_v36  ;;  %v20815_v62 = vunpack.i.l.bf16 %v20814_v28  ;;  %v20816_v17 = vld [vmem:[#allocation221_spill] sm:$0xff]  ;;  %7667 = vmatprep.subr.bf16.mxu0 %v19129_v57  ;;  %v8379_v18 = vunpack.i.h.bf16 %v20771_v25  ;;  %3545 = vmatprep.mubr.f32.mxu0 %v20817_v30  ;;  %v3153_v49 = vsel %vm1154_vm9, %v3127_v56, %v8534_v38  ;;  %v8539_v25 = vunpack.i.h.bf16 %v14873_v4  ;;  %v20825_v56 = vld [vmem:[#allocation267_spill] sm:$0xff]  ;;  %v4008_v4 = vld [vmem:[%s18330_s7 + $0x88] sm:$0xff] }
 0x384   :  { %v5362_v22 = vrot.slane %v20816_v17, 7  ;;  %3631 = vmatmul.mubr.f32.gmra.mrb[36].mxu1 %v20818_v35  ;;  %v4007_v57 = vld [vmem:[%s18330_s7 + $0x80] sm:$0xff]  ;;  %v20823_v30 = vpack.i.bf16 %v20702_v13, %v20534_v55  ;;  %v20824_v38 = vunpack.i.l.bf16 %v20717_v39  ;;  %v8613_v55 = vunpack.i.l.bf16 %v14807_v60 }
 0x385   :  { %v2646_v12 = vsel %vm1138_vm8, %v2630_v61, %v20815_v62  ;;  %v20822_v61 = vunpack.i.h.bf16 %v20634_v40  ;;  %v20826_v40 = vld [vmem:[#allocation258_spill] sm:$0xff]  ;;  %v20828_v13 = vunpack.i.l.bf16 %v20722_v6  ;;  %v20835_v36 = vunpack.i.l.bf16 %v20730_v7  ;;  %v20843_v8 = vld [vmem:[#allocation189_spill] sm:$0xff] }
 0x386   :  { %v15062_v2 = vsel %vm1154_vm9, %v2646_v12, %v20820_v1  ;;  %8856 = vrot.lane.b32.xlu1 %v20823_v30, %s9476_s0  ;;  %v2589_v12 = vsel %vm1122_vm3, %v20825_v56, %v20824_v38  ;;  %8941 = vrot.lane.b32.xlu0 %v20826_v40, %s9473_s17  ;;  %v3129_v1 = vsel %vm1138_vm8, %v3104_v3, %v8574_v21  ;;  %v20829_v30 = vld [vmem:[#allocation79_spill] sm:$0xff]  ;;  %v15092_v38 = vpop.permute.xlu0 %8661  ;;  %v20831_v56 = vld [vmem:[#allocation306_spill] sm:$0xff]  ;;  %v20833_v3 = vld [vmem:[#allocation25_spill] sm:$0xff] }
 0x387   :  { %20821 = vst [vmem:[#allocation78_spill] sm:$0xff] %v15062_v2  ;;  %v2695_v62 = vsel %vm1138_vm8, %v2679_v43, %v20822_v61  ;;  %v20827_v43 = vld [vmem:[#allocation209_spill] sm:$0xff]  ;;  %v2604_v61 = vsel %vm1138_vm8, %v2589_v12, %v20828_v13  ;;  %3635 = vmatprep.mubr.f32.mxu1 %v20829_v30  ;;  %20830 = vst [vmem:[#allocation81_spill] sm:$0xff] %v15092_v38  ;;  %v20832_v40 = vunpack.i.l.bf16 %v20831_v56  ;;  %3546 = vmatmul.mubr.f32.gmra.mrb[60].mxu0 %v14893_v37  ;;  %v20836_v30 = vld [vmem:[#allocation95_spill] sm:$0xff] }
 0x388   :  { %v2631_v35 = vsel %vm1122_vm3, %v20827_v43, %v8363_v48  ;;  %v7635_v48 = vpack.c.bf16 %v4008_v4, %v4007_v57  ;;  %v15100_v43 = vpop.permute.xlu1 %8576  ;;  %v2619_v6 = vsel %vm1154_vm9, %v2604_v61, %v20835_v36  ;;  %v3238_v12 = vrot.slane %v3153_v49, 1  ;;  %v20837_v38 = vld [vmem:[#allocation253_spill] sm:$0xff] }
 0x389   :  { %v15098_v21 = vsel %vm1154_vm9, %v20833_v3, %v20832_v40  ;;  %v15107_v13 = vpack.i.bf16 %v5362_v22, %v20629_v41  ;;  %v8578_v2 = vunpack.i.l.bf16 %v15100_v43  ;;  %3550 = vmatprep.mubr.f32.mxu0 %v2619_v6  ;;  %v20838_v40 = vld [vmem:[#allocation233_spill] sm:$0xff]  ;;  %v3155_v57 = vsel %vm1154_vm9, %v3129_v1, %v8613_v55  ;;  %v20841_v22 = vld [vmem:[#allocation66_spill] sm:$0xff]  ;;  %v20844_v6 = vld [vmem:[#allocation136_spill] sm:$0xff] }
 0x38a   :  { %20834 = vst [vmem:[#allocation262_spill] sm:$0xff] %v15098_v21  ;;  %3636 = vmatmul.mubr.f32.gmra.mrb[38].mxu1 %v20838_v40  ;;  %v20839_v4 = vunpack.i.h.bf16 %v20804_v42  ;;  %v20840_v36 = vunpack.i.h.bf16 %v20814_v28  ;;  %v20842_v49 = vrot.slane %v20841_v22, 7  ;;  %v20845_v37 = vpack.i.bf16 %v20843_v8, %v20844_v6  ;;  %v20846_v1 = vld [vmem:[#allocation348_spill] sm:$0xff]  ;;  %v20852_v22 = vld [vmem:[#allocation106_spill] sm:$0xff]  ;;  %7636 = vmatprep.subr.bf16.mxu1 %v7635_v48  ;;  %v4023_v48 = vld [vmem:[%s18330_s7 + $0x100] sm:$0xff] }
 0x38b   :  { %8951 = vrot.lane.b32.xlu0 %v20846_v1, %s9474_s18  ;;  %v20848_v28 = vunpack.i.h.bf16 %v20831_v56  ;;  %3640 = vmatprep.mubr.f32.mxu1 %v20852_v22  ;;  %v20854_v56 = vld [vmem:[#allocation192_spill] sm:$0xff]  ;;  %v3247_v55 = vrot.slane %v3155_v57, 1  ;;  %v20858_v57 = vld [vmem:[#allocation249_spill] sm:$0xff] }
 0x38c   :  { %v15117_v3 = vsel %vm1154_vm9, %v2695_v62, %v20839_v4  ;;  %v2647_v41 = vsel %vm1138_vm8, %v2631_v35, %v20840_v36  ;;  %v3106_v61 = vsel %vm1122_vm3, %v20842_v49, %v8539_v25  ;;  %8866 = vrot.lane.b32.xlu1 %v20845_v37, %s9476_s0  ;;  %v20849_v35 = vld [vmem:[#allocation191_spill] sm:$0xff]  ;;  %v20851_v25 = vld [vmem:[#allocation285_spill] sm:$0xff]  ;;  %v8614_v36 = vunpack.i.h.bf16 %v14807_v60  ;;  %v15144_v49 = vpop.permute.xlu0 %8671  ;;  %v15148_v42 = vpop.permute.xlu1 %8586  ;;  %3551 = vmatmul.mubr.f32.gmra.mrb[62].mxu0 %v14934_v46 }
 0x38d   :  { %v15138_v40 = vsel %vm1154_vm9, %v20849_v35, %v20848_v28  ;;  %v8473_v4 = vunpack.i.l.bf16 %v20851_v25  ;;  %v3131_v37 = vsel %vm1138_vm8, %v3106_v61, %v8578_v2  ;;  %20853 = vst [vmem:[#allocation7_spill] sm:$0xff] %v15144_v49  ;;  %v20855_v28 = vrot.slane %v20854_v56, 1  ;;  %v20857_v61 = vld [vmem:[#allocation252_spill] sm:$0xff]  ;;  %v4024_v56 = vld [vmem:[%s18330_s7 + $0x108] sm:$0xff]  ;;  %v20862_v1 = vld [vmem:[#allocation113_spill] sm:$0xff] }
 0x38e   :  { %20850 = vst [vmem:[#allocation145_spill] sm:$0xff] %v15138_v40  ;;  %v20856_v60 = vunpack.i.h.bf16 %v20819_v9  ;;  %v15161_v22 = vsel %vm1122_vm3, %v20857_v61, %v8379_v18  ;;  %3641 = vmatmul.mubr.f32.gmra.mrb[40].mxu1 %v20858_v57  ;;  %v3157_v9 = vsel %vm1154_vm9, %v3131_v37, %v8614_v36  ;;  %v8403_v49 = vunpack.i.l.bf16 %v20862_v1  ;;  %v20863_v8 = vld [vmem:[#allocation141_spill] sm:$0xff]  ;;  %v20874_v40 = vld [vmem:[#allocation84_spill] sm:$0xff] }
 0x38f   :  { %v3239_v35 = vsel %vm724_vm5, %v20855_v28, %v3238_v12  ;;  %v8474_v12 = vunpack.i.h.bf16 %v20851_v25  ;;  %v20864_v25 = vld [vmem:[#allocation117_spill] sm:$0xff]  ;;  %v20875_v21 = vrot.slane %v20874_v40, 7 }
 0x390   :  { %v15157_v2 = vsel %vm1154_vm9, %v2647_v41, %v20856_v60  ;;  %3765 = vmatprep.mubr.f32.mxu0 %v3239_v35  ;;  %v20859_v41 = vld [vmem:[#allocation173_spill] sm:$0xff]  ;;  %8876 = vrot.lane.b32.xlu1 %v20863_v8, %s9476_s0  ;;  %v20865_v35 = vld [vmem:[#allocation183_spill] sm:$0xff]  ;;  %v20873_v8 = vunpack.i.l.bf16 %v20717_v39  ;;  %v15210_v7 = vpop.permute.xlu1 %8596  ;;  %v20881_v39 = vld [vmem:[#allocation58_spill] sm:$0xff] }
 0x391   :  { %v20860_v28 = vunpack.i.h.bf16 %v20859_v41  ;;  %v20861_v60 = vld [vmem:[#allocation109_spill] sm:$0xff]  ;;  %v20866_v6 = vpack.i.bf16 %v20864_v25, %v20865_v35  ;;  %v20869_v41 = vunpack.i.h.bf16 %v20766_v19  ;;  %v20878_v25 = vld [vmem:[#allocation62_spill] sm:$0xff]  ;;  %v20880_v19 = vld [vmem:[#allocation260_spill] sm:$0xff]  ;;  %3766 = vmatmul.mubr.f32.vlgmr.msra.gmra.mrb[64].mxu0 %v14922_v26  ;;  %v20882_v40 = vrot.slane %v20881_v39, 1 }
 0x392   :  { %v20867_v57 = vld [vmem:[#allocation169_spill] sm:$0xff]  ;;  %v15201_v35 = vsel %vm1122_vm3, %v20875_v21, %v20873_v8  ;;  %3645 = vmatprep.mubr.f32.mxu1 %v20878_v25  ;;  %v3256_v8 = vrot.slane %v3157_v9, 1  ;;  %v20885_v25 = vld [vmem:[#allocation300_spill] sm:$0xff] }
 0x393   :  { %v15176_v18 = vsel %vm1138_vm8, %v20861_v60, %v20860_v28  ;;  %8961 = vrot.lane.b32.xlu0 %v20866_v6, %s9475_s29  ;;  %v20868_v36 = vunpack.i.h.bf16 %v20867_v57  ;;  %v20870_v28 = vld [vmem:[#allocation259_spill] sm:$0xff]  ;;  %20876 = vst [vmem:[#allocation333_spill] sm:$0xff] %v15201_v35  ;;  %v20877_v6 = vld [vmem:[#allocation217_spill] sm:$0xff]  ;;  %v3248_v21 = vsel %vm724_vm5, %v20882_v40, %v3247_v55  ;;  %v20883_v35 = vld [vmem:[#allocation126_spill] sm:$0xff]  ;;  %v20888_v55 = vunpack.i.h.bf16 %v20650_v51 }
 0x394   :  { %v2632_v60 = vsel %vm1122_vm3, %v20870_v28, %v20869_v41  ;;  %v8484_v57 = vunpack.i.h.bf16 %v20877_v6  ;;  %v7668_v41 = vpack.c.bf16 %v4024_v56, %v4023_v48  ;;  %v8404_v28 = vunpack.i.h.bf16 %v20862_v1  ;;  %v4026_v1 = vld [vmem:[%s18330_s7 + $0x118] sm:$0xff]  ;;  %3770 = vmatprep.mubr.f32.mxu0 %v3248_v21  ;;  %v20887_v26 = vld [vmem:[#allocation181_spill] sm:$0xff]  ;;  %v20893_v21 = vld [vmem:[#allocation75_spill] sm:$0xff] }
 0x395   :  { %v2643_v37 = vsel %vm1138_vm8, %v14909_v50, %v20868_v36  ;;  %v15205_v50 = vpop.permute.xlu0 %8681  ;;  %v2633_v36 = vsel %vm1122_vm3, %v20880_v19, %v8473_v4  ;;  %v20884_v61 = vunpack.i.l.bf16 %v20883_v35  ;;  %v4025_v4 = vld [vmem:[%s18330_s7 + $0x110] sm:$0xff]  ;;  %3646 = vmatmul.mubr.f32.gmra.mrb[42].mxu1 %v20887_v26  ;;  %v20890_v56 = vld [vmem:[#allocation97_spill] sm:$0xff]  ;;  %v8483_v46 = vunpack.i.l.bf16 %v20877_v6  ;;  %v20895_v51 = vld [vmem:[#allocation110_spill] sm:$0xff] }
 0x396   :  { %20879 = vst [vmem:[#allocation146_spill] sm:$0xff] %v15205_v50  ;;  %v15232_v40 = vsel %vm1154_vm9, %v2643_v37, %v20888_v55  ;;  %v20894_v62 = vpack.i.bf16 %v20596_v0, %v20893_v21  ;;  %v15247_v37 = vsel %vm1138_vm8, %v2632_v60, %v8403_v49  ;;  %v15250_v26 = vsel %vm1138_vm8, %v2633_v36, %v8404_v28  ;;  %v20899_v21 = vld [vmem:[#allocation266_spill] sm:$0xff]  ;;  %v20903_v60 = vld [vmem:[#allocation77_spill] sm:$0xff] }
 0x397   :  { %v15220_v50 = vsel %vm1154_vm9, %v20885_v25, %v20884_v61  ;;  %v20891_v61 = vld [vmem:[#allocation224_spill] sm:$0xff]  ;;  %v20892_v25 = vld [vmem:[#allocation270_spill] sm:$0xff]  ;;  %8971 = vrot.lane.b32.xlu0 %v20895_v51, %s9470_s15  ;;  %v20900_v51 = vunpack.i.h.bf16 %v20883_v35  ;;  %7669 = vmatpush1.bf16.msra.mxu0 %v7668_v41  ;;  %v7671_v28 = vpack.c.bf16 %v4026_v1, %v4025_v4  ;;  %v8544_v36 = vunpack.i.h.bf16 %v20903_v60  ;;  %v4027_v41 = vld [vmem:[%s18330_s7 + $0x120] sm:$0xff] }
 0x398   :  { %20886 = vst [vmem:[#allocation103_spill] sm:$0xff] %v15220_v50  ;;  %v5363_v39 = vrot.slane %v20891_v61, 7  ;;  %v2634_v19 = vsel %vm1122_vm3, %v20892_v25, %v8474_v12  ;;  %8886 = vrot.lane.b32.xlu1 %v20894_v62, %s9476_s0  ;;  %v20897_v12 = vld [vmem:[#allocation26_spill] sm:$0xff]  ;;  %v2682_v62 = vsel %vm1122_vm3, %v20899_v21, %v8484_v57  ;;  %v8543_v9 = vunpack.i.l.bf16 %v20903_v60  ;;  %v20907_v21 = vld [vmem:[#allocation313_spill] sm:$0xff] }
 0x399   :  { %3650 = vmatprep.mubr.f32.mxu1 %v20897_v12  ;;  %v15255_v6 = vpop.permute.xlu0 %8691  ;;  %v20901_v61 = vld [vmem:[#allocation170_spill] sm:$0xff]  ;;  %v15268_v12 = vpop.permute.xlu1 %8606  ;;  %v20908_v35 = vunpack.i.l.bf16 %v20907_v21  ;;  %v8549_v1 = vunpack.i.h.bf16 %v14946_v32  ;;  %v8583_v21 = vunpack.i.l.bf16 %v14646_v47  ;;  %v8588_v48 = vunpack.i.l.bf16 %v15148_v42 }
 0x39a   :  { %20898 = vst [vmem:[#allocation165_spill] sm:$0xff] %v15255_v6  ;;  %v15264_v49 = vsel %vm1154_vm9, %v20901_v61, %v20900_v51  ;;  %v20904_v6 = vld [vmem:[#allocation198_spill] sm:$0xff]  ;;  %v20909_v61 = vmov 0.0|0.0   ;;  %v20914_v51 = vld [vmem:[#allocation51_spill] sm:$0xff] }
 0x39b   :  { %20902 = vst [vmem:[#allocation193_spill] sm:$0xff] %v15264_v49  ;;  %3771 = vmatmul.mubr.f32.gmra.mrb[66].mxu0 %v20904_v6  ;;  %v20905_v25 = vld [vmem:[#allocation206_spill] sm:$0xff]  ;;  %v2650_v50 = vsel %vm1138_vm8, %v2634_v19, %v20908_v35  ;;  %7670 = vmatprep.subr.bf16.mxu0 %v20909_v61  ;;  %v8579_v35 = vunpack.i.h.bf16 %v15100_v43  ;;  %v20919_v43 = vunpack.i.l.bf16 %v20664_v14  ;;  %v20926_v49 = vld [vmem:[#allocation100_spill] sm:$0xff] }
 0x39c   :  { %v20906_v55 = vrot.slane %v20905_v25, 1  ;;  %v4028_v4 = vld [vmem:[%s18330_s7 + $0x128] sm:$0xff]  ;;  %v8548_v25 = vunpack.i.l.bf16 %v14946_v32  ;;  %7672 = vmatpush1.bf16.msra.mxu0 %v7671_v28 }
 0x39d   :  { %v20912_v19 = vld [vmem:[#allocation286_spill] sm:$0xff]  ;;  %7673 = vmatprep.subr.bf16.mxu0 %v20909_v61 }
 0x39e   :  { %v3257_v57 = vsel %vm724_vm5, %v20906_v55, %v3256_v8  ;;  %v20910_v8 = vld [vmem:[#allocation321_spill] sm:$0xff]  ;;  %v15288_v55 = vpack.i.bf16 %v5363_v39, %v20628_v44  ;;  %v20913_v6 = vunpack.i.h.bf16 %v20912_v19  ;;  %v20915_v32 = vld [vmem:[#allocation314_spill] sm:$0xff]  ;;  %v20916_v44 = vpack.i.bf16 %v20405_v20, %v20623_v23  ;;  %v20917_v39 = vld [vmem:[#allocation148_spill] sm:$0xff] }
 0x39f   :  { %3775 = vmatprep.mubr.f32.mxu0 %v3257_v57  ;;  %3651 = vmatmul.mubr.f32.gmra.mrb[44].mxu1 %v20910_v8  ;;  %v15307_v57 = vsel %vm1122_vm3, %v20917_v39, %v8483_v46  ;;  %v15310_v8 = vpop.permute.xlu0 %8701  ;;  %v15315_v19 = vsel %vm1138_vm8, %v2682_v62, %v20919_v43  ;;  %v20921_v46 = vld [vmem:[#allocation121_spill] sm:$0xff]  ;;  %v20922_v20 = vld [vmem:[#allocation123_spill] sm:$0xff]  ;;  %v8584_v43 = vunpack.i.h.bf16 %v14646_v47 }
 0x3a0   :  { %20911 = vst [vmem:[#allocation105_spill] sm:$0xff] %v15288_v55  ;;  %v15294_v60 = vsel %vm1138_vm8, %v20914_v51, %v20913_v6  ;;  %8896 = vrot.lane.b32.xlu1 %v20915_v32, %s9473_s17  ;;  %8981 = vrot.lane.b32.xlu0 %v20916_v44, %s9476_s0  ;;  %20918 = vst [vmem:[#allocation28_spill] sm:$0xff] %v15310_v8  ;;  %v20920_v51 = vunpack.i.l.bf16 %v20663_v52  ;;  %v7674_v44 = vpack.c.bf16 %v4028_v4, %v4027_v41  ;;  %v20924_v55 = vld [vmem:[#allocation70_spill] sm:$0xff]  ;;  %v8617_v6 = vpop.permute.xlu1 %8616  ;;  %v20927_v52 = vld [vmem:[#allocation116_spill] sm:$0xff] }
 0x3a1   :  { %3655 = vmatprep.mubr.f32.mxu1 %v14660_v15  ;;  %v8488_v39 = vunpack.i.l.bf16 %v20921_v46  ;;  %v20923_v15 = vrot.slane %v20922_v20, 7  ;;  %v20925_v14 = vrot.slane %v20924_v55, 7  ;;  %3776 = vmatmul.mubr.f32.gmra.mrb[68].mxu0 %v20926_v49  ;;  %v8618_v4 = vunpack.i.l.bf16 %v8617_v6 }
 0x3a2   :  { %v15321_v32 = vsel %vm1154_vm9, %v2650_v50, %v20920_v51  ;;  %v20928_v50 = vrot.slane %v20927_v52, 7  ;;  %v8589_v49 = vunpack.i.h.bf16 %v15148_v42  ;;  %v20930_v51 = vld [vmem:[#allocation316_spill] sm:$0xff]  ;;  %7675 = vmatpush1.bf16.msra.mxu0 %v7674_v44  ;;  %v8489_v44 = vunpack.i.h.bf16 %v20921_v46 }
 0x3a3   :  { %v3110_v8 = vsel %vm1122_vm3, %v20923_v15, %v8544_v36  ;;  %v3108_v62 = vsel %vm1122_vm3, %v20925_v14, %v8543_v9  ;;  %v8619_v36 = vunpack.i.h.bf16 %v8617_v6  ;;  %3656 = vmatmul.mubr.f32.gmra.mrb[46].mxu1 %v14689_v16  ;;  %v20931_v15 = vld [vmem:[#allocation341_spill] sm:$0xff]  ;;  %v20933_v14 = vld [vmem:[#allocation294_spill] sm:$0xff]  ;;  %v8624_v16 = vunpack.i.h.bf16 %v14855_v54  ;;  %7676 = vmatprep.subr.bf16.mxu0 %v20909_v61 }
 0x3a4   :  { %v3112_v28 = vsel %vm1122_vm3, %v20928_v50, %v8549_v1  ;;  %v20929_v41 = vmov %v20928_v50  ;;  %v3135_v9 = vsel %vm1138_vm8, %v3110_v8, %v8583_v21  ;;  %v3133_v47 = vsel %vm1138_vm8, %v3108_v62, %v8579_v35  ;;  %3660 = vmatprep.mubr.f32.mxu1 %v14746_v58  ;;  %v15355_v35 = vpop.permute.xlu0 %8711  ;;  %v15360_v6 = vpop.permute.xlu1 %8626  ;;  %v4029_v58 = vld [vmem:[%s18330_s7 + $0x130] sm:$0xff] }
 0x3a5   :  { %v3111_v20 = vsel %vm1122_vm3, %v20929_v41, %v8548_v25  ;;  %v3137_v55 = vsel %vm1138_vm8, %v3112_v28, %v8588_v48  ;;  %v20932_v1 = vpack.i.bf16 %v20930_v51, %v20931_v15  ;;  %v20934_v25 = vpack.i.bf16 %v20933_v14, %v20654_v29  ;;  %20935 = vst [vmem:[#allocation76_spill] sm:$0xff] %v15355_v35  ;;  %v20936_v48 = vld [vmem:[#allocation157_spill] sm:$0xff]  ;;  %v20937_v28 = vld [vmem:[#allocation214_spill] sm:$0xff]  ;;  %v20938_v41 = vld [vmem:[#allocation332_spill] sm:$0xff] }
 0x3a6   :  { %v3159_v21 = vsel %vm1154_vm9, %v3133_v47, %v8618_v4  ;;  %v3161_v42 = vsel %vm1154_vm9, %v3135_v9, %v8619_v36  ;;  %v3136_v50 = vsel %vm1138_vm8, %v3111_v20, %v8584_v43  ;;  %v4030_v36 = vld [vmem:[%s18330_s7 + $0x138] sm:$0xff]  ;;  %v8623_v4 = vunpack.i.l.bf16 %v14855_v54  ;;  %v20939_v20 = vld [vmem:[#allocation65_spill] sm:$0xff]  ;;  %v20946_v8 = vld [vmem:[#allocation187_spill] sm:$0xff] }
 0x3a7   :  { %8906 = vrot.lane.b32.xlu1 %v20932_v1, %s9473_s17  ;;  %8991 = vrot.lane.b32.xlu0 %v20934_v25, %s9473_s17  ;;  %v3265_v62 = vrot.slane %v3159_v21, 1  ;;  %v3274_v52 = vrot.slane %v3161_v42, 1  ;;  %v8628_v9 = vunpack.i.l.bf16 %v15360_v6  ;;  %v3163_v43 = vsel %vm1154_vm9, %v3137_v55, %v8624_v16  ;;  %v20940_v25 = vld [vmem:[#allocation147_spill] sm:$0xff]  ;;  %v20964_v35 = vld [vmem:[#allocation104_spill] sm:$0xff] }
 0x3a8   :  { %3661 = vmatmul.mubr.f32.gmra.mrb[48].mxu1 %v15232_v40  ;;  %v3139_v21 = vsel %vm1138_vm8, %v20940_v25, %v8589_v49  ;;  %v20941_v42 = vld [vmem:[#allocation343_spill] sm:$0xff]  ;;  %v20943_v46 = vrot.slane %v14706_v11, 1  ;;  %v3088_v40 = vsel %vm1154_vm9, %v14943_v63, %v8488_v39  ;;  %v15394_v25 = vpop.permute.xlu0 %8721  ;;  %v7677_v11 = vpack.c.bf16 %v4030_v36, %v4029_v58  ;;  %v20950_v58 = vld [vmem:[#allocation296_spill] sm:$0xff] }
 0x3a9   :  { %v20942_v1 = vpack.i.bf16 %v20661_v5, %v20941_v42  ;;  %v3165_v16 = vsel %vm1154_vm9, %v3139_v21, %v8628_v9  ;;  %v20944_v49 = vld [vmem:[#allocation91_spill] sm:$0xff]  ;;  %20945 = vst [vmem:[#allocation311_spill] sm:$0xff] %v15394_v25  ;;  %v3283_v55 = vrot.slane %v3163_v43, 1  ;;  %v4031_v21 = vld [vmem:[%s18330_s7 + $0x140] sm:$0xff]  ;;  %v8513_v36 = vunpack.i.l.bf16 %v20950_v58  ;;  %v20969_v15 = vld [vmem:[#allocation40_spill] sm:$0xff] }
 0x3aa   :  { %v3266_v54 = vsel %vm724_vm5, %v20943_v46, %v3265_v62  ;;  %3665 = vmatprep.mubr.f32.mxu1 %v20944_v49  ;;  %v8508_v62 = vunpack.i.l.bf16 %v20946_v8  ;;  %v15398_v46 = vpop.permute.xlu1 %8636  ;;  %v20948_v47 = vld [vmem:[#allocation35_spill] sm:$0xff]  ;;  %v3292_v9 = vrot.slane %v3165_v16, 1  ;;  %v20955_v49 = vld [vmem:[#allocation197_spill] sm:$0xff]  ;;  %v8514_v5 = vunpack.i.h.bf16 %v20950_v58  ;;  %7678 = vmatpush1.bf16.msra.mxu0 %v7677_v11 }
 0x3ab   :  { %8916 = vrot.lane.b32.xlu1 %v20942_v1, %s9473_s17  ;;  %9001 = vrot.lane.b32.xlu0 %v14813_v53, %s9470_s15  ;;  %v3162_v1 = vsel %vm1154_vm9, %v3136_v50, %v8623_v4  ;;  %v20947_v53 = vld [vmem:[#allocation101_spill] sm:$0xff]  ;;  %v20949_v63 = vrot.slane %v20948_v47, 1  ;;  %v4032_v50 = vld [vmem:[%s18330_s7 + $0x148] sm:$0xff]  ;;  %v20971_v51 = vld [vmem:[#allocation283_spill] sm:$0xff] }
 0x3ac   :  { %3780 = vmatprep.mubr.f32.mxu0 %v3266_v54  ;;  %v20951_v4 = vld [vmem:[#allocation150_spill] sm:$0xff]  ;;  %v20952_v54 = vld [vmem:[#allocation284_spill] sm:$0xff]  ;;  %v20963_v58 = vld [vmem:[#allocation257_spill] sm:$0xff]  ;;  %7679 = vmatprep.subr.bf16.mxu0 %v20909_v61 }
 0x3ad   :  { %3781 = vmatmul.mubr.f32.gmra.mrb[70].mxu0 %v20947_v53  ;;  %v3275_v39 = vsel %vm724_vm5, %v20949_v63, %v3274_v52  ;;  %3666 = vmatmul.mubr.f32.gmra.mrb[50].mxu1 %v20951_v4  ;;  %v15414_v47 = vsel %vm1154_vm9, %v20952_v54, %v8489_v44  ;;  %v20953_v52 = vld [vmem:[#allocation73_spill] sm:$0xff]  ;;  %v20956_v53 = vld [vmem:[#allocation32_spill] sm:$0xff]  ;;  %v3282_v4 = vrot.slane %v3162_v1, 1  ;;  %v20959_v44 = vpack.i.bf16 %v20533_v27, %v20714_v10  ;;  %v20962_v63 = vld [vmem:[#allocation119_spill] sm:$0xff] }
 0x3ae   :  { %3785 = vmatprep.mubr.f32.mxu0 %v3275_v39  ;;  %v20954_v43 = vunpack.i.l.bf16 %v20953_v52  ;;  %v20957_v39 = vld [vmem:[#allocation174_spill] sm:$0xff]  ;;  %v3280_v54 = vrot.slane %v3088_v40, 1  ;;  %v20960_v52 = vld [vmem:[#allocation151_spill] sm:$0xff]  ;;  %v8553_v25 = vunpack.i.l.bf16 %v20963_v58  ;;  %3670 = vmatprep.mubr.f32.mxu1 %v20964_v35  ;;  %v20967_v1 = vld [vmem:[#allocation168_spill] sm:$0xff]  ;;  %v7680_v27 = vpack.c.bf16 %v4032_v50, %v4031_v21  ;;  %v15460_v21 = vpop.f32.mrb[30].mxu0 }
 0x3af   :  { %v20958_v42 = vpack.i.bf16 %v20596_v0, %v20957_v39  ;;  %9011 = vrot.lane.b32.xlu0 %v20959_v44, %s9476_s0  ;;  %v15441_v39 = vpop.permute.xlu0 %8731  ;;  %v8509_v40 = vunpack.i.h.bf16 %v20946_v8  ;;  %v20968_v44 = vld [vmem:[#allocation207_spill] sm:$0xff]  ;;  %v3090_v35 = vsel %vm1154_vm9, %v20971_v51, %v8508_v62  ;;  %v4034_v8 = vld [vmem:[%s18330_s7 + $0x158] sm:$0xff]  ;;  %20972 = vst [vmem:[#allocation166_spill] sm:$0xff] %v15460_v21  ;;  %v15467_v51 = vsel %vm1154_vm9, %v15176_v18, %v8513_v36  ;;  %v15471_v0 = vpop.f32.mrb[31].mxu0  ;;  %v20979_v18 = vld [vmem:[#allocation161_spill] sm:$0xff] }
 0x3b0   :  { %v15420_v16 = vsel %vm1154_vm9, %v15315_v19, %v20954_v43  ;;  %v20961_v19 = vrot.slane %v20960_v52, 1  ;;  %20965 = vst [vmem:[#allocation182_spill] sm:$0xff] %v15441_v39  ;;  %v8593_v52 = vunpack.i.l.bf16 %v20968_v44  ;;  %v4033_v11 = vld [vmem:[%s18330_s7 + $0x150] sm:$0xff]  ;;  %20975 = vst [vmem:[#allocation319_spill] sm:$0xff] %v15471_v0  ;;  %v8554_v39 = vunpack.i.h.bf16 %v20963_v58  ;;  %v20981_v0 = vld [vmem:[#allocation5_spill] sm:$0xff]  ;;  %7681 = vmatpush1.bf16.msra.mxu0 %v7680_v27 }
 0x3b1   :  { %8926 = vrot.lane.b32.xlu1 %v20958_v42, %s9472_s16  ;;  %v20966_v42 = vld [vmem:[#allocation124_spill] sm:$0xff]  ;;  %3786 = vmatmul.mubr.f32.gmra.mrb[72].mxu0 %v20969_v15  ;;  %v8629_v15 = vunpack.i.h.bf16 %v15360_v6  ;;  %v20976_v21 = vld [vmem:[#allocation347_spill] sm:$0xff]  ;;  %v20977_v6 = vrot.slane %v14972_v59, 1  ;;  %v15485_v36 = vsel %vm1154_vm9, %v20979_v18, %v8514_v5  ;;  %v20982_v58 = vrot.slane %v20981_v0, 7  ;;  %v4036_v27 = vld [vmem:[%s18330_s7 + $0x168] sm:$0xff] }
 0x3b2   :  { %v15436_v43 = vsel %vm724_vm5, %v20961_v19, %v3292_v9  ;;  %v15448_v9 = vpop.permute.xlu1 %8646  ;;  %v3284_v19 = vsel %vm724_vm5, %v3282_v4, %v3283_v55  ;;  %3671 = vmatmul.mubr.f32.gmra.mrb[52].mxu1 %v15015_v34  ;;  %v3288_v55 = vrot.slane %v15414_v47, 1  ;;  %v20978_v47 = vpack.i.bf16 %v20791_v24, %v20790_v31  ;;  %v20986_v4 = vld [vmem:[#allocation289_spill] sm:$0xff]  ;;  %7682 = vmatprep.subr.bf16.mxu0 %v20909_v61 }
 0x3b3   :  { %20970 = vst [vmem:[#allocation118_spill] sm:$0xff] %v15448_v9  ;;  %3790 = vmatprep.mubr.f32.mxu0 %v3284_v19  ;;  %v3281_v34 = vsel %vm724_vm5, %v20977_v6, %v3280_v54  ;;  %v20980_v19 = vld [vmem:[#allocation227_spill] sm:$0xff]  ;;  %v3115_v9 = vsel %vm1122_vm3, %v20982_v58, %v8553_v25  ;;  %3675 = vmatprep.mubr.f32.mxu1 %v15033_v33  ;;  %v3289_v59 = vrot.slane %v3090_v35, 1  ;;  %v15493_v54 = vpop.permute.xlu0 %8741  ;;  %v4035_v33 = vld [vmem:[%s18330_s7 + $0x160] sm:$0xff]  ;;  %v8598_v24 = vunpack.i.l.bf16 %v15210_v7 }
 0x3b4   :  { %9021 = vrot.lane.b32.xlu0 %v20978_v47, %s9475_s29  ;;  %20984 = vst [vmem:[#allocation111_spill] sm:$0xff] %v15493_v54  ;;  %v7683_v6 = vpack.c.bf16 %v4034_v8, %v4033_v11  ;;  %v8594_v47 = vunpack.i.h.bf16 %v20968_v44  ;;  %v3141_v5 = vsel %vm1138_vm8, %v3115_v9, %v8593_v52  ;;  %v3091_v0 = vsel %vm1154_vm9, %v20986_v4, %v8509_v40  ;;  %v20987_v44 = vld [vmem:[#allocation315_spill] sm:$0xff]  ;;  %v20988_v9 = vld [vmem:[#allocation64_spill] sm:$0xff]  ;;  %v20990_v40 = vld [vmem:[#allocation78_spill] sm:$0xff] }
 0x3b5   :  { %8936 = vrot.lane.b32.xlu1 %v20976_v21, %s9472_s16  ;;  %v20983_v21 = vld [vmem:[#allocation186_spill] sm:$0xff]  ;;  %3791 = vmatmul.mubr.f32.gmra.mrb[74].mxu0 %v3281_v34  ;;  %v8478_v52 = vunpack.i.l.bf16 %v20987_v44  ;;  %v8633_v35 = vunpack.i.l.bf16 %v20988_v9  ;;  %v20989_v11 = vld [vmem:[#allocation83_spill] sm:$0xff]  ;;  %v3167_v4 = vsel %vm1154_vm9, %v3141_v5, %v8629_v15  ;;  %v3298_v15 = vrot.slane %v3091_v0, 1 }
 0x3b6   :  { %v8493_v62 = vunpack.i.l.bf16 %v20983_v21  ;;  %v15497_v18 = vpop.permute.xlu1 %8656  ;;  %v8558_v8 = vunpack.i.l.bf16 %v20989_v11  ;;  %3795 = vmatprep.mubr.f32.mxu0 %v15436_v43  ;;  %3676 = vmatmul.mubr.f32.gmra.mrb[54].mxu1 %v20990_v40  ;;  %v20991_v34 = vld [vmem:[#allocation194_spill] sm:$0xff]  ;;  %v8494_v31 = vunpack.i.h.bf16 %v20983_v21  ;;  %v3290_v40 = vsel %vm724_vm5, %v3288_v55, %v3289_v59  ;;  %v20996_v59 = vld [vmem:[#allocation68_spill] sm:$0xff] }
 0x3b7   :  { %20985 = vst [vmem:[#allocation201_spill] sm:$0xff] %v15497_v18  ;;  %v20992_v58 = vrot.slane %v20991_v34, 7  ;;  %v20993_v54 = vld [vmem:[#allocation102_spill] sm:$0xff]  ;;  %3680 = vmatprep.mubr.f32.mxu1 %v15117_v3  ;;  %v15527_v5 = vpop.permute.xlu0 %8751  ;;  %7684 = vmatpush1.bf16.msra.mxu0 %v7683_v6  ;;  %v7686_v21 = vpack.c.bf16 %v4036_v27, %v4035_v33  ;;  %v20995_v18 = vld [vmem:[#allocation112_spill] sm:$0xff]  ;;  %v3304_v55 = vrot.slane %v3167_v4, 1  ;;  %v4037_v3 = vld [vmem:[%s18330_s7 + $0x170] sm:$0xff]  ;;  %v2664_v0 = vsel %vm1154_vm9, %v15247_v37, %v8478_v52 }
 0x3b8   :  { %9031 = vrot.lane.b32.xlu0 %v15107_v13, %s9470_s15  ;;  %v20994_v34 = vld [vmem:[#allocation122_spill] sm:$0xff]  ;;  %v3297_v50 = vrot.slane %v20995_v18, 1  ;;  %7685 = vmatprep.subr.bf16.mxu0 %v20909_v61  ;;  %v20997_v6 = vrot.slane %v20996_v59, 7  ;;  %v2697_v37 = vsel %vm1138_vm8, %v15307_v57, %v8494_v31  ;;  %v8634_v52 = vunpack.i.h.bf16 %v20988_v9 }
 0x3b9   :  { %v3117_v25 = vsel %vm1122_vm3, %v20992_v58, %v8554_v39  ;;  %8946 = vrot.lane.b32.xlu1 %v20993_v54, %s9470_s15  ;;  %v2696_v39 = vsel %vm1138_vm8, %v15161_v22, %v8493_v62  ;;  %v8524_v58 = vunpack.i.h.bf16 %v20994_v34  ;;  %3796 = vmatmul.mubr.f32.gmra.mrb[76].mxu0 %v3290_v40  ;;  %v4038_v22 = vld [vmem:[%s18330_s7 + $0x178] sm:$0xff]  ;;  %v8479_v62 = vunpack.i.h.bf16 %v20987_v44  ;;  %v21006_v31 = vld [vmem:[#allocation262_spill] sm:$0xff] }
 0x3ba   :  { %v3143_v54 = vsel %vm1138_vm8, %v3117_v25, %v8594_v47  ;;  %v15533_v13 = vpop.permute.xlu1 %8666  ;;  %v3119_v47 = vsel %vm1122_vm3, %v20997_v6, %v8558_v8  ;;  %3800 = vmatprep.mubr.f32.mxu0 %v15436_v43  ;;  %3681 = vmatmul.mubr.f32.gmra.mrb[56].mxu1 %v15157_v2  ;;  %v20998_v25 = vld [vmem:[#allocation50_spill] sm:$0xff]  ;;  %v20999_v44 = vpack.i.bf16 %v20837_v38, %v20836_v30  ;;  %v21000_v8 = vld [vmem:[#allocation228_spill] sm:$0xff]  ;;  %v21002_v2 = vunpack.i.l.bf16 %v20939_v20 }
 0x3bb   :  { %v3169_v18 = vsel %vm1154_vm9, %v3143_v54, %v8633_v35  ;;  %v8498_v33 = vunpack.i.l.bf16 %v20998_v25  ;;  %v3145_v27 = vsel %vm1138_vm8, %v3119_v47, %v8598_v24  ;;  %v21001_v4 = vpack.i.bf16 %v20652_v45, %v21000_v8  ;;  %v15572_v38 = vpop.permute.xlu0 %8761  ;;  %7687 = vmatpush1.bf16.msra.mxu0 %v7686_v21  ;;  %v21004_v54 = vld [vmem:[#allocation167_spill] sm:$0xff] }
 0x3bc   :  { %v2712_v35 = vsel %vm1154_vm9, %v2696_v39, %v21002_v2  ;;  %v8559_v24 = vunpack.i.h.bf16 %v20989_v11  ;;  %v15570_v40 = vsel %vm724_vm5, %v3297_v50, %v3298_v15  ;;  %21003 = vst [vmem:[#allocation56_spill] sm:$0xff] %v15572_v38  ;;  %v7689_v30 = vpack.c.bf16 %v4038_v22, %v4037_v3  ;;  %7688 = vmatprep.subr.bf16.mxu0 %v20909_v61  ;;  %v4039_v50 = vld [vmem:[%s18330_s7 + $0x180] sm:$0xff]  ;;  %v4040_v15 = vld [vmem:[%s18330_s7 + $0x188] sm:$0xff]  ;;  %v21009_v22 = vld [vmem:[#allocation175_spill] sm:$0xff] }
 0x3bd   :  { %8956 = vrot.lane.b32.xlu1 %v20999_v44, %s9469_s14  ;;  %9041 = vrot.lane.b32.xlu0 %v21001_v4, %s9476_s0  ;;  %v8518_v59 = vunpack.i.l.bf16 %v21004_v54  ;;  %v8599_v6 = vunpack.i.h.bf16 %v15210_v7  ;;  %v21007_v57 = vrot.slane %v21006_v31, 1  ;;  %v3313_v11 = vrot.slane %v3169_v18, 1  ;;  %v21011_v44 = vld [vmem:[#allocation30_spill] sm:$0xff]  ;;  %v21012_v2 = vld [vmem:[#allocation45_spill] sm:$0xff] }
 0x3be   :  { %3685 = vmatprep.mubr.f32.mxu1 %v2712_v35  ;;  %3801 = vmatmul.mubr.f32.gmra.mrb[78].mxu0 %v15570_v40  ;;  %v15577_v39 = vpop.permute.xlu1 %8676  ;;  %v8523_v7 = vunpack.i.l.bf16 %v20994_v34  ;;  %v8638_v21 = vunpack.i.l.bf16 %v15398_v46  ;;  %v21008_v3 = vrot.slane %v15467_v51, 1  ;;  %v3171_v18 = vsel %vm1154_vm9, %v3145_v27, %v8634_v52  ;;  %v21015_v51 = vld [vmem:[#allocation34_spill] sm:$0xff] }
 0x3bf   :  { %21005 = vst [vmem:[#allocation80_spill] sm:$0xff] %v15577_v39  ;;  %v3305_v9 = vsel %vm724_vm5, %v21007_v57, %v3304_v55  ;;  %v21010_v55 = vrot.slane %v21009_v22, 1  ;;  %3686 = vmatmul.mubr.f32.gmra.mrb[58].mxu1 %v2664_v0  ;;  %v8563_v4 = vunpack.i.l.bf16 %v21011_v44  ;;  %v3058_v35 = vsel %vm1122_vm3, %v21012_v2, %v8498_v33  ;;  %v21014_v57 = vld [vmem:[#allocation337_spill] sm:$0xff]  ;;  %v21018_v33 = vld [vmem:[#allocation108_spill] sm:$0xff]  ;;  %7690 = vmatpush1.bf16.msra.mxu0 %v7689_v30 }
 0x3c0   :  { %3805 = vmatprep.mubr.f32.mxu0 %v3305_v9  ;;  %v21013_v31 = vpack.i.bf16 %v20714_v10, %v20623_v23  ;;  %v21016_v9 = vpack.i.bf16 %v21014_v57, %v21015_v51  ;;  %v2665_v27 = vsel %vm1154_vm9, %v15250_v26, %v8479_v62  ;;  %v8519_v52 = vunpack.i.h.bf16 %v21004_v54  ;;  %v15618_v10 = vpop.permute.xlu0 %8771  ;;  %7691 = vmatprep.subr.bf16.mxu0 %v20909_v61  ;;  %v21028_v61 = vld [vmem:[#allocation328_spill] sm:$0xff] }
 0x3c1   :  { %v3302_v47 = vsel %vm724_vm5, %v21010_v55, %v21008_v3  ;;  %v21017_v3 = vunpack.i.h.bf16 %v20939_v20  ;;  %v8603_v22 = vunpack.i.l.bf16 %v21018_v33  ;;  %v21019_v55 = vld [vmem:[#allocation61_spill] sm:$0xff]  ;;  %21021 = vst [vmem:[#allocation29_spill] sm:$0xff] %v15618_v10  ;;  %v3322_v54 = vrot.slane %v3171_v18, 1 }
 0x3c2   :  { %8966 = vrot.lane.b32.xlu1 %v21013_v31, %s9472_s16  ;;  %9051 = vrot.lane.b32.xlu0 %v21016_v9, %s9473_s17  ;;  %v21020_v2 = vrot.slane %v21019_v55, 7  ;;  %v7692_v31 = vpack.c.bf16 %v4040_v15, %v4039_v50  ;;  %v21022_v9 = vld [vmem:[#allocation145_spill] sm:$0xff]  ;;  %v21027_v50 = vld [vmem:[#allocation250_spill] sm:$0xff]  ;;  %v8639_v15 = vunpack.i.h.bf16 %v15398_v46  ;;  %v8608_v18 = vunpack.i.l.bf16 %v15268_v12 }
 0x3c3   :  { %v2713_v0 = vsel %vm1154_vm9, %v2697_v37, %v21017_v3  ;;  %3806 = vmatmul.mubr.f32.gmra.mrb[80].mxu0 %v3302_v47  ;;  %v15621_v37 = vpop.permute.xlu1 %8686  ;;  %v21023_v26 = vrot.slane %v21022_v9, 1  ;;  %v3094_v3 = vsel %vm1154_vm9, %v15294_v60, %v8518_v59  ;;  %v21026_v55 = vld [vmem:[#allocation333_spill] sm:$0xff]  ;;  %v21029_v60 = vpack.i.bf16 %v20890_v56, %v21028_v61 }
 0x3c4   :  { %v3121_v23 = vsel %vm1122_vm3, %v21020_v2, %v8559_v24  ;;  %3690 = vmatprep.mubr.f32.mxu1 %v2713_v0  ;;  %v21024_v24 = vld [vmem:[#allocation265_spill] sm:$0xff]  ;;  %v21030_v59 = vrot.slane %v15485_v36, 1  ;;  %v3319_v56 = vrot.slane %v3094_v3, 1  ;;  %v15658_v36 = vpop.permute.xlu0 %8781  ;;  %7693 = vmatpush1.bf16.msra.mxu0 %v7692_v31  ;;  %v21043_v31 = vld [vmem:[#allocation142_spill] sm:$0xff] }
 0x3c5   :  { %v3147_v20 = vsel %vm1138_vm8, %v3121_v23, %v8599_v6  ;;  %v3314_v62 = vsel %vm724_vm5, %v21023_v26, %v3313_v11  ;;  %v21025_v0 = vunpack.i.l.bf16 %v21024_v24  ;;  %v8568_v6 = vunpack.i.l.bf16 %v21027_v50  ;;  %3691 = vmatmul.mubr.f32.gmra.mrb[60].mxu1 %v2665_v27  ;;  %v21031_v2 = vld [vmem:[#allocation149_spill] sm:$0xff]  ;;  %v21034_v27 = vld [vmem:[#allocation46_spill] sm:$0xff]  ;;  %v21038_v24 = vld [vmem:[#allocation215_spill] sm:$0xff] }
 0x3c6   :  { %3810 = vmatprep.mubr.f32.mxu0 %v3314_v62  ;;  %v3173_v47 = vsel %vm1154_vm9, %v3147_v20, %v8638_v21  ;;  %v8564_v11 = vunpack.i.h.bf16 %v21011_v44  ;;  %8976 = vrot.lane.b32.xlu1 %v21029_v60, %s9474_s18  ;;  %v21032_v23 = vrot.slane %v21031_v2, 1  ;;  %v21033_v46 = vld [vmem:[#allocation105_spill] sm:$0xff]  ;;  %v21035_v21 = vunpack.i.l.bf16 %v21034_v27  ;;  %v21036_v20 = vld [vmem:[#allocation84_spill] sm:$0xff] }
 0x3c7   :  { %v3148_v30 = vsel %vm1138_vm8, %v21026_v55, %v21025_v0  ;;  %9061 = vrot.lane.b32.xlu0 %v21033_v46, %s9470_s15  ;;  %v21037_v26 = vrot.slane %v21036_v20, 7  ;;  %3695 = vmatprep.mubr.f32.mxu1 %v15420_v16  ;;  %v3095_v0 = vsel %vm1154_vm9, %v21038_v24, %v8519_v52  ;;  %v21039_v55 = vld [vmem:[#allocation290_spill] sm:$0xff]  ;;  %v3331_v46 = vrot.slane %v3173_v47, 1  ;;  %v3991_v52 = vld [vmem:[%s18330_s7] sm:$0xff]  ;;  %v4009_v47 = vld [vmem:[%s18330_s7 + $0x90] sm:$0xff] }
 0x3c8   :  { %v3311_v9 = vsel %vm724_vm5, %v21032_v23, %v21030_v59  ;;  %v15652_v44 = vsel %vm1154_vm9, %v3148_v30, %v21035_v21  ;;  %v21040_v60 = vunpack.i.h.bf16 %v21039_v55  ;;  %v8499_v30 = vunpack.i.h.bf16 %v20998_v25  ;;  %v15667_v23 = vpop.permute.xlu1 %8696 }
 0x3c9   :  { %v3123_v62 = vsel %vm1122_vm3, %v21037_v26, %v8563_v4  ;;  %3811 = vmatmul.mubr.f32.gmra.mrb[82].mxu0 %v3311_v9  ;;  %v21041_v4 = vld [vmem:[#allocation103_spill] sm:$0xff]  ;;  %v8504_v25 = vunpack.i.h.bf16 %v21043_v31  ;;  %v21044_v9 = vld [vmem:[#allocation125_spill] sm:$0xff]  ;;  %3696 = vmatmul.mubr.f32.gmra.mrb[62].mxu1 %v15321_v32  ;;  %v4010_v26 = vld [vmem:[%s18330_s7 + $0x98] sm:$0xff]  ;;  %v21048_v32 = vpack.i.bf16 %v20816_v17, %v20936_v48 }
 0x3ca   :  { %v3077_v59 = vsel %vm1138_vm8, %v3058_v35, %v21040_v60  ;;  %v3149_v2 = vsel %vm1138_vm8, %v3123_v62, %v8603_v22  ;;  %v21042_v16 = vrot.slane %v21041_v4, 1  ;;  %v3992_v35 = vld [vmem:[%s18330_s7 + $0x8] sm:$0xff]  ;;  %v8503_v22 = vunpack.i.l.bf16 %v21043_v31  ;;  %v15711_v31 = vpop.permute.xlu0 %8791 }
 0x3cb   :  { %v21045_v27 = vrot.slane %v21044_v9, 7  ;;  %v8604_v62 = vunpack.i.h.bf16 %v21018_v33  ;;  %9071 = vrot.lane.b32.xlu0 %v21048_v32, %s9476_s0  ;;  %v3096_v60 = vsel %vm1154_vm9, %v3077_v59, %v8523_v7  ;;  %v21055_v7 = vld [vmem:[#allocation193_spill] sm:$0xff] }
 0x3cc   :  { %v3323_v3 = vsel %vm724_vm5, %v21042_v16, %v3322_v54  ;;  %v3175_v54 = vsel %vm1154_vm9, %v3149_v2, %v8639_v15  ;;  %v3328_v15 = vrot.slane %v3095_v0, 1  ;;  %v21049_v2 = vld [vmem:[#allocation195_spill] sm:$0xff]  ;;  %v21056_v59 = vrot.slane %v21055_v7, 1  ;;  %v21062_v7 = vld [vmem:[#allocation349_spill] sm:$0xff] }
 0x3cd   :  { %v3125_v21 = vsel %vm1122_vm3, %v21045_v27, %v8568_v6  ;;  %3815 = vmatprep.mubr.f32.mxu0 %v3323_v3  ;;  %v21046_v6 = vld [vmem:[#allocation155_spill] sm:$0xff]  ;;  %v8644_v4 = vunpack.i.h.bf16 %v21049_v2  ;;  %v8643_v33 = vunpack.i.l.bf16 %v21049_v2  ;;  %v7637_v27 = vpack.c.bf16 %v3992_v35, %v3991_v52 }
 0x3ce   :  { %v3151_v24 = vsel %vm1138_vm8, %v3125_v21, %v8608_v18  ;;  %v21047_v55 = vpack.i.bf16 %v20654_v29, %v21046_v6  ;;  %v21050_v18 = vld [vmem:[#allocation269_spill] sm:$0xff]  ;;  %v21052_v29 = vld [vmem:[#allocation82_spill] sm:$0xff]  ;;  %v21053_v21 = vld [vmem:[#allocation335_spill] sm:$0xff]  ;;  %v15714_v6 = vpop.permute.xlu1 %8706  ;;  %v3340_v32 = vrot.slane %v3175_v54, 1  ;;  %v7639_v2 = vpack.c.bf16 %v4010_v26, %v4009_v47 }
 0x3cf   :  { %v21051_v16 = vrot.slane %v21050_v18, 1  ;;  %7463 = vmatprep.mubr.msk.f32.mxu1 %vm1122_vm3, %v21052_v29  ;;  %v8528_v0 = vunpack.i.l.bf16 %v21053_v21  ;;  %21054 = vst [vmem:[#allocation176_spill] sm:$0xff] %v15714_v6  ;;  %v3994_v18 = vld [vmem:[%s18330_s7 + $0x18] sm:$0xff]  ;;  %v21057_v52 = vrot.slane %v21044_v9, 7  ;;  %v21058_v54 = vld [vmem:[#allocation153_spill] sm:$0xff]  ;;  %v3177_v47 = vsel %vm1154_vm9, %v3151_v24, %v8644_v4  ;;  %v4012_v9 = vld [vmem:[%s18330_s7 + $0xa8] sm:$0xff] }
 0x3d0   :  { %8986 = vrot.lane.b32.xlu1 %v21047_v55, %s9469_s14  ;;  %v3332_v55 = vsel %vm724_vm5, %v21056_v59, %v3331_v46  ;;  %v3339_v46 = vrot.slane %v15652_v44, 1  ;;  %7464 = vmatmul.mubr.msk.f32.vlgmr.msra.gmra.mrb[64].mxu1 %vm1122_vm3, %v21058_v54  ;;  %v4011_v26 = vld [vmem:[%s18330_s7 + $0xa0] sm:$0xff]  ;;  %v21061_v24 = vpack.i.bf16 %v20956_v53, %v20955_v49  ;;  %v3337_v4 = vrot.slane %v3096_v60, 1  ;;  %v21068_v54 = vld [vmem:[#allocation47_spill] sm:$0xff]  ;;  %v21107_v6 = vld [vmem:[#allocation260_spill] sm:$0xff] }
 0x3d1   :  { %v3320_v3 = vsel %vm724_vm5, %v21051_v16, %v3319_v56  ;;  %v3993_v56 = vld [vmem:[%s18330_s7 + $0x10] sm:$0xff]  ;;  %v3124_v35 = vsel %vm1122_vm3, %v21057_v52, %v8564_v11  ;;  %v3059_v16 = vsel %vm1122_vm3, %v21036_v20, %v8499_v30  ;;  %v21060_v30 = vpack.i.bf16 %v20938_v41, %v20937_v28  ;;  %7638 = vmatpush3.bf16.msra.mxu1 %v7637_v27 }
 0x3d2   :  { %3816 = vmatmul.mubr.f32.gmra.mrb[84].mxu0 %v3320_v3  ;;  %v21059_v11 = vld [vmem:[#allocation291_spill] sm:$0xff]  ;;  %v3078_v20 = vsel %vm1138_vm8, %v3059_v16, %v8503_v22  ;;  %v3150_v44 = vsel %vm1138_vm8, %v3124_v35, %v8604_v62  ;;  %9081 = vrot.lane.b32.xlu0 %v21061_v24, %s9469_s14  ;;  %v8529_v29 = vunpack.i.h.bf16 %v21053_v21  ;;  %v21063_v59 = vrot.slane %v21062_v7, 1  ;;  %v15758_v62 = vpop.permute.xlu0 %8801  ;;  %v15761_v35 = vpop.permute.xlu1 %8716  ;;  %v21076_v7 = vld [vmem:[#allocation225_spill] sm:$0xff] }
 0x3d3   :  { %3820 = vmatprep.mubr.f32.mxu0 %v3332_v55  ;;  %v3079_v3 = vsel %vm1138_vm8, %v21059_v11, %v8504_v25  ;;  %v21064_v22 = vld [vmem:[#allocation99_spill] sm:$0xff]  ;;  %21065 = vst [vmem:[#allocation344_spill] sm:$0xff] %v15758_v62  ;;  %v3176_v55 = vsel %vm1154_vm9, %v3150_v44, %v8643_v33  ;;  %v7641_v52 = vpack.c.bf16 %v3994_v18, %v3993_v56  ;;  %v3349_v60 = vrot.slane %v3177_v47, 1  ;;  %v3996_v33 = vld [vmem:[%s18330_s7 + $0x28] sm:$0xff]  ;;  %v21071_v47 = vld [vmem:[#allocation136_spill] sm:$0xff] }
 0x3d4   :  { %8996 = vrot.lane.b32.xlu1 %v21060_v30, %s9475_s29  ;;  %v3329_v25 = vsel %vm724_vm5, %v21063_v59, %v3328_v15  ;;  %7466 = vmatprep.mubr.msk.f32.mxu1 %vm1122_vm3, %v21064_v22  ;;  %v3341_v49 = vsel %vm724_vm5, %v3339_v46, %v3340_v32  ;;  %v3098_v21 = vsel %vm1154_vm9, %v3079_v3, %v8528_v0  ;;  %v3995_v15 = vld [vmem:[%s18330_s7 + $0x20] sm:$0xff]  ;;  %v21066_v27 = vunpack.i.l.bf16 %v20962_v63  ;;  %v21067_v56 = vld [vmem:[#allocation67_spill] sm:$0xff]  ;;  %v21069_v46 = vld [vmem:[#allocation36_spill] sm:$0xff] }
 0x3d5   :  { %7640 = vmatprep.subr.bf16.mxu1 %v7639_v2  ;;  %v7643_v16 = vpack.c.bf16 %v4012_v9, %v4011_v26  ;;  %v3336_v32 = vrot.slane %v21068_v54, 1  ;;  %7467 = vmatmul.mubr.msk.f32.gmra.mrb[66].mxu1 %vm1122_vm3, %v21069_v46  ;;  %v21070_v0 = vld [vmem:[#allocation309_spill] sm:$0xff]  ;;  %v21072_v26 = vrot.slane %v20980_v19, 7  ;;  %v4013_v63 = vld [vmem:[%s18330_s7 + $0xb0] sm:$0xff]  ;;  %v4014_v11 = vld [vmem:[%s18330_s7 + $0xb8] sm:$0xff]  ;;  %v21074_v30 = vpack.i.bf16 %v20967_v1, %v20966_v42 }
 0x3d6   :  { %3821 = vmatmul.mubr.f32.gmra.mrb[86].mxu0 %v3329_v25  ;;  %v3062_v18 = vsel %vm1122_vm3, %v21067_v56, %v21066_v27  ;;  %v9015_v2 = vpack.i.bf16 %v20933_v14, %v21070_v0  ;;  %v21073_v3 = vld [vmem:[#allocation213_spill] sm:$0xff]  ;;  %v3348_v14 = vrot.slane %v3176_v55, 1  ;;  %v21075_v24 = vld [vmem:[#allocation139_spill] sm:$0xff]  ;;  %v3097_v25 = vsel %vm1154_vm9, %v3078_v20, %v8524_v58  ;;  %v21078_v22 = vld [vmem:[#allocation242_spill] sm:$0xff]  ;;  %7642 = vmatpush3.bf16.msra.mxu1 %v7641_v52  ;;  %v15812_v34 = vpop.permute.xlu1 %8726  ;;  %v15815_v20 = vpop.permute.xlu0 %8811 }
 0x3d7   :  { %3825 = vmatprep.mubr.f32.mxu0 %v3341_v49  ;;  %v9100_v9 = vpack.i.bf16 %v21072_v26, %v21071_v47  ;;  %v8533_v44 = vunpack.i.l.bf16 %v21073_v3  ;;  %v21077_v59 = vpack.i.bf16 %v21075_v24, %v21076_v7  ;;  %v15802_v49 = vrot.slane %v21078_v22, 1  ;;  %v21080_v56 = vld [vmem:[#allocation37_spill] sm:$0xff]  ;;  %v21081_v54 = vld [vmem:[#allocation6_spill] sm:$0xff]  ;;  %21084 = vst [vmem:[#allocation27_spill] sm:$0xff] %v15812_v34  ;;  %21085 = vst [vmem:[#allocation216_spill] sm:$0xff] %v15815_v20 }
 0x3d8   :  { %9006 = vrot.lane.b32.xlu1 %v21074_v30, %s9474_s18  ;;  %v3338_v27 = vsel %vm724_vm5, %v3336_v32, %v3337_v4  ;;  %7469 = vmatprep.mubr.msk.f32.mxu1 %vm1122_vm3, %v21080_v56  ;;  %v3346_v1 = vrot.slane %v3098_v21, 1  ;;  %v21082_v55 = vrot.slane %v21081_v54, 6  ;;  %v7645_v0 = vpack.c.bf16 %v3996_v33, %v3995_v15  ;;  %v21086_v47 = vld [vmem:[#allocation330_spill] sm:$0xff]  ;;  %v21087_v32 = vld [vmem:[#allocation208_spill] sm:$0xff]  ;;  %v3997_v3 = vld [vmem:[%s18330_s7 + $0x30] sm:$0xff] }
 0x3d9   :  { %9091 = vrot.lane.b32.xlu0 %v21077_v59, %s9475_s29  ;;  %21079 = vst [vmem:[#allocation133_spill] sm:$0xff] %v15802_v49  ;;  %v3350_v58 = vsel %vm724_vm5, %v3348_v14, %v3349_v60  ;;  %v3099_v4 = vsel %vm1154_vm9, %v21086_v47, %v8529_v29  ;;  %v3306_v26 = vrot.slane %v21087_v32, 1  ;;  %7644 = vmatprep.subr.bf16.mxu1 %v7643_v16  ;;  %v3998_v52 = vld [vmem:[%s18330_s7 + $0x38] sm:$0xff]  ;;  %v3345_v15 = vrot.slane %v3097_v25, 1  ;;  %v21089_v33 = vld [vmem:[#allocation138_spill] sm:$0xff]  ;;  %v4015_v14 = vld [vmem:[%s18330_s7 + $0xc0] sm:$0xff] }
 0x3da   :  { %v15810_v46 = vsel %vm1703_vm4, %v21082_v55, 0.0  ;;  %3826 = vmatmul.mubr.f32.gmra.mrb[88].mxu0 %v3338_v27  ;;  %v7647_v21 = vpack.c.bf16 %v4014_v11, %v4013_v63  ;;  %v21088_v60 = vld [vmem:[#allocation272_spill] sm:$0xff]  ;;  %v9025_v29 = vpack.i.bf16 %v20936_v48, %v21000_v8  ;;  %v21090_v30 = vunpack.i.h.bf16 %v21089_v33  ;;  %v21091_v63 = vld [vmem:[#allocation115_spill] sm:$0xff]  ;;  %v4016_v59 = vld [vmem:[%s18330_s7 + $0xc8] sm:$0xff]  ;;  %7646 = vmatpush3.bf16.msra.mxu1 %v7645_v0 }
 0x3db   :  { %21083 = vst [vmem:[#allocation55_spill] sm:$0xff] %v15810_v46  ;;  %3830 = vmatprep.mubr.f32.mxu0 %v3350_v58  ;;  %7470 = vmatmul.mubr.msk.f32.gmra.mrb[68].mxu1 %vm1122_vm3, %v21088_v60  ;;  %v3307_v11 = vrot.slane %v21091_v63, 1  ;;  %v21092_v8 = vrot.slane %v21076_v7, 2  ;;  %v21093_v25 = vld [vmem:[#allocation224_spill] sm:$0xff]  ;;  %v15849_v27 = vrot.slane %v15810_v46, 1  ;;  %v4824_v56 = vrot.slane %v20980_v19, 3  ;;  %v15860_v58 = vpop.permute.xlu0 %8821 }
 0x3dc   :  { %v3081_v16 = vsel %vm1138_vm8, %v3062_v18, %v21090_v30  ;;  %9016 = vrot.lane.b32.xlu1 %v9015_v2, %s9469_s14  ;;  %v3347_v54 = vsel %vm724_vm5, %v3345_v15, %v3346_v1  ;;  %v3354_v55 = vrot.slane %v3099_v4, 1  ;;  %7472 = vmatprep.mubr.msk.f32.mxu1 %vm1122_vm3, %v15802_v49  ;;  %v15856_v2 = vrot.slane %v15810_v46, 3  ;;  %21096 = vst [vmem:[#allocation298_spill] sm:$0xff] %v15860_v58  ;;  %v21097_v47 = vld [vmem:[#allocation209_spill] sm:$0xff]  ;;  %v21098_v60 = vld [vmem:[#allocation127_spill] sm:$0xff]  ;;  %v4000_v0 = vld [vmem:[%s18330_s7 + $0x48] sm:$0xff] }
 0x3dd   :  { %9101 = vrot.lane.b32.xlu0 %v9100_v9, %s9470_s15  ;;  %v3100_v48 = vsel %vm1154_vm9, %v3081_v16, %v8533_v44  ;;  %v15846_v18 = vpack.i.bf16 %v21093_v25, %v21092_v8  ;;  %v7649_v9 = vpack.c.bf16 %v3998_v52, %v3997_v3  ;;  %v15858_v44 = vpop.permute.xlu1 %8736  ;;  %v3315_v32 = vrot.slane %v21097_v47, 1  ;;  %7648 = vmatprep.subr.bf16.mxu1 %v7647_v21  ;;  %v3999_v4 = vld [vmem:[%s18330_s7 + $0x40] sm:$0xff]  ;;  %v21099_v15 = vld [vmem:[#allocation259_spill] sm:$0xff]  ;;  %v21100_v21 = vld [vmem:[#allocation128_spill] sm:$0xff] }
 0x3de   :  { %21094 = vst [vmem:[#allocation54_spill] sm:$0xff] %v15856_v2  ;;  %3831 = vmatmul.mubr.f32.gmra.mrb[90].mxu0 %v3347_v54  ;;  %21095 = vst [vmem:[#allocation140_spill] sm:$0xff] %v15858_v44  ;;  %v3316_v33 = vrot.slane %v21098_v60, 1  ;;  %v7651_v1 = vpack.c.bf16 %v4016_v59, %v4015_v14  ;;  %v3355_v3 = vrot.slane %v3100_v48, 1  ;;  %v3308_v52 = vsel %vm724_vm5, %v3306_v26, %v3307_v11  ;;  %v4017_v63 = vld [vmem:[%s18330_s7 + $0xd0] sm:$0xff]  ;;  %v4018_v14 = vld [vmem:[%s18330_s7 + $0xd8] sm:$0xff] }
 0x3df   :  { %3835 = vmatprep.mubr.f32.mxu0 %v15436_v43  ;;  %7473 = vmatmul.mubr.msk.f32.gmra.mrb[70].mxu1 %vm1122_vm3, %v15802_v49  ;;  %v3324_v30 = vrot.slane %v21099_v15, 1  ;;  %v3325_v16 = vrot.slane %v21100_v21, 1  ;;  %v21101_v59 = vld [vmem:[#allocation38_spill] sm:$0xff]  ;;  %v21102_v48 = vld [vmem:[#allocation301_spill] sm:$0xff]  ;;  %v21103_v11 = vld [vmem:[#allocation39_spill] sm:$0xff]  ;;  %v5752_v54 = vrot.slane %v20938_v41, 1  ;;  %v7653_v15 = vpack.c.bf16 %v4000_v0, %v3999_v4 }
 0x3e0   :  { %9026 = vrot.lane.b32.xlu1 %v9025_v29, %s9472_s16  ;;  %v9035_v26 = vpack.i.bf16 %v21102_v48, %v21101_v59  ;;  %v9120_v8 = vpack.i.bf16 %v21103_v11, %v15849_v27  ;;  %v5753_v47 = vrot.slane %v21028_v61, 1  ;;  %v3356_v60 = vsel %vm724_vm5, %v3354_v55, %v3355_v3  ;;  %7475 = vmatprep.mubr.msk.f32.mxu1 %vm1122_vm3, %v3308_v52  ;;  %v15899_v48 = vpop.permute.xlu0 %8831  ;;  %v21108_v61 = vld [vmem:[#allocation243_spill] sm:$0xff]  ;;  %v4020_v4 = vld [vmem:[%s18330_s7 + $0xe8] sm:$0xff]  ;;  %v21182_v62 = vld [vmem:[#allocation76_spill] sm:$0xff] }
 0x3e1   :  { %9111 = vrot.lane.b32.xlu0 %v15846_v18, %s9476_s0  ;;  %v15895_v29 = vsel %vm1904_vm6, %v4824_v56, %v15856_v2  ;;  %7650 = vmatpush3.bf16.msra.mxu1 %v7649_v9  ;;  %v15897_v21 = vpop.permute.xlu1 %8746  ;;  %21106 = vst [vmem:[#allocation196_spill] sm:$0xff] %v15899_v48  ;;  %v3317_v10 = vsel %vm724_vm5, %v3315_v32, %v3316_v33  ;;  %v3333_v41 = vrot.slane %v21107_v6, 1  ;;  %v3334_v28 = vrot.slane %v21108_v61, 1  ;;  %v4001_v56 = vld [vmem:[%s18330_s7 + $0x50] sm:$0xff]  ;;  %v4002_v9 = vld [vmem:[%s18330_s7 + $0x58] sm:$0xff]  ;;  %v21109_v33 = vld [vmem:[#allocation270_spill] sm:$0xff] }
 0x3e2   :  { %21104 = vst [vmem:[#allocation89_spill] sm:$0xff] %v15895_v29  ;;  %3836 = vmatmul.mubr.f32.gmra.mrb[92].mxu0 %v3356_v60  ;;  %21105 = vst [vmem:[#allocation96_spill] sm:$0xff] %v15897_v21  ;;  %7652 = vmatprep.subr.bf16.mxu1 %v7651_v1  ;;  %v7655_v55 = vpack.c.bf16 %v4018_v14, %v4017_v63  ;;  %v3326_v32 = vsel %vm724_vm5, %v3324_v30, %v3325_v16  ;;  %v3342_v6 = vrot.slane %v21109_v33, 1  ;;  %v4019_v1 = vld [vmem:[%s18330_s7 + $0xe0] sm:$0xff]  ;;  %v21110_v0 = vld [vmem:[#allocation310_spill] sm:$0xff] }
 0x3e3   :  { %3840 = vmatprep.mubr.f32.mxu0 %v15436_v43  ;;  %7476 = vmatmul.mubr.msk.f32.gmra.mrb[72].mxu1 %vm1122_vm3, %v3317_v10  ;;  %v9045_v43 = vpack.i.bf16 %v21015_v51, %v21110_v0  ;;  %v9130_v10 = vpack.i.bf16 %v15895_v29, %v21014_v57  ;;  %v21111_v3 = vld [vmem:[#allocation107_spill] sm:$0xff]  ;;  %v5754_v30 = vsel %vm724_vm5, %v5752_v54, %v5753_v47  ;;  %v4716_v16 = vrot.slane %v20980_v19, 1  ;;  %v4004_v54 = vld [vmem:[%s18330_s7 + $0x68] sm:$0xff]  ;;  %v21115_v47 = vld [vmem:[#allocation288_spill] sm:$0xff] }
 0x3e4   :  { %9036 = vrot.lane.b32.xlu1 %v9035_v26, %s9474_s18  ;;  %v3343_v52 = vrot.slane %v21111_v3, 1  ;;  %7478 = vmatprep.mubr.msk.f32.mxu1 %vm1122_vm3, %v3326_v32  ;;  %v7657_v63 = vpack.c.bf16 %v4002_v9, %v4001_v56  ;;  %v15933_v26 = vpop.permute.xlu0 %8841  ;;  %v3335_v51 = vsel %vm724_vm5, %v3333_v41, %v3334_v28  ;;  %v7659_v57 = vpack.c.bf16 %v4020_v4, %v4019_v1  ;;  %v4022_v28 = vld [vmem:[%s18330_s7 + $0xf8] sm:$0xff]  ;;  %v21114_v41 = vld [vmem:[#allocation222_spill] sm:$0xff]  ;;  %v21116_v61 = vld [vmem:[#allocation341_spill] sm:$0xff] }
 0x3e5   :  { %9121 = vrot.lane.b32.xlu0 %v9120_v8, %s9473_s17  ;;  %7654 = vmatpush3.bf16.msra.mxu1 %v7653_v15  ;;  %v15931_v14 = vpop.permute.xlu1 %8756  ;;  %21113 = vst [vmem:[#allocation241_spill] sm:$0xff] %v15933_v26  ;;  %v4003_v8 = vld [vmem:[%s18330_s7 + $0x60] sm:$0xff]  ;;  %v9055_v60 = vpack.i.bf16 %v21115_v47, %v21114_v41  ;;  %v15960_v56 = vsel %vm724_vm5, %v4716_v16, %v15849_v27  ;;  %v4593_v9 = vrot.slane %v21093_v25, 3  ;;  %v15964_v32 = vrot.slane %v21076_v7, 3  ;;  %v4005_v0 = vld [vmem:[%s18330_s7 + $0x70] sm:$0xff]  ;;  %v21122_v3 = vld [vmem:[#allocation52_spill] sm:$0xff] }
 0x3e6   :  { %3841 = vmatmul.mubr.f32.gmra.mrb[94].mxu0 %v15570_v40  ;;  %21112 = vst [vmem:[#allocation248_spill] sm:$0xff] %v15931_v14  ;;  %7656 = vmatprep.subr.bf16.mxu1 %v7655_v55  ;;  %v4021_v40 = vld [vmem:[%s18330_s7 + $0xf0] sm:$0xff]  ;;  %v3344_v15 = vsel %vm724_vm5, %v3342_v6, %v3343_v52  ;;  %v9140_v55 = vpack.i.bf16 %v21116_v61, %v15849_v27  ;;  %v4006_v27 = vld [vmem:[%s18330_s7 + $0x78] sm:$0xff]  ;;  %v21140_v7 = vld [vmem:[#allocation338_spill] sm:$0xff] }
 0x3e7   :  { %7479 = vmatmul.mubr.msk.f32.gmra.mrb[74].mxu1 %vm1122_vm3, %v3335_v51  ;;  %6919 = vmatprep.mubr.msk.f32.mxu0 %vm353_vm0, %v5754_v30  ;;  %21117 = vst [vmem:[#allocation152_spill] sm:$0xff] %v15964_v32  ;;  %v7661_v33 = vpack.c.bf16 %v4004_v54, %v4003_v8  ;;  %v7663_v6 = vpack.c.bf16 %v4022_v28, %v4021_v40  ;;  %v21126_v8 = vld [vmem:[#allocation189_spill] sm:$0xff]  ;;  %v4770_v28 = vrot.slane %v20980_v19, 2  ;;  %v21161_v24 = vld [vmem:[#allocation118_spill] sm:$0xff]  ;;  %v21165_v14 = vld [vmem:[#allocation236_spill] sm:$0xff] }
 0x3e8   :  { %9046 = vrot.lane.b32.xlu1 %v9045_v43, %s9469_s14  ;;  %7481 = vmatprep.mubr.msk.f32.mxu1 %vm1122_vm3, %v3344_v15  ;;  %v15968_v4 = vpop.permute.xlu0 %8851  ;;  %v21120_v43 = vld [vmem:[#allocation162_spill] sm:$0xff]  ;;  %v9150_v30 = vpack.i.bf16 %v15960_v56, %v15856_v2  ;;  %v15988_v16 = vsel %vm1904_vm6, %v4593_v9, %v15964_v32  ;;  %v9075_v54 = vpack.i.bf16 %v21126_v8, %v20816_v17  ;;  %v21129_v9 = vld [vmem:[#allocation41_spill] sm:$0xff]  ;;  %v21141_v2 = vmov 0.0  }
 0x3e9   :  { %9131 = vrot.lane.b32.xlu0 %v9130_v10, %s9474_s18  ;;  %7658 = vmatpush3.bf16.msra.mxu1 %v7657_v63  ;;  %v15966_v1 = vpop.permute.xlu1 %8766  ;;  %21119 = vst [vmem:[#allocation177_spill] sm:$0xff] %v15968_v4  ;;  %v21121_v10 = vld [vmem:[#allocation329_spill] sm:$0xff]  ;;  %21123 = vst [vmem:[#allocation264_spill] sm:$0xff] %v15988_v16  ;;  %v7665_v63 = vpack.c.bf16 %v4006_v27, %v4005_v0  ;;  %v9160_v40 = vpack.i.bf16 %v15895_v29, %v15988_v16  ;;  %v21142_v29 = vld [vmem:[#allocation230_spill] sm:$0xff]  ;;  %v8649_v21 = vunpack.i.h.bf16 %v21161_v24 }
 0x3ea   :  { %21118 = vst [vmem:[#allocation299_spill] sm:$0xff] %v15966_v1  ;;  %7660 = vmatprep.subr.bf16.mxu1 %v7659_v57  ;;  %v9065_v52 = vpack.i.bf16 %v21122_v3, %v21121_v10  ;;  %v9115_v25 = vpack.i.bf16 %v15960_v56, %v21140_v7  ;;  %v21148_v7 = vld [vmem:[#allocation274_spill] sm:$0xff]  ;;  %v21159_v10 = vld [vmem:[#allocation180_spill] sm:$0xff] }
 0x3eb   :  { %7482 = vmatmul.mubr.msk.f32.gmra.mrb[76].mxu1 %vm1122_vm3, %v21120_v43  ;;  %v21132_v43 = vld [vmem:[#allocation8_spill] sm:$0xff] }
 0x3ec   :  { %9056 = vrot.lane.b32.xlu1 %v9055_v60, %s9475_s29  ;;  %7484 = vmatprep.mubr.msk.f32.mxu1 %vm1122_vm3, %v15802_v49  ;;  %v15992_v57 = vpop.permute.xlu0 %8861  ;;  %v4771_v60 = vrot.slane %v15810_v46, 2  ;;  %v4072_v3 = vrot.slane %v21132_v43, 6  ;;  %v21137_v43 = vld [vmem:[#allocation226_spill] sm:$0xff] }
 0x3ed   :  { %9141 = vrot.lane.b32.xlu0 %v9140_v55, %s9469_s14  ;;  %7662 = vmatpush3.bf16.msra.mxu1 %v7661_v33  ;;  %v15990_v51 = vpop.permute.xlu1 %8776  ;;  %21125 = vst [vmem:[#allocation159_spill] sm:$0xff] %v15992_v57  ;;  %v9085_v55 = vpack.i.bf16 %v15960_v56, %v20956_v53  ;;  %v16014_v33 = vpack.i.bf16 %v21129_v9, %v20980_v19  ;;  %v21154_v56 = vld [vmem:[#allocation93_spill] sm:$0xff] }
 0x3ee   :  { %21124 = vst [vmem:[#allocation278_spill] sm:$0xff] %v15990_v51  ;;  %7664 = vmatprep.subr.bf16.mxu1 %v7663_v6  ;;  %v4772_v6 = vsel %vm814_vm2, %v4770_v28, %v4771_v60  ;;  %v16033_v28 = vsel %vm1703_vm4, 0.0, %v4072_v3  ;;  %v16036_v9 = vsel %vm1703_vm4, %v4072_v3, 0.0  ;;  %v9125_v3 = vpack.i.bf16 %v15810_v46, %v20980_v19  ;;  %v21156_v51 = vld [vmem:[#allocation146_spill] sm:$0xff] }
 0x3ef   :  { %7485 = vmatmul.mubr.msk.f32.gmra.mrb[78].mxu1 %vm1122_vm3, %v15802_v49  ;;  %21136 = vst [vmem:[#allocation318_spill] sm:$0xff] %v16036_v9  ;;  %v8684_v4 = vunpack.i.h.bf16 %v21156_v51 }
 0x3f0   :  { %9066 = vrot.lane.b32.xlu1 %v9065_v52, %s9474_s18  ;;  %v16006_v61 = vpop.permute.xlu0 %8871  ;;  %v21133_v52 = vld [vmem:[#allocation90_spill] sm:$0xff] }
 0x3f1   :  { %9151 = vrot.lane.b32.xlu0 %v9150_v30, %s9474_s18  ;;  %7666 = vmatpush3.bf16.msra.mxu1 %v7665_v63  ;;  %v16004_v15 = vpop.permute.xlu1 %8786  ;;  %21128 = vst [vmem:[#allocation154_spill] sm:$0xff] %v16006_v61  ;;  %v9180_v30 = vpack.i.bf16 %v21133_v52, %v4772_v6  ;;  %v21138_v52 = vld [vmem:[#allocation211_spill] sm:$0xff] }
 0x3f2   :  { %21127 = vst [vmem:[#allocation164_spill] sm:$0xff] %v16004_v15  ;;  %v21139_v1 = vrot.slane %v21138_v52, 2  ;;  %v21174_v20 = vrot.slane %v21138_v52, 1 }
 0x3f4   :  { %9076 = vrot.lane.b32.xlu1 %v9075_v54, %s9472_s16  ;;  %v16019_v27 = vpop.permute.xlu0 %8881  ;;  %v4878_v54 = vrot.slane %v20980_v19, 4  ;;  %v9190_v49 = vpack.i.bf16 %v21139_v1, %v21137_v43  ;;  %v16060_v1 = vpack.i.bf16 %v4771_v60, %v4772_v6  ;;  %v21152_v60 = vld [vmem:[#allocation94_spill] sm:$0xff]  ;;  %v21153_v6 = vld [vmem:[#allocation305_spill] sm:$0xff] }
 0x3f5   :  { %9161 = vrot.lane.b32.xlu0 %v9160_v40, %s9475_s29  ;;  %v16017_v0 = vpop.permute.xlu1 %8796  ;;  %21131 = vst [vmem:[#allocation282_spill] sm:$0xff] %v16019_v27  ;;  %v4879_v40 = vrot.slane %v15810_v46, 4  ;;  %v21143_v27 = vld [vmem:[#allocation334_spill] sm:$0xff] }
 0x3f6   :  { %21130 = vst [vmem:[#allocation42_spill] sm:$0xff] %v16017_v0  ;;  %v21150_v46 = vld [vmem:[#allocation134_spill] sm:$0xff] }
 0x3f8   :  { %9086 = vrot.lane.b32.xlu1 %v9085_v55, %s9473_s17  ;;  %v16028_v63 = vpop.permute.xlu0 %8891  ;;  %v9105_v55 = vpack.i.bf16 %v15964_v32, %v15988_v16 }
 0x3f9   :  { %9171 = vrot.lane.b32.xlu0 %v16014_v33, %s9476_s0  ;;  %v16026_v53 = vpop.permute.xlu1 %8806  ;;  %21135 = vst [vmem:[#allocation130_spill] sm:$0xff] %v16028_v63 }
 0x3fa   :  { %21134 = vst [vmem:[#allocation69_spill] sm:$0xff] %v16026_v53  ;;  %v9200_v53 = vpack.i.bf16 %v21142_v29, %v21141_v2  ;;  %v21149_v2 = vld [vmem:[#allocation81_spill] sm:$0xff] }
 0x3fb   :  { %v8664_v15 = vunpack.i.h.bf16 %v21149_v2  ;;  %v8663_v19 = vunpack.i.l.bf16 %v21149_v2  ;;  %v8569_v2 = vunpack.i.h.bf16 %v21027_v50  ;;  %v21168_v50 = vld [vmem:[#allocation53_spill] sm:$0xff] }
 0x3fc   :  { %9096 = vrot.lane.b32.xlu1 %v15846_v18, %s9472_s16  ;;  %v21144_v18 = vld [vmem:[#allocation232_spill] sm:$0xff]  ;;  %v16058_v57 = vpop.permute.xlu0 %8901 }
 0x3fd   :  { %9181 = vrot.lane.b32.xlu0 %v9180_v30, %s9470_s15  ;;  %v9210_v41 = vpack.i.bf16 %v21144_v18, %v21143_v27  ;;  %v21145_v30 = vld [vmem:[#allocation200_spill] sm:$0xff]  ;;  %v16056_v61 = vpop.permute.xlu1 %8816  ;;  %21147 = vst [vmem:[#allocation339_spill] sm:$0xff] %v16058_v57  ;;  %v16069_v27 = vsel %vm1982_vm7, %v4878_v54, %v4879_v40  ;;  %v21157_v18 = vld [vmem:[#allocation231_spill] sm:$0xff]  ;;  %v8648_v57 = vunpack.i.l.bf16 %v21161_v24  ;;  %v16097_v48 = vsel %vm353_vm0, %v21137_v43, %v8664_v15  ;;  %v21175_v43 = vld [vmem:[#allocation297_spill] sm:$0xff] }
 0x3fe   :  { %v8654_v63 = vunpack.i.h.bf16 %v21145_v30  ;;  %v8653_v0 = vunpack.i.l.bf16 %v21145_v30  ;;  %21146 = vst [vmem:[#allocation277_spill] sm:$0xff] %v16056_v61  ;;  %v21151_v30 = vld [vmem:[#allocation7_spill] sm:$0xff]  ;;  %v8609_v24 = vunpack.i.h.bf16 %v15268_v12  ;;  %v21183_v12 = vrot.slane %v21138_v52, 3 }
 0x3ff   :  { %v8673_v32 = vunpack.i.l.bf16 %v21151_v30  ;;  %v21155_v61 = vld [vmem:[#allocation235_spill] sm:$0xff] }
 0x400   :  { %9106 = vrot.lane.b32.xlu1 %v9105_v55, %s9474_s18  ;;  %v21158_v54 = vld [vmem:[#allocation275_spill] sm:$0xff]  ;;  %v16084_v30 = vsel %vm353_vm0, %v21159_v10, %v8654_v63  ;;  %v16091_v16 = vpop.permute.xlu0 %8911  ;;  %v4983_v10 = vsel %vm353_vm0, %v20816_v17, %v8663_v19  ;;  %v21164_v63 = vld [vmem:[#allocation165_spill] sm:$0xff]  ;;  %v8683_v19 = vunpack.i.l.bf16 %v21156_v51  ;;  %v5365_v51 = vrot.slane %v21157_v18, 7 }
 0x401   :  { %9191 = vrot.lane.b32.xlu0 %v9190_v49, %s9472_s16  ;;  %v21160_v55 = vld [vmem:[#allocation179_spill] sm:$0xff]  ;;  %v16089_v26 = vpop.permute.xlu1 %8826  ;;  %21163 = vst [vmem:[#allocation71_spill] sm:$0xff] %v16091_v16  ;;  %v8694_v40 = vunpack.i.h.bf16 %v21164_v63  ;;  %v21169_v16 = vld [vmem:[#allocation156_spill] sm:$0xff] }
 0x402   :  { %v4979_v49 = vsel %vm353_vm0, %v21160_v55, %v8653_v0  ;;  %21162 = vst [vmem:[#allocation85_spill] sm:$0xff] %v16089_v26  ;;  %v5367_v0 = vrot.slane %v21165_v14, 7  ;;  %v21166_v55 = vld [vmem:[#allocation234_spill] sm:$0xff]  ;;  %v21167_v26 = vld [vmem:[#allocation28_spill] sm:$0xff] }
 0x403   :  { %v4987_v58 = vsel %vm353_vm0, %v21166_v55, %v8673_v32  ;;  %v8704_v44 = vunpack.i.h.bf16 %v21167_v26  ;;  %v16113_v17 = vsel %vm1122_vm3, %v4979_v49, %v8684_v4  ;;  %v16128_v4 = vpack.i.bf16 %v21175_v43, %v21174_v20  ;;  %v21178_v32 = vld [vmem:[#allocation201_spill] sm:$0xff] }
 0x404   :  { %9116 = vrot.lane.b32.xlu1 %v9115_v25, %s9469_s14  ;;  %21171 = vst [vmem:[#allocation63_spill] sm:$0xff] %v16113_v17  ;;  %v8693_v25 = vunpack.i.l.bf16 %v21164_v63  ;;  %v16123_v15 = vpop.permute.xlu0 %8921  ;;  %v16133_v49 = vsel %vm1122_vm3, %v4983_v10, %v8694_v40  ;;  %v8659_v63 = vunpack.i.h.bf16 %v21178_v32  ;;  %v21179_v17 = vld [vmem:[#allocation160_spill] sm:$0xff]  ;;  %v8713_v20 = vunpack.i.l.bf16 %v21182_v62 }
 0x405   :  { %9201 = vrot.lane.b32.xlu0 %v9200_v53, %s9476_s0  ;;  %v4977_v53 = vsel %vm353_vm0, 0.0, %v8648_v57  ;;  %v16121_v34 = vpop.permute.xlu1 %8836  ;;  %21173 = vst [vmem:[#allocation312_spill] sm:$0xff] %v16123_v15  ;;  %21176 = vst [vmem:[#allocation340_spill] sm:$0xff] %v16128_v4  ;;  %v16137_v57 = vpack.i.bf16 %v21179_v17, %v5367_v0  ;;  %v8703_v15 = vunpack.i.l.bf16 %v21167_v26  ;;  %v21184_v40 = vld [vmem:[#allocation304_spill] sm:$0xff]  ;;  %v21186_v4 = vld [vmem:[#allocation174_spill] sm:$0xff] }
 0x406   :  { %21172 = vst [vmem:[#allocation204_spill] sm:$0xff] %v16121_v34  ;;  %21177 = vst [vmem:[#allocation48_spill] sm:$0xff] %v16133_v49  ;;  %v16140_v34 = vsel %vm1122_vm3, %v4987_v58, %v8704_v44  ;;  %v16149_v10 = vpack.i.bf16 %v21184_v40, %v21183_v12  ;;  %v4978_v0 = vsel %vm353_vm0, %v21186_v4, %v8649_v21  ;;  %v21188_v26 = vld [vmem:[#allocation238_spill] sm:$0xff]  ;;  %v21192_v40 = vld [vmem:[#allocation87_spill] sm:$0xff]  ;;  %v8719_v58 = vunpack.i.h.bf16 %v15761_v35 }
 0x407   :  { %21180 = vst [vmem:[#allocation281_spill] sm:$0xff] %v16137_v57  ;;  %21181 = vst [vmem:[#allocation292_spill] sm:$0xff] %v16140_v34  ;;  %v4990_v17 = vsel %vm1122_vm3, %v4977_v53, %v8569_v2  ;;  %v5368_v57 = vrot.slane %v21188_v26, 7  ;;  %v8714_v34 = vunpack.i.h.bf16 %v21182_v62  ;;  %v4982_v2 = vsel %vm353_vm0, %v20652_v45, %v8659_v63  ;;  %v21193_v53 = vld [vmem:[#allocation322_spill] sm:$0xff] }
 0x408   :  { %9126 = vrot.lane.b32.xlu1 %v9125_v3, %s9475_s29  ;;  %21185 = vst [vmem:[#allocation137_spill] sm:$0xff] %v16149_v10  ;;  %v21189_v3 = vld [vmem:[#allocation311_spill] sm:$0xff]  ;;  %v16162_v12 = vpop.permute.xlu0 %8931  ;;  %v16165_v10 = vpack.i.bf16 %v21192_v40, %v5365_v51  ;;  %v4991_v44 = vsel %vm1122_vm3, %v4978_v0, %v8683_v19  ;;  %v21196_v45 = vpack.i.bf16 %v21148_v7, %v21142_v29  ;;  %v5366_v51 = vrot.slane %v21166_v55, 7  ;;  %v21197_v63 = vld [vmem:[#allocation182_spill] sm:$0xff] }
 0x409   :  { %9211 = vrot.lane.b32.xlu0 %v9210_v41, %s9475_s29  ;;  %v8724_v49 = vunpack.i.h.bf16 %v21189_v3  ;;  %v8669_v41 = vunpack.i.h.bf16 %v15533_v13  ;;  %v16160_v52 = vpop.permute.xlu1 %8846  ;;  %21191 = vst [vmem:[#allocation229_spill] sm:$0xff] %v16162_v12  ;;  %v8658_v12 = vunpack.i.l.bf16 %v21178_v32  ;;  %v8734_v40 = vunpack.i.h.bf16 %v21197_v63  ;;  %v21198_v19 = vld [vmem:[#allocation326_spill] sm:$0xff] }
 0x40a   :  { %21190 = vst [vmem:[#allocation308_spill] sm:$0xff] %v16160_v52  ;;  %v16176_v52 = vsel %vm5003_vm10, %v4990_v17, %v8713_v20  ;;  %v16189_v0 = vpack.i.bf16 %v21198_v19, %v5368_v57  ;;  %v4995_v20 = vsel %vm1122_vm3, %v4982_v2, %v8693_v25  ;;  %v21199_v17 = vld [vmem:[#allocation111_spill] sm:$0xff]  ;;  %v16207_v19 = vsel %vm5003_vm10, %v4991_v44, %v8714_v34  ;;  %v21203_v32 = vld [vmem:[#allocation210_spill] sm:$0xff]  ;;  %v21207_v44 = vld [vmem:[#allocation132_spill] sm:$0xff] }
 0x40b   :  { %21195 = vst [vmem:[#allocation88_spill] sm:$0xff] %v16176_v52  ;;  %v4986_v21 = vsel %vm353_vm0, %v21157_v18, %v8669_v41  ;;  %v16204_v57 = vsel %vm1138_vm8, %v16176_v52, %v8609_v24  ;;  %v4719_v25 = vrot.slane %v16033_v28, 1  ;;  %v16211_v2 = vrot.slane %v16036_v9, 1  ;;  %v21206_v24 = vld [vmem:[#allocation343_spill] sm:$0xff] }
 0x40c   :  { %9136 = vrot.lane.b32.xlu1 %v16060_v1, %s9472_s16  ;;  %v16200_v43 = vpop.permute.xlu0 %8941  ;;  %21201 = vst [vmem:[#allocation131_spill] sm:$0xff] %v16204_v57  ;;  %v4981_v41 = vsel %vm353_vm0, %v21203_v32, %v8658_v12  ;;  %v21204_v4 = vpack.i.bf16 %v21150_v46, %v21126_v8  ;;  %v21205_v34 = vpack.i.bf16 %v21153_v6, %v21152_v60  ;;  %v21208_v52 = vld [vmem:[#allocation135_spill] sm:$0xff]  ;;  %v8679_v6 = vunpack.i.h.bf16 %v15577_v39  ;;  %v21216_v60 = vld [vmem:[#allocation240_spill] sm:$0xff] }
 0x40d   :  { %9221 = vrot.lane.b32.xlu0 %v21196_v45, %s9472_s16  ;;  %v8668_v45 = vunpack.i.l.bf16 %v15533_v13  ;;  %v16198_v62 = vpop.permute.xlu1 %8856  ;;  %21202 = vst [vmem:[#allocation43_spill] sm:$0xff] %v16211_v2  ;;  %v4999_v12 = vsel %vm1122_vm3, %v4986_v21, %v8703_v15  ;;  %v8689_v13 = vunpack.i.h.bf16 %v15621_v37  ;;  %v16233_v46 = vsel %vm5003_vm10, %v4995_v20, %v8724_v49  ;;  %v21221_v32 = vld [vmem:[#allocation75_spill] sm:$0xff] }
 0x40e   :  { %21200 = vst [vmem:[#allocation345_spill] sm:$0xff] %v16198_v62  ;;  %v16227_v62 = vpack.i.bf16 %v21208_v52, %v5366_v51  ;;  %21210 = vst [vmem:[#allocation202_spill] sm:$0xff] %v16233_v46  ;;  %v21212_v52 = vld [vmem:[#allocation295_spill] sm:$0xff]  ;;  %v21213_v51 = vld [vmem:[#allocation268_spill] sm:$0xff]  ;;  %v8688_v49 = vunpack.i.l.bf16 %v15621_v37  ;;  %v16256_v39 = vsel %vm5003_vm10, %v4999_v12, %v8734_v40  ;;  %v21218_v21 = vpack.i.bf16 %v21155_v61, %v21154_v56 }
 0x40f   :  { %v4985_v8 = vsel %vm353_vm0, %v21142_v29, %v8668_v45  ;;  %v16252_v29 = vsel %vm724_vm5, %v4719_v25, %v16211_v2  ;;  %v8698_v45 = vunpack.i.l.bf16 %v15667_v23  ;;  %21217 = vst [vmem:[#allocation199_spill] sm:$0xff] %v16256_v39  ;;  %v4994_v2 = vsel %vm1122_vm3, %v4981_v41, %v8689_v13  ;;  %v21222_v40 = vld [vmem:[#allocation74_spill] sm:$0xff]  ;;  %v21246_v25 = vld [vmem:[#allocation27_spill] sm:$0xff] }
 0x410   :  { %9146 = vrot.lane.b32.xlu1 %v21204_v4, %s9470_s15  ;;  %21209 = vst [vmem:[#allocation171_spill] sm:$0xff] %v16227_v62  ;;  %v4596_v12 = vrot.slane %v21222_v40, 3  ;;  %v16272_v39 = vrot.slane %v21216_v60, 3  ;;  %v4993_v13 = vsel %vm1122_vm3, %v16084_v30, %v8688_v49  ;;  %v21231_v30 = vunpack.i.l.bf16 %v21189_v3 }
 0x411   :  { %9231 = vrot.lane.b32.xlu0 %v21205_v34, %s9474_s18  ;;  %v16238_v4 = vpop.permute.xlu1 %8866  ;;  %v16240_v34 = vpop.permute.xlu0 %8951  ;;  %v4997_v15 = vsel %vm1122_vm3, %v16097_v48, %v8698_v45  ;;  %v8718_v45 = vunpack.i.l.bf16 %v15761_v35  ;;  %v21240_v3 = vpack.i.bf16 %v16069_v27, %v21103_v11  ;;  %v8729_v41 = vunpack.i.h.bf16 %v21246_v25  ;;  %v21253_v11 = vld [vmem:[#allocation63_spill] sm:$0xff] }
 0x412   :  { %21211 = vst [vmem:[#allocation144_spill] sm:$0xff] %v16238_v4  ;;  %v8699_v4 = vunpack.i.h.bf16 %v15667_v23  ;;  %21223 = vst [vmem:[#allocation172_spill] sm:$0xff] %v16272_v39  ;;  %v21230_v23 = vpack.i.bf16 %v21158_v54, %v21157_v18  ;;  %v16305_v49 = vsel %vm5003_vm10, %v4994_v2, %v21231_v30  ;;  %v8728_v35 = vunpack.i.l.bf16 %v21246_v25 }
 0x413   :  { %21232 = vst [vmem:[#allocation33_spill] sm:$0xff] %v16305_v49  ;;  %v21251_v27 = vunpack.i.l.bf16 %v21197_v63  ;;  %v16375_v25 = vsel %vm5003_vm10, %v4993_v13, %v8719_v58  ;;  %v21256_v63 = vld [vmem:[#allocation129_spill] sm:$0xff]  ;;  %v16399_v56 = vrot.slane %v16036_v9, 3  ;;  %v21307_v37 = vunpack.i.h.bf16 %v15711_v31 }
 0x414   :  { %9156 = vrot.lane.b32.xlu1 %v16060_v1, %s9476_s0  ;;  %v16276_v1 = vsel %vm353_vm0, %v21078_v22, %v8679_v6  ;;  %v21229_v6 = vld [vmem:[#allocation143_spill] sm:$0xff]  ;;  %v4998_v48 = vsel %vm1122_vm3, %v4985_v8, %v8699_v4  ;;  %v5764_v8 = vrot.slane %v21115_v47, 1  ;;  %v5765_v4 = vrot.slane %v21101_v59, 1 }
 0x415   :  { %9241 = vrot.lane.b32.xlu0 %v21218_v21, %s9475_s29  ;;  %21224 = vst [vmem:[#allocation271_spill] sm:$0xff] %v16276_v1  ;;  %v16278_v21 = vpop.permute.xlu1 %8876  ;;  %v16280_v61 = vpop.permute.xlu0 %8961  ;;  %v5758_v20 = vrot.slane %v21229_v6, 1  ;;  %v21241_v59 = vpack.i.bf16 %v21169_v16, %v21168_v50  ;;  %v4773_v47 = vrot.slane %v16033_v28, 2  ;;  %21261 = vst [vmem:[#allocation205_spill] sm:$0xff] %v16399_v56  ;;  %v4881_v56 = vrot.slane %v16033_v28, 4 }
 0x416   :  { %21225 = vst [vmem:[#allocation280_spill] sm:$0xff] %v16278_v21  ;;  %v5759_v21 = vrot.slane %v20966_v42, 1 }
 0x418   :  { %9166 = vrot.lane.b32.xlu1 %v16014_v33, %s9472_s16  ;;  %v16314_v33 = vsel %vm1904_vm6, %v4596_v12, %v16272_v39  ;;  %v16329_v12 = vsel %vm724_vm5, %v5758_v20, %v5759_v21  ;;  %v4774_v20 = vrot.slane %v16036_v9, 2  ;;  %v21243_v21 = vunpack.i.h.bf16 %v15527_v5 }
 0x419   :  { %9251 = vrot.lane.b32.xlu0 %v21230_v23, %s9472_s16  ;;  %21235 = vst [vmem:[#allocation245_spill] sm:$0xff] %v16314_v33  ;;  %v16316_v6 = vpop.permute.xlu1 %8886  ;;  %v16318_v23 = vpop.permute.xlu0 %8971  ;;  %v21300_v33 = vld [vmem:[#allocation223_spill] sm:$0xff] }
 0x41a   :  { %21236 = vst [vmem:[#allocation98_spill] sm:$0xff] %v16316_v6  ;;  %v16349_v42 = vsel %vm1138_vm8, %v16305_v49, %v21243_v21  ;;  %v16363_v21 = vsel %vm724_vm5, %v5764_v8, %v5765_v4  ;;  %v21254_v49 = vld [vmem:[#allocation216_spill] sm:$0xff]  ;;  %v21273_v8 = vunpack.i.h.bf16 %v15658_v36 }
 0x41b   :  { %21244 = vst [vmem:[#allocation307_spill] sm:$0xff] %v16349_v42  ;;  %21250 = vst [vmem:[#allocation203_spill] sm:$0xff] %v16363_v21  ;;  %v16372_v42 = vsel %vm5003_vm10, %v21253_v11, %v8718_v45  ;;  %v21255_v4 = vld [vmem:[#allocation140_spill] sm:$0xff]  ;;  %v21258_v45 = vpack.i.bf16 %v21166_v55, %v21158_v54  ;;  %v16393_v11 = vsel %vm814_vm2, %v4773_v47, %v4774_v20 }
 0x41c   :  { %9176 = vrot.lane.b32.xlu1 %v21240_v3, %s9469_s14  ;;  %v16368_v3 = vsel %vm5003_vm10, %v4998_v48, %v21251_v27  ;;  %v8738_v21 = vunpack.i.l.bf16 %v21255_v4  ;;  %v21257_v48 = vpack.i.bf16 %v21256_v63, %v21078_v22  ;;  %21260 = vst [vmem:[#allocation120_spill] sm:$0xff] %v16393_v11  ;;  %v5011_v27 = vsel %vm5003_vm10, %v4997_v15, %v8729_v41  ;;  %v21262_v63 = vld [vmem:[#allocation48_spill] sm:$0xff] }
 0x41d   :  { %9261 = vrot.lane.b32.xlu0 %v21241_v59, %s9473_s17  ;;  %v21247_v59 = vld [vmem:[#allocation96_spill] sm:$0xff]  ;;  %v16356_v30 = vpop.permute.xlu1 %8896  ;;  %v16358_v39 = vpop.permute.xlu0 %8981  ;;  %21252 = vst [vmem:[#allocation219_spill] sm:$0xff] %v16368_v3  ;;  %v5369_v22 = vrot.slane %v21222_v40, 7  ;;  %v16404_v54 = vsel %vm5003_vm10, %v21262_v63, %v8728_v35  ;;  %v21266_v41 = vunpack.i.l.bf16 %v15527_v5  ;;  %v16424_v4 = vpack.i.bf16 %v4774_v20, %v16393_v11 }
 0x41e   :  { %v8749_v2 = vunpack.i.h.bf16 %v21247_v59  ;;  %21248 = vst [vmem:[#allocation279_spill] sm:$0xff] %v16356_v30  ;;  %v8748_v30 = vunpack.i.l.bf16 %v21247_v59  ;;  %21263 = vst [vmem:[#allocation59_spill] sm:$0xff] %v16404_v54  ;;  %v21267_v63 = vld [vmem:[#allocation248_spill] sm:$0xff] }
 0x41f   :  { %21268 = vst [vmem:[#allocation92_spill] sm:$0xff] %v16424_v4  ;;  %v21269_v3 = vld [vmem:[#allocation292_spill] sm:$0xff]  ;;  %v8759_v5 = vunpack.i.h.bf16 %v21267_v63 }
 0x420   :  { %9186 = vrot.lane.b32.xlu1 %v21257_v48, %s9474_s18  ;;  %v5019_v59 = vsel %vm1138_vm8, %v16372_v42, %v8749_v2  ;;  %v21264_v48 = vld [vmem:[#allocation298_spill] sm:$0xff]  ;;  %v16417_v2 = vsel %vm1138_vm8, %v16375_v25, %v21266_v41  ;;  %v5018_v35 = vsel %vm1138_vm8, %v16207_v19, %v8748_v30  ;;  %v21271_v15 = vld [vmem:[#allocation340_spill] sm:$0xff]  ;;  %v21272_v41 = vld [vmem:[#allocation281_spill] sm:$0xff]  ;;  %v21274_v30 = vunpack.i.l.bf16 %v15572_v38 }
 0x421   :  { %9271 = vrot.lane.b32.xlu0 %v21258_v45, %s9476_s0  ;;  %v16407_v13 = vpop.permute.xlu1 %8906  ;;  %v16409_v47 = vpop.permute.xlu0 %8991  ;;  %v8758_v45 = vunpack.i.l.bf16 %v21267_v63  ;;  %v5034_v19 = vsel %vm5030_vm11, %v5019_v59, %v21273_v8  ;;  %v21276_v11 = vld [vmem:[#allocation196_spill] sm:$0xff]  ;;  %v21283_v4 = vunpack.i.l.bf16 %v21264_v48  ;;  %v21285_v63 = vld [vmem:[#allocation139_spill] sm:$0xff]  ;;  %v21286_v38 = vld [vmem:[#allocation329_spill] sm:$0xff] }
 0x422   :  { %21265 = vst [vmem:[#allocation255_spill] sm:$0xff] %v16407_v13  ;;  %v16428_v13 = vsel %vm5003_vm10, %v21269_v3, %v8738_v21  ;;  %v16441_v20 = vsel %vm1138_vm8, %v5011_v27, %v21274_v30  ;;  %v21281_v27 = vunpack.i.l.bf16 %v15658_v36  ;;  %v21288_v21 = vld [vmem:[#allocation278_spill] sm:$0xff] }
 0x423   :  { %21270 = vst [vmem:[#allocation163_spill] sm:$0xff] %v16428_v13  ;;  %21275 = vst [vmem:[#allocation251_spill] sm:$0xff] %v16441_v20  ;;  %v16468_v58 = vsel %vm1154_vm9, %v5034_v19, %v21283_v4  ;;  %v16476_v3 = vunpack.i.l.bf16 %v21288_v21  ;;  %v21291_v4 = vld [vmem:[#allocation342_spill] sm:$0xff] }
 0x424   :  { %9196 = vrot.lane.b32.xlu1 %v21271_v15, %s9473_s17  ;;  %v21277_v15 = vld [vmem:[#allocation327_spill] sm:$0xff]  ;;  %v16459_v30 = vsel %vm5030_vm11, %v5018_v35, %v21281_v27  ;;  %21284 = vst [vmem:[#allocation273_spill] sm:$0xff] %v16468_v58  ;;  %v5023_v35 = vsel %vm1138_vm8, %v16404_v54, %v8759_v5  ;;  %v21287_v27 = vld [vmem:[#allocation177_spill] sm:$0xff]  ;;  %v21292_v19 = vpack.i.bf16 %v21169_v16, %v21291_v4  ;;  %v4882_v54 = vrot.slane %v16036_v9, 4  ;;  %v21297_v4 = vld [vmem:[#allocation264_spill] sm:$0xff] }
 0x425   :  { %9281 = vrot.lane.b32.xlu0 %v21272_v41, %s9470_s15  ;;  %v16448_v13 = vpack.i.bf16 %v21277_v15, %v5369_v22  ;;  %v16452_v8 = vpop.permute.xlu1 %8916  ;;  %v16454_v59 = vpop.permute.xlu0 %9001  ;;  %v5022_v22 = vsel %vm1138_vm8, %v16233_v46, %v8758_v45  ;;  %v5771_v41 = vrot.slane %v21286_v38, 1  ;;  %21289 = vst [vmem:[#allocation221_spill] sm:$0xff] %v16476_v3  ;;  %v21290_v45 = vld [vmem:[#allocation137_spill] sm:$0xff]  ;;  %v16490_v5 = vunpack.i.l.bf16 %v21287_v27 }
 0x426   :  { %21280 = vst [vmem:[#allocation247_spill] sm:$0xff] %v16452_v8  ;;  %v6987_v15 = vpop.f32.mrb[0].mxu1  ;;  %v5770_v8 = vrot.slane %v21285_v63, 1  ;;  %v21293_v63 = vrot.slane %v21216_v60, 2  ;;  %v8943_v58 = vunpack.i.l.bf16 %v16200_v43  ;;  %v5038_v46 = vsel %vm5030_vm11, %v5023_v35, %v21307_v37 }
 0x427   :  { %21278 = vst [vmem:[#allocation60_spill] sm:$0xff] %v16448_v13  ;;  %v6988_v13 = vpop.f32.mrb[1].mxu1  ;;  %21295 = vst [vmem:[#allocation212_spill] sm:$0xff] %v16490_v5 }
 0x428   :  { %9206 = vrot.lane.b32.xlu1 %v21290_v45, %s9474_s18  ;;  %v16487_v38 = vpack.i.bf16 %v21222_v40, %v21293_v63  ;;  %v6989_v20 = vadd.f32 %v6988_v13, %v6987_v15  ;;  %v8779_v45 = vunpack.i.h.bf16 %v21288_v21  ;;  %v21298_v63 = vld [vmem:[#allocation152_spill] sm:$0xff]  ;;  %v6990_v15 = vpop.f32.mrb[2].mxu1  ;;  %v16507_v9 = vsel %vm724_vm5, %v5770_v8, %v5771_v41  ;;  %v21302_v21 = vld [vmem:[#allocation159_spill] sm:$0xff] }
 0x429   :  { %9291 = vrot.lane.b32.xlu0 %v21292_v19, %s9469_s14  ;;  %v16496_v62 = vpop.permute.xlu1 %8926  ;;  %v16498_v16 = vpop.permute.xlu0 %9011  ;;  %v5776_v19 = vrot.slane %v21297_v4, 1  ;;  %v5777_v40 = vrot.slane %v21298_v63, 1  ;;  %v21303_v63 = vpack.i.bf16 %v21165_v14, %v21193_v53 }
 0x42a   :  { %21294 = vst [vmem:[#allocation346_spill] sm:$0xff] %v16487_v38  ;;  %21296 = vst [vmem:[#allocation320_spill] sm:$0xff] %v16498_v16  ;;  %v21299_v38 = vld [vmem:[#allocation164_spill] sm:$0xff]  ;;  %v16504_v13 = vadd.f32 %v6989_v20, %v21300_v33  ;;  %v6991_v16 = vpop.f32.mrb[3].mxu1  ;;  %v5031_v33 = vsel %vm5030_vm11, %v16204_v57, %v16476_v3  ;;  %v21304_v20 = vunpack.i.l.bf16 %v15711_v31  ;;  %v8928_v8 = vunpack.i.l.bf16 %v16496_v62 }
 0x42b   :  { %v6992_v55 = vadd.f32 %v6991_v16, %v6990_v15  ;;  %v16543_v16 = vsel %vm724_vm5, %v5776_v19, %v5777_v40  ;;  %v21310_v15 = vld [vmem:[#allocation220_spill] sm:$0xff]  ;;  %v6993_v35 = vpop.f32.mrb[4].mxu1 }
 0x42c   :  { %21301 = vst [vmem:[#allocation267_spill] sm:$0xff] %v16504_v13  ;;  %9216 = vrot.lane.b32.xlu1 %v16165_v10, %s9470_s15  ;;  %v16523_v41 = vsel %vm5030_vm11, %v5022_v22, %v21304_v20  ;;  %v16527_v10 = vsel %vm1982_vm7, %v4881_v56, %v4882_v54  ;;  %v16540_v22 = vsel %vm5030_vm11, %v16204_v57, %v8779_v45  ;;  %21309 = vst [vmem:[#allocation306_spill] sm:$0xff] %v16543_v16  ;;  %v21316_v57 = vld [vmem:[#allocation316_spill] sm:$0xff] }
 0x42d   :  { %9301 = vrot.lane.b32.xlu0 %v21303_v63, %s9476_s0  ;;  %21305 = vst [vmem:[#allocation258_spill] sm:$0xff] %v16523_v41  ;;  %21306 = vst [vmem:[#allocation79_spill] sm:$0xff] %v16527_v10  ;;  %v21308_v63 = vld [vmem:[#allocation49_spill] sm:$0xff]  ;;  %v16534_v4 = vpop.permute.xlu1 %8936  ;;  %v16536_v3 = vpop.permute.xlu0 %9021  ;;  %v5370_v56 = vrot.slane %v16033_v28, 7  ;;  %v16548_v37 = vadd.f32 %v21310_v15, %v6992_v55  ;;  %v8953_v16 = vunpack.i.l.bf16 %v16240_v34 }
 0x42e   :  { %v5542_v13 = vsel %vm353_vm0, %v21308_v63, %v8943_v58  ;;  %v8939_v54 = vunpack.i.h.bf16 %v16534_v4  ;;  %v21312_v58 = vld [vmem:[#allocation276_spill] sm:$0xff]  ;;  %v21313_v63 = vunpack.i.l.bf16 %v21299_v38  ;;  %v21315_v10 = vld [vmem:[#allocation297_spill] sm:$0xff]  ;;  %v6994_v15 = vpop.f32.mrb[5].mxu1 }
 0x42f   :  { %21311 = vst [vmem:[#allocation25_spill] sm:$0xff] %v16548_v37  ;;  %v5046_v20 = vsel %vm1154_vm9, %v5031_v33, %v21312_v58  ;;  %v21317_v55 = vpack.i.bf16 %v21315_v10, %v21316_v57  ;;  %v21318_v33 = vunpack.i.l.bf16 %v21276_v11  ;;  %v6995_v41 = vadd.f32 %v6994_v15, %v6993_v35  ;;  %v21324_v35 = vld [vmem:[#allocation246_spill] sm:$0xff]  ;;  %v6996_v57 = vpop.f32.mrb[6].mxu1 }
 0x430   :  { %v5035_v45 = vsel %vm5030_vm11, %v16417_v2, %v21313_v63  ;;  %v5092_v63 = vsel %vm1122_vm3, %v16276_v1, %v8928_v8  ;;  %v5561_v19 = vsel %vm1122_vm3, %v5542_v13, %v8939_v54  ;;  %v16587_v2 = vpack.i.bf16 %v21221_v32, %v5370_v56  ;;  %v21326_v1 = vld [vmem:[#allocation130_spill] sm:$0xff] }
 0x431   :  { %9226 = vrot.lane.b32.xlu1 %v21317_v55, %s9469_s14  ;;  %9311 = vrot.lane.b32.xlu0 %v16189_v0, %s9470_s15  ;;  %v16568_v58 = vsel %vm1154_vm9, %v5038_v46, %v21318_v33  ;;  %v8947_v10 = vpop.permute.xlu1 %8946  ;;  %v16575_v55 = vpop.permute.xlu0 %9031  ;;  %v16579_v0 = vsel %vm5061_vm12, %v5046_v20, %v16490_v5  ;;  %v21322_v46 = vunpack.i.h.bf16 %v21264_v48  ;;  %v16591_v15 = vadd.f32 %v6995_v41, %v21324_v35  ;;  %v21330_v35 = vld [vmem:[#allocation277_spill] sm:$0xff] }
 0x432   :  { %21319 = vst [vmem:[#allocation95_spill] sm:$0xff] %v16568_v58  ;;  %21321 = vst [vmem:[#allocation253_spill] sm:$0xff] %v16579_v0  ;;  %v8949_v8 = vunpack.i.h.bf16 %v8947_v10  ;;  %v8948_v54 = vunpack.i.l.bf16 %v8947_v10  ;;  %v8893_v58 = vunpack.i.l.bf16 %v21326_v1  ;;  %v8963_v20 = vunpack.i.l.bf16 %v16280_v61  ;;  %v6997_v10 = vpop.f32.mrb[7].mxu1 }
 0x433   :  { %v16584_v33 = vsel %vm1154_vm9, %v5035_v45, %v21322_v46  ;;  %21323 = vst [vmem:[#allocation233_spill] sm:$0xff] %v16587_v2  ;;  %21325 = vst [vmem:[#allocation66_spill] sm:$0xff] %v16591_v15  ;;  %v21327_v5 = vunpack.i.h.bf16 %v21199_v17  ;;  %v5580_v46 = vsel %vm5003_vm10, %v5561_v19, %v8953_v16  ;;  %v21328_v56 = vpack.i.bf16 %v21157_v18, %v21148_v7  ;;  %v21331_v19 = vld [vmem:[#allocation345_spill] sm:$0xff] }
 0x434   :  { %v21329_v41 = vpack.i.bf16 %v21207_v44, %v21206_v24  ;;  %v8818_v13 = vunpack.i.l.bf16 %v21330_v35  ;;  %v5600_v16 = vsel %vm1138_vm8, %v5580_v46, %v8949_v8  ;;  %v8983_v18 = vunpack.i.l.bf16 %v16358_v39  ;;  %v6999_v46 = vpop.f32.mrb[8].mxu1 }
 0x435   :  { %v5108_v45 = vsel %vm5003_vm10, %v5092_v63, %v21327_v5  ;;  %9236 = vrot.lane.b32.xlu1 %v21328_v56, %s9476_s0  ;;  %v5599_v5 = vsel %vm1138_vm8, %v16372_v42, %v8949_v8  ;;  %v21332_v7 = vunpack.i.h.bf16 %v15658_v36  ;;  %v8957_v17 = vpop.permute.xlu1 %8956  ;;  %v6998_v24 = vadd.f32 %v6997_v10, %v6996_v57  ;;  %v21334_v36 = vld [vmem:[#allocation244_spill] sm:$0xff]  ;;  %v21336_v57 = vld [vmem:[#allocation171_spill] sm:$0xff] }
 0x436   :  { %9321 = vrot.lane.b32.xlu0 %v21329_v41, %s9469_s14  ;;  %v5124_v15 = vsel %vm1138_vm8, %v5108_v45, %v8948_v54  ;;  %v16617_v41 = vpop.permute.xlu0 %9041  ;;  %v8929_v2 = vunpack.i.h.bf16 %v16496_v62  ;;  %v21333_v54 = vunpack.i.l.bf16 %v21264_v48  ;;  %v8959_v45 = vunpack.i.h.bf16 %v8957_v17 }
 0x437   :  { %v5629_v56 = vsel %vm5030_vm11, %v5599_v5, %v21332_v7  ;;  %v8958_v8 = vunpack.i.l.bf16 %v8957_v17  ;;  %v8889_v63 = vunpack.i.h.bf16 %v16316_v6  ;;  %v5630_v40 = vsel %vm5030_vm11, %v5600_v16, %v8963_v20  ;;  %v7000_v5 = vpop.f32.mrb[9].mxu1 }
 0x438   :  { %v5659_v42 = vsel %vm1154_vm9, %v5629_v56, %v21333_v54  ;;  %v16626_v37 = vadd.f32 %v21334_v36, %v6998_v24  ;;  %v21337_v10 = vunpack.i.h.bf16 %v21254_v49  ;;  %v21338_v17 = vpack.i.bf16 %v21213_v51, %v21212_v52  ;;  %v7087_v56 = vpop.f32.mrb[32].mxu0  ;;  %v21340_v36 = vld [vmem:[#allocation287_spill] sm:$0xff] }
 0x439   :  { %9246 = vrot.lane.b32.xlu1 %v21336_v57, %s9470_s15  ;;  %v5660_v7 = vsel %vm1154_vm9, %v5630_v40, %v8959_v45  ;;  %v7001_v16 = vadd.f32 %v7000_v5, %v6999_v46  ;;  %v21339_v24 = vunpack.i.h.bf16 %v21331_v19  ;;  %v5078_v57 = vsel %vm353_vm0, %v21340_v36, %v8893_v58  ;;  %v7088_v6 = vpop.f32.mrb[33].mxu0  ;;  %v16646_v51 = vpop.permute.xlu1 %8966 }
 0x43a   :  { %21335 = vst [vmem:[#allocation348_spill] sm:$0xff] %v16626_v37  ;;  %v5140_v62 = vsel %vm5030_vm11, %v5124_v15, %v21337_v10  ;;  %9331 = vrot.lane.b32.xlu0 %v21338_v17, %s9474_s18  ;;  %v8954_v15 = vunpack.i.h.bf16 %v16240_v34  ;;  %v5690_v10 = vsel %vm5061_vm12, %v5660_v7, %v8983_v18  ;;  %v8894_v45 = vunpack.i.h.bf16 %v21326_v1  ;;  %v16656_v58 = vpop.permute.xlu0 %9051  ;;  %v7002_v34 = vpop.f32.mrb[10].mxu1 }
 0x43b   :  { %v5156_v20 = vsel %vm1154_vm9, %v5140_v62, %v8958_v8  ;;  %v5689_v54 = vsel %vm5061_vm12, %v5659_v42, %v21339_v24  ;;  %v5093_v8 = vsel %vm1122_vm3, %v5078_v57, %v8929_v2  ;;  %v16651_v46 = vadd.f32 %v7088_v6, %v7087_v56  ;;  %v21341_v42 = vld [vmem:[#allocation256_spill] sm:$0xff]  ;;  %v7003_v2 = vpop.f32.mrb[11].mxu1  ;;  %v7090_v56 = vpop.f32.mrb[34].mxu0 }
 0x43c   :  { %v5172_v40 = vsel %vm5061_vm12, %v5156_v20, %v8889_v63  ;;  %v16654_v62 = vadd.f32 %v7001_v16, %v21341_v42  ;;  %v8819_v18 = vunpack.i.h.bf16 %v21330_v35  ;;  %v19251_v5 = vunpack.i.h.bf16 %v16318_v23  ;;  %v21342_v63 = vld [vmem:[#allocation317_spill] sm:$0xff]  ;;  %v21344_v16 = vld [vmem:[#allocation178_spill] sm:$0xff]  ;;  %v7091_v42 = vpop.f32.mrb[35].mxu0 }
 0x43d   :  { %5935 = vmatprep.mubr.f32.mxu1 %v5172_v40  ;;  %v21343_v17 = vpack.i.bf16 %v21168_v50, %v21342_v63  ;;  %v5749_v1 = vrot.slane %v5689_v54, 1  ;;  %v5750_v6 = vrot.slane %v5690_v10, 1  ;;  %v8973_v7 = vunpack.i.l.bf16 %v16318_v23  ;;  %v21347_v54 = vld [vmem:[#allocation229_spill] sm:$0xff] }
 0x43e   :  { %5936 = vmatmul.mubr.f32.vlgmr.msra.gmra.mrb[80].mxu1 %v16579_v0  ;;  %v7004_v20 = vadd.f32 %v7003_v2, %v7002_v34  ;;  %v21345_v35 = vpack.i.bf16 %v21216_v60, %v21344_v16  ;;  %v5047_v24 = vsel %vm1154_vm9, %v16540_v22, %v8818_v13  ;;  %v21346_v50 = vunpack.i.l.bf16 %v21302_v21  ;;  %v16681_v34 = vpop.permute.xlu1 %8976  ;;  %v21357_v13 = vld [vmem:[#allocation183_spill] sm:$0xff] }
 0x43f   :  { %9256 = vrot.lane.b32.xlu1 %v21343_v17, %s9469_s14  ;;  %v8933_v57 = vunpack.i.l.bf16 %v21347_v54  ;;  %v8944_v10 = vunpack.i.h.bf16 %v16200_v43  ;;  %v5109_v40 = vsel %vm5003_vm10, %v5093_v8, %v8954_v15  ;;  %v5751_v63 = vsel %vm724_vm5, %v5749_v1, %v5750_v6  ;;  %v21348_v17 = vld [vmem:[#allocation117_spill] sm:$0xff]  ;;  %v7005_v43 = vpop.f32.mrb[12].mxu1  ;;  %v21351_v1 = vld [vmem:[#allocation72_spill] sm:$0xff]  ;;  %v21352_v6 = vld [vmem:[#allocation158_spill] sm:$0xff] }
 0x440   :  { %9341 = vrot.lane.b32.xlu0 %v21345_v35, %s9475_s29  ;;  %v16676_v36 = vsel %vm5061_vm12, %v16584_v33, %v21346_v50  ;;  %v5079_v22 = vsel %vm353_vm0, %v21348_v17, %v8894_v45  ;;  %v16687_v2 = vadd.f32 %v7091_v42, %v7090_v56  ;;  %6081 = vmatmul.mubr.f32.vlgmr.msra.gmra.mrb[96].mxu0 %v5751_v63  ;;  %v21349_v33 = vld [vmem:[#allocation254_spill] sm:$0xff]  ;;  %v16692_v50 = vpop.permute.xlu0 %9061  ;;  %v8964_v15 = vunpack.i.h.bf16 %v16280_v61  ;;  %v7006_v42 = vpop.f32.mrb[13].mxu1 }
 0x441   :  { %v16690_v35 = vadd.f32 %v21349_v33, %v7004_v20  ;;  %v5601_v8 = vsel %vm1138_vm8, %v16375_v25, %v19251_v5  ;;  %v8968_v45 = vunpack.i.l.bf16 %v16646_v51  ;;  %v21353_v56 = vpack.i.bf16 %v21351_v1, %v21352_v6  ;;  %6920 = vmatprep.mubr.msk.f32.mxu0 %vm353_vm0, %v16329_v12  ;;  %v7093_v63 = vpop.f32.mrb[36].mxu0  ;;  %v21356_v12 = vld [vmem:[#allocation85_spill] sm:$0xff]  ;;  %v21385_v6 = vld [vmem:[#allocation114_spill] sm:$0xff] }
 0x442   :  { %v16708_v20 = vsel %vm1154_vm9, %v16459_v30, %v8819_v18  ;;  %v8978_v61 = vunpack.i.l.bf16 %v16681_v34  ;;  %v7007_v17 = vadd.f32 %v7006_v42, %v7005_v43  ;;  %v21354_v25 = vpack.i.bf16 %v21221_v32, %v21188_v26  ;;  %v7094_v42 = vpop.f32.mrb[37].mxu0  ;;  %v8987_v60 = vpop.permute.xlu1 %8986 }
 0x443   :  { %21350 = vst [vmem:[#allocation191_spill] sm:$0xff] %v16690_v35  ;;  %9266 = vrot.lane.b32.xlu1 %v21353_v56, %s9474_s18  ;;  %v5125_v33 = vsel %vm1138_vm8, %v5109_v40, %v8973_v7  ;;  %v21355_v1 = vunpack.i.h.bf16 %v21287_v27  ;;  %v5094_v30 = vsel %vm1122_vm3, %v5079_v22, %v8933_v57  ;;  %v5543_v43 = vsel %vm353_vm0, %v21357_v13, %v8944_v10  ;;  %v21360_v27 = vld [vmem:[#allocation33_spill] sm:$0xff]  ;;  %v7008_v22 = vpop.f32.mrb[14].mxu1  ;;  %v21361_v13 = vld [vmem:[#allocation263_spill] sm:$0xff]  ;;  %v7096_v52 = vpop.f32.mrb[38].mxu0  ;;  %v21372_v35 = vld [vmem:[#allocation320_spill] sm:$0xff] }
 0x444   :  { %9351 = vrot.lane.b32.xlu0 %v21354_v25, %s9472_s16  ;;  %v21358_v32 = vunpack.i.l.bf16 %v21299_v38  ;;  %v21359_v7 = vunpack.i.h.bf16 %v16454_v59  ;;  %v16731_v40 = vadd.f32 %v7094_v42, %v7093_v63  ;;  %v16733_v57 = vpop.permute.xlu0 %9071  ;;  %v8984_v18 = vunpack.i.h.bf16 %v16358_v39  ;;  %v7009_v63 = vpop.f32.mrb[15].mxu1 }
 0x445   :  { %v5063_v56 = vsel %vm5061_vm12, %v5047_v24, %v21355_v1  ;;  %v8988_v1 = vunpack.i.l.bf16 %v8987_v60  ;;  %v5562_v10 = vsel %vm1122_vm3, %v5543_v43, %v8968_v45  ;;  %v16738_v5 = vadd.f32 %v7007_v17, %v21361_v13  ;;  %v21365_v45 = vld [vmem:[#allocation190_spill] sm:$0xff]  ;;  %v21367_v43 = vld [vmem:[#allocation279_spill] sm:$0xff] }
 0x446   :  { %v5631_v25 = vsel %vm5030_vm11, %v5601_v8, %v21358_v32  ;;  %v5603_v24 = vsel %vm1138_vm8, %v21360_v27, %v21359_v7  ;;  %v21362_v8 = vld [vmem:[#allocation237_spill] sm:$0xff]  ;;  %v5141_v7 = vsel %vm5030_vm11, %v5125_v33, %v8964_v15  ;;  %v8993_v42 = vunpack.i.l.bf16 %v16409_v47  ;;  %v7097_v33 = vpop.f32.mrb[39].mxu0 }
 0x447   :  { %v21363_v32 = vld [vmem:[#allocation293_spill] sm:$0xff]  ;;  %v5581_v27 = vsel %vm5003_vm10, %v5562_v10, %v8978_v61  ;;  %v5157_v39 = vsel %vm1154_vm9, %v5141_v7, %v8988_v1  ;;  %v7010_v0 = vadd.f32 %v7009_v63, %v7008_v22  ;;  %v21366_v17 = vpack.i.bf16 %v16252_v29, %v21365_v45 }
 0x448   :  { %v21364_v49 = vpack.i.bf16 %v21362_v8, %v21363_v32  ;;  %v16756_v8 = vpop.permute.xlu1 %8996  ;;  %v5173_v61 = vsel %vm5061_vm12, %v5157_v39, %v8984_v18  ;;  %v21369_v10 = vunpack.i.h.bf16 %v21264_v48  ;;  %v8979_v22 = vunpack.i.h.bf16 %v16681_v34 }
 0x449   :  { %9361 = vrot.lane.b32.xlu0 %v21366_v17, %s9473_s17  ;;  %v16763_v7 = vadd.f32 %v7097_v33, %v7096_v52  ;;  %v8998_v63 = vunpack.i.l.bf16 %v16756_v8  ;;  %5940 = vmatprep.mubr.f32.mxu1 %v5173_v61  ;;  %v21370_v17 = vld [vmem:[#allocation261_spill] sm:$0xff]  ;;  %v9013_v37 = vunpack.i.l.bf16 %v21372_v35  ;;  %v8969_v18 = vunpack.i.h.bf16 %v16646_v51  ;;  %v21374_v52 = vld [vmem:[#allocation234_spill] sm:$0xff] }
 0x44a   :  { %9276 = vrot.lane.b32.xlu1 %v21364_v49, %s9475_s29  ;;  %v21368_v49 = vunpack.i.h.bf16 %v21299_v38  ;;  %v5661_v1 = vsel %vm1154_vm9, %v5631_v25, %v21369_v10  ;;  %v16767_v13 = vadd.f32 %v21370_v17, %v7010_v0  ;;  %v8989_v48 = vunpack.i.h.bf16 %v8987_v60  ;;  %5941 = vmatmul.mubr.f32.gmra.mrb[82].mxu1 %v5063_v56  ;;  %v21376_v33 = vld [vmem:[#allocation214_spill] sm:$0xff]  ;;  %v7099_v17 = vpop.f32.mrb[40].mxu0  ;;  %v21377_v60 = vld [vmem:[#allocation172_spill] sm:$0xff]  ;;  %v21378_v51 = vld [vmem:[#allocation245_spill] sm:$0xff] }
 0x44b   :  { %v21373_v25 = vunpack.i.h.bf16 %v16318_v23  ;;  %v21375_v39 = vpack.i.bf16 %v21193_v53, %v21374_v52  ;;  %v5544_v61 = vsel %vm353_vm0, %v21376_v33, %v8993_v42  ;;  %v21379_v23 = vpack.i.bf16 %v21377_v60, %v21378_v51  ;;  %v7100_v52 = vpop.f32.mrb[41].mxu0 }
 0x44c   :  { %v5633_v15 = vsel %vm5030_vm11, %v5603_v24, %v21368_v49  ;;  %21371 = vst [vmem:[#allocation285_spill] sm:$0xff] %v16767_v13  ;;  %v16769_v24 = vpop.permute.xlu0 %9081  ;;  %v7011_v49 = vpop.f32.mrb[16].mxu1  ;;  %v9003_v53 = vunpack.i.l.bf16 %v16454_v59  ;;  %v9023_v56 = vunpack.i.l.bf16 %v16536_v3  ;;  %v5563_v16 = vsel %vm1122_vm3, %v5544_v61, %v8969_v18  ;;  %v21387_v18 = vld [vmem:[#allocation303_spill] sm:$0xff] }
 0x44d   :  { %v5602_v34 = vsel %vm1138_vm8, %v5581_v27, %v21373_v25  ;;  %v7012_v0 = vpop.f32.mrb[17].mxu1  ;;  %9371 = vrot.lane.b32.xlu0 %v21379_v23, %s9474_s18  ;;  %v21380_v27 = vunpack.i.l.bf16 %v21302_v21  ;;  %v9043_v61 = vunpack.i.l.bf16 %v16617_v41 }
 0x44e   :  { %9286 = vrot.lane.b32.xlu1 %v21375_v39, %s9472_s16  ;;  %v5632_v10 = vsel %vm5030_vm11, %v5602_v34, %v8998_v63  ;;  %v7013_v13 = vadd.f32 %v7012_v0, %v7011_v49  ;;  %v16792_v39 = vpop.permute.xlu1 %9006  ;;  %v21381_v63 = vunpack.i.l.bf16 %v21356_v12  ;;  %v5110_v34 = vsel %vm5003_vm10, %v5094_v30, %v8979_v22  ;;  %v7014_v60 = vpop.f32.mrb[18].mxu1 }
 0x44f   :  { %v5691_v25 = vsel %vm5061_vm12, %v5661_v1, %v21380_v27  ;;  %v5662_v42 = vsel %vm1154_vm9, %v5632_v10, %v8989_v48  ;;  %v16799_v0 = vadd.f32 %v7100_v52, %v7099_v17  ;;  %v9008_v33 = vunpack.i.l.bf16 %v16792_v39  ;;  %v21383_v1 = vld [vmem:[#allocation184_spill] sm:$0xff]  ;;  %v21384_v10 = vld [vmem:[#allocation31_spill] sm:$0xff]  ;;  %v7015_v17 = vpop.f32.mrb[19].mxu1 }
 0x450   :  { %v5663_v49 = vsel %vm1154_vm9, %v5633_v15, %v21381_v63  ;;  %v16803_v23 = vadd.f32 %v7013_v13, %v21383_v1  ;;  %v16805_v27 = vpop.permute.xlu0 %9091  ;;  %v8999_v48 = vunpack.i.h.bf16 %v16756_v8  ;;  %v21386_v15 = vpack.i.bf16 %v21384_v10, %v21385_v6  ;;  %v7102_v63 = vpop.f32.mrb[42].mxu0 }
 0x451   :  { %21382 = vst [vmem:[#allocation106_spill] sm:$0xff] %v16799_v0  ;;  %v5692_v30 = vsel %vm5061_vm12, %v5662_v42, %v9013_v37  ;;  %v5755_v22 = vrot.slane %v5691_v25, 1  ;;  %v9014_v52 = vunpack.i.h.bf16 %v21372_v35  ;;  %v5582_v13 = vsel %vm5003_vm10, %v5563_v16, %v9008_v33  ;;  %v7103_v25 = vpop.f32.mrb[43].mxu0 }
 0x452   :  { %9296 = vrot.lane.b32.xlu1 %v21386_v15, %s9474_s18  ;;  %v5756_v1 = vrot.slane %v5692_v30, 1  ;;  %v7016_v0 = vadd.f32 %v7015_v17, %v7014_v60  ;;  %v21388_v8 = vpack.i.bf16 %v16033_v28, %v21387_v18  ;;  %v21389_v10 = vunpack.i.h.bf16 %v16454_v59  ;;  %v9017_v42 = vpop.permute.xlu1 %9016  ;;  %v7017_v18 = vpop.f32.mrb[20].mxu1 }
 0x453   :  { %v5126_v35 = vsel %vm1138_vm8, %v5110_v34, %v9003_v53  ;;  %v21390_v16 = vunpack.i.h.bf16 %v21302_v21  ;;  %v16828_v60 = vadd.f32 %v7103_v25, %v7102_v63  ;;  %v9019_v15 = vunpack.i.h.bf16 %v9017_v42  ;;  %v21393_v53 = vld [vmem:[#allocation239_spill] sm:$0xff]  ;;  %v21394_v34 = vld [vmem:[#allocation336_spill] sm:$0xff]  ;;  %v7018_v25 = vpop.f32.mrb[21].mxu1 }
 0x454   :  { %9381 = vrot.lane.b32.xlu0 %v21388_v8, %s9475_s29  ;;  %v5604_v37 = vsel %vm1138_vm8, %v5582_v13, %v21389_v10  ;;  %v9018_v30 = vunpack.i.l.bf16 %v9017_v42  ;;  %v16831_v8 = vpop.permute.xlu0 %9101  ;;  %v5757_v13 = vsel %vm724_vm5, %v5755_v22, %v5756_v1  ;;  %v21391_v10 = vld [vmem:[#allocation44_spill] sm:$0xff]  ;;  %v5142_v63 = vsel %vm5030_vm11, %v5126_v35, %v8999_v48  ;;  %v7105_v42 = vpop.f32.mrb[44].mxu0 }
 0x455   :  { %v5693_v33 = vsel %vm5061_vm12, %v5663_v49, %v21390_v16  ;;  %v5634_v17 = vsel %vm5030_vm11, %v5604_v37, %v9023_v56  ;;  %v16836_v6 = vadd.f32 %v21391_v10, %v7016_v0  ;;  %v21395_v49 = vpack.i.bf16 %v21393_v53, %v21394_v34  ;;  %6086 = vmatmul.mubr.f32.gmra.mrb[98].mxu0 %v5757_v13  ;;  %v21396_v0 = vld [vmem:[#allocation325_spill] sm:$0xff] }
 0x456   :  { %v8934_v56 = vunpack.i.h.bf16 %v21347_v54  ;;  %v5664_v37 = vsel %vm1154_vm9, %v5634_v17, %v9019_v15  ;;  %v5158_v16 = vsel %vm1154_vm9, %v5142_v63, %v9018_v30  ;;  %v7019_v22 = vadd.f32 %v7018_v25, %v7017_v18  ;;  %v7106_v54 = vpop.f32.mrb[45].mxu0  ;;  %v16855_v59 = vpop.permute.xlu1 %9026  ;;  %v21400_v17 = vld [vmem:[#allocation203_spill] sm:$0xff]  ;;  %v21402_v63 = vld [vmem:[#allocation188_spill] sm:$0xff] }
 0x457   :  { %21392 = vst [vmem:[#allocation192_spill] sm:$0xff] %v16836_v6  ;;  %9306 = vrot.lane.b32.xlu1 %v21395_v49, %s9475_s29  ;;  %v21397_v1 = vpack.i.bf16 %v16252_v29, %v21396_v0  ;;  %v21398_v10 = vunpack.i.l.bf16 %v21367_v43  ;;  %v21399_v49 = vld [vmem:[#allocation332_spill] sm:$0xff]  ;;  %v9009_v35 = vunpack.i.h.bf16 %v16792_v39  ;;  %v5174_v15 = vsel %vm5061_vm12, %v5158_v16, %v9014_v52  ;;  %6921 = vmatprep.mubr.msk.f32.mxu0 %vm353_vm0, %v21400_v17  ;;  %v7020_v52 = vpop.f32.mrb[22].mxu1  ;;  %v21424_v6 = vld [vmem:[#allocation57_spill] sm:$0xff] }
 0x458   :  { %v5694_v18 = vsel %vm5061_vm12, %v5664_v37, %v9043_v61  ;;  %v16862_v13 = vadd.f32 %v7106_v54, %v7105_v42  ;;  %5945 = vmatprep.mubr.f32.mxu1 %v5174_v15  ;;  %v16865_v25 = vadd.f32 %v7019_v22, %v21402_v63  ;;  %v21403_v39 = vunpack.i.l.bf16 %v21331_v19  ;;  %v21405_v37 = vld [vmem:[#allocation202_spill] sm:$0xff]  ;;  %v7021_v15 = vpop.f32.mrb[23].mxu1  ;;  %v7108_v63 = vpop.f32.mrb[46].mxu0 }
 0x459   :  { %9391 = vrot.lane.b32.xlu0 %v21397_v1, %s9469_s14  ;;  %v5080_v48 = vsel %vm353_vm0, %v21399_v49, %v21398_v10  ;;  %v16871_v1 = vpop.permute.xlu0 %9111  ;;  %v8899_v16 = vunpack.i.h.bf16 %v21367_v43  ;;  %v21404_v61 = vunpack.i.h.bf16 %v16575_v55  ;;  %v21406_v10 = vld [vmem:[#allocation323_spill] sm:$0xff]  ;;  %v5761_v49 = vrot.slane %v5693_v33, 1 }
 0x45a   :  { %21401 = vst [vmem:[#allocation252_spill] sm:$0xff] %v16862_v13  ;;  %v5064_v0 = vsel %vm5061_vm12, %v16708_v20, %v21403_v39  ;;  %v21407_v22 = vpack.i.bf16 %v21406_v10, %v21165_v14  ;;  %v5762_v54 = vrot.slane %v5694_v18, 1  ;;  %v9033_v20 = vunpack.i.l.bf16 %v16575_v55  ;;  %v21408_v39 = vld [vmem:[#allocation318_spill] sm:$0xff] }
 0x45b   :  { %v5605_v42 = vsel %vm1138_vm8, %v21405_v37, %v21404_v61  ;;  %5946 = vmatmul.mubr.f32.gmra.mrb[84].mxu1 %v5064_v0  ;;  %v5095_v17 = vsel %vm1122_vm3, %v5080_v48, %v8934_v56  ;;  %v7022_v43 = vadd.f32 %v7021_v15, %v7020_v52  ;;  %v21409_v30 = vpack.i.bf16 %v21378_v51, %v21408_v39  ;;  %v21411_v37 = vld [vmem:[#allocation273_spill] sm:$0xff]  ;;  %v7109_v56 = vpop.f32.mrb[47].mxu0  ;;  %v9037_v48 = vpop.permute.xlu1 %9036  ;;  %v21412_v15 = vld [vmem:[#allocation144_spill] sm:$0xff] }
 0x45c   :  { %9316 = vrot.lane.b32.xlu1 %v21407_v22, %s9472_s16  ;;  %v21410_v61 = vunpack.i.h.bf16 %v21331_v19  ;;  %v8994_v33 = vunpack.i.h.bf16 %v16409_v47  ;;  %v8938_v18 = vunpack.i.l.bf16 %v16534_v4  ;;  %v5111_v0 = vsel %vm5003_vm10, %v5095_v17, %v9009_v35  ;;  %v7023_v4 = vpop.f32.mrb[24].mxu1  ;;  %v21417_v35 = vld [vmem:[#allocation143_spill] sm:$0xff] }
 0x45d   :  { %9396 = vrot.lane.b32.xlu0 %v21409_v30, %s9475_s29  ;;  %v5763_v52 = vsel %vm724_vm5, %v5761_v49, %v5762_v54  ;;  %v21413_v30 = vunpack.i.l.bf16 %v15711_v31  ;;  %v16902_v39 = vadd.f32 %v7109_v56, %v7108_v63  ;;  %v16907_v47 = vpop.permute.xlu0 %9121  ;;  %v5081_v17 = vsel %vm353_vm0, %v21417_v35, %v8899_v16  ;;  %v7024_v56 = vpop.f32.mrb[25].mxu1  ;;  %v21420_v16 = vld [vmem:[#allocation92_spill] sm:$0xff]  ;;  %v21421_v35 = vld [vmem:[#allocation218_spill] sm:$0xff] }
 0x45e   :  { %v16892_v22 = vsel %vm5061_vm12, %v21411_v37, %v21410_v61  ;;  %6091 = vmatmul.mubr.f32.gmra.mrb[100].mxu0 %v5763_v52  ;;  %v21415_v61 = vld [vmem:[#allocation86_spill] sm:$0xff]  ;;  %v9024_v49 = vunpack.i.h.bf16 %v16536_v3  ;;  %v9028_v53 = vunpack.i.l.bf16 %v16855_v59  ;;  %v9038_v52 = vunpack.i.l.bf16 %v9037_v48 }
 0x45f   :  { %v5635_v19 = vsel %vm5030_vm11, %v5605_v42, %v21413_v30  ;;  %21414 = vst [vmem:[#allocation249_spill] sm:$0xff] %v16902_v39  ;;  %v16905_v37 = vadd.f32 %v21415_v61, %v7022_v43  ;;  %v21418_v42 = vld [vmem:[#allocation302_spill] sm:$0xff]  ;;  %6922 = vmatprep.mubr.msk.f32.mxu0 %vm353_vm0, %v16507_v9  ;;  %v9039_v43 = vunpack.i.h.bf16 %v9037_v48  ;;  %v7111_v30 = vpop.f32.mrb[48].mxu0  ;;  %v7025_v61 = vadd.f32 %v7024_v56, %v7023_v4  ;;  %v9047_v14 = vpop.permute.xlu1 %9046 }
 0x460   :  { %v21419_v63 = vpack.i.bf16 %v21418_v42, %v21207_v44  ;;  %v5127_v3 = vsel %vm1138_vm8, %v5111_v0, %v9033_v20  ;;  %v5545_v54 = vsel %vm353_vm0, %v21421_v35, %v8994_v33  ;;  %v5096_v51 = vsel %vm1122_vm3, %v5081_v17, %v8938_v18  ;;  %v7026_v33 = vpop.f32.mrb[26].mxu1  ;;  %v21426_v17 = vld [vmem:[#allocation59_spill] sm:$0xff] }
 0x461   :  { %21416 = vst [vmem:[#allocation173_spill] sm:$0xff] %v16905_v37  ;;  %9406 = vrot.lane.b32.xlu0 %v21420_v16, %s9472_s16  ;;  %v9044_v44 = vunpack.i.h.bf16 %v16617_v41  ;;  %v21422_v9 = vunpack.i.h.bf16 %v21356_v12  ;;  %v9053_v4 = vunpack.i.l.bf16 %v16656_v58  ;;  %v9048_v37 = vunpack.i.l.bf16 %v9047_v14  ;;  %v16936_v0 = vpop.permute.xlu0 %9131 }
 0x462   :  { %9326 = vrot.lane.b32.xlu1 %v21419_v63, %s9473_s17  ;;  %v7112_v63 = vpop.f32.mrb[49].mxu0  ;;  %v16934_v20 = vadd.f32 %v7025_v61, %v21424_v6  ;;  %v9063_v18 = vunpack.i.l.bf16 %v16692_v50  ;;  %v21425_v41 = vunpack.i.h.bf16 %v16692_v50  ;;  %v5143_v6 = vsel %vm5030_vm11, %v5127_v3, %v9024_v49  ;;  %v7027_v61 = vpop.f32.mrb[27].mxu1 }
 0x463   :  { %v5665_v48 = vsel %vm1154_vm9, %v5635_v19, %v21422_v9  ;;  %v16931_v56 = vadd.f32 %v7112_v63, %v7111_v30  ;;  %v5564_v19 = vsel %vm1122_vm3, %v5545_v54, %v9028_v53  ;;  %v21427_v30 = vpack.i.bf16 %v21188_v26, %v21406_v10 }
 0x464   :  { %v5607_v35 = vsel %vm1138_vm8, %v21426_v17, %v21425_v41  ;;  %v5112_v63 = vsel %vm5003_vm10, %v5096_v51, %v9039_v43  ;;  %v5583_v9 = vsel %vm5003_vm10, %v5564_v19, %v9038_v52  ;;  %v5159_v39 = vsel %vm1154_vm9, %v5143_v6, %v9048_v37  ;;  %v21428_v41 = vld [vmem:[#allocation205_spill] sm:$0xff]  ;;  %v9057_v17 = vpop.permute.xlu1 %9056 }
 0x465   :  { %21423 = vst [vmem:[#allocation109_spill] sm:$0xff] %v16931_v56  ;;  %v7114_v56 = vpop.f32.mrb[50].mxu0  ;;  %v7028_v13 = vadd.f32 %v7027_v61, %v7026_v33  ;;  %v21429_v53 = vpack.i.bf16 %v16252_v29, %v21428_v41  ;;  %v9074_v54 = vunpack.i.h.bf16 %v16733_v57  ;;  %v9073_v10 = vunpack.i.l.bf16 %v16733_v57  ;;  %v21430_v33 = vld [vmem:[#allocation185_spill] sm:$0xff]  ;;  %v16965_v29 = vpop.permute.xlu0 %9141 }
 0x466   :  { %9336 = vrot.lane.b32.xlu1 %v21427_v30, %s9476_s0  ;;  %v9083_v49 = vunpack.i.l.bf16 %v16769_v24  ;;  %v7115_v3 = vpop.f32.mrb[51].mxu0  ;;  %v5175_v51 = vsel %vm5061_vm12, %v5159_v39, %v9044_v44  ;;  %v9059_v52 = vunpack.i.h.bf16 %v9057_v17  ;;  %v9058_v37 = vunpack.i.l.bf16 %v9057_v17  ;;  %v7029_v30 = vpop.f32.mrb[28].mxu1  ;;  %v21433_v39 = vld [vmem:[#allocation60_spill] sm:$0xff] }
 0x467   :  { %9416 = vrot.lane.b32.xlu0 %v21429_v53, %s9474_s18  ;;  %v16960_v43 = vadd.f32 %v7115_v3, %v7114_v56  ;;  %5950 = vmatprep.mubr.f32.mxu1 %v5175_v51  ;;  %v16963_v19 = vadd.f32 %v21430_v33, %v7028_v13  ;;  %v9029_v6 = vunpack.i.h.bf16 %v16855_v59  ;;  %v9049_v57 = vunpack.i.h.bf16 %v9047_v14  ;;  %v7030_v44 = vpop.f32.mrb[29].mxu1  ;;  %v21434_v13 = vld [vmem:[#allocation222_spill] sm:$0xff]  ;;  %v7117_v51 = vpop.f32.mrb[52].mxu0 }
 0x468   :  { %v21432_v61 = vunpack.i.h.bf16 %v16575_v55  ;;  %5951 = vmatmul.mubr.f32.gmra.mrb[86].mxu1 %v16892_v22  ;;  %v5128_v56 = vsel %vm1138_vm8, %v5112_v63, %v9063_v18  ;;  %v5546_v3 = vsel %vm353_vm0, %v21434_v13, %v9053_v4  ;;  %v7031_v59 = vadd.f32 %v7030_v44, %v7029_v30  ;;  %v7118_v55 = vpop.f32.mrb[53].mxu0 }
 0x469   :  { %21431 = vst [vmem:[#allocation113_spill] sm:$0xff] %v16963_v19  ;;  %v5144_v14 = vsel %vm5030_vm11, %v5128_v56, %v9059_v52  ;;  %v21435_v18 = vunpack.i.l.bf16 %v21412_v15  ;;  %v4827_v63 = vrot.slane %v16033_v28, 3  ;;  %v9093_v44 = vunpack.i.l.bf16 %v16805_v27  ;;  %v21439_v56 = vld [vmem:[#allocation324_spill] sm:$0xff]  ;;  %v21468_v19 = vld [vmem:[#allocation71_spill] sm:$0xff] }
 0x46a   :  { %v5606_v53 = vsel %vm1138_vm8, %v5583_v9, %v21432_v61  ;;  %9346 = vrot.lane.b32.xlu1 %v21433_v39, %s9470_s15  ;;  %v16981_v9 = vpop.permute.xlu1 %9066  ;;  %v5160_v22 = vsel %vm1154_vm9, %v5144_v14, %v9083_v49  ;;  %v16992_v61 = vadd.f32 %v7118_v55, %v7117_v51  ;;  %v16998_v49 = vpop.permute.xlu0 %9151 }
 0x46b   :  { %v5636_v17 = vsel %vm5030_vm11, %v5606_v53, %v9058_v37  ;;  %4696 = vrot.lane.b32.xlu0 %v16033_v28, %s9472_s16  ;;  %v5695_v4 = vsel %vm5061_vm12, %v5665_v48, %v21435_v18  ;;  %v21436_v37 = vunpack.i.h.bf16 %v15711_v31  ;;  %v9068_v52 = vunpack.i.l.bf16 %v16981_v9  ;;  %v21438_v53 = vld [vmem:[#allocation319_spill] sm:$0xff] }
 0x46c   :  { %v5666_v33 = vsel %vm1154_vm9, %v5636_v17, %v9049_v57  ;;  %21437 = vst [vmem:[#allocation141_spill] sm:$0xff] %v16992_v61  ;;  %v16996_v39 = vadd.f32 %v7031_v59, %v21438_v53  ;;  %v7032_v57 = vpop.f32.mrb[30].mxu1  ;;  %v5565_v48 = vsel %vm1122_vm3, %v5546_v3, %v9029_v6  ;;  %v21440_v31 = vpack.i.bf16 %v21365_v45, %v21439_v56  ;;  %v7120_v59 = vpop.f32.mrb[54].mxu0  ;;  %v21457_v3 = vld [vmem:[#allocation306_spill] sm:$0xff]  ;;  %v21474_v61 = vld [vmem:[#allocation139_spill] sm:$0xff] }
 0x46d   :  { %v5637_v30 = vsel %vm5030_vm11, %v5607_v35, %v21436_v37  ;;  %v5176_v35 = vsel %vm5061_vm12, %v5160_v22, %v9074_v54  ;;  %v5696_v13 = vsel %vm5061_vm12, %v5666_v33, %v9073_v10  ;;  %v7033_v17 = vpop.f32.mrb[31].mxu1  ;;  %v5584_v51 = vsel %vm5003_vm10, %v5565_v48, %v9068_v52  ;;  %v21441_v37 = vld [vmem:[#allocation120_spill] sm:$0xff]  ;;  %v7121_v10 = vpop.f32.mrb[55].mxu0 }
 0x46e   :  { %9356 = vrot.lane.b32.xlu1 %v21440_v31, %s9469_s14  ;;  %5955 = vmatprep.mubr.f32.mxu1 %v5176_v35  ;;  %v5767_v14 = vrot.slane %v5695_v4, 1  ;;  %v5768_v55 = vrot.slane %v5696_v13, 1  ;;  %v7034_v18 = vadd.f32 %v7033_v17, %v7032_v57  ;;  %v9084_v45 = vunpack.i.h.bf16 %v16769_v24  ;;  %v17017_v22 = vpop.permute.xlu1 %9076  ;;  %v21445_v4 = vld [vmem:[#allocation307_spill] sm:$0xff]  ;;  %v17026_v56 = vpop.permute.xlu0 %9161 }
 0x46f   :  { %4806 = vrot.lane.b32.xlu0 %v21441_v37, %s9470_s15  ;;  %v21443_v53 = vunpack.i.h.bf16 %v16692_v50  ;;  %5956 = vmatmul.mubr.f32.gmra.mrb[88].mxu1 %v16676_v36  ;;  %v21444_v33 = vunpack.i.h.bf16 %v21299_v38  ;;  %v17023_v57 = vadd.f32 %v7121_v10, %v7120_v59  ;;  %v7167_v24 = vpop.f32.mrb[32].mxu1  ;;  %v21447_v50 = vunpack.i.l.bf16 %v21276_v11  ;;  %v21448_v36 = vld [vmem:[#allocation42_spill] sm:$0xff]  ;;  %v21450_v13 = vld [vmem:[#allocation131_spill] sm:$0xff] }
 0x470   :  { %v5769_v48 = vsel %vm724_vm5, %v5767_v14, %v5768_v55  ;;  %v21449_v35 = vunpack.i.l.bf16 %v21448_v36  ;;  %v19260_v38 = vunpack.i.h.bf16 %v21412_v15  ;;  %v21451_v59 = vld [vmem:[#allocation166_spill] sm:$0xff]  ;;  %v7168_v55 = vpop.f32.mrb[33].mxu1  ;;  %v9078_v26 = vunpack.i.l.bf16 %v17017_v22 }
 0x471   :  { %v5608_v54 = vsel %vm1138_vm8, %v5584_v51, %v21443_v53  ;;  %v5036_v52 = vsel %vm5030_vm11, %v21445_v4, %v21444_v33  ;;  %21446 = vst [vmem:[#allocation169_spill] sm:$0xff] %v17023_v57  ;;  %v5667_v31 = vsel %vm1154_vm9, %v5637_v30, %v21447_v50  ;;  %v9113_v51 = vunpack.i.l.bf16 %v16871_v1  ;;  %6096 = vmatmul.mubr.f32.gmra.mrb[102].mxu0 %v5769_v48  ;;  %v21453_v14 = vld [vmem:[#allocation346_spill] sm:$0xff]  ;;  %v21455_v33 = vld [vmem:[#allocation339_spill] sm:$0xff]  ;;  %v7123_v50 = vpop.f32.mrb[56].mxu0  ;;  %v7170_v6 = vpop.f32.mrb[34].mxu1 }
 0x472   :  { %v5039_v17 = vsel %vm5030_vm11, %v21450_v13, %v21449_v35  ;;  %v17038_v37 = vadd.f32 %v21451_v59, %v7034_v18  ;;  %9366 = vrot.lane.b32.xlu1 %v21453_v14, %s9472_s16  ;;  %v5638_v53 = vsel %vm5030_vm11, %v5608_v54, %v9093_v44  ;;  %v8903_v4 = vunpack.i.l.bf16 %v21455_v33  ;;  %v21456_v13 = vld [vmem:[#allocation79_spill] sm:$0xff]  ;;  %6923 = vmatprep.mubr.msk.f32.mxu0 %vm353_vm0, %v21457_v3  ;;  %v7124_v48 = vpop.f32.mrb[57].mxu0  ;;  %v17053_v59 = vpop.permute.xlu1 %9086  ;;  %v21459_v10 = vld [vmem:[#allocation54_spill] sm:$0xff] }
 0x473   :  { %v7169_v35 = vadd.f32 %v7168_v55, %v7167_v24  ;;  %4914 = vrot.lane.b32.xlu0 %v21456_v13, %s9469_s14  ;;  %v17051_v18 = vsel %vm1904_vm6, %v4827_v63, %v21428_v41  ;;  %v5668_v44 = vsel %vm1154_vm9, %v5638_v53, %v9084_v45  ;;  %v5697_v54 = vsel %vm5061_vm12, %v5667_v31, %v19260_v38  ;;  %v21458_v24 = vld [vmem:[#allocation89_spill] sm:$0xff]  ;;  %v17067_v41 = vpop.permute.xlu0 %9171  ;;  %v7126_v38 = vpop.f32.mrb[58].mxu0 }
 0x474   :  { %21452 = vst [vmem:[#allocation217_spill] sm:$0xff] %v17038_v37  ;;  %v5782_v55 = vrot.slane %v21458_v24, 1  ;;  %v5783_v13 = vrot.slane %v21459_v10, 1  ;;  %v17062_v3 = vadd.f32 %v7124_v48, %v7123_v50  ;;  %v21461_v45 = vunpack.i.h.bf16 %v21276_v11  ;;  %v7171_v24 = vpop.f32.mrb[35].mxu1 }
 0x475   :  { %v17065_v63 = vadd.f32 %v7169_v35, %v16651_v46  ;;  %v8904_v31 = vunpack.i.h.bf16 %v21455_v33  ;;  %v5698_v10 = vsel %vm5061_vm12, %v5668_v44, %v9113_v51  ;;  %v21462_v46 = vunpack.i.h.bf16 %v21448_v36  ;;  %v21463_v35 = vld [vmem:[#allocation251_spill] sm:$0xff]  ;;  %v21464_v33 = vld [vmem:[#allocation25_spill] sm:$0xff]  ;;  %v21467_v51 = vld [vmem:[#allocation288_spill] sm:$0xff] }
 0x476   :  { %21460 = vst [vmem:[#allocation62_spill] sm:$0xff] %v17062_v3  ;;  %v5054_v53 = vsel %vm1154_vm9, %v5039_v17, %v21461_v45  ;;  %9376 = vrot.lane.b32.xlu1 %v21453_v14, %s9476_s0  ;;  %v5773_v11 = vrot.slane %v5697_v54, 1  ;;  %v5774_v30 = vrot.slane %v5698_v10, 1  ;;  %v7172_v17 = vadd.f32 %v7171_v24, %v7170_v6  ;;  %v21465_v45 = vld [vmem:[#allocation43_spill] sm:$0xff]  ;;  %v7127_v3 = vpop.f32.mrb[59].mxu0  ;;  %v17089_v36 = vpop.permute.xlu1 %9096 }
 0x477   :  { %v5040_v48 = vsel %vm5030_vm11, %v21463_v35, %v21462_v46  ;;  %6179 = vrot.lane.b32.xlu0 %v21464_v33, %s9472_s16  ;;  %v21466_v14 = vld [vmem:[#allocation331_spill] sm:$0xff]  ;;  %v5082_v44 = vsel %vm353_vm0, %v21467_v51, %v8903_v4  ;;  %v8913_v50 = vunpack.i.l.bf16 %v21468_v19  ;;  %v5784_v46 = vsel %vm724_vm5, %v5782_v55, %v5783_v13  ;;  %v21469_v35 = vld [vmem:[#allocation154_spill] sm:$0xff]  ;;  %v17101_v37 = vpop.permute.xlu0 %9181  ;;  %v7173_v4 = vpop.f32.mrb[36].mxu1  ;;  %v21475_v13 = vld [vmem:[#allocation204_spill] sm:$0xff] }
 0x478   :  { %v21470_v54 = vunpack.i.l.bf16 %v21469_v35  ;;  %v5097_v10 = vsel %vm1122_vm3, %v5082_v44, %v9078_v26  ;;  %v5775_v24 = vsel %vm724_vm5, %v5773_v11, %v5774_v30  ;;  %v17099_v33 = vadd.f32 %v7127_v3, %v7126_v38  ;;  %v21476_v38 = vld [vmem:[#allocation233_spill] sm:$0xff]  ;;  %v7174_v30 = vpop.f32.mrb[37].mxu1  ;;  %v7129_v11 = vpop.f32.mrb[60].mxu0 }
 0x479   :  { %v21473_v51 = vunpack.i.l.bf16 %v21356_v12  ;;  %v17108_v55 = vsel %vm353_vm0, %v21474_v61, %v8904_v31  ;;  %6101 = vmatmul.mubr.f32.gmra.mrb[104].mxu0 %v5775_v24  ;;  %v17113_v26 = vadd.f32 %v7172_v17, %v16687_v2  ;;  %v7175_v44 = vadd.f32 %v7174_v30, %v7173_v4  ;;  %v21479_v2 = vld [vmem:[#allocation255_spill] sm:$0xff]  ;;  %v7130_v24 = vpop.f32.mrb[61].mxu0 }
 0x47a   :  { %v17095_v6 = vsel %vm5061_vm12, %v5054_v53, %v21470_v54  ;;  %21472 = vst [vmem:[#allocation126_spill] sm:$0xff] %v17099_v33  ;;  %v8838_v53 = vunpack.i.l.bf16 %v21475_v13  ;;  %v9069_v54 = vunpack.i.h.bf16 %v16981_v9  ;;  %9386 = vrot.lane.b32.xlu1 %v21476_v38, %s9470_s15  ;;  %6924 = vmatprep.mubr.msk.f32.mxu0 %vm353_vm0, %v5784_v46  ;;  %v21477_v9 = vld [vmem:[#allocation93_spill] sm:$0xff]  ;;  %v8908_v31 = vunpack.i.l.bf16 %v21479_v2 }
 0x47b   :  { %21471 = vst [vmem:[#allocation58_spill] sm:$0xff] %v17095_v6  ;;  %v5051_v57 = vsel %vm1154_vm9, %v5036_v52, %v21473_v51  ;;  %v9103_v52 = vunpack.i.l.bf16 %v16831_v8  ;;  %6185 = vrot.lane.b32.xlu0 %v16654_v62, %s9472_s16  ;;  %v17124_v61 = vsel %vm353_vm0, %v21477_v9, %v8913_v50  ;;  %v17128_v51 = vpop.permute.xlu1 %9106  ;;  %v21480_v38 = vunpack.i.h.bf16 %v21302_v21  ;;  %v17139_v50 = vpop.permute.xlu0 %9191 }
 0x47c   :  { %21478 = vst [vmem:[#allocation300_spill] sm:$0xff] %v17124_v61  ;;  %v5113_v17 = vsel %vm5003_vm10, %v5097_v10, %v9069_v54  ;;  %v17134_v62 = vadd.f32 %v7130_v24, %v7129_v11  ;;  %v17137_v46 = vadd.f32 %v7175_v44, %v16731_v40  ;;  %v7176_v9 = vpop.f32.mrb[38].mxu1  ;;  %v21482_v3 = vunpack.i.h.bf16 %v21356_v12  ;;  %v21483_v10 = vld [vmem:[#allocation258_spill] sm:$0xff]  ;;  %v21486_v44 = vld [vmem:[#allocation95_spill] sm:$0xff] }
 0x47d   :  { %v5067_v4 = vsel %vm5061_vm12, %v5051_v57, %v21480_v38  ;;  %v9094_v19 = vunpack.i.h.bf16 %v16805_v27  ;;  %v7177_v21 = vpop.f32.mrb[39].mxu1  ;;  %v21484_v57 = vunpack.i.l.bf16 %v21412_v15  ;;  %v21485_v40 = vunpack.i.h.bf16 %v21412_v15  ;;  %v21490_v27 = vld [vmem:[#allocation94_spill] sm:$0xff] }
 0x47e   :  { %21481 = vst [vmem:[#allocation181_spill] sm:$0xff] %v17134_v62  ;;  %v5052_v54 = vsel %vm1154_vm9, %v21483_v10, %v21482_v3  ;;  %5224 = vrot.lane.b32.xlu1 %v21465_v45, %s9473_s17  ;;  %v17160_v12 = vsel %vm1154_vm9, %v5040_v48, %v8838_v53  ;;  %v21488_v3 = vld [vmem:[#allocation280_spill] sm:$0xff]  ;;  %v9054_v38 = vunpack.i.h.bf16 %v16656_v58  ;;  %v7132_v10 = vpop.f32.mrb[62].mxu0  ;;  %v7178_v30 = vadd.f32 %v7177_v21, %v7176_v9  ;;  %v21497_v62 = vld [vmem:[#allocation55_spill] sm:$0xff] }
 0x47f   :  { %v17151_v11 = vsel %vm5061_vm12, %v5052_v54, %v21484_v57  ;;  %v17157_v24 = vsel %vm5061_vm12, %v21486_v44, %v21485_v40  ;;  %21487 = vst [vmem:[#allocation97_spill] sm:$0xff] %v17160_v12  ;;  %6189 = vrot.lane.b32.xlu0 %v16738_v5, %s9472_s16  ;;  %v5129_v54 = vsel %vm1138_vm8, %v5113_v17, %v9103_v52  ;;  %v21489_v57 = vld [vmem:[#allocation264_spill] sm:$0xff]  ;;  %v7133_v44 = vpop.f32.mrb[63].mxu0  ;;  %v17172_v48 = vpop.permute.xlu1 %9116  ;;  %v9114_v21 = vunpack.i.h.bf16 %v16871_v1 }
 0x480   :  { %v17170_v40 = vsel %vm353_vm0, %v21489_v57, %v8908_v31  ;;  %v17176_v12 = vadd.f32 %v7133_v44, %v7132_v10  ;;  %v9118_v9 = vunpack.i.l.bf16 %v17172_v48  ;;  %v17180_v5 = vadd.f32 %v7178_v30, %v16763_v7  ;;  %v17182_v52 = vpop.permute.xlu0 %9201  ;;  %v7179_v17 = vpop.f32.mrb[40].mxu1  ;;  %v21493_v30 = vld [vmem:[#allocation224_spill] sm:$0xff] }
 0x481   :  { %v9123_v57 = vunpack.i.l.bf16 %v16907_v47  ;;  %v9079_v53 = vunpack.i.h.bf16 %v17017_v22  ;;  %v21492_v10 = vpack.i.bf16 %v17051_v18, %v21418_v42  ;;  %v5145_v44 = vsel %vm5030_vm11, %v5129_v54, %v9094_v19  ;;  %v7180_v7 = vpop.f32.mrb[41].mxu1  ;;  %v7247_v31 = vpop.f32.mrb[64].mxu0  ;;  %v21494_v54 = vld [vmem:[#allocation158_spill] sm:$0xff] }
 0x482   :  { %21491 = vst [vmem:[#allocation110_spill] sm:$0xff] %v17176_v12  ;;  %v5547_v58 = vsel %vm353_vm0, %v21493_v30, %v9054_v38  ;;  %v9088_v15 = vunpack.i.l.bf16 %v17053_v59  ;;  %v5161_v1 = vsel %vm1154_vm9, %v5145_v44, %v9118_v9  ;;  %v7181_v35 = vadd.f32 %v7180_v7, %v7179_v17  ;;  %v21495_v9 = vld [vmem:[#allocation106_spill] sm:$0xff] }
 0x483   :  { %9401 = vrot.lane.b32.xlu1 %v21492_v10, %s9474_s18  ;;  %6193 = vrot.lane.b32.xlu0 %v16803_v23, %s9472_s16  ;;  %v9098_v22 = vunpack.i.l.bf16 %v17089_v36  ;;  %v9108_v42 = vunpack.i.l.bf16 %v17128_v51  ;;  %v7248_v10 = vpop.f32.mrb[65].mxu0  ;;  %v17201_v6 = vpop.permute.xlu1 %9126  ;;  %v5177_v19 = vsel %vm5061_vm12, %v5161_v1, %v9114_v21  ;;  %v5801_v38 = vrot.slane %v21494_v54, 1  ;;  %v21496_v7 = vld [vmem:[#allocation178_spill] sm:$0xff]  ;;  %v21499_v1 = vld [vmem:[#allocation225_spill] sm:$0xff] }
 0x484   :  { %v9109_v30 = vunpack.i.h.bf16 %v17128_v51  ;;  %v7249_v61 = vadd.f32 %v7248_v10, %v7247_v31  ;;  %5960 = vmatprep.mubr.f32.mxu1 %v5177_v19  ;;  %v17207_v17 = vadd.f32 %v7181_v35, %v21495_v9  ;;  %v17209_v44 = vpop.permute.xlu0 %9211  ;;  %v7182_v23 = vpop.f32.mrb[42].mxu1  ;;  %v5806_v12 = vrot.slane %v21496_v7, 1 }
 0x485   :  { %v9104_v13 = vunpack.i.h.bf16 %v16831_v8  ;;  %v17215_v33 = vsel %vm353_vm0, %v21497_v62, %v9123_v57  ;;  %v5566_v21 = vsel %vm1122_vm3, %v5547_v58, %v9079_v53  ;;  %v9089_v51 = vunpack.i.h.bf16 %v17053_v59  ;;  %5961 = vmatmul.mubr.f32.gmra.mrb[90].mxu1 %v5067_v4  ;;  %v7183_v31 = vpop.f32.mrb[43].mxu1  ;;  %v7250_v19 = vpop.f32.mrb[66].mxu0 }
 0x486   :  { %v21498_v35 = vpack.i.bf16 %v21466_v14, %v21465_v45  ;;  %v5548_v10 = vsel %vm353_vm0, %v21499_v1, %v9088_v15  ;;  %v9099_v8 = vunpack.i.h.bf16 %v17089_v36  ;;  %v7184_v9 = vadd.f32 %v7183_v31, %v7182_v23  ;;  %v7251_v53 = vpop.f32.mrb[67].mxu0 }
 0x487   :  { %6197 = vrot.lane.b32.xlu0 %v16865_v25, %s9472_s16  ;;  %v17229_v62 = vadd.f32 %v7249_v61, %v17065_v63  ;;  %v9134_v59 = vunpack.i.h.bf16 %v16936_v0  ;;  %v9133_v45 = vunpack.i.l.bf16 %v16936_v0  ;;  %v5567_v14 = vsel %vm1122_vm3, %v5548_v10, %v9098_v22  ;;  %v9137_v15 = vpop.permute.xlu1 %9136  ;;  %v7185_v63 = vpop.f32.mrb[44].mxu1 }
 0x488   :  { %9411 = vrot.lane.b32.xlu1 %v21498_v35, %s9469_s14  ;;  %v5585_v4 = vsel %vm5003_vm10, %v5566_v21, %v9108_v42  ;;  %v5586_v36 = vsel %vm5003_vm10, %v5567_v14, %v9109_v30  ;;  %v7252_v58 = vadd.f32 %v7251_v53, %v7250_v19  ;;  %v9138_v57 = vunpack.i.l.bf16 %v9137_v15  ;;  %v17239_v25 = vpop.permute.xlu0 %9221  ;;  %v7186_v30 = vpop.f32.mrb[45].mxu1  ;;  %v21500_v21 = vld [vmem:[#allocation227_spill] sm:$0xff]  ;;  %v21502_v53 = vld [vmem:[#allocation252_spill] sm:$0xff] }
 0x489   :  { %v17237_v23 = vadd.f32 %v7184_v9, %v16828_v60  ;;  %v9144_v61 = vunpack.i.h.bf16 %v16965_v29  ;;  %v9143_v0 = vunpack.i.l.bf16 %v16965_v29  ;;  %v9129_v22 = vunpack.i.h.bf16 %v17201_v6  ;;  %v7253_v31 = vpop.f32.mrb[68].mxu0 }
 0x48a   :  { %v9128_v42 = vunpack.i.l.bf16 %v17201_v6  ;;  %v5549_v35 = vsel %vm353_vm0, %v21500_v21, %v9089_v51  ;;  %v5098_v60 = vsel %vm1122_vm3, %v17108_v55, %v9099_v8  ;;  %v7187_v1 = vadd.f32 %v7186_v30, %v7185_v63  ;;  %v7254_v51 = vpop.f32.mrb[69].mxu0 }
 0x48b   :  { %6201 = vrot.lane.b32.xlu0 %v16934_v20, %s9472_s16  ;;  %v17254_v29 = vadd.f32 %v7252_v58, %v17113_v26  ;;  %v9163_v6 = vunpack.i.l.bf16 %v17026_v56  ;;  %v5609_v10 = vsel %vm1138_vm8, %v5585_v4, %v9104_v13  ;;  %v5568_v19 = vsel %vm1122_vm3, %v5549_v35, %v9138_v57  ;;  %v9147_v9 = vpop.permute.xlu1 %9146  ;;  %v7188_v58 = vpop.f32.mrb[46].mxu1 }
 0x48c   :  { %9421 = vrot.lane.b32.xlu1 %v21420_v16, %s9476_s0  ;;  %v5610_v16 = vsel %vm1138_vm8, %v5586_v36, %v9104_v13  ;;  %v17260_v14 = vadd.f32 %v7254_v51, %v7253_v31  ;;  %v17262_v55 = vunpack.i.h.bf16 %v9147_v9  ;;  %v9148_v8 = vunpack.i.l.bf16 %v9147_v9  ;;  %v17267_v26 = vpop.permute.xlu0 %9231  ;;  %v7189_v57 = vpop.f32.mrb[47].mxu1 }
 0x48d   :  { %v17265_v20 = vadd.f32 %v7187_v1, %v21502_v53  ;;  %v9173_v63 = vunpack.i.l.bf16 %v17067_v41  ;;  %v5639_v4 = vsel %vm5030_vm11, %v5609_v10, %v9128_v42  ;;  %v5640_v13 = vsel %vm5030_vm11, %v5610_v16, %v9129_v22 }
 0x48e   :  { %21501 = vst [vmem:[#allocation26_spill] sm:$0xff] %v17262_v55  ;;  %v5114_v36 = vsel %vm5003_vm10, %v5098_v60, %v9133_v45  ;;  %v9139_v30 = vunpack.i.h.bf16 %v9137_v15  ;;  %v5587_v21 = vsel %vm5003_vm10, %v5568_v19, %v9134_v59  ;;  %v7190_v31 = vadd.f32 %v7189_v57, %v7188_v58  ;;  %v7191_v60 = vpop.f32.mrb[48].mxu1  ;;  %v21503_v59 = vld [vmem:[#allocation249_spill] sm:$0xff]  ;;  %v7256_v57 = vpop.f32.mrb[70].mxu0 }
 0x48f   :  { %v5130_v35 = vsel %vm1138_vm8, %v5114_v36, %v9148_v8  ;;  %6205 = vrot.lane.b32.xlu0 %v16996_v39, %s9472_s16  ;;  %v9153_v1 = vunpack.i.l.bf16 %v16998_v49  ;;  %v9119_v42 = vunpack.i.h.bf16 %v17172_v48  ;;  %v9157_v22 = vpop.permute.xlu1 %9156  ;;  %v5611_v10 = vsel %vm1138_vm8, %v5587_v21, %v17262_v55  ;;  %v7192_v39 = vpop.f32.mrb[49].mxu1 }
 0x490   :  { %4960 = vrot.lane.b32.xlu1 %v16033_v28, %s9476_s0  ;;  %v5146_v45 = vsel %vm5030_vm11, %v5130_v35, %v9163_v6  ;;  %v9159_v15 = vunpack.i.h.bf16 %v9157_v22  ;;  %v9158_v16 = vunpack.i.l.bf16 %v9157_v22  ;;  %v17285_v19 = vadd.f32 %v7190_v31, %v21503_v59  ;;  %v17288_v9 = vpop.permute.xlu0 %9241  ;;  %v7257_v35 = vpop.f32.mrb[71].mxu0 }
 0x491   :  { %v5162_v51 = vsel %vm1154_vm9, %v5146_v45, %v9144_v61  ;;  %v7193_v6 = vadd.f32 %v7192_v39, %v7191_v60  ;;  %v5669_v8 = vsel %vm1154_vm9, %v5639_v4, %v9119_v42  ;;  %v5670_v53 = vsel %vm1154_vm9, %v5640_v13, %v9143_v0  ;;  %v21505_v13 = vld [vmem:[#allocation221_spill] sm:$0xff]  ;;  %v7259_v39 = vpop.f32.mrb[72].mxu0 }
 0x492   :  { %v5178_v48 = vsel %vm5061_vm12, %v5162_v51, %v9173_v63  ;;  %v9124_v58 = vunpack.i.h.bf16 %v16907_v47  ;;  %v5569_v36 = vsel %vm1122_vm3, %v17215_v33, %v9139_v30  ;;  %v5699_v61 = vsel %vm5061_vm12, %v5669_v8, %v9158_v16  ;;  %v21504_v63 = vld [vmem:[#allocation109_spill] sm:$0xff]  ;;  %v21507_v51 = vld [vmem:[#allocation267_spill] sm:$0xff] }
 0x493   :  { %5965 = vmatprep.mubr.f32.mxu1 %v5178_v48  ;;  %v5700_v21 = vsel %vm5061_vm12, %v5670_v53, %v9159_v15  ;;  %v9167_v31 = vpop.permute.xlu1 %9166  ;;  %v17302_v22 = vadd.f32 %v7193_v6, %v21504_v63  ;;  %v5779_v4 = vrot.slane %v5699_v61, 1  ;;  %v5641_v47 = vsel %vm5030_vm11, %v5611_v10, %v21505_v13  ;;  %v7194_v15 = vpop.f32.mrb[50].mxu1  ;;  %v21508_v6 = vld [vmem:[#allocation276_spill] sm:$0xff]  ;;  %v21509_v61 = vld [vmem:[#allocation133_spill] sm:$0xff] }
 0x494   :  { %4860 = vrot.lane.b32.xlu1 %v17051_v18, %s9475_s29  ;;  %5966 = vmatmul.mubr.f32.gmra.mrb[92].mxu1 %v17151_v11  ;;  %v5780_v0 = vrot.slane %v5700_v21, 1  ;;  %v9154_v33 = vunpack.i.h.bf16 %v16998_v49  ;;  %v9164_v30 = vunpack.i.h.bf16 %v17026_v56  ;;  %v7258_v42 = vadd.f32 %v7257_v35, %v7256_v57  ;;  %v17308_v60 = vpop.permute.xlu0 %9251  ;;  %v7195_v49 = vpop.f32.mrb[51].mxu1 }
 0x495   :  { %v9168_v45 = vunpack.i.l.bf16 %v9167_v31  ;;  %v17311_v16 = vunpack.i.h.bf16 %v17067_v41  ;;  %v9183_v11 = vunpack.i.l.bf16 %v17101_v37  ;;  %v5588_v59 = vsel %vm5003_vm10, %v5569_v36, %v9153_v1  ;;  %v7260_v36 = vpop.f32.mrb[73].mxu0 }
 0x496   :  { %v5781_v10 = vsel %vm724_vm5, %v5779_v4, %v5780_v0  ;;  %v5612_v48 = vsel %vm1138_vm8, %v5588_v59, %v17262_v55  ;;  %v7196_v41 = vadd.f32 %v7195_v49, %v7194_v15  ;;  %v5671_v8 = vsel %vm1154_vm9, %v5641_v47, %v21508_v6 }
 0x497   :  { %21506 = vst [vmem:[#allocation266_spill] sm:$0xff] %v17311_v16  ;;  %v5099_v56 = vsel %vm1122_vm3, %v17170_v40, %v9168_v45  ;;  %6106 = vmatmul.mubr.f32.gmra.mrb[106].mxu0 %v5781_v10  ;;  %v19263_v1 = vunpack.i.l.bf16 %v17182_v52  ;;  %v9177_v57 = vpop.permute.xlu1 %9176  ;;  %v21510_v40 = vld [vmem:[#allocation88_spill] sm:$0xff]  ;;  %v17332_v35 = vadd.f32 %v7258_v42, %v17180_v5  ;;  %v17334_v63 = vadd.f32 %v7260_v36, %v7259_v39  ;;  %v7197_v45 = vpop.f32.mrb[52].mxu1 }
 0x498   :  { %6177 = vrot.lane.b32.xlu1 %v21507_v51, %s9472_s16  ;;  %v5115_v53 = vsel %vm5003_vm10, %v5099_v56, %v9154_v33  ;;  %6925 = vmatprep.mubr.msk.f32.mxu0 %vm353_vm0, %v21509_v61  ;;  %v5613_v21 = vsel %vm1138_vm8, %v21510_v40, %v17262_v55  ;;  %v9179_v4 = vunpack.i.h.bf16 %v9177_v57  ;;  %v17336_v0 = vunpack.i.l.bf16 %v9177_v57  ;;  %v17341_v33 = vpop.permute.xlu0 %9261  ;;  %v21512_v51 = vld [vmem:[#allocation66_spill] sm:$0xff]  ;;  %v7198_v42 = vpop.f32.mrb[53].mxu1  ;;  %v21513_v10 = vld [vmem:[#allocation212_spill] sm:$0xff] }
 0x499   :  { %v17339_v47 = vadd.f32 %v7196_v41, %v16960_v43  ;;  %v9169_v15 = vunpack.i.h.bf16 %v9167_v31  ;;  %v5642_v59 = vsel %vm5030_vm11, %v5612_v48, %v21505_v13  ;;  %v5131_v5 = vsel %vm1138_vm8, %v5115_v53, %v9183_v11  ;;  %v7262_v56 = vpop.f32.mrb[74].mxu0  ;;  %v21514_v57 = vld [vmem:[#allocation114_spill] sm:$0xff] }
 0x49a   :  { %21511 = vst [vmem:[#allocation170_spill] sm:$0xff] %v17336_v0  ;;  %v5701_v49 = vsel %vm5061_vm12, %v5671_v8, %v21513_v10  ;;  %v5672_v43 = vsel %vm1154_vm9, %v5642_v59, %v17336_v0  ;;  %v5147_v39 = vsel %vm5030_vm11, %v5131_v5, %v9164_v30  ;;  %v7199_v41 = vadd.f32 %v7198_v42, %v7197_v45  ;;  %v7263_v48 = vpop.f32.mrb[75].mxu0  ;;  %v21515_v5 = vld [vmem:[#allocation141_spill] sm:$0xff] }
 0x49b   :  { %v17355_v31 = vadd.f32 %v17260_v14, %v17137_v46  ;;  %v17357_v36 = vpop.permute.xlu1 %9186  ;;  %v5163_v11 = vsel %vm1154_vm9, %v5147_v39, %v9179_v4  ;;  %v5702_v53 = vsel %vm5061_vm12, %v5672_v43, %v17311_v16  ;;  %v5643_v8 = vsel %vm5030_vm11, %v5613_v21, %v21505_v13  ;;  %v7200_v4 = vpop.f32.mrb[54].mxu1  ;;  %v21516_v21 = vld [vmem:[#allocation348_spill] sm:$0xff] }
 0x49c   :  { %6181 = vrot.lane.b32.xlu1 %v21512_v51, %s9472_s16  ;;  %v5807_v40 = vrot.slane %v21514_v57, 1  ;;  %v5551_v30 = vsel %vm353_vm0, 0.0, %v9124_v58  ;;  %v7264_v45 = vadd.f32 %v7263_v48, %v7262_v56  ;;  %v9188_v59 = vunpack.i.l.bf16 %v17357_v36  ;;  %v17370_v14 = vpop.permute.xlu0 %9271  ;;  %v7201_v56 = vpop.f32.mrb[55].mxu1  ;;  %v21518_v48 = vld [vmem:[#allocation334_spill] sm:$0xff] }
 0x49d   :  { %v5179_v46 = vsel %vm5061_vm12, %v5163_v11, %v19263_v1  ;;  %v5570_v51 = vsel %vm1122_vm3, %v5551_v30, %v9169_v15  ;;  %v17374_v42 = vadd.f32 %v7199_v41, %v21515_v5  ;;  %v5785_v58 = vrot.slane %v5701_v49, 1  ;;  %v7265_v15 = vpop.f32.mrb[76].mxu0 }
 0x49e   :  { %5970 = vmatprep.mubr.f32.mxu1 %v5179_v46  ;;  %v5786_v43 = vrot.slane %v5702_v53, 1  ;;  %v21517_v39 = vunpack.i.h.bf16 %v21479_v2  ;;  %v5589_v57 = vsel %vm5003_vm10, %v5570_v51, %v9188_v59  ;;  %v7202_v30 = vadd.f32 %v7201_v56, %v7200_v4  ;;  %v7266_v53 = vpop.f32.mrb[77].mxu0  ;;  %v21521_v51 = vld [vmem:[#allocation169_spill] sm:$0xff] }
 0x49f   :  { %5971 = vmatmul.mubr.f32.gmra.mrb[94].mxu1 %v17157_v24  ;;  %v5673_v41 = vsel %vm1154_vm9, %v5643_v8, %v21508_v6  ;;  %v5614_v49 = vsel %vm1138_vm8, %v5589_v57, %v17262_v55  ;;  %v17390_v46 = vpop.permute.xlu1 %9196  ;;  %v21519_v5 = vrot.slane %v21490_v27, 1  ;;  %v17401_v24 = vadd.f32 %v7264_v45, %v17237_v23  ;;  %v21523_v45 = vld [vmem:[#allocation191_spill] sm:$0xff]  ;;  %v21526_v23 = vld [vmem:[#allocation62_spill] sm:$0xff] }
 0x4a0   :  { %6183 = vrot.lane.b32.xlu1 %v21516_v21, %s9472_s16  ;;  %v17382_v11 = vsel %vm353_vm0, %v21518_v48, %v21517_v39  ;;  %v5787_v2 = vsel %vm724_vm5, %v5785_v58, %v5786_v43  ;;  %v21520_v21 = vrot.slane %v21363_v32, 1  ;;  %v9193_v8 = vunpack.i.l.bf16 %v17139_v50  ;;  %v17407_v39 = vpop.permute.xlu0 %9281  ;;  %v7203_v58 = vpop.f32.mrb[56].mxu1 }
 0x4a1   :  { %v7267_v4 = vadd.f32 %v7266_v53, %v7265_v15  ;;  %6111 = vmatmul.mubr.f32.gmra.mrb[108].mxu0 %v5787_v2  ;;  %v17405_v56 = vadd.f32 %v7202_v30, %v21521_v51  ;;  %v21522_v27 = vrot.slane %v21394_v34, 1  ;;  %v7204_v48 = vpop.f32.mrb[57].mxu1  ;;  %v5644_v57 = vsel %vm5030_vm11, %v5614_v49, %v21505_v13  ;;  %v7268_v53 = vpop.f32.mrb[78].mxu0 }
 0x4a2   :  { %v17398_v59 = vsel %vm724_vm5, %v21520_v21, %v21519_v5  ;;  %6926 = vmatprep.mubr.msk.f32.mxu0 %vm353_vm0, %v21509_v61  ;;  %v5703_v54 = vsel %vm5061_vm12, %v5673_v41, %v21513_v10  ;;  %v9189_v15 = vunpack.i.h.bf16 %v17357_v36  ;;  %v9198_v30 = vunpack.i.l.bf16 %v17390_v46  ;;  %v7269_v51 = vpop.f32.mrb[79].mxu0  ;;  %v21525_v36 = vld [vmem:[#allocation271_spill] sm:$0xff] }
 0x4a3   :  { %v17414_v43 = vsel %vm724_vm5, %v21522_v27, %v5801_v38  ;;  %v17428_v38 = vsel %vm724_vm5, %v5806_v12, %v5807_v40  ;;  %v7205_v2 = vadd.f32 %v7204_v48, %v7203_v58  ;;  %v5674_v5 = vsel %vm1154_vm9, %v5644_v57, %v17336_v0  ;;  %v17436_v41 = vpop.permute.xlu1 %9206  ;;  %v21524_v40 = vld [vmem:[#allocation303_spill] sm:$0xff] }
 0x4a4   :  { %6187 = vrot.lane.b32.xlu1 %v21523_v45, %s9472_s16  ;;  %v9184_v21 = vunpack.i.h.bf16 %v17101_v37  ;;  %v9194_v49 = vunpack.i.h.bf16 %v17139_v50  ;;  %v5704_v12 = vsel %vm5061_vm12, %v5674_v5, %v17311_v16  ;;  %v5100_v45 = vsel %vm1122_vm3, %v21525_v36, %v9193_v8  ;;  %v17445_v1 = vpop.permute.xlu0 %9291  ;;  %v7206_v37 = vpop.f32.mrb[58].mxu1  ;;  %v21527_v5 = vld [vmem:[#allocation285_spill] sm:$0xff]  ;;  %v21528_v48 = vld [vmem:[#allocation211_spill] sm:$0xff] }
 0x4a5   :  { %v7270_v57 = vadd.f32 %v7269_v51, %v7268_v53  ;;  %v9223_v50 = vunpack.i.l.bf16 %v17239_v25  ;;  %v17449_v61 = vadd.f32 %v7205_v2, %v21526_v23  ;;  %v5788_v27 = vrot.slane %v5703_v54, 1  ;;  %v7207_v10 = vpop.f32.mrb[59].mxu1  ;;  %v7271_v51 = vpop.f32.mrb[80].mxu0 }
 0x4a6   :  { %v5789_v16 = vrot.slane %v5704_v12, 1  ;;  %v9213_v8 = vunpack.i.l.bf16 %v17209_v44  ;;  %v5116_v36 = vsel %vm5003_vm10, %v5100_v45, %v9189_v15  ;;  %v5552_v53 = vsel %vm353_vm0, %v21528_v48, %v9198_v30  ;;  %v7272_v23 = vpop.f32.mrb[81].mxu0 }
 0x4a7   :  { %v7208_v58 = vadd.f32 %v7207_v10, %v7206_v37  ;;  %v17460_v2 = vpop.permute.xlu1 %9216  ;;  %v17464_v54 = vadd.f32 %v17334_v63, %v17207_v17  ;;  %v17467_v12 = vadd.f32 %v7270_v57, %v17285_v19  ;;  %v17470_v15 = vadd.f32 %v7267_v4, %v17265_v20  ;;  %v7209_v17 = vpop.f32.mrb[60].mxu1  ;;  %v21531_v57 = vld [vmem:[#allocation192_spill] sm:$0xff] }
 0x4a8   :  { %6191 = vrot.lane.b32.xlu1 %v21527_v5, %s9472_s16  ;;  %v17458_v0 = vsel %vm724_vm5, %v5788_v27, %v5789_v16  ;;  %v9208_v30 = vunpack.i.l.bf16 %v17436_v41  ;;  %v7273_v10 = vadd.f32 %v7272_v23, %v7271_v51  ;;  %v9218_v16 = vunpack.i.l.bf16 %v17460_v2  ;;  %v21530_v27 = vld [vmem:[#allocation126_spill] sm:$0xff]  ;;  %v17478_v48 = vpop.permute.xlu0 %9301  ;;  %v7210_v37 = vpop.f32.mrb[61].mxu1  ;;  %v21532_v5 = vld [vmem:[#allocation219_spill] sm:$0xff]  ;;  %v21533_v20 = vld [vmem:[#allocation344_spill] sm:$0xff] }
 0x4a9   :  { %21529 = vst [vmem:[#allocation77_spill] sm:$0xff] %v17458_v0  ;;  %6116 = vmatmul.mubr.f32.gmra.mrb[110].mxu0 %v17458_v0  ;;  %v17476_v45 = vadd.f32 %v7208_v58, %v21530_v27  ;;  %v9224_v63 = vunpack.i.h.bf16 %v17239_v25  ;;  %v5101_v19 = vsel %vm1122_vm3, %v17382_v11, %v9223_v50  ;;  %v9199_v58 = vunpack.i.h.bf16 %v17390_v46  ;;  %v7274_v25 = vpop.f32.mrb[82].mxu0 }
 0x4aa   :  { %6927 = vmatprep.mubr.msk.f32.mxu0 %vm353_vm0, %v17398_v59  ;;  %v5615_v51 = vsel %vm1138_vm8, %v21532_v5, %v9218_v16  ;;  %v7211_v23 = vadd.f32 %v7210_v37, %v7209_v17  ;;  %v5132_v11 = vsel %vm1138_vm8, %v5116_v36, %v9184_v21  ;;  %v5571_v27 = vsel %vm1122_vm3, %v5552_v53, %v9194_v49  ;;  %v7275_v0 = vpop.f32.mrb[83].mxu0  ;;  %v21535_v17 = vld [vmem:[#allocation181_spill] sm:$0xff]  ;;  %v7212_v36 = vpop.f32.mrb[62].mxu1 }
 0x4ab   :  { %v21534_v4 = vunpack.i.l.bf16 %v21533_v20  ;;  %v9227_v6 = vpop.permute.xlu1 %9226  ;;  %v17499_v59 = vadd.f32 %v7273_v10, %v17302_v22  ;;  %v5590_v46 = vsel %vm5003_vm10, %v5571_v27, %v9208_v30  ;;  %v7276_v13 = vadd.f32 %v7275_v0, %v7274_v25  ;;  %v7213_v22 = vpop.f32.mrb[63].mxu1  ;;  %v21537_v10 = vld [vmem:[#allocation204_spill] sm:$0xff] }
 0x4ac   :  { %6195 = vrot.lane.b32.xlu1 %v21531_v57, %s9472_s16  ;;  %v9228_v55 = vunpack.i.l.bf16 %v9227_v6  ;;  %v17503_v37 = vadd.f32 %v7211_v23, %v21535_v17  ;;  %v17505_v21 = vpop.permute.xlu0 %9311  ;;  %v5616_v49 = vsel %vm1138_vm8, %v5590_v46, %v9218_v16  ;;  %v9229_v53 = vunpack.i.h.bf16 %v9227_v6  ;;  %v21539_v25 = vld [vmem:[#allocation232_spill] sm:$0xff]  ;;  %v7277_v27 = vpop.f32.mrb[84].mxu0 }
 0x4ad   :  { %v5645_v57 = vsel %vm5030_vm11, %v5615_v51, %v21534_v4  ;;  %v21536_v4 = vld [vmem:[#allocation173_spill] sm:$0xff]  ;;  %v5148_v51 = vsel %vm5030_vm11, %v5132_v11, %v9213_v8  ;;  %v21538_v50 = vunpack.i.h.bf16 %v21537_v10  ;;  %v9243_v30 = vunpack.i.l.bf16 %v17288_v9 }
 0x4ae   :  { %v5553_v23 = vsel %vm353_vm0, %v21539_v25, %v9199_v58  ;;  %v5164_v17 = vsel %vm1154_vm9, %v5148_v51, %v9228_v55  ;;  %v7214_v16 = vadd.f32 %v7213_v22, %v7212_v36  ;;  %v9209_v6 = vunpack.i.h.bf16 %v17436_v41 }
 0x4af   :  { %v5675_v0 = vsel %vm1154_vm9, %v5645_v57, %v21538_v50  ;;  %v9219_v46 = vunpack.i.h.bf16 %v17460_v2  ;;  %v17520_v8 = vpop.permute.xlu1 %9236  ;;  %v21540_v11 = vunpack.i.h.bf16 %v17182_v52  ;;  %v17526_v57 = vadd.f32 %v7276_v13, %v17339_v47  ;;  %v7465_v2 = vpop.f32.mrb[64].mxu1  ;;  %v21543_v47 = vld [vmem:[#allocation110_spill] sm:$0xff] }
 0x4b0   :  { %6199 = vrot.lane.b32.xlu1 %v21536_v4, %s9472_s16  ;;  %v7278_v4 = vpop.f32.mrb[85].mxu0  ;;  %v21541_v58 = vunpack.i.h.bf16 %v17209_v44  ;;  %v9238_v36 = vunpack.i.l.bf16 %v17520_v8  ;;  %v17532_v41 = vpop.permute.xlu0 %9321  ;;  %v21542_v51 = vunpack.i.l.bf16 %v21488_v3  ;;  %v21544_v44 = vld [vmem:[#allocation113_spill] sm:$0xff] }
 0x4b1   :  { %v5180_v50 = vsel %vm5061_vm12, %v5164_v17, %v21540_v11  ;;  %v7279_v55 = vadd.f32 %v7278_v4, %v7277_v27  ;;  %v9263_v17 = vunpack.i.l.bf16 %v17341_v33  ;;  %v17540_v11 = vadd.f32 %v7214_v16, %v21543_v47  ;;  %v3912_v4 = vpop.f32.mrb[65].mxu1  ;;  %v21551_v16 = vld [vmem:[#allocation241_spill] sm:$0xff] }
 0x4b2   :  { %v5646_v25 = vsel %vm5030_vm11, %v5616_v49, %v21541_v58  ;;  %5975 = vmatprep.mubr.f32.mxu1 %v5180_v50  ;;  %v5705_v22 = vsel %vm5061_vm12, %v5675_v0, %v21542_v51  ;;  %v21545_v49 = vld [vmem:[#allocation253_spill] sm:$0xff]  ;;  %v3918_v27 = vadd.f32 %v7465_v2, %v17254_v29  ;;  %v5572_v50 = vsel %vm1122_vm3, %v5553_v23, %v9224_v63  ;;  %v7280_v0 = vpop.f32.mrb[86].mxu0  ;;  %v21546_v2 = vld [vmem:[#allocation235_spill] sm:$0xff] }
 0x4b3   :  { %v5676_v13 = vsel %vm1154_vm9, %v5646_v25, %v9229_v53  ;;  %5976 = vmatmul.mubr.f32.gmra.mrb[96].mxu1 %v21545_v49  ;;  %v3913_v51 = vadd.f32 %v3912_v4, %v17229_v62  ;;  %v17550_v53 = vadd.f32 %v7279_v55, %v17374_v42  ;;  %v5117_v25 = vsel %vm5003_vm10, %v5101_v19, %v9209_v6  ;;  %v7281_v47 = vpop.f32.mrb[87].mxu0  ;;  %v7468_v55 = vpop.f32.mrb[66].mxu1 }
 0x4b4   :  { %6203 = vrot.lane.b32.xlu1 %v21544_v44, %s9472_s16  ;;  %v5706_v58 = vsel %vm5061_vm12, %v5676_v13, %v9238_v36  ;;  %v17554_v44 = vpop.permute.xlu1 %9246  ;;  %v5791_v49 = vrot.slane %v5705_v22, 1  ;;  %6243 = vrot.lane.b32.xlu0 %v3918_v27, %s9470_s15  ;;  %v9253_v63 = vunpack.i.l.bf16 %v17308_v60  ;;  %v5133_v23 = vsel %vm1138_vm8, %v5117_v25, %v9219_v46  ;;  %v17560_v42 = vpop.permute.xlu0 %9331  ;;  %v21548_v13 = vld [vmem:[#allocation217_spill] sm:$0xff] }
 0x4b5   :  { %v5792_v29 = vrot.slane %v5706_v58, 1  ;;  %v7282_v36 = vadd.f32 %v7281_v47, %v7280_v0  ;;  %v9248_v62 = vunpack.i.l.bf16 %v17554_v44  ;;  %v5554_v19 = vsel %vm353_vm0, %v21546_v2, %v9263_v17  ;;  %v3922_v4 = vpop.f32.mrb[67].mxu1  ;;  %v21549_v0 = vld [vmem:[#allocation199_spill] sm:$0xff]  ;;  %v7283_v17 = vpop.f32.mrb[88].mxu0 }
 0x4b6   :  { %v21547_v6 = vunpack.i.l.bf16 %v17267_v26  ;;  %v3928_v46 = vadd.f32 %v7468_v55, %v17332_v35  ;;  %v19273_v58 = vunpack.i.l.bf16 %v17407_v39  ;;  %v3923_v2 = vadd.f32 %v3922_v4, %v17355_v31  ;;  %v7471_v4 = vpop.f32.mrb[68].mxu1 }
 0x4b7   :  { %v5793_v27 = vsel %vm724_vm5, %v5791_v49, %v5792_v29  ;;  %v5617_v25 = vsel %vm1138_vm8, %v21549_v0, %v9248_v62  ;;  %v7284_v29 = vpop.f32.mrb[89].mxu0  ;;  %v5149_v55 = vsel %vm5030_vm11, %v5133_v23, %v9243_v30  ;;  %v9239_v30 = vunpack.i.h.bf16 %v17520_v8 }
 0x4b8   :  { %v5591_v22 = vsel %vm5003_vm10, %v5572_v50, %v21547_v6  ;;  %6207 = vrot.lane.b32.xlu1 %v21548_v13, %s9472_s16  ;;  %6121 = vmatmul.mubr.f32.gmra.mrb[112].mxu0 %v5793_v27  ;;  %v9273_v50 = vunpack.i.l.bf16 %v17370_v14  ;;  %v21550_v6 = vunpack.i.h.bf16 %v21533_v20  ;;  %v9257_v35 = vpop.permute.xlu1 %9256  ;;  %v17584_v13 = vadd.f32 %v7282_v36, %v17405_v56  ;;  %v17586_v31 = vpop.permute.xlu0 %9341 }
 0x4b9   :  { %v5618_v47 = vsel %vm1138_vm8, %v5591_v22, %v9248_v62  ;;  %6928 = vmatprep.mubr.msk.f32.mxu0 %vm353_vm0, %v17414_v43  ;;  %v7285_v62 = vadd.f32 %v7284_v29, %v7283_v17  ;;  %v9259_v22 = vunpack.i.h.bf16 %v9257_v35  ;;  %v9258_v27 = vunpack.i.l.bf16 %v9257_v35  ;;  %6245 = vrot.lane.b32.xlu0 %v3923_v2, %s9470_s15  ;;  %v3932_v36 = vpop.f32.mrb[69].mxu1  ;;  %v21555_v2 = vld [vmem:[#allocation163_spill] sm:$0xff]  ;;  %v7286_v35 = vpop.f32.mrb[90].mxu0 }
 0x4ba   :  { %v5647_v49 = vsel %vm5030_vm11, %v5617_v25, %v21550_v6  ;;  %v21552_v25 = vunpack.i.l.bf16 %v21551_v16  ;;  %v21553_v23 = vunpack.i.h.bf16 %v17288_v9  ;;  %v3938_v56 = vadd.f32 %v7471_v4, %v17401_v24  ;;  %v7287_v4 = vpop.f32.mrb[91].mxu0 }
 0x4bb   :  { %v21554_v17 = vunpack.i.h.bf16 %v21488_v3  ;;  %v5165_v9 = vsel %vm1154_vm9, %v5149_v55, %v9258_v27 }
 0x4bc   :  { %v5677_v6 = vsel %vm1154_vm9, %v5647_v49, %v21552_v25  ;;  %v5648_v43 = vsel %vm5030_vm11, %v5618_v47, %v21553_v23  ;;  %6241 = vrot.lane.b32.xlu1 %v3913_v51, %s9470_s15  ;;  %v5619_v49 = vsel %vm1138_vm8, %v21555_v2, %v19273_v58  ;;  %v3933_v47 = vadd.f32 %v3932_v36, %v17464_v54  ;;  %v21556_v51 = vld [vmem:[#allocation300_spill] sm:$0xff]  ;;  %v17610_v25 = vpop.permute.xlu1 %9266  ;;  %v17618_v55 = vpop.permute.xlu0 %9351 }
 0x4bd   :  { %v5707_v29 = vsel %vm5061_vm12, %v5677_v6, %v21554_v17  ;;  %v5678_v8 = vsel %vm1154_vm9, %v5648_v43, %v9259_v22  ;;  %v5102_v24 = vsel %vm1122_vm3, %v21556_v51, %v9253_v63  ;;  %v5181_v6 = vsel %vm5061_vm12, %v5165_v9, %v9239_v30  ;;  %v7474_v43 = vpop.f32.mrb[70].mxu1  ;;  %v21557_v63 = vld [vmem:[#allocation69_spill] sm:$0xff] }
 0x4be   :  { %v5708_v23 = vsel %vm5061_vm12, %v5678_v8, %v9273_v50  ;;  %v17615_v17 = vadd.f32 %v7285_v62, %v17449_v61  ;;  %v7288_v58 = vadd.f32 %v7287_v4, %v7286_v35  ;;  %v9268_v22 = vunpack.i.l.bf16 %v17610_v25  ;;  %5980 = vmatprep.mubr.f32.mxu1 %v5181_v6  ;;  %6249 = vrot.lane.b32.xlu0 %v3933_v47, %s9470_s15  ;;  %v21560_v8 = vld [vmem:[#allocation58_spill] sm:$0xff]  ;;  %v3942_v35 = vpop.f32.mrb[71].mxu1  ;;  %v7289_v47 = vpop.f32.mrb[92].mxu0 }
 0x4bf   :  { %v5797_v54 = vrot.slane %v5707_v29, 1  ;;  %v5798_v27 = vrot.slane %v5708_v23, 1  ;;  %v21558_v36 = vunpack.i.l.bf16 %v21557_v63  ;;  %v9249_v50 = vunpack.i.h.bf16 %v17554_v44  ;;  %5981 = vmatmul.mubr.f32.gmra.mrb[98].mxu1 %v21560_v8  ;;  %v7290_v6 = vpop.f32.mrb[93].mxu0 }
 0x4c0   :  { %v21559_v61 = vunpack.i.h.bf16 %v17308_v60  ;;  %6247 = vrot.lane.b32.xlu1 %v3928_v46, %s9470_s15  ;;  %v3948_v29 = vadd.f32 %v7474_v43, %v17467_v12  ;;  %v3833_v44 = vadd.f32 %v7288_v58, %v17476_v45  ;;  %v9274_v60 = vunpack.i.h.bf16 %v17370_v14  ;;  %v9277_v23 = vpop.permute.xlu1 %9276 }
 0x4c1   :  { %v5649_v30 = vsel %vm5030_vm11, %v5619_v49, %v21558_v36  ;;  %v5799_v51 = vsel %vm724_vm5, %v5797_v54, %v5798_v27  ;;  %v3943_v49 = vadd.f32 %v3942_v35, %v17470_v15  ;;  %v9293_v46 = vunpack.i.l.bf16 %v17445_v1  ;;  %v17641_v27 = vpop.permute.xlu0 %9361  ;;  %v7477_v15 = vpop.f32.mrb[72].mxu1 }
 0x4c2   :  { %v5573_v62 = vsel %vm1122_vm3, %v5554_v19, %v21559_v61  ;;  %v9294_v19 = vunpack.i.h.bf16 %v17445_v1  ;;  %v21561_v4 = vunpack.i.h.bf16 %v17267_v26  ;;  %6126 = vmatmul.mubr.f32.gmra.mrb[114].mxu0 %v5799_v51  ;;  %v9279_v43 = vunpack.i.h.bf16 %v9277_v23  ;;  %v3952_v61 = vpop.f32.mrb[73].mxu1 }
 0x4c3   :  { %v5592_v9 = vsel %vm5003_vm10, %v5573_v62, %v9268_v22  ;;  %v7291_v22 = vadd.f32 %v7290_v6, %v7289_v47  ;;  %v9278_v54 = vunpack.i.l.bf16 %v9277_v23  ;;  %6253 = vrot.lane.b32.xlu0 %v3943_v49, %s9470_s15  ;;  %6929 = vmatprep.mubr.msk.f32.mxu0 %vm353_vm0, %v17428_v38  ;;  %v21562_v1 = vunpack.i.h.bf16 %v21551_v16  ;;  %v7292_v38 = vpop.f32.mrb[94].mxu0 }
 0x4c4   :  { %v5118_v12 = vsel %vm5003_vm10, %v5102_v24, %v21561_v4  ;;  %v9303_v14 = vunpack.i.l.bf16 %v17478_v48  ;;  %v21563_v58 = vunpack.i.l.bf16 %v17407_v39  ;;  %6251 = vrot.lane.b32.xlu1 %v3938_v56, %s9470_s15  ;;  %v3958_v36 = vadd.f32 %v7477_v15, %v17526_v57  ;;  %v7293_v47 = vpop.f32.mrb[95].mxu0  ;;  %v17661_v51 = vpop.permute.xlu1 %9286  ;;  %v21564_v56 = vld [vmem:[#allocation282_spill] sm:$0xff]  ;;  %v21566_v4 = vld [vmem:[#allocation295_spill] sm:$0xff] }
 0x4c5   :  { %v5679_v26 = vsel %vm1154_vm9, %v5649_v30, %v21562_v1  ;;  %v5134_v45 = vsel %vm1138_vm8, %v5118_v12, %v9249_v50  ;;  %v3953_v8 = vadd.f32 %v3952_v61, %v17499_v59  ;;  %v3838_v35 = vadd.f32 %v7291_v22, %v17503_v37  ;;  %v7480_v37 = vpop.f32.mrb[74].mxu1  ;;  %v21569_v22 = vld [vmem:[#allocation97_spill] sm:$0xff] }
 0x4c6   :  { %v5620_v24 = vsel %vm1138_vm8, %v5592_v9, %v21563_v58  ;;  %v5150_v30 = vsel %vm5030_vm11, %v5134_v45, %v9278_v54  ;;  %v21565_v49 = vunpack.i.l.bf16 %v21564_v56  ;;  %v5813_v12 = vrot.slane %v21566_v4, 1  ;;  %v21570_v45 = vld [vmem:[#allocation71_spill] sm:$0xff] }
 0x4c7   :  { %v5650_v62 = vsel %vm5030_vm11, %v5620_v24, %v9279_v43  ;;  %v5166_v9 = vsel %vm1154_vm9, %v5150_v30, %v9293_v46  ;;  %v7294_v6 = vadd.f32 %v7293_v47, %v7292_v38  ;;  %v9288_v59 = vunpack.i.l.bf16 %v17661_v51  ;;  %v17670_v43 = vpop.permute.xlu0 %9371  ;;  %6257 = vrot.lane.b32.xlu0 %v3953_v8, %s9470_s15 }
 0x4c8   :  { %v5680_v50 = vsel %vm1154_vm9, %v5650_v62, %v9294_v19  ;;  %v5709_v57 = vsel %vm5061_vm12, %v5679_v26, %v21565_v49  ;;  %v5182_v23 = vsel %vm5061_vm12, %v5166_v9, %v9274_v60  ;;  %6255 = vrot.lane.b32.xlu1 %v3948_v29, %s9470_s15  ;;  %v21567_v19 = vld [vmem:[#allocation154_spill] sm:$0xff]  ;;  %v3968_v15 = vadd.f32 %v7480_v37, %v17584_v13  ;;  %v3962_v26 = vpop.f32.mrb[75].mxu1  ;;  %v21572_v62 = vld [vmem:[#allocation7_spill] sm:$0xff]  ;;  %v17687_v30 = vpop.permute.xlu1 %9296  ;;  %v21574_v9 = vld [vmem:[#allocation176_spill] sm:$0xff] }
 0x4c9   :  { %5985 = vmatprep.mubr.f32.mxu1 %v5182_v23  ;;  %v21568_v46 = vunpack.i.h.bf16 %v21567_v19  ;;  %v5710_v1 = vsel %vm5061_vm12, %v5680_v50, %v9303_v14  ;;  %v21571_v60 = vunpack.i.h.bf16 %v21570_v45  ;;  %v5803_v24 = vrot.slane %v5709_v57, 1  ;;  %v7483_v13 = vpop.f32.mrb[76].mxu1  ;;  %v21575_v23 = vld [vmem:[#allocation56_spill] sm:$0xff] }
 0x4ca   :  { %v5804_v61 = vrot.slane %v5710_v1, 1  ;;  %v3963_v29 = vadd.f32 %v3962_v26, %v17550_v53  ;;  %v8674_v38 = vunpack.i.h.bf16 %v21572_v62  ;;  %v3843_v14 = vadd.f32 %v7294_v6, %v17540_v11 }
 0x4cb   :  { %v5071_v54 = vsel %vm5061_vm12, %v21569_v22, %v21568_v46  ;;  %v5087_v58 = vsel %vm353_vm0, %v21363_v32, %v21571_v60  ;;  %v21573_v50 = vrot.slane %v21524_v40, 1  ;;  %v8708_v32 = vunpack.i.l.bf16 %v21574_v9  ;;  %v17696_v53 = vpop.permute.xlu0 %9381 }
 0x4cc   :  { %5986 = vmatmul.mubr.f32.gmra.mrb[100].mxu1 %v5071_v54  ;;  %v5103_v8 = vsel %vm1122_vm3, %v5087_v58, %v9288_v59  ;;  %v9269_v49 = vunpack.i.h.bf16 %v17610_v25  ;;  %v5805_v57 = vsel %vm724_vm5, %v5803_v24, %v5804_v61  ;;  %v3978_v4 = vadd.f32 %v7483_v13, %v3833_v44  ;;  %6261 = vrot.lane.b32.xlu0 %v3963_v29, %s9470_s15  ;;  %v3972_v59 = vpop.f32.mrb[77].mxu1  ;;  %v21577_v25 = vld [vmem:[#allocation236_spill] sm:$0xff]  ;;  %v9307_v1 = vpop.permute.xlu1 %9306 }
 0x4cd   :  { %v5814_v47 = vsel %vm724_vm5, %v21573_v50, %v5813_v12  ;;  %v8764_v37 = vunpack.i.h.bf16 %v21575_v23  ;;  %6131 = vmatmul.mubr.f32.gmra.mrb[116].mxu0 %v5805_v57  ;;  %6259 = vrot.lane.b32.xlu1 %v3958_v36, %s9470_s15  ;;  %v3973_v11 = vadd.f32 %v3972_v59, %v17615_v17  ;;  %v21576_v12 = vld [vmem:[#allocation140_spill] sm:$0xff]  ;;  %v4988_v46 = vsel %vm353_vm0, %v21577_v25, %v8674_v38  ;;  %v7486_v26 = vpop.f32.mrb[78].mxu1 }
 0x4ce   :  { %v8739_v6 = vunpack.i.h.bf16 %v21576_v12  ;;  %v5119_v19 = vsel %vm5003_vm10, %v5103_v8, %v9269_v49  ;;  %6930 = vmatprep.mubr.msk.f32.mxu0 %vm353_vm0, %v5814_v47  ;;  %v9284_v44 = vunpack.i.h.bf16 %v17407_v39  ;;  %v9313_v22 = vunpack.i.l.bf16 %v17505_v21  ;;  %v3982_v24 = vpop.f32.mrb[79].mxu1  ;;  %v21579_v47 = vld [vmem:[#allocation237_spill] sm:$0xff] }
 0x4cf   :  { %v9323_v54 = vunpack.i.l.bf16 %v17532_v41  ;;  %v5001_v36 = vsel %vm1122_vm3, %v4988_v46, %v8708_v32  ;;  %v9264_v17 = vunpack.i.h.bf16 %v17341_v33  ;;  %v9308_v45 = vunpack.i.l.bf16 %v9307_v1  ;;  %v17712_v60 = vpop.permute.xlu0 %9391  ;;  %v21583_v46 = vld [vmem:[#allocation308_spill] sm:$0xff] }
 0x4d0   :  { %v17714_v58 = vadd.f32 %v7486_v26, %v3843_v14  ;;  %6265 = vrot.lane.b32.xlu0 %v3973_v11, %s9470_s15  ;;  %v9289_v39 = vunpack.i.h.bf16 %v17661_v51  ;;  %v3983_v61 = vadd.f32 %v3982_v24, %v3838_v35  ;;  %v5135_v29 = vsel %vm1138_vm8, %v5119_v19, %v9284_v44  ;;  %v17730_v14 = vpop.permute.xlu1 %9316  ;;  %v21582_v19 = vld [vmem:[#allocation80_spill] sm:$0xff] }
 0x4d1   :  { %6263 = vrot.lane.b32.xlu1 %v3968_v15, %s9470_s15  ;;  %v5025_v62 = vsel %vm1138_vm8, %v21532_v5, %v8764_v37  ;;  %v17723_v33 = vsel %vm5003_vm10, %v5001_v36, %v8739_v6  ;;  %v9304_v38 = vunpack.i.h.bf16 %v17478_v48  ;;  %v9298_v8 = vunpack.i.l.bf16 %v17687_v30 }
 0x4d2   :  { %v5151_v13 = vsel %vm5030_vm11, %v5135_v29, %v9308_v45  ;;  %v5621_v51 = vsel %vm1138_vm8, %v17723_v33, %v9313_v22  ;;  %v21578_v15 = vunpack.i.l.bf16 %v21533_v20  ;;  %v8809_v50 = vunpack.i.h.bf16 %v21557_v63 }
 0x4d3   :  { %v5167_v35 = vsel %vm1154_vm9, %v5151_v13, %v9323_v54  ;;  %v5555_v48 = vsel %vm353_vm0, %v21579_v47, %v9264_v17  ;;  %v21580_v49 = vunpack.i.h.bf16 %v21537_v10  ;;  %v17743_v59 = vpop.permute.xlu0 %9396  ;;  %v21581_v37 = vunpack.i.l.bf16 %v21488_v3  ;;  %v21584_v54 = vld [vmem:[#allocation247_spill] sm:$0xff] }
 0x4d4   :  { %v5041_v5 = vsel %vm5030_vm11, %v5025_v62, %v21578_v15  ;;  %v5183_v32 = vsel %vm5061_vm12, %v5167_v35, %v9304_v38  ;;  %6269 = vrot.lane.b32.xlu0 %v3983_v61, %s9470_s15  ;;  %v5574_v23 = vsel %vm1122_vm3, %v5555_v48, %v9289_v39  ;;  %v5651_v12 = vsel %vm5030_vm11, %v5621_v51, %v8809_v50  ;;  %v21585_v62 = vld [vmem:[#allocation111_spill] sm:$0xff]  ;;  %v21588_v48 = vld [vmem:[#allocation172_spill] sm:$0xff] }
 0x4d5   :  { %v5056_v57 = vsel %vm1154_vm9, %v5041_v5, %v21580_v49  ;;  %6267 = vrot.lane.b32.xlu1 %v3978_v4, %s9470_s15  ;;  %5990 = vmatprep.mubr.f32.mxu1 %v5183_v32  ;;  %v5593_v10 = vsel %vm5003_vm10, %v5574_v23, %v9298_v8  ;;  %v9309_v6 = vunpack.i.h.bf16 %v9307_v1  ;;  %v8678_v25 = vunpack.i.l.bf16 %v21582_v19  ;;  %v17758_v4 = vpop.permute.xlu1 %9326  ;;  %v21586_v8 = vld [vmem:[#allocation238_spill] sm:$0xff] }
 0x4d6   :  { %v5072_v11 = vsel %vm5061_vm12, %v5056_v57, %v21581_v37  ;;  %v8848_v44 = vunpack.i.l.bf16 %v21583_v46  ;;  %v8918_v26 = vunpack.i.l.bf16 %v21584_v54  ;;  %v9318_v36 = vunpack.i.l.bf16 %v17730_v14  ;;  %v21589_v57 = vld [vmem:[#allocation299_spill] sm:$0xff] }
 0x4d7   :  { %5991 = vmatmul.mubr.f32.gmra.mrb[102].mxu1 %v5072_v11  ;;  %v17761_v17 = vpop.permute.xlu0 %9406  ;;  %v8709_v45 = vunpack.i.h.bf16 %v21574_v9  ;;  %v9324_v24 = vunpack.i.h.bf16 %v17532_v41  ;;  %v5622_v39 = vsel %vm1138_vm8, %v5593_v10, %v9313_v22  ;;  %v8884_v61 = vunpack.i.h.bf16 %v21564_v56  ;;  %v21587_v41 = vld [vmem:[#allocation245_spill] sm:$0xff] }
 0x4d8   :  { %v5681_v1 = vsel %vm1154_vm9, %v5651_v12, %v8848_v44  ;;  %v5652_v29 = vsel %vm5030_vm11, %v5622_v39, %v9309_v6  ;;  %v8743_v38 = vunpack.i.l.bf16 %v21585_v62  ;;  %v4989_v13 = vsel %vm353_vm0, %v21586_v8, %v8678_v25 }
 0x4d9   :  { %v5088_v9 = vsel %vm353_vm0, %v21394_v34, %v8918_v26  ;;  %v9337_v51 = vpop.permute.xlu1 %9336  ;;  %v5818_v35 = vrot.slane %v21587_v41, 1  ;;  %v5711_v47 = vsel %vm5061_vm12, %v5681_v1, %v8884_v61  ;;  %v5819_v32 = vrot.slane %v21588_v48, 1 }
 0x4da   :  { %v5104_v22 = vsel %vm1122_vm3, %v5088_v9, %v9318_v36  ;;  %v9338_v15 = vunpack.i.l.bf16 %v9337_v51  ;;  %v5002_v49 = vsel %vm1122_vm3, %v4989_v13, %v8709_v45  ;;  %v8768_v23 = vunpack.i.l.bf16 %v21589_v57 }
 0x4db   :  { %v17778_v5 = vpop.permute.xlu0 %9416  ;;  %v9299_v34 = vunpack.i.h.bf16 %v17687_v30  ;;  %v5682_v37 = vsel %vm1154_vm9, %v5652_v29, %v9324_v24  ;;  %v8919_v11 = vunpack.i.h.bf16 %v21584_v54  ;;  %v9328_v12 = vunpack.i.l.bf16 %v17758_v4 }
 0x4dc   :  { %v5712_v10 = vsel %vm5061_vm12, %v5682_v37, %v9338_v15  ;;  %v9353_v6 = vunpack.i.l.bf16 %v17618_v55  ;;  %v5809_v26 = vrot.slane %v5711_v47, 1  ;;  %v9314_v45 = vunpack.i.h.bf16 %v17505_v21 }
 0x4dd   :  { %v5120_v19 = vsel %vm5003_vm10, %v5104_v22, %v9299_v34  ;;  %v9347_v25 = vpop.permute.xlu1 %9346  ;;  %v5810_v36 = vrot.slane %v5712_v10, 1  ;;  %v17795_v30 = vsel %vm5003_vm10, %v5002_v49, %v8743_v38  ;;  %v5820_v54 = vsel %vm724_vm5, %v5818_v35, %v5819_v32  ;;  %v21590_v38 = vld [vmem:[#allocation239_spill] sm:$0xff] }
 0x4de   :  { %v9348_v39 = vunpack.i.l.bf16 %v9347_v25  ;;  %v8769_v1 = vunpack.i.h.bf16 %v21589_v57  ;;  %v5026_v29 = vsel %vm1138_vm8, %v21549_v0, %v8768_v23  ;;  %v9343_v62 = vunpack.i.l.bf16 %v17586_v31 }
 0x4df   :  { %v17797_v24 = vpop.permute.xlu0 %4696  ;;  %v5811_v8 = vsel %vm724_vm5, %v5809_v26, %v5810_v36  ;;  %v5089_v21 = vsel %vm353_vm0, %v21496_v7, %v8919_v11  ;;  %v9334_v13 = vunpack.i.h.bf16 %v17560_v42  ;;  %v5556_v9 = vsel %vm353_vm0, %v21590_v38, %v9328_v12  ;;  %v21591_v7 = vld [vmem:[#allocation216_spill] sm:$0xff] }
 0x4e0   :  { %6136 = vmatmul.mubr.f32.gmra.mrb[118].mxu0 %v5811_v8  ;;  %v5136_v35 = vsel %vm1138_vm8, %v5120_v19, %v9314_v45  ;;  %v5105_v22 = vsel %vm1122_vm3, %v5089_v21, %v9353_v6  ;;  %v9319_v15 = vunpack.i.h.bf16 %v17730_v14  ;;  %v9349_v0 = vunpack.i.h.bf16 %v9347_v25 }
 0x4e1   :  { %v5623_v47 = vsel %vm1138_vm8, %v17795_v30, %v9348_v39  ;;  %v9357_v48 = vpop.permute.xlu1 %9356  ;;  %6931 = vmatprep.mubr.msk.f32.mxu0 %vm353_vm0, %v5820_v54  ;;  %v8813_v32 = vunpack.i.l.bf16 %v21591_v7  ;;  %v9333_v49 = vunpack.i.l.bf16 %v17560_v42  ;;  %v21592_v34 = vunpack.i.h.bf16 %v21533_v20  ;;  %v21619_v7 = vld [vmem:[#allocation77_spill] sm:$0xff] }
 0x4e2   :  { %v9358_v57 = vunpack.i.l.bf16 %v9357_v48  ;;  %v5027_v14 = vsel %vm1138_vm8, %v21555_v2, %v8769_v1  ;;  %v5575_v11 = vsel %vm1122_vm3, %v5556_v9, %v9319_v15  ;;  %v9339_v12 = vunpack.i.h.bf16 %v9337_v51 }
 0x4e3   :  { %v17818_v23 = vpop.permute.xlu0 %4806  ;;  %v5042_v37 = vsel %vm5030_vm11, %v5026_v29, %v21592_v34  ;;  %v5152_v10 = vsel %vm5030_vm11, %v5136_v35, %v9343_v62  ;;  %v9383_v6 = vunpack.i.l.bf16 %v17696_v53  ;;  %v5121_v19 = vsel %vm5003_vm10, %v5105_v22, %v9334_v13  ;;  %v21596_v22 = vld [vmem:[#allocation98_spill] sm:$0xff] }
 0x4e4   :  { %v5653_v42 = vsel %vm5030_vm11, %v5623_v47, %v8813_v32  ;;  %v5168_v20 = vsel %vm1154_vm9, %v5152_v10, %v9358_v57  ;;  %v8849_v25 = vunpack.i.h.bf16 %v21583_v46  ;;  %v5137_v26 = vsel %vm1138_vm8, %v5121_v19, %v9349_v0 }
 0x4e5   :  { %v17835_v2 = vpop.permute.xlu1 %9366  ;;  %v5184_v51 = vsel %vm5061_vm12, %v5168_v20, %v9339_v12  ;;  %v21593_v36 = vunpack.i.l.bf16 %v21551_v16  ;;  %v5594_v54 = vsel %vm5003_vm10, %v5575_v11, %v9333_v49  ;;  %v21594_v1 = vunpack.i.h.bf16 %v21488_v3 }
 0x4e6   :  { %5995 = vmatprep.mubr.f32.mxu1 %v5184_v51  ;;  %v21595_v8 = vunpack.i.l.bf16 %v21557_v63  ;;  %v9393_v13 = vunpack.i.l.bf16 %v17712_v60  ;;  %v5624_v38 = vsel %vm1138_vm8, %v5594_v54, %v9348_v39  ;;  %v9359_v9 = vunpack.i.h.bf16 %v9357_v48  ;;  %v21598_v39 = vld [vmem:[#allocation205_spill] sm:$0xff] }
 0x4e7   :  { %v5057_v45 = vsel %vm1154_vm9, %v5042_v37, %v21593_v36  ;;  %v17845_v62 = vpop.permute.xlu0 %4914  ;;  %v5683_v35 = vsel %vm1154_vm9, %v5653_v42, %v8849_v25  ;;  %v8888_v3 = vunpack.i.l.bf16 %v21596_v22  ;;  %v9344_v15 = vunpack.i.h.bf16 %v17586_v31 }
 0x4e8   :  { %v5073_v29 = vsel %vm5061_vm12, %v5057_v45, %v21594_v1  ;;  %v5043_v21 = vsel %vm5030_vm11, %v5027_v14, %v21595_v8  ;;  %v5153_v0 = vsel %vm5030_vm11, %v5137_v26, %v9383_v6  ;;  %v21597_v49 = vunpack.i.h.bf16 %v21551_v16  ;;  %v21600_v8 = vld [vmem:[#allocation14_spill] sm:$0xff] }
 0x4e9   :  { %5996 = vmatmul.mubr.f32.gmra.mrb[104].mxu1 %v5073_v29  ;;  %v9377_v47 = vpop.permute.xlu1 %9376  ;;  %v5824_v34 = vrot.slane %v17051_v18, 1  ;;  %v5825_v48 = vrot.slane %v21598_v39, 1  ;;  %v5654_v37 = vsel %vm5030_vm11, %v5624_v38, %v9344_v15  ;;  %v5713_v31 = vsel %vm5061_vm12, %v5683_v35, %v8888_v3  ;;  %v21602_v35 = vld [vmem:[#allocation312_spill] sm:$0xff] }
 0x4ea   :  { %v5058_v57 = vsel %vm1154_vm9, %v5043_v21, %v21597_v49  ;;  %v9379_v14 = vunpack.i.h.bf16 %v9377_v47  ;;  %v9378_v11 = vunpack.i.l.bf16 %v9377_v47  ;;  %v5684_v10 = vsel %vm1154_vm9, %v5654_v37, %v9359_v9  ;;  %v21603_v49 = vld [vmem:[#allocation74_spill] sm:$0xff] }
 0x4eb   :  { %v17864_v12 = vpop.permute.xlu0 %6179  ;;  %v5169_v16 = vsel %vm1154_vm9, %v5153_v0, %v9393_v13  ;;  %v21599_v42 = vunpack.i.l.bf16 %v21564_v56  ;;  %v5815_v26 = vrot.slane %v5713_v31, 1  ;;  %v9329_v36 = vunpack.i.h.bf16 %v17758_v4  ;;  %v21601_v13 = vld [vmem:[#allocation29_spill] sm:$0xff]  ;;  %v21605_v31 = vld [vmem:[#allocation16_spill] sm:$0xff] }
 0x4ec   :  { %v5714_v6 = vsel %vm5061_vm12, %v5684_v10, %v9378_v11  ;;  %v5185_v18 = vsel %vm5061_vm12, %v5169_v16, %v9379_v14  ;;  %v5826_v54 = vsel %vm724_vm5, %v5824_v34, %v5825_v48  ;;  %v9409_v1 = vunpack.i.h.bf16 %v17761_v17  ;;  %v21604_v48 = vld [vmem:[#allocation318_spill] sm:$0xff] }
 0x4ed   :  { %v17873_v19 = vpop.permute.xlu1 %9386  ;;  %6000 = vmatprep.mubr.f32.mxu1 %v5185_v18  ;;  %v5074_v20 = vsel %vm5061_vm12, %v5058_v57, %v21599_v42  ;;  %v5816_v51 = vrot.slane %v5714_v6, 1  ;;  %v8773_v38 = vunpack.i.l.bf16 %v21601_v13  ;;  %v9364_v9 = vunpack.i.h.bf16 %v17641_v27 }
 0x4ee   :  { %6001 = vmatmul.mubr.f32.gmra.mrb[106].mxu1 %v5074_v20  ;;  %v8923_v15 = vunpack.i.l.bf16 %v21602_v35  ;;  %v9354_v4 = vunpack.i.h.bf16 %v17618_v55  ;;  %v9363_v0 = vunpack.i.l.bf16 %v17641_v27  ;;  %v5557_v57 = vsel %vm353_vm0, %v21603_v49, %v9329_v36  ;;  %v21608_v49 = vld [vmem:[#allocation26_spill] sm:$0xff] }
 0x4ef   :  { %v6186_v45 = vpop.permute.xlu0 %6185  ;;  %v5817_v29 = vsel %vm724_vm5, %v5815_v26, %v5816_v51  ;;  %v9408_v34 = vunpack.i.l.bf16 %v17761_v17  ;;  %v9418_v39 = vunpack.i.l.bf16 %v17778_v5  ;;  %v9369_v11 = vunpack.i.h.bf16 %v17835_v2 }
 0x4f0   :  { %v17884_v21 = vsel %vm1122_vm3, %v21600_v8, %v6186_v45  ;;  %6141 = vmatmul.mubr.f32.gmra.mrb[120].mxu0 %v5817_v29  ;;  %v9368_v55 = vunpack.i.l.bf16 %v17835_v2  ;;  %v8924_v16 = vunpack.i.h.bf16 %v21602_v35  ;;  %v5559_v17 = vsel %vm353_vm0, %v16033_v28, %v9364_v9  ;;  %v21606_v2 = vld [vmem:[#allocation240_spill] sm:$0xff] }
 0x4f1   :  { %v5225_v47 = vpop.permute.xlu1 %5224  ;;  %6932 = vmatprep.mubr.msk.f32.mxu0 %vm353_vm0, %v5826_v54  ;;  %v9373_v6 = vunpack.i.l.bf16 %v17670_v43  ;;  %v5028_v18 = vsel %vm1138_vm8, %v17723_v33, %v8773_v38  ;;  %v5090_v42 = vsel %vm353_vm0, %v21524_v40, %v8923_v15  ;;  %v5558_v20 = vsel %vm353_vm0, %v21606_v2, %v9363_v0  ;;  %v21607_v38 = vld [vmem:[#allocation18_spill] sm:$0xff] }
 0x4f2   :  { %v5560_v37 = vsel %vm353_vm0, %v21604_v48, %v5225_v47  ;;  %v5576_v26 = vsel %vm1122_vm3, %v5557_v57, %v9354_v4  ;;  %v9388_v51 = vunpack.i.l.bf16 %v17873_v19  ;;  %v9374_v45 = vunpack.i.h.bf16 %v17670_v43 }
 0x4f3   :  { %v6190_v14 = vpop.permute.xlu0 %6189  ;;  %v5579_v27 = vsel %vm1122_vm3, %v5560_v37, %v9409_v1  ;;  %v5578_v33 = vsel %vm1122_vm3, %v5559_v17, %v9408_v34  ;;  %v5106_v8 = vsel %vm1122_vm3, %v5090_v42, %v9369_v11  ;;  %v5577_v40 = vsel %vm1122_vm3, %v5558_v20, %v9368_v55 }
 0x4f4   :  { %v17903_v10 = vsel %vm1122_vm3, %v21605_v31, %v6190_v14  ;;  %v5598_v28 = vsel %vm5003_vm10, %v5579_v27, %v9418_v39  ;;  %v9384_v35 = vunpack.i.h.bf16 %v17696_v53  ;;  %v5595_v15 = vsel %vm5003_vm10, %v5576_v26, %v9373_v6  ;;  %v21609_v14 = vld [vmem:[#allocation221_spill] sm:$0xff]  ;;  %v21610_v31 = vld [vmem:[#allocation20_spill] sm:$0xff] }
 0x4f5   :  { %v9402_v36 = vpop.permute.xlu1 %9401  ;;  %v9389_v0 = vunpack.i.h.bf16 %v17873_v19  ;;  %v5625_v47 = vsel %vm1138_vm8, %v5595_v15, %v9388_v51  ;;  %v5628_v57 = vsel %vm1138_vm8, %v5598_v28, %v21608_v49  ;;  %v9394_v48 = vunpack.i.h.bf16 %v17712_v60  ;;  %v21611_v28 = vld [vmem:[#allocation276_spill] sm:$0xff] }
 0x4f6   :  { %v9404_v54 = vunpack.i.h.bf16 %v9402_v36  ;;  %v9403_v1 = vunpack.i.l.bf16 %v9402_v36  ;;  %v9398_v53 = vunpack.i.l.bf16 %v17743_v59  ;;  %v5596_v37 = vsel %vm5003_vm10, %v5577_v40, %v9374_v45  ;;  %v21614_v15 = vld [vmem:[#allocation212_spill] sm:$0xff] }
 0x4f7   :  { %v6194_v29 = vpop.permute.xlu0 %6193  ;;  %v5626_v19 = vsel %vm1138_vm8, %v5596_v37, %v9388_v51  ;;  %v9399_v42 = vunpack.i.h.bf16 %v17743_v59  ;;  %v5655_v60 = vsel %vm5030_vm11, %v5625_v47, %v9384_v35  ;;  %v5658_v2 = vsel %vm5030_vm11, %v5628_v57, %v21609_v14 }
 0x4f8   :  { %v17924_v9 = vsel %vm1122_vm3, %v21607_v38, %v6194_v29  ;;  %v5597_v43 = vsel %vm5003_vm10, %v5578_v33, %v9404_v54  ;;  %v5122_v4 = vsel %vm5003_vm10, %v5106_v8, %v9403_v1  ;;  %v5044_v20 = vsel %vm5030_vm11, %v5028_v18, %v8809_v50  ;;  %v21613_v8 = vld [vmem:[#allocation170_spill] sm:$0xff] }
 0x4f9   :  { %v5627_v34 = vsel %vm1138_vm8, %v5597_v43, %v21608_v49  ;;  %v5138_v6 = vsel %vm1138_vm8, %v5122_v4, %v9389_v0  ;;  %v5091_v26 = vsel %vm353_vm0, %v21587_v41, %v8924_v16  ;;  %v5059_v45 = vsel %vm1154_vm9, %v5044_v20, %v8848_v44  ;;  %v21612_v16 = vld [vmem:[#allocation22_spill] sm:$0xff] }
 0x4fa   :  { %v9412_v39 = vpop.permute.xlu1 %9411  ;;  %v5657_v11 = vsel %vm5030_vm11, %v5627_v34, %v21609_v14  ;;  %v5656_v54 = vsel %vm5030_vm11, %v5626_v19, %v9398_v53  ;;  %v5154_v63 = vsel %vm5030_vm11, %v5138_v6, %v9399_v42  ;;  %v5685_v41 = vsel %vm1154_vm9, %v5655_v60, %v9394_v48  ;;  %v21615_v48 = vld [vmem:[#allocation266_spill] sm:$0xff]  ;;  %v21616_v14 = vld [vmem:[#allocation24_spill] sm:$0xff] }
 0x4fb   :  { %v6198_v55 = vpop.permute.xlu0 %6197  ;;  %v9413_v27 = vunpack.i.l.bf16 %v9412_v39  ;;  %v9414_v51 = vunpack.i.h.bf16 %v9412_v39  ;;  %v5687_v59 = vsel %vm1154_vm9, %v5657_v11, %v21611_v28  ;;  %v5688_v44 = vsel %vm1154_vm9, %v5658_v2, %v21613_v8 }
 0x4fc   :  { %v17944_v17 = vsel %vm1122_vm3, %v21610_v31, %v6198_v55  ;;  %v9419_v40 = vunpack.i.h.bf16 %v17778_v5  ;;  %v5717_v43 = vsel %vm5061_vm12, %v5687_v59, %v21614_v15  ;;  %v5107_v4 = vsel %vm1122_vm3, %v5091_v26, %v17797_v24  ;;  %v21617_v31 = vld [vmem:[#allocation133_spill] sm:$0xff] }
 0x4fd   :  { %v5686_v50 = vsel %vm1154_vm9, %v5656_v54, %v9413_v27  ;;  %v5170_v47 = vsel %vm1154_vm9, %v5154_v63, %v9414_v51  ;;  %v8774_v34 = vunpack.i.h.bf16 %v21601_v13  ;;  %v5718_v53 = vsel %vm5061_vm12, %v5688_v44, %v21615_v48 }
 0x4fe   :  { %v9422_v36 = vpop.permute.xlu1 %9421  ;;  %v5075_v37 = vsel %vm5061_vm12, %v5059_v45, %v8884_v61  ;;  %v5827_v55 = vrot.slane %v5717_v43, 1  ;;  %v5123_v13 = vsel %vm5003_vm10, %v5107_v4, %v9419_v40  ;;  %v5828_v56 = vrot.slane %v5718_v53, 1 }
 0x4ff   :  { %v9424_v1 = vunpack.i.h.bf16 %v9422_v36  ;;  %v9423_v29 = vunpack.i.l.bf16 %v9422_v36  ;;  %v6202_v33 = vpop.permute.xlu0 %6201  ;;  %v5139_v19 = vsel %vm1138_vm8, %v5123_v13, %v17818_v23  ;;  %v5029_v6 = vsel %vm1138_vm8, %v17795_v30, %v8774_v34 }
 0x500   :  { %v17967_v18 = vsel %vm1122_vm3, %v21612_v16, %v6202_v33  ;;  %v5829_v42 = vsel %vm724_vm5, %v5827_v55, %v5828_v56  ;;  %v5045_v2 = vsel %vm5030_vm11, %v5029_v6, %v8813_v32  ;;  %v21618_v23 = vunpack.i.l.bf16 %v17182_v52 }
 0x501   :  { %v5715_v38 = vsel %vm5061_vm12, %v5685_v41, %v9423_v29  ;;  %v5716_v35 = vsel %vm5061_vm12, %v5686_v50, %v9424_v1  ;;  %v5060_v26 = vsel %vm1154_vm9, %v5045_v2, %v8849_v25 }
 0x502   :  { %v4961_v0 = vpop.permute.xlu1 %4960  ;;  %v5821_v49 = vrot.slane %v5715_v38, 1  ;;  %v5822_v57 = vrot.slane %v5716_v35, 1  ;;  %v5076_v30 = vsel %vm5061_vm12, %v5060_v26, %v8888_v3 }
 0x503   :  { %v5186_v39 = vsel %vm5061_vm12, %v5170_v47, %v4961_v0  ;;  %v6206_v5 = vpop.permute.xlu0 %6205 }
 0x504   :  { %6005 = vmatprep.mubr.f32.mxu1 %v5186_v39  ;;  %v5823_v24 = vsel %vm724_vm5, %v5821_v49, %v5822_v57  ;;  %v17989_v11 = vsel %vm1122_vm3, %v21616_v14, %v6206_v5 }
 0x505   :  { %6006 = vmatmul.mubr.f32.gmra.mrb[108].mxu1 %v5075_v37  ;;  %6146 = vmatmul.mubr.f32.gmra.mrb[122].mxu0 %v5823_v24 }
 0x506   :  { %v4861_v27 = vpop.permute.xlu1 %4860  ;;  %6933 = vmatprep.mubr.msk.f32.mxu0 %vm353_vm0, %v21617_v31 }
 0x507   :  { %v5155_v61 = vsel %vm5030_vm11, %v5139_v19, %v4861_v27 }
 0x508   :  { %v5171_v60 = vsel %vm1154_vm9, %v5155_v61, %v17845_v62 }
 0x509   :  { %6151 = vmatmul.mubr.f32.gmra.mrb[124].mxu0 %v5829_v42  ;;  %v5187_v20 = vsel %vm5061_vm12, %v5171_v60, %v21618_v23 }
 0x50a   :  { %6010 = vmatprep.mubr.f32.mxu1 %v5187_v20  ;;  %6934 = vmatprep.mubr.msk.f32.mxu0 %vm353_vm0, %v21617_v31  ;;  %v18020_v38 = vpop.permute.xlu1 %6177 }
 0x50b   :  { %6011 = vmatmul.mubr.f32.gmra.mrb[110].mxu1 %v5076_v30 }
 0x50d   :  { %6156 = vmatmul.mubr.f32.gmra.mrb[126].mxu0 %v21619_v7 }
 0x50e   :  { %v18023_v0 = vpop.permute.xlu1 %6181 }
 0x511   :  { %v7347_v32 = vpop.f32.mrb[80].mxu1 }
 0x512   :  { %v7348_v62 = vpop.f32.mrb[81].mxu1  ;;  %v18026_v34 = vpop.permute.xlu1 %6183 }
 0x513   :  { %v7349_v52 = vadd.f32 %v7348_v62, %v7347_v32  ;;  %v6082_v51 = vpop.f32.mrb[96].mxu0 }
 0x514   :  { %v6084_v45 = vpop.f32.mrb[97].mxu0 }
 0x515   :  { %v6083_v36 = vadd.f32 %v7349_v52, %v6082_v51 }
 0x516   :  { %v18028_v39 = vpop.permute.xlu1 %6187 }
 0x517   :  { %6305 = vrot.lane.b32.xlu0 %v6083_v36, %s9469_s14 }
 0x51a   :  { %v18030_v37 = vpop.permute.xlu1 %6191 }
 0x51d   :  { %v7350_v46 = vpop.f32.mrb[82].mxu1 }
 0x51e   :  { %v7351_v25 = vpop.f32.mrb[83].mxu1  ;;  %v18032_v24 = vpop.permute.xlu1 %6195 }
 0x51f   :  { %v7352_v28 = vadd.f32 %v7351_v25, %v7350_v46 }
 0x522   :  { %v18034_v13 = vpop.permute.xlu1 %6199 }
 0x526   :  { %v18037_v61 = vpop.permute.xlu1 %6203  ;;  %v6244_v42 = vpop.permute.xlu0 %6243 }
 0x528   :  { %v6087_v22 = vpop.f32.mrb[98].mxu0 }
 0x529   :  { %v6088_v59 = vadd.f32 %v7352_v28, %v6087_v22  ;;  %v6089_v3 = vpop.f32.mrb[99].mxu0 }
 0x52a   :  { %v18039_v20 = vpop.permute.xlu1 %6207 }
 0x52b   :  { %6307 = vrot.lane.b32.xlu1 %v6088_v59, %s9469_s14  ;;  %v6246_v7 = vpop.permute.xlu0 %6245 }
 0x52e   :  { %v7353_v54 = vpop.f32.mrb[84].mxu1  ;;  %v6242_v32 = vpop.permute.xlu1 %6241 }
 0x52f   :  { %v7354_v1 = vpop.f32.mrb[85].mxu1 }
 0x530   :  { %v7355_v29 = vadd.f32 %v7354_v1, %v7353_v54  ;;  %v18042_v36 = vpop.permute.xlu0 %6249 }
 0x531   :  { %v6092_v33 = vpop.f32.mrb[100].mxu0 }
 0x532   :  { %v6093_v63 = vadd.f32 %v7355_v29, %v6092_v33  ;;  %v6094_v50 = vpop.f32.mrb[101].mxu0  ;;  %v6248_v45 = vpop.permute.xlu1 %6247 }
 0x534   :  { %6309 = vrot.lane.b32.xlu0 %v6093_v63, %s9469_s14 }
 0x535   :  { %v18045_v46 = vpop.permute.xlu0 %6253 }
 0x536   :  { %v18047_v22 = vpop.permute.xlu1 %6251 }
 0x539   :  { %v18049_v54 = vpop.permute.xlu0 %6257 }
 0x53a   :  { %v18051_v33 = vpop.permute.xlu1 %6255 }
 0x53b   :  { %v7356_v41 = vpop.f32.mrb[86].mxu1 }
 0x53c   :  { %v7357_v16 = vpop.f32.mrb[87].mxu1 }
 0x53d   :  { %v7358_v8 = vadd.f32 %v7357_v16, %v7356_v41 }
 0x53e   :  { %v18054_v63 = vpop.permute.xlu0 %6261 }
 0x53f   :  { %v18056_v16 = vpop.permute.xlu1 %6259 }
 0x542   :  { %v7359_v44 = vpop.f32.mrb[88].mxu1 }
 0x543   :  { %v7360_v40 = vpop.f32.mrb[89].mxu1 }
 0x544   :  { %v7361_v35 = vadd.f32 %v7360_v40, %v7359_v44  ;;  %v6097_v15 = vpop.f32.mrb[102].mxu0 }
 0x545   :  { %v6098_v43 = vadd.f32 %v7358_v8, %v6097_v15  ;;  %v6099_v4 = vpop.f32.mrb[103].mxu0  ;;  %v18058_v15 = vpop.permute.xlu0 %6265 }
 0x547   :  { %6311 = vrot.lane.b32.xlu1 %v6098_v43, %s9469_s14  ;;  %v18061_v43 = vpop.permute.xlu1 %6263 }
 0x54c   :  { %v6102_v47 = vpop.f32.mrb[104].mxu0 }
 0x54d   :  { %v6103_v49 = vadd.f32 %v7361_v35, %v6102_v47  ;;  %v6104_v57 = vpop.f32.mrb[105].mxu0 }
 0x54e   :  { %v18063_v57 = vpop.permute.xlu0 %6269 }
 0x54f   :  { %6313 = vrot.lane.b32.xlu0 %v6103_v49, %s9469_s14 }
 0x558   :  { %v7362_v5 = vpop.f32.mrb[90].mxu1 }
 0x559   :  { %v7363_v48 = vpop.f32.mrb[91].mxu1 }
 0x55a   :  { %v7364_v53 = vadd.f32 %v7363_v48, %v7362_v5 }
 0x567   :  { %v7365_v14 = vpop.f32.mrb[92].mxu1 }
 0x568   :  { %v7366_v55 = vpop.f32.mrb[93].mxu1 }
 0x569   :  { %v7367_v19 = vadd.f32 %v7366_v55, %v7365_v14  ;;  %v18065_v14 = vpop.permute.xlu1 %6267 }
 0x56a   :  { %v6107_v27 = vpop.f32.mrb[106].mxu0 }
 0x56b   :  { %v6108_v31 = vadd.f32 %v7364_v53, %v6107_v27  ;;  %v6109_v56 = vpop.f32.mrb[107].mxu0 }
 0x56d   :  { %6315 = vrot.lane.b32.xlu1 %v6108_v31, %s9469_s14  ;;  %v21621_v31 = vld [vmem:[#allocation10_spill] sm:$0xff] }
 0x56e   :  { %v6353_v56 = vsel %vm1122_vm3, %v21621_v31, %v18020_v38 }
 0x572   :  { %v7368_v6 = vpop.f32.mrb[94].mxu1 }
 0x573   :  { %v7369_v60 = vpop.f32.mrb[95].mxu1 }
 0x574   :  { %v7370_v2 = vadd.f32 %v7369_v60, %v7368_v6  ;;  %v6112_v23 = vpop.f32.mrb[108].mxu0  ;;  %v6369_v60 = vsel %vm1138_vm8, %v6353_v56, %v6242_v32 }
 0x575   :  { %v6113_v26 = vadd.f32 %v7367_v19, %v6112_v23  ;;  %v6114_v30 = vpop.f32.mrb[109].mxu0  ;;  %v21620_v19 = vld [vmem:[#allocation9_spill] sm:$0xff] }
 0x576   :  { %v6354_v27 = vsel %vm1122_vm3, %v21620_v19, %v17864_v12 }
 0x577   :  { %6317 = vrot.lane.b32.xlu0 %v6113_v26, %s9469_s14  ;;  %v6370_v6 = vsel %vm1138_vm8, %v6354_v27, %v6244_v42 }
 0x57c   :  { %v6117_v62 = vpop.f32.mrb[110].mxu0 }
 0x57d   :  { %v6118_v52 = vadd.f32 %v7370_v2, %v6117_v62  ;;  %v6119_v51 = vpop.f32.mrb[111].mxu0 }
 0x57f   :  { %6319 = vrot.lane.b32.xlu1 %v6118_v52, %s9469_s14  ;;  %v21622_v52 = vld [vmem:[#allocation12_spill] sm:$0xff] }
 0x580   :  { %v6355_v38 = vsel %vm1122_vm3, %v21622_v52, %v18023_v0  ;;  %v21624_v52 = vld [vmem:[#allocation13_spill] sm:$0xff] }
 0x581   :  { %v6371_v42 = vsel %vm1138_vm8, %v6355_v38, %v6246_v7  ;;  %v6358_v38 = vsel %vm1122_vm3, %v21624_v52, %v18028_v39 }
 0x586   :  { %v7371_v25 = vpop.f32.mrb[96].mxu1 }
 0x587   :  { %v7372_v28 = vpop.f32.mrb[97].mxu1 }
 0x588   :  { %v7373_v59 = vadd.f32 %v7372_v28, %v7371_v25 }
 0x589   :  { %v6306_v55 = vpop.permute.xlu0 %6305 }
 0x58a   :  { %v18077_v23 = vsel %vm1154_vm9, %v6369_v60, %v6306_v55 }
 0x58b   :  { %v6122_v3 = vpop.f32.mrb[112].mxu0 }
 0x58c   :  { %v6123_v1 = vadd.f32 %v7373_v59, %v6122_v3  ;;  %v6124_v29 = vpop.f32.mrb[113].mxu0 }
 0x58d   :  { %v21623_v29 = vld [vmem:[#allocation11_spill] sm:$0xff] }
 0x58e   :  { %6321 = vrot.lane.b32.xlu0 %v6123_v1, %s9469_s14 }
 0x592   :  { %v7374_v50 = vpop.f32.mrb[98].mxu1 }
 0x593   :  { %v7375_v41 = vpop.f32.mrb[99].mxu1 }
 0x594   :  { %v7376_v8 = vadd.f32 %v7375_v41, %v7374_v50  ;;  %v6356_v50 = vsel %vm1122_vm3, %v21623_v29, %v18026_v34 }
 0x595   :  { %v6127_v44 = vpop.f32.mrb[114].mxu0  ;;  %v6372_v0 = vsel %vm1138_vm8, %v6356_v50, %v6248_v45 }
 0x596   :  { %v6129_v40 = vpop.f32.mrb[115].mxu0  ;;  %v6128_v35 = vadd.f32 %v7376_v8, %v6127_v44 }
 0x598   :  { %6323 = vrot.lane.b32.xlu1 %v6128_v35, %s9469_s14 }
 0x59d   :  { %v6308_v2 = vpop.permute.xlu1 %6307 }
 0x59e   :  { %v18080_v26 = vsel %vm1154_vm9, %v6370_v6, %v6308_v2 }
 0x59f   :  { %v7377_v4 = vpop.f32.mrb[100].mxu1  ;;  %v6401_v30 = vadd.f32 %v18080_v26, %v18077_v23 }
 0x5a0   :  { %v7378_v47 = vpop.f32.mrb[101].mxu1  ;;  %v6132_v5 = vpop.f32.mrb[116].mxu0 }
 0x5a1   :  { %v7379_v49 = vadd.f32 %v7378_v47, %v7377_v4  ;;  %v6134_v53 = vpop.f32.mrb[117].mxu0 }
 0x5a3   :  { %v6133_v48 = vadd.f32 %v7379_v49, %v6132_v5  ;;  %v6373_v49 = vsel %vm1138_vm8, %v17884_v21, %v18042_v36 }
 0x5a5   :  { %6325 = vrot.lane.b32.xlu0 %v6133_v48, %s9469_s14 }
 0x5a6   :  { %v6310_v32 = vpop.permute.xlu0 %6309 }
 0x5a7   :  { %v18089_v25 = vsel %vm1154_vm9, %v6371_v42, %v6310_v32  ;;  %v6374_v32 = vsel %vm1138_vm8, %v6358_v38, %v18047_v22  ;;  %v21629_v38 = vld [vmem:[#allocation23_spill] sm:$0xff] }
 0x5a8   :  { %v6402_v28 = vadd.f32 %v6401_v30, %v18089_v25 }
 0x5aa   :  { %v7380_v62 = vpop.f32.mrb[102].mxu1 }
 0x5ab   :  { %v7381_v12 = vpop.f32.mrb[103].mxu1 }
 0x5ac   :  { %v7382_v51 = vadd.f32 %v7381_v12, %v7380_v62 }
 0x5b3   :  { %v6137_v59 = vpop.f32.mrb[118].mxu0 }
 0x5b4   :  { %v6138_v3 = vadd.f32 %v7382_v51, %v6137_v59  ;;  %v6139_v1 = vpop.f32.mrb[119].mxu0 }
 0x5b6   :  { %6327 = vrot.lane.b32.xlu1 %v6138_v3, %s9469_s14 }
 0x5b9   :  { %v6312_v8 = vpop.permute.xlu1 %6311 }
 0x5ba   :  { %v18098_v44 = vsel %vm1154_vm9, %v6372_v0, %v6312_v8  ;;  %v21625_v0 = vld [vmem:[#allocation15_spill] sm:$0xff] }
 0x5bb   :  { %v6403_v35 = vadd.f32 %v6402_v28, %v18098_v44  ;;  %v6360_v22 = vsel %vm1122_vm3, %v21625_v0, %v18030_v37 }
 0x5bc   :  { %v7383_v41 = vpop.f32.mrb[104].mxu1  ;;  %v6376_v8 = vsel %vm1138_vm8, %v6360_v22, %v18051_v33 }
 0x5bd   :  { %v7384_v7 = vpop.f32.mrb[105].mxu1 }
 0x5be   :  { %v7385_v40 = vadd.f32 %v7384_v7, %v7383_v41 }
 0x5c1   :  { %v7386_v4 = vpop.f32.mrb[106].mxu1  ;;  %v6314_v5 = vpop.permute.xlu0 %6313 }
 0x5c2   :  { %v7387_v47 = vpop.f32.mrb[107].mxu1  ;;  %v18105_v53 = vsel %vm1154_vm9, %v6373_v49, %v6314_v5  ;;  %v21626_v49 = vld [vmem:[#allocation17_spill] sm:$0xff] }
 0x5c3   :  { %v7388_v48 = vadd.f32 %v7387_v47, %v7386_v4  ;;  %v6142_v34 = vpop.f32.mrb[120].mxu0  ;;  %v6404_v19 = vadd.f32 %v6403_v35, %v18105_v53  ;;  %v6377_v4 = vsel %vm1138_vm8, %v17924_v9, %v18049_v54  ;;  %v6362_v5 = vsel %vm1122_vm3, %v21626_v49, %v18032_v24 }
 0x5c4   :  { %v6143_v45 = vadd.f32 %v7385_v40, %v6142_v34  ;;  %v6144_v55 = vpop.f32.mrb[121].mxu0  ;;  %v6378_v37 = vsel %vm1138_vm8, %v6362_v5, %v18056_v16 }
 0x5c6   :  { %6329 = vrot.lane.b32.xlu0 %v6143_v45, %s9469_s14  ;;  %v6379_v45 = vsel %vm1138_vm8, %v17944_v17, %v18054_v63 }
 0x5d8   :  { %v7389_v27 = vpop.f32.mrb[108].mxu1  ;;  %v6147_v31 = vpop.f32.mrb[122].mxu0 }
 0x5d9   :  { %v6148_v56 = vadd.f32 %v7388_v48, %v6147_v31  ;;  %v7390_v6 = vpop.f32.mrb[109].mxu1  ;;  %v6149_v60 = vpop.f32.mrb[123].mxu0 }
 0x5da   :  { %v7391_v2 = vadd.f32 %v7390_v6, %v7389_v27  ;;  %v6381_v6 = vsel %vm1138_vm8, %v17967_v18, %v18058_v15 }
 0x5db   :  { %6331 = vrot.lane.b32.xlu1 %v6148_v56, %s9469_s14 }
 0x5dc   :  { %v6152_v21 = vpop.f32.mrb[124].mxu0 }
 0x5dd   :  { %v6153_v36 = vadd.f32 %v7391_v2, %v6152_v21  ;;  %v6154_v30 = vpop.f32.mrb[125].mxu0  ;;  %v21628_v2 = vld [vmem:[#allocation21_spill] sm:$0xff] }
 0x5de   :  { %v7392_v62 = vpop.f32.mrb[110].mxu1  ;;  %v6366_v21 = vsel %vm1122_vm3, %v21628_v2, %v18037_v61  ;;  %v6368_v61 = vsel %vm1122_vm3, %v21629_v38, %v18039_v20 }
 0x5df   :  { %v7393_v12 = vpop.f32.mrb[111].mxu1  ;;  %6271 = vrot.lane.b32.xlu1 %v17714_v58, %s9470_s15  ;;  %6333 = vrot.lane.b32.xlu0 %v6153_v36, %s9469_s14  ;;  %v6316_v59 = vpop.permute.xlu1 %6315  ;;  %v6375_v58 = vsel %vm1138_vm8, %v17903_v10, %v18045_v46 }
 0x5e0   :  { %v7394_v51 = vadd.f32 %v7393_v12, %v7392_v62  ;;  %v6157_v42 = vpop.f32.mrb[126].mxu0  ;;  %v6390_v1 = vsel %vm1154_vm9, %v6374_v32, %v6316_v59  ;;  %v6383_v62 = vsel %vm1138_vm8, %v17989_v11, %v18063_v57 }
 0x5e1   :  { %v6159_v28 = vpop.f32.mrb[127].mxu0  ;;  %v6405_v29 = vadd.f32 %v6404_v19, %v6390_v1  ;;  %v21627_v19 = vld [vmem:[#allocation19_spill] sm:$0xff] }
 0x5e2   :  { %v6158_v3 = vadd.f32 %v7394_v51, %v6157_v42  ;;  %v6364_v27 = vsel %vm1122_vm3, %v21627_v19, %v18034_v13  ;;  %v6382_v13 = vsel %vm1138_vm8, %v6366_v21, %v18065_v14 }
 0x5e3   :  { %v6380_v24 = vsel %vm1138_vm8, %v6364_v27, %v18061_v43 }
 0x5e4   :  { %6335 = vrot.lane.b32.xlu0 %v6158_v3, %s9469_s14 }
 0x5e9   :  { %v6318_v50 = vpop.permute.xlu0 %6317 }
 0x5ea   :  { %v6391_v39 = vsel %vm1154_vm9, %v6375_v58, %v6318_v50 }
 0x5eb   :  { %v6406_v41 = vadd.f32 %v6405_v29, %v6391_v39 }
 0x5f1   :  { %v6320_v7 = vpop.permute.xlu1 %6319 }
 0x5f2   :  { %v6392_v40 = vsel %vm1154_vm9, %v6376_v8, %v6320_v7 }
 0x5f3   :  { %v6407_v35 = vadd.f32 %v6406_v41, %v6392_v40 }
 0x600   :  { %v6322_v10 = vpop.permute.xlu0 %6321 }
 0x601   :  { %v6393_v46 = vsel %vm1154_vm9, %v6377_v4, %v6322_v10 }
 0x602   :  { %v6408_v47 = vadd.f32 %v6407_v35, %v6393_v46 }
 0x60a   :  { %v6324_v33 = vpop.permute.xlu1 %6323 }
 0x60b   :  { %v6394_v48 = vsel %vm1154_vm9, %v6378_v37, %v6324_v33 }
 0x60c   :  { %v6409_v34 = vadd.f32 %v6408_v47, %v6394_v48 }
 0x617   :  { %v6326_v9 = vpop.permute.xlu0 %6325 }
 0x618   :  { %v6395_v54 = vsel %vm1154_vm9, %v6379_v45, %v6326_v9 }
 0x619   :  { %v6410_v55 = vadd.f32 %v6409_v34, %v6395_v54 }
 0x628   :  { %v6328_v16 = vpop.permute.xlu1 %6327 }
 0x629   :  { %v6396_v31 = vsel %vm1154_vm9, %v6380_v24, %v6328_v16 }
 0x62a   :  { %v6411_v56 = vadd.f32 %v6410_v55, %v6396_v31 }
 0x638   :  { %v6330_v17 = vpop.permute.xlu0 %6329 }
 0x639   :  { %v6397_v63 = vsel %vm1154_vm9, %v6381_v6, %v6330_v17 }
 0x63a   :  { %v6412_v60 = vadd.f32 %v6411_v56, %v6397_v63 }
 0x64d   :  { %v6332_v43 = vpop.permute.xlu1 %6331 }
 0x64e   :  { %v6398_v36 = vsel %vm1154_vm9, %v6382_v13, %v6332_v43 }
 0x64f   :  { %v6413_v30 = vadd.f32 %v6412_v60, %v6398_v36 }
 0x651   :  { %v6334_v18 = vpop.permute.xlu0 %6333  ;;  %v6272_v12 = vpop.permute.xlu1 %6271 }
 0x652   :  { %v6399_v15 = vsel %vm1154_vm9, %v6383_v62, %v6334_v18  ;;  %v6384_v51 = vsel %vm1138_vm8, %v6368_v61, %v6272_v12 }
 0x653   :  { %v6414_v52 = vadd.f32 %v6413_v30, %v6399_v15 }
 0x656   :  { %v6336_v14 = vpop.permute.xlu0 %6335 }
 0x657   :  { %v6400_v42 = vsel %vm1154_vm9, %v6384_v51, %v6336_v14 }
 0x658   :  { %v6415_v32 = vadd.f32 %v6414_v52, %v6400_v42 }
 0x65a   :  { %v6416_v28 = vrot.slane %v6415_v32, 4 }
 0x65c   :  { %v6417_v59 = vadd.f32 %v6416_v28, %v6415_v32 }
 0x65e   :  { %v6418_v3 = vrot.slane %v6417_v59, 2 }
 0x660   :  { %v6419_v29 = vadd.f32 %v6418_v3, %v6417_v59 }
 0x662   :  { %v6420_v11 = vrot.slane %v6419_v29, 1 }
 0x664   :  { %v6421_v57 = vadd.f32 %v6420_v11, %v6419_v29  ;;  %v6935_v29 = vld [vmem:[%s18331_s8] ss:$0 sm:$0xff]  ;;  %s9478_s8 = smov [#allocation2]  }
 0x666   :  { %v6423_v58 = vmul.f32 0.0078125, %v6421_v57 }
 0x668   :  { %v6424_v50 = vsub.f32 %v18077_v23, %v6423_v58  ;;  %v6425_v41 = vsub.f32 %v18080_v26, %v6423_v58  ;;  %v6426_v0 = vsub.f32 %v18089_v25, %v6423_v58  ;;  %v6427_v20 = vsub.f32 %v18098_v44, %v6423_v58 }
 0x669   :  { %v6428_v22 = vsub.f32 %v18105_v53, %v6423_v58  ;;  %v6429_v8 = vsub.f32 %v6390_v1, %v6423_v58  ;;  %v6430_v7 = vsub.f32 %v6391_v39, %v6423_v58  ;;  %v6431_v35 = vsub.f32 %v6392_v40, %v6423_v58 }
 0x66a   :  { %v6432_v4 = vsub.f32 %v6393_v46, %v6423_v58  ;;  %v6433_v10 = vsub.f32 %v6394_v48, %v6423_v58  ;;  %v6434_v47 = vsub.f32 %v6395_v54, %v6423_v58  ;;  %v6435_v49 = vsub.f32 %v6396_v31, %v6423_v58 }
 0x66b   :  { %v6436_v5 = vsub.f32 %v6397_v63, %v6423_v58  ;;  %v6437_v37 = vsub.f32 %v6398_v36, %v6423_v58  ;;  %v6438_v33 = vsub.f32 %v6399_v15, %v6423_v58  ;;  %v6439_v34 = vsub.f32 %v6400_v42, %v6423_v58 }
 0x66c   :  { %v6440_v23 = vmul.f32 %v6424_v50, %v6424_v50  ;;  %v6441_v45 = vmul.f32 %v6425_v41, %v6425_v41  ;;  %v6442_v26 = vmul.f32 %v6426_v0, %v6426_v0  ;;  %v6443_v25 = vmul.f32 %v6427_v20, %v6427_v20 }
 0x66d   :  { %v6444_v44 = vmul.f32 %v6428_v22, %v6428_v22  ;;  %v6445_v53 = vmul.f32 %v6429_v8, %v6429_v8  ;;  %v6446_v39 = vmul.f32 %v6430_v7, %v6430_v7  ;;  %v6447_v46 = vmul.f32 %v6431_v35, %v6431_v35 }
 0x66e   :  { %v6456_v9 = vadd.f32 %v6441_v45, %v6440_v23  ;;  %v6448_v54 = vmul.f32 %v6432_v4, %v6432_v4  ;;  %v6449_v24 = vmul.f32 %v6433_v10, %v6433_v10  ;;  %v6450_v31 = vmul.f32 %v6434_v47, %v6434_v47 }
 0x66f   :  { %v6451_v6 = vmul.f32 %v6435_v49, %v6435_v49  ;;  %v6452_v63 = vmul.f32 %v6436_v5, %v6436_v5  ;;  %v6453_v2 = vmul.f32 %v6437_v37, %v6437_v37  ;;  %v6454_v13 = vmul.f32 %v6438_v33, %v6438_v33 }
 0x670   :  { %v6457_v55 = vadd.f32 %v6456_v9, %v6442_v26  ;;  %v6455_v36 = vmul.f32 %v6439_v34, %v6439_v34 }
 0x672   :  { %v6458_v19 = vadd.f32 %v6457_v55, %v6443_v25 }
 0x674   :  { %v6459_v1 = vadd.f32 %v6458_v19, %v6444_v44 }
 0x676   :  { %v6460_v40 = vadd.f32 %v6459_v1, %v6445_v53 }
 0x678   :  { %v6461_v48 = vadd.f32 %v6460_v40, %v6446_v39 }
 0x67a   :  { %v6462_v27 = vadd.f32 %v6461_v48, %v6447_v46 }
 0x67c   :  { %v6463_v16 = vadd.f32 %v6462_v27, %v6448_v54 }
 0x67e   :  { %v6464_v56 = vadd.f32 %v6463_v16, %v6449_v24 }
 0x680   :  { %v6465_v17 = vadd.f32 %v6464_v56, %v6450_v31 }
 0x682   :  { %v6466_v60 = vadd.f32 %v6465_v17, %v6451_v6 }
 0x684   :  { %v6467_v21 = vadd.f32 %v6466_v60, %v6452_v63 }
 0x686   :  { %v6468_v43 = vadd.f32 %v6467_v21, %v6453_v2 }
 0x688   :  { %v6469_v30 = vadd.f32 %v6468_v43, %v6454_v13 }
 0x68a   :  { %v6470_v62 = vadd.f32 %v6469_v30, %v6455_v36 }
 0x68c   :  { %v6471_v18 = vrot.slane %v6470_v62, 4 }
 0x68e   :  { %v6472_v15 = vadd.f32 %v6471_v18, %v6470_v62 }
 0x690   :  { %v6473_v12 = vrot.slane %v6472_v15, 2 }
 0x692   :  { %v6474_v52 = vadd.f32 %v6473_v12, %v6472_v15 }
 0x694   :  { %v6475_v38 = vrot.slane %v6474_v52, 1 }
 0x696   :  { %v6476_v61 = vadd.f32 %v6475_v38, %v6474_v52 }
 0x698   :  { %v6477_v51 = vmul.f32 0.0078125, %v6476_v61 }
 0x69a   :  { %v6478_v14 = vadd.f32 1e-05, %v6477_v51 }
 0x69c   :  { %9425 = vrsqrt.f32 %v6478_v14 }
 0x6a6   :  { %v9426_v42 = vpop.eup %9425 }
 0x6a7   :  { %v6480_v32 = vmul.f32 %v9426_v42, %v6424_v50  ;;  %v6481_v28 = vmul.f32 %v9426_v42, %v6425_v41  ;;  %v6482_v59 = vmul.f32 %v9426_v42, %v6426_v0  ;;  %v6483_v3 = vmul.f32 %v9426_v42, %v6427_v20  ;;  %v6936_v20 = vld [vmem:[%s18332_s9] ss:$0 sm:$0xff]  ;;  %s6860_s9 = sshll.u32 %s9478_s8, 4  ;;  %s6861_s9 = int_to_ptr.vmem [resolvable:$true] %s6860_s9 }
 0x6a8   :  { %v6484_v11 = vmul.f32 %v9426_v42, %v6428_v22  ;;  %v6485_v57 = vmul.f32 %v9426_v42, %v6429_v8  ;;  %v6486_v58 = vmul.f32 %v9426_v42, %v6430_v7  ;;  %v6487_v23 = vmul.f32 %v9426_v42, %v6431_v35  ;;  %s9445_s18 = scalar_lea.vmem %s6861_s9, 512  ;;  %p9450_p1 = scmp.lt.s32.totalorder %s6861_s9, %s6861_s9 }
 0x6a9   :  { %v6488_v45 = vmul.f32 %v9426_v42, %v6432_v4  ;;  %v6489_v26 = vmul.f32 %v9426_v42, %v6433_v10  ;;  %v6490_v9 = vmul.f32 %v9426_v42, %v6434_v47  ;;  %v6491_v25 = vmul.f32 %v9426_v42, %v6435_v49  ;;  %p9446_p0 = scmp.ne.s32.totalorder %s6861_s9, %s9445_s18  ;;  %p9451_p2 = scmp.lt.s32.totalorder %s9445_s18, %s9445_s18 }
 0x6aa   :  { %v6492_v55 = vmul.f32 %v9426_v42, %v6436_v5  ;;  %v6493_v44 = vmul.f32 %v9426_v42, %v6437_v37  ;;  %v6494_v19 = vmul.f32 %v9426_v42, %v6438_v33  ;;  %v6495_v53 = vmul.f32 %v9426_v42, %v6439_v34 }
 0x6ab   :  { %v6503_v50 = vmul.f32 %v6935_v29, %v6480_v32  ;;  %v6504_v41 = vmul.f32 %v6935_v29, %v6481_v28  ;;  %v6505_v0 = vmul.f32 %v6935_v29, %v6482_v59  ;;  %v6506_v1 = vmul.f32 %v6935_v29, %v6483_v3  ;;  %p9452_p3 = por %p9451_p2, %p9450_p1 }
 0x6ac   :  { %v6507_v22 = vmul.f32 %v6935_v29, %v6484_v11  ;;  %v6508_v8 = vmul.f32 %v6935_v29, %v6485_v57  ;;  %v6509_v7 = vmul.f32 %v6935_v29, %v6486_v58  ;;  %v6510_v35 = vmul.f32 %v6935_v29, %v6487_v23 }
 0x6ad   :  { %v6511_v4 = vmul.f32 %v6935_v29, %v6488_v45  ;;  %v6512_v10 = vmul.f32 %v6935_v29, %v6489_v26  ;;  %v6513_v47 = vmul.f32 %v6935_v29, %v6490_v9  ;;  %v6514_v49 = vmul.f32 %v6935_v29, %v6491_v25  ;;  %p9453_p4 = pnand %p9452_p3, %p9446_p0 }
 0x6ae   :  { %v6515_v5 = vmul.f32 %v6935_v29, %v6492_v55  ;;  %v6516_v37 = vmul.f32 %v6935_v29, %v6493_v44  ;;  %v6517_v33 = vmul.f32 %v6935_v29, %v6494_v19  ;;  %v6518_v34 = vmul.f32 %v6935_v29, %v6495_v53 }
 0x6af   :  { %v6526_v39 = vadd.f32 %v6936_v20, %v6503_v50  ;;  %v6527_v40 = vadd.f32 %v6936_v20, %v6504_v41  ;;  %v6528_v46 = vadd.f32 %v6936_v20, %v6505_v0  ;;  %v6529_v48 = vadd.f32 %v6936_v20, %v6506_v1 }
 0x6b0   :  { %v6530_v54 = vadd.f32 %v6936_v20, %v6507_v22  ;;  %v6531_v27 = vadd.f32 %v6936_v20, %v6508_v8  ;;  %v6532_v24 = vadd.f32 %v6936_v20, %v6509_v7  ;;  %v6533_v16 = vadd.f32 %v6936_v20, %v6510_v35 }
 0x6b1   :  { %v6534_v31 = vadd.f32 %v6936_v20, %v6511_v4  ;;  %v6535_v56 = vadd.f32 %v6936_v20, %v6512_v10  ;;  %v6536_v6 = vadd.f32 %v6936_v20, %v6513_v47  ;;  %v6537_v17 = vadd.f32 %v6936_v20, %v6514_v49 }
 0x6b2   :  { %v6538_v63 = vadd.f32 %v6936_v20, %v6515_v5  ;;  %v6539_v60 = vadd.f32 %v6936_v20, %v6516_v37  ;;  %v6540_v2 = vadd.f32 %v6936_v20, %v6517_v33  ;;  %v6541_v21 = vadd.f32 %v6936_v20, %v6518_v34 }
 0x6b3   :  { %v6542_v13 = vmax.f32 %v6526_v39, 0.0  ;;  %v6543_v43 = vmax.f32 %v6527_v40, 0.0  ;;  %v6544_v36 = vmax.f32 %v6528_v46, 0.0  ;;  %v6545_v30 = vmax.f32 %v6529_v48, 0.0 }
 0x6b4   :  { %v6546_v62 = vmax.f32 %v6530_v54, 0.0  ;;  %v6547_v18 = vmax.f32 %v6531_v27, 0.0  ;;  %v6548_v15 = vmax.f32 %v6532_v24, 0.0  ;;  %v6549_v12 = vmax.f32 %v6533_v16, 0.0 }
 0x6b5   :  { %v6550_v52 = vmax.f32 %v6534_v31, 0.0  ;;  %v6551_v38 = vmax.f32 %v6535_v56, 0.0  ;;  %v6552_v61 = vmax.f32 %v6536_v6, 0.0  ;;  %v6553_v51 = vmax.f32 %v6537_v17, 0.0 }
 0x6b6   :  { %v6554_v14 = vmax.f32 %v6538_v63, 0.0  ;;  %v6555_v42 = vmax.f32 %v6539_v60, 0.0  ;;  %v6556_v32 = vmax.f32 %v6540_v2, 0.0  ;;  %v6557_v28 = vmax.f32 %v6541_v21, 0.0 }
 0x6b7   :  { %v18180_v59 = vrot.slane %v6542_v13, 7  ;;  %v18182_v3 = vrot.slane %v6543_v43, 7  ;;  %v6576_v29 = vrot.slane %v6544_v36, 7  ;;  %v6577_v11 = vrot.slane %v6545_v30, 7 }
 0x6b8   :  { %v6578_v57 = vrot.slane %v6546_v62, 7  ;;  %v6579_v58 = vrot.slane %v6547_v18, 7  ;;  %v6580_v23 = vrot.slane %v6548_v15, 7  ;;  %v6581_v45 = vrot.slane %v6549_v12, 7 }
 0x6b9   :  { %v6582_v26 = vrot.slane %v6550_v52, 7  ;;  %v6583_v9 = vrot.slane %v6551_v38, 7  ;;  %v6584_v25 = vrot.slane %v6552_v61, 7  ;;  %v6585_v55 = vrot.slane %v6553_v51, 7 }
 0x6ba   :  { %v6586_v44 = vrot.slane %v6554_v14, 7  ;;  %v6587_v19 = vrot.slane %v6555_v42, 7  ;;  %v6588_v53 = vrot.slane %v6556_v32, 7  ;;  %v6589_v50 = vrot.slane %v6557_v28, 7 }
 0x6bb   :  { %v18186_v41 = vsel %vm148_vm1, 0.0, %v18180_v59  ;;  %v18190_v0 = vsel %vm148_vm1, 0.0, %v18182_v3  ;;  %v6608_v20 = vsel %vm148_vm1, 0.0, %v6576_v29  ;;  %v6609_v1 = vsel %vm148_vm1, 0.0, %v6577_v11 }
 0x6bc   :  { %v6610_v22 = vsel %vm148_vm1, 0.0, %v6578_v57  ;;  %v18196_v8 = vsel %vm148_vm1, 0.0, %v6579_v58  ;;  %v18199_v7 = vsel %vm148_vm1, 0.0, %v6580_v23  ;;  %v18202_v35 = vsel %vm148_vm1, 0.0, %v6581_v45 }
 0x6bd   :  { %v6614_v4 = vsel %vm148_vm1, 0.0, %v6582_v26  ;;  %v6615_v10 = vsel %vm148_vm1, 0.0, %v6583_v9  ;;  %v6616_v47 = vsel %vm148_vm1, 0.0, %v6584_v25  ;;  %v6617_v49 = vsel %vm148_vm1, 0.0, %v6585_v55 }
 0x6be   :  { %v6618_v5 = vsel %vm148_vm1, 0.0, %v6586_v44  ;;  %v18210_v37 = vsel %vm148_vm1, 0.0, %v6587_v19  ;;  %v18213_v33 = vsel %vm148_vm1, 0.0, %v6588_v53  ;;  %v18216_v34 = vsel %vm148_vm1, 0.0, %v6589_v50 }
 0x6bf   :  { %v18219_v39 = vsel %vm148_vm1, %v6576_v29, 0.0  ;;  %v18222_v40 = vsel %vm148_vm1, %v6577_v11, 0.0  ;;  %v6626_v46 = vsel %vm148_vm1, %v6578_v57, 0.0  ;;  %v18226_v48 = vsel %vm148_vm1, %v6579_v58, 0.0 }
 0x6c0   :  { %v18229_v54 = vsel %vm148_vm1, %v6580_v23, 0.0  ;;  %v6630_v27 = vsel %vm148_vm1, %v6582_v26, 0.0  ;;  %v6631_v24 = vsel %vm148_vm1, %v6583_v9, 0.0  ;;  %v6629_v16 = vsel %vm148_vm1, %v6581_v45, 0.0 }
 0x6c1   :  { %v6632_v31 = vsel %vm148_vm1, %v6584_v25, 0.0  ;;  %v6633_v56 = vsel %vm148_vm1, %v6585_v55, 0.0  ;;  %v6634_v6 = vsel %vm148_vm1, %v6586_v44, 0.0  ;;  %v18238_v17 = vsel %vm148_vm1, %v6587_v19, 0.0 }
 0x6c2   :  { %v18241_v63 = vsel %vm148_vm1, %v6588_v53, 0.0  ;;  %v6637_v60 = vsel %vm148_vm1, %v6589_v50, 0.0  ;;  %v6640_v2 = vmax.f32 %v6614_v4, 0.0  ;;  %v6641_v21 = vmax.f32 %v6630_v27, 0.0 }
 0x6c3   :  { %v6691_v13 = vmax.f32 %v18190_v0, %v6608_v20  ;;  %v6693_v43 = vmax.f32 %v6615_v10, %v6616_v47  ;;  %v6694_v36 = vmax.f32 %v6631_v24, %v6632_v31  ;;  %v6743_v62 = vmax.f32 %v6609_v1, %v6610_v22 }
 0x6c4   :  { %v6644_v30 = vmax.f32 %v6640_v2, %v6615_v10  ;;  %v6744_v18 = vmax.f32 %v18222_v40, %v6626_v46  ;;  %v6745_v15 = vmax.f32 %v6617_v49, %v6618_v5  ;;  %v6645_v12 = vmax.f32 %v6641_v21, %v6631_v24 }
 0x6c5   :  { %v18246_v52 = vmax.f32 %v6691_v13, %v6609_v1  ;;  %v6697_v38 = vmax.f32 %v6693_v43, %v6617_v49  ;;  %v6698_v61 = vmax.f32 %v6694_v36, %v6633_v56  ;;  %v6638_v51 = vmax.f32 %v18186_v41, 0.0 }
 0x6c6   :  { %v6649_v14 = vrot.slane %v6644_v30, 1  ;;  %v6746_v42 = vmax.f32 %v6633_v56, %v6634_v6  ;;  %v18250_v32 = vmax.f32 %v6743_v62, %v18196_v8  ;;  %v6655_v28 = vrot.slane %v6644_v30, 2 }
 0x6c7   :  { %v6663_v29 = vrot.slane %v6645_v12, 2  ;;  %v6702_v11 = vrot.slane %v6697_v38, 1  ;;  %v6708_v57 = vrot.slane %v6697_v38, 2  ;;  %v18253_v23 = vmax.f32 %v6744_v18, %v18226_v48 }
 0x6c8   :  { %v6653_v58 = vmax.f32 %v6644_v30, %v6649_v14  ;;  %v6749_v45 = vmax.f32 %v6745_v15, %v18210_v37  ;;  %v6750_v26 = vmax.f32 %v6746_v42, %v18238_v17  ;;  %v6716_v25 = vrot.slane %v6698_v61, 2 }
 0x6c9   :  { %v6706_v9 = vmax.f32 %v6697_v38, %v6702_v11  ;;  %v6795_v55 = vmax.f32 %v18196_v8, %v18199_v7  ;;  %v6796_v44 = vmax.f32 %v18226_v48, %v18229_v54  ;;  %v6759_v20 = vrot.slane %v18250_v32, 2 }
 0x6ca   :  { %v6659_v19 = vmax.f32 %v6653_v58, %v6655_v28  ;;  %v6667_v53 = vmax.f32 %v6653_v58, %v6663_v29  ;;  %v6754_v50 = vrot.slane %v6749_v45, 1  ;;  %v6760_v4 = vrot.slane %v6749_v45, 2 }
 0x6cb   :  { %v6712_v1 = vmax.f32 %v6706_v9, %v6708_v57  ;;  %v6720_v22 = vmax.f32 %v6706_v9, %v6716_v25  ;;  %v6768_v10 = vrot.slane %v6750_v26, 2  ;;  %v6797_v8 = vmax.f32 %v18210_v37, %v18213_v33 }
 0x6cc   :  { %v6671_v47 = vrot.slane %v6659_v19, 1  ;;  %v6675_v49 = vrot.slane %v6659_v19, 2  ;;  %v6681_v5 = vrot.slane %v6667_v53, 3  ;;  %v6758_v46 = vmax.f32 %v6749_v45, %v6754_v50 }
 0x6cd   :  { %v6724_v27 = vrot.slane %v6712_v1, 1  ;;  %v6728_v24 = vrot.slane %v6712_v1, 2  ;;  %v6734_v31 = vrot.slane %v6720_v22, 3  ;;  %v6798_v56 = vmax.f32 %v18238_v17, %v18241_v63 }
 0x6ce   :  { %v6685_v7 = vsel %vm148_vm1, %v6659_v19, %v6671_v47  ;;  %v6764_v48 = vmax.f32 %v6758_v46, %v6760_v4  ;;  %v6772_v54 = vmax.f32 %v6758_v46, %v6768_v10  ;;  %v6799_v21 = vmax.f32 %v6795_v55, %v18202_v35 }
 0x6cf   :  { %v6687_v6 = vsel %vm1703_vm4, %v6685_v7, %v6675_v49  ;;  %v6738_v2 = vsel %vm148_vm1, %v6712_v1, %v6724_v27  ;;  %v6800_v13 = vmax.f32 %v6796_v44, %v6629_v16  ;;  %v6801_v18 = vmax.f32 %v6797_v8, %v18216_v34 }
 0x6d0   :  { %v6690_v43 = vsel %vm6688_vm13, %v6687_v6, %v6681_v5  ;;  %v6740_v36 = vsel %vm1703_vm4, %v6738_v2, %v6728_v24  ;;  %v6776_v30 = vrot.slane %v6764_v48, 1  ;;  %v6780_v37 = vrot.slane %v6764_v48, 2 }
 0x6d1   :  { %v6742_v33 = vsel %vm6688_vm13, %v6740_v36, %v6734_v31  ;;  %v6786_v62 = vrot.slane %v6772_v54, 3  ;;  %v6802_v15 = vmax.f32 %v6798_v56, %v6637_v60  ;;  %6851 = vst [vmem:[#allocation2 + $0x10] sm:$0xf] %v6690_v43  ;;  %v6805_v63 = vrot.slane %v6799_v21, 1 }
 0x6d2   :  { %v6790_v17 = vsel %vm148_vm1, %v6764_v48, %v6776_v30  ;;  %v6811_v12 = vrot.slane %v6799_v21, 2  ;;  %v6819_v38 = vrot.slane %v6800_v13, 2  ;;  %6852 = vst [vmem:[#allocation2 + $0x14] sm:$0xf] %v6742_v33  ;;  %v6806_v16 = vrot.slane %v6801_v18, 1 }
 0x6d3   :  { %v6792_v35 = vsel %vm1703_vm4, %v6790_v17, %v6780_v37  ;;  %v6812_v61 = vrot.slane %v6801_v18, 2  ;;  %v6820_v14 = vrot.slane %v6802_v15, 2  ;;  %v6809_v28 = vmax.f32 %v6799_v21, %v6805_v63 }
 0x6d4   :  { %v6794_v42 = vsel %vm6688_vm13, %v6792_v35, %v6786_v62  ;;  %v6622_v29 = vsel %vm148_vm1, %v18180_v59, 0.0  ;;  %v6623_v34 = vsel %vm148_vm1, %v18182_v3, 0.0  ;;  %v6810_v60 = vmax.f32 %v6801_v18, %v6806_v16 }
 0x6d5   :  { %6853 = vst [vmem:[#allocation2 + $0x18] sm:$0xf] %v6794_v42  ;;  %v6639_v11 = vmax.f32 %v6622_v29, 0.0  ;;  %v6642_v57 = vmax.f32 %v6638_v51, %v18190_v0  ;;  %v6692_v58 = vmax.f32 %v6623_v34, %v18219_v39  ;;  %v6767_v45 = vrot.slane %v18253_v23, 2 }
 0x6d6   :  { %v6815_v26 = vmax.f32 %v6809_v28, %v6811_v12  ;;  %v6823_v9 = vmax.f32 %v6809_v28, %v6819_v38  ;;  %v6701_v25 = vrot.slane %v18246_v52, 1  ;;  %v6816_v55 = vmax.f32 %v6810_v60, %v6812_v61 }
 0x6d7   :  { %v6824_v59 = vmax.f32 %v6810_v60, %v6820_v14  ;;  %v6643_v44 = vmax.f32 %v6639_v11, %v6623_v34  ;;  %v6648_v19 = vrot.slane %v6642_v57, 1  ;;  %v6654_v3 = vrot.slane %v6642_v57, 2 }
 0x6d8   :  { %v6696_v53 = vmax.f32 %v6692_v58, %v18222_v40  ;;  %v6705_v50 = vmax.f32 %v18246_v52, %v6701_v25  ;;  %v6707_v41 = vrot.slane %v18246_v52, 2  ;;  %v6828_v0 = vrot.slane %v6816_v55, 1 }
 0x6d9   :  { %v6832_v51 = vrot.slane %v6816_v55, 2  ;;  %v6838_v39 = vrot.slane %v6824_v59, 3  ;;  %v6652_v1 = vmax.f32 %v6642_v57, %v6648_v19  ;;  %v6662_v23 = vrot.slane %v6643_v44, 2 }
 0x6da   :  { %v6711_v22 = vmax.f32 %v6705_v50, %v6707_v41  ;;  %v6715_v4 = vrot.slane %v6696_v53, 2  ;;  %v6753_v10 = vrot.slane %v18250_v32, 1  ;;  %v6842_v47 = vsel %vm148_vm1, %v6816_v55, %v6828_v0 }
 0x6db   :  { %v6658_v49 = vmax.f32 %v6652_v1, %v6654_v3  ;;  %v6827_v5 = vrot.slane %v6815_v26, 1  ;;  %v6831_v46 = vrot.slane %v6815_v26, 2  ;;  %v6844_v40 = vsel %vm1703_vm4, %v6842_v47, %v6832_v51 }
 0x6dc   :  { %v6666_v27 = vmax.f32 %v6652_v1, %v6662_v23  ;;  %v6719_v24 = vmax.f32 %v6705_v50, %v6715_v4  ;;  %v6723_v31 = vrot.slane %v6711_v22, 1  ;;  %v6846_v52 = vsel %vm6688_vm13, %v6844_v40, %v6838_v39 }
 0x6dd   :  { %v6670_v8 = vrot.slane %v6658_v49, 1  ;;  %v6674_v7 = vrot.slane %v6658_v49, 2  ;;  %v6727_v48 = vrot.slane %v6711_v22, 2  ;;  %v6837_v54 = vrot.slane %v6823_v9, 3  ;;  %6854 = vst [vmem:[#allocation2 + $0x1c] sm:$0xf] %v6846_v52 }
 0x6de   :  { %v6733_v56 = vrot.slane %v6719_v24, 3  ;;  %v6737_v6 = vsel %vm148_vm1, %v6711_v22, %v6723_v31  ;;  %v6757_v2 = vmax.f32 %v18250_v32, %v6753_v10  ;;  %v6680_v21 = vrot.slane %v6666_v27, 3 }
 0x6df   :  { %v6684_v13 = vsel %vm148_vm1, %v6658_v49, %v6670_v8  ;;  %v6739_v43 = vsel %vm1703_vm4, %v6737_v6, %v6727_v48  ;;  %v6841_v36 = vsel %vm148_vm1, %v6815_v26, %v6827_v5 }
 0x6e0   :  { %v6686_v30 = vsel %vm1703_vm4, %v6684_v13, %v6674_v7  ;;  %v6741_v37 = vsel %vm6688_vm13, %v6739_v43, %v6733_v56  ;;  %v6763_v33 = vmax.f32 %v6757_v2, %v6759_v20  ;;  %v6771_v62 = vmax.f32 %v6757_v2, %v6767_v45 }
 0x6e1   :  { %v6689_v18 = vsel %vm6688_vm13, %v6686_v30, %v6680_v21  ;;  %v6843_v15 = vsel %vm1703_vm4, %v6841_v36, %v6831_v46  ;;  %6848 = vst [vmem:[#allocation2 + $0x4] sm:$0xf] %v6741_v37 }
 0x6e2   :  { %v6775_v17 = vrot.slane %v6763_v33, 1  ;;  %v6779_v63 = vrot.slane %v6763_v33, 2  ;;  %v6845_v12 = vsel %vm6688_vm13, %v6843_v15, %v6837_v54  ;;  %6847 = vst [vmem:[#allocation2] sm:$0xf] %v6689_v18  ;;  %v6785_v38 = vrot.slane %v6771_v62, 3 }
 0x6e3   :  { %6850 = vst [vmem:[#allocation2 + $0xc] sm:$0xf] %v6845_v12 }
 0x6e4   :  { %v6789_v35 = vsel %vm148_vm1, %v6763_v33, %v6775_v17 }
 0x6e5   :  { %v6791_v32 = vsel %vm1703_vm4, %v6789_v35, %v6779_v63 }
 0x6e6   :  { %v6793_v20 = vsel %vm6688_vm13, %v6791_v32, %v6785_v38 }
 0x6e7   :  { %6849 = vst [vmem:[#allocation2 + $0x8] sm:$0xf] %v6793_v20 }
 0x6e8   :  { %9456 = shalt.err (!%p9453_p4)
}
 0x6e9   :  { %s9457_s6 = scalar_lea.hbm %s18333_s10, 512 }
 0x6ea   :  { %p9458_p5 = scmp.ne.s32.totalorder %s18333_s10, %s9457_s6  ;;  %p9461_p6 = scmp.lt.u32.totalorder %s9457_s6, %s18333_s10 }
 0x6ec   :  { %p9463_p7 = pnand %p9461_p6, %p9458_p5 }
 0x6ee   :  { %9466 = shalt.err (!%p9463_p7)
}
 0x6ef   :  { %s9479_s5 = smov 4  }
 0x6f0   :  { %6866 = dma.vmem_to_hbm [thread:$0]  %s6861_s9, 512, %s18333_s10, [#allocation3], %s9470_s15, %s9470_s15, %s9479_s5  }
 0x6f1   :  { %9467 = dma.done.wait [#allocation3], 512  }
 0x6f2   :  { %9468 = vsyncadd [#allocation3], 4294966784 }
 0x6f3   :  { %6870 = vsyncpa [#allocation3], 1 }

</bundles_post_ra>
